<compile_context>
chip_gen: v7x
topology: tpu7x:2x2x1
jax: 0.10.0
libtpu: 0.0.40
codegen_flags: <defaults>
</compile_context>

<pallas_src>
import functools

import jax
import jax.numpy as jnp
from jax.experimental import pallas as pl
from jax.experimental.pallas import tpu as pltpu

LANE = 128


# ----------------------------------------------------------------------------
# Fused decoder kernel: fc1 -> relu -> fc2(int8 deq) -> relu -> heads -> decode
# ----------------------------------------------------------------------------
def _generator_kernel(z_ref, w1_ref, b1_ref, w2_ref, s2_ref, b2_ref,
                      w3_ref, b3_ref, wc_ref, bc_ref, epi_ref, o_ref, *,
                      nv3, centroid_scale, bias_scale):
    f32 = jnp.float32
    bf16 = jnp.bfloat16

    # ---- trunk: fc1 -> relu ----
    z = z_ref[...].astype(bf16)
    h1 = jnp.dot(z, w1_ref[...], preferred_element_type=f32) + b1_ref[...]
    h1 = jnp.maximum(h1, 0.0)

    # ---- fc2 with int8 weights: cast (exact for |w|<=127) and fold the
    #      per-output-channel scale AFTER the matmul (commutes with columns).
    w2 = w2_ref[...].astype(bf16)                                  # (D1, D2)
    h2 = jnp.dot(h1.astype(bf16), w2, preferred_element_type=f32)
    h2 = h2 * s2_ref[...] + b2_ref[...]
    h2 = jnp.maximum(h2, 0.0)                                      # (B, D2) f32
    h2_bf = h2.astype(bf16)

    # ---- fc_bias head (126 lanes) on the MXU ----
    head = jnp.dot(h2_bf, w3_ref[...], preferred_element_type=f32) + b3_ref[...]
    bias = head[:, 0:nv3] * bias_scale                             # (B, nv3)

    # ---- fc_centroid head: 3 scalars via VPU multiply + cross-lane reduce ----
    wc = wc_ref[...]                                               # (3, D2) f32

    def _cen(k):
        c = jnp.sum(h2 * wc[k:k + 1, :], axis=-1, keepdims=True)   # (B, 1)
        return jnp.tanh((c + bc_ref[:, k:k + 1]) * centroid_scale)

    c0, c1, c2 = _cen(0), _cen(1), _cen(2)

    # ---- vertex decode (epilogue constants precomputed on host) ----
    logit = epi_ref[0:1, :]                                        # (1, nv3)
    sign = epi_ref[1:2, :]
    cen = (c0 * epi_ref[2:3, :] + c1 * epi_ref[3:4, :]
           + c2 * epi_ref[4:5, :])                                 # (B, nv3)
    v = jax.nn.sigmoid(logit + bias) * sign
    # relu(v)*(1-c) - relu(-v)*(1+c) + c  ==  v + (1 - |v|) * c
    o_ref[...] = (0.5 * (v + (1.0 - jnp.abs(v)) * cen)).astype(o_ref.dtype)


# ----------------------------------------------------------------------------
# Parameter preparation (run once, outside the hot path):
#   * w1, w3 -> bf16;  w2 -> int8 + per-column f32 scale
#   * fc_bias head padded lane-dense to 128 columns (no centroid tiling)
#   * wc transposed to a lane-dense (3, D2) slab
#   * vertices_base epilogue constants (clamped logit, sign, coord masks)
# ----------------------------------------------------------------------------
def prepare_params(raw, vertices_base, *, obj_scale=0.5):
    wb, bb = raw["wb"], raw["bb"]          # (D2, nv*3), (nv*3,)
    wc, bc = raw["wc"], raw["bc"]          # (D2, 3),    (3,)
    D2, nv3 = wb.shape
    head_pad = ((nv3 + LANE - 1) // LANE) * LANE

    # fc_bias head, padded lane-dense
    w3 = jnp.zeros((D2, head_pad), jnp.float32).at[:, 0:nv3].set(wb)
    b3 = jnp.zeros((head_pad,), jnp.float32).at[0:nv3].set(bb)

    # fc2 -> int8 with per-output-channel scale
    w2 = raw["w2"]
    amax = jnp.max(jnp.abs(w2), axis=0)                      # (D2,)
    s2 = jnp.where(amax > 0, amax / 127.0, 1.0)
    w2_i8 = jnp.clip(jnp.round(w2 / s2), -127.0, 127.0).astype(jnp.int8)

    # fc_centroid: lane-dense transposed weights + padded bias
    wc_t = wc.T.astype(jnp.float32)                           # (3, D2)
    bc_pad = jnp.zeros((1, LANE), jnp.float32).at[0, 0:3].set(bc)

    # vertices_base epilogue constants (clamped to avoid Inf/NaN)
    base = vertices_base.reshape(-1).astype(jnp.float32) * obj_scale   # (nv3,)
    sign = jnp.sign(base)
    ab = jnp.clip(jnp.abs(base), 1e-7, 1.0 - 1e-6)
    logit = jnp.log(ab / (1.0 - ab))
    coord = jnp.arange(nv3) % 3
    epi = jnp.stack([logit, sign,
                     (coord == 0).astype(jnp.float32),
                     (coord == 1).astype(jnp.float32),
                     (coord == 2).astype(jnp.float32)], axis=0)        # (5, nv3)

    return dict(
        w1=raw["w1"].astype(jnp.bfloat16), b1=raw["b1"].reshape(1, -1),
        w2=w2_i8, s2=s2.reshape(1, -1), b2=raw["b2"].reshape(1, -1),
        w3=w3.astype(jnp.bfloat16), b3=b3.reshape(1, -1),
        wc=wc_t, bc=bc_pad, epi=epi,
        nv3=nv3, head_pad=head_pad,
    )


# ----------------------------------------------------------------------------
# Forward wrapper (== Unconditional_Generator.forward / no_color_forward)
# ----------------------------------------------------------------------------
def generator_forward(z, params, faces, *, centroid_scale=0.1, bias_scale=1.0):
    B, zdim = z.shape
    nf = faces.shape[0]
    nv3 = params["nv3"]
    nv = nv3 // 3
    head_pad = params["head_pad"]

    w1, b1 = params["w1"], params["b1"]
    w2, s2, b2 = params["w2"], params["s2"], params["b2"]
    w3, b3 = params["w3"], params["b3"]
    wc, bc, epi = params["wc"], params["bc"], params["epi"]
    D1 = w1.shape[1]
    D2 = w2.shape[1]

    flops = 2 * B * (zdim * D1 + D1 * D2 + D2 * head_pad + 3 * D2)
    bytes_accessed = (2 * (zdim * D1 + D2 * head_pad)     # bf16 weights
                      + D1 * D2                           # int8 w2
                      + 4 * (B * zdim + B * nv3 + D1 + 2 * D2 + head_pad
                             + 3 * D2 + LANE + 5 * nv3))

    verts_flat = pl.pallas_call(
        functools.partial(_generator_kernel, nv3=nv3,
                          centroid_scale=centroid_scale,
                          bias_scale=bias_scale),
        out_shape=jax.ShapeDtypeStruct((B, nv3), jnp.float32),
        grid_spec=pltpu.PrefetchScalarGridSpec(
            num_scalar_prefetch=0,
            grid=(1,),
            in_specs=[
                pl.BlockSpec((B, zdim), lambda i: (0, 0)),        # z
                pl.BlockSpec((zdim, D1), lambda i: (0, 0)),       # w1 (bf16)
                pl.BlockSpec((1, D1), lambda i: (0, 0)),          # b1
                pl.BlockSpec((D1, D2), lambda i: (0, 0)),         # w2 (int8)
                pl.BlockSpec((1, D2), lambda i: (0, 0)),          # s2
                pl.BlockSpec((1, D2), lambda i: (0, 0)),          # b2
                pl.BlockSpec((D2, head_pad), lambda i: (0, 0)),   # w3 (bf16)
                pl.BlockSpec((1, head_pad), lambda i: (0, 0)),    # b3
                pl.BlockSpec((3, D2), lambda i: (0, 0)),          # wc^T (f32)
                pl.BlockSpec((1, LANE), lambda i: (0, 0)),        # bc (padded)
                pl.BlockSpec((5, nv3), lambda i: (0, 0)),         # epilogue consts
            ],
            out_specs=pl.BlockSpec((B, nv3), lambda i: (0, 0)),
        ),
        compiler_params=pltpu.CompilerParams(
            dimension_semantics=("arbitrary",),
            vmem_limit_bytes=24 * 1024 * 1024),
        cost_estimate=pl.CostEstimate(
            flops=flops,
            transcendentals=B * (nv3 + 3),
            bytes_accessed=bytes_accessed),
    )(z, w1, b1, w2, s2, b2, w3, b3, wc, bc, epi)

    vertices = verts_flat.reshape(B, nv, 3)
    faces_out = jnp.broadcast_to(faces[None, :, :], (B, nf, 3))
    return vertices, faces_out


# ----------------------------------------------------------------------------
# Pure-JAX reference (mirrors the torch no_color_forward) for sanity checking
# ----------------------------------------------------------------------------
def generator_ref(z, raw, vertices_base, faces, *,
                  centroid_scale=0.1, bias_scale=1.0, obj_scale=0.5):
    hp = jax.lax.Precision.HIGHEST
    B = z.shape[0]
    nv = vertices_base.shape[0]
    nf = faces.shape[0]
    h = jax.nn.relu(jnp.dot(z, raw["w1"], precision=hp) + raw["b1"])
    h = jax.nn.relu(jnp.dot(h, raw["w2"], precision=hp) + raw["b2"])
    centroid = (jnp.dot(h, raw["wc"], precision=hp) + raw["bc"]) * centroid_scale
    bias = ((jnp.dot(h, raw["wb"], precision=hp) + raw["bb"]) * bias_scale
            ).reshape(B, nv, 3)
    base = vertices_base * obj_scale
    sign = jnp.sign(base)
    ab = jnp.abs(base)
    base_l = jnp.log(ab / (1.0 - ab))
    cen = jnp.tanh(centroid)[:, None, :]
    scale_pos = 1.0 - cen
    scale_neg = cen + 1.0
    v = jax.nn.sigmoid(base_l + bias) * sign
    v = jax.nn.relu(v) * scale_pos - jax.nn.relu(-v) * scale_neg
    v = (v + cen) * 0.5
    faces_out = jnp.broadcast_to(faces[None], (B, nf, 3))
    return v, faces_out


def _init_linear(key, fan_in, fan_out):
    kw, kb = jax.random.split(key)
    bound = 1.0 / float(fan_in) ** 0.5
    w = jax.random.uniform(kw, (fan_in, fan_out), jnp.float32, -bound, bound)
    b = jax.random.uniform(kb, (fan_out,), jnp.float32, -bound, bound)
    return w, b


if __name__ == "__main__":
    B = 2
    Z_DIM = 512                  # z_dim (== Decoder dim_in default)
    D1, D2 = 1024, 2048          # dim_hidden = [1024, 2048] as in the module
    NV, NF = 42, 80              # synthetic template-mesh sizes

    key = jax.random.PRNGKey(0)
    ks = jax.random.split(key, 7)

    w1, b1 = _init_linear(ks[0], Z_DIM, D1)
    w2, b2 = _init_linear(ks[1], D1, D2)
    wc, bc = _init_linear(ks[2], D2, 3)
    wb, bb = _init_linear(ks[3], D2, NV * 3)
    raw = dict(w1=w1, b1=b1, w2=w2, b2=b2, wc=wc, bc=bc, wb=wb, bb=bb)

    vertices_base = jax.random.uniform(ks[4], (NV, 3), jnp.float32, -0.9, 0.9)
    faces = jax.random.randint(ks[5], (NF, 3), 0, NV, dtype=jnp.int32)
    z = jax.random.normal(ks[6], (B, Z_DIM), jnp.float32)

    # Offline prep: int8 w2 + scales, bf16 w1/w3, head fusion, epilogue consts.
    params = prepare_params(raw, vertices_base)

    fwd = jax.jit(lambda zz: generator_forward(zz, params, faces))
    verts, faces_out = fwd(z)
    jax.block_until_ready((verts, faces_out))

    # sanity check vs pure-JAX f32 reference
    v_ref, f_ref = generator_ref(z, raw, vertices_base, faces)
    assert verts.shape == (B, NV, 3)
    assert faces_out.shape == (B, NF, 3)
    assert jnp.allclose(verts, v_ref, atol=2e-2, rtol=2e-2), (
        float(jnp.max(jnp.abs(verts - v_ref))))
    assert jnp.array_equal(faces_out, f_ref)

    print("KERNEL_OK")
</pallas_src>

<mosaic_0001>
module attributes {stable_mosaic.version = 11 : i64} {
  func.func @_generator_kernel(%arg0: i32, %arg1: memref<2x512xf32, #tpu.memory_space<vmem>>, %arg2: memref<512x1024xbf16, #tpu.memory_space<vmem>>, %arg3: memref<1x1024xf32, #tpu.memory_space<vmem>>, %arg4: memref<1024x2048xi8, #tpu.memory_space<vmem>>, %arg5: memref<1x2048xf32, #tpu.memory_space<vmem>>, %arg6: memref<1x2048xf32, #tpu.memory_space<vmem>>, %arg7: memref<2048x128xbf16, #tpu.memory_space<vmem>>, %arg8: memref<1x128xf32, #tpu.memory_space<vmem>>, %arg9: memref<3x2048xf32, #tpu.memory_space<vmem>>, %arg10: memref<1x128xf32, #tpu.memory_space<vmem>>, %arg11: memref<5x126xf32, #tpu.memory_space<vmem>>, %arg12: memref<2x126xf32, #tpu.memory_space<vmem>>) attributes {dimension_semantics = [#tpu.dimension_semantics<arbitrary>], iteration_bounds = array<i64: 1>, scalar_prefetch = 0 : i64, scratch_operands = 0 : i64, tpu.core_type = #tpu.core_type<tc>, window_params = [{pipeline_mode = #tpu.pipeline_mode<synchronous>, transform_indices = @transform_0, window_bounds = array<i64: 2, 512>}, {pipeline_mode = #tpu.pipeline_mode<synchronous>, transform_indices = @transform_1, window_bounds = array<i64: 512, 1024>}, {pipeline_mode = #tpu.pipeline_mode<synchronous>, transform_indices = @transform_2, window_bounds = array<i64: 1, 1024>}, {pipeline_mode = #tpu.pipeline_mode<synchronous>, transform_indices = @transform_3, window_bounds = array<i64: 1024, 2048>}, {pipeline_mode = #tpu.pipeline_mode<synchronous>, transform_indices = @transform_4, window_bounds = array<i64: 1, 2048>}, {pipeline_mode = #tpu.pipeline_mode<synchronous>, transform_indices = @transform_5, window_bounds = array<i64: 1, 2048>}, {pipeline_mode = #tpu.pipeline_mode<synchronous>, transform_indices = @transform_6, window_bounds = array<i64: 2048, 128>}, {pipeline_mode = #tpu.pipeline_mode<synchronous>, transform_indices = @transform_7, window_bounds = array<i64: 1, 128>}, {pipeline_mode = #tpu.pipeline_mode<synchronous>, transform_indices = @transform_8, window_bounds = array<i64: 3, 2048>}, {pipeline_mode = #tpu.pipeline_mode<synchronous>, transform_indices = @transform_9, window_bounds = array<i64: 1, 128>}, {pipeline_mode = #tpu.pipeline_mode<synchronous>, transform_indices = @transform_10, window_bounds = array<i64: 5, 126>}, {pipeline_mode = #tpu.pipeline_mode<synchronous>, transform_indices = @transform_11, window_bounds = array<i64: 2, 126>}]} {
    %c0 = arith.constant 0 : index
    %c0_0 = arith.constant 0 : index
    %0 = vector.load %arg1[%c0, %c0_0] : memref<2x512xf32, #tpu.memory_space<vmem>>, vector<2x512xf32>
    %1 = arith.truncf %0 : vector<2x512xf32> to vector<2x512xbf16>
    %c0_1 = arith.constant 0 : index
    %c0_2 = arith.constant 0 : index
    %2 = vector.load %arg2[%c0_1, %c0_2] : memref<512x1024xbf16, #tpu.memory_space<vmem>>, vector<512x1024xbf16>
    %cst = arith.constant dense<0.000000e+00> : vector<2x1024xf32>
    %3 = tpu.matmul %1, %2, %cst {dimension_numbers = #tpu.dot_dimension_numbers<[1], [0], [0], [1], [0, 0, 1, 1], [], []>} : vector<2x512xbf16>, vector<512x1024xbf16>, vector<2x1024xf32> -> vector<2x1024xf32>
    %c0_3 = arith.constant 0 : index
    %c0_4 = arith.constant 0 : index
    %4 = vector.load %arg3[%c0_3, %c0_4] : memref<1x1024xf32, #tpu.memory_space<vmem>>, vector<1x1024xf32>
    %5 = vector.broadcast %4 : vector<1x1024xf32> to vector<2x1024xf32>
    %6 = arith.addf %3, %5 : vector<2x1024xf32>
    %cst_5 = arith.constant 0.000000e+00 : f32
    %7 = vector.broadcast %cst_5 : f32 to vector<2x1024xf32>
    %8 = arith.maximumf %6, %7 : vector<2x1024xf32>
    %c0_6 = arith.constant 0 : index
    %c0_7 = arith.constant 0 : index
    %9 = vector.load %arg4[%c0_6, %c0_7] : memref<1024x2048xi8, #tpu.memory_space<vmem>>, vector<1024x2048xi8>
    %10 = arith.sitofp %9 : vector<1024x2048xi8> to vector<1024x2048xbf16>
    %11 = arith.truncf %8 : vector<2x1024xf32> to vector<2x1024xbf16>
    %cst_8 = arith.constant dense<0.000000e+00> : vector<2x2048xf32>
    %12 = tpu.matmul %11, %10, %cst_8 {dimension_numbers = #tpu.dot_dimension_numbers<[1], [0], [0], [1], [0, 0, 1, 1], [], []>} : vector<2x1024xbf16>, vector<1024x2048xbf16>, vector<2x2048xf32> -> vector<2x2048xf32>
    %c0_9 = arith.constant 0 : index
    %c0_10 = arith.constant 0 : index
    %13 = vector.load %arg5[%c0_9, %c0_10] : memref<1x2048xf32, #tpu.memory_space<vmem>>, vector<1x2048xf32>
    %14 = vector.broadcast %13 : vector<1x2048xf32> to vector<2x2048xf32>
    %15 = arith.mulf %12, %14 : vector<2x2048xf32>
    %c0_11 = arith.constant 0 : index
    %c0_12 = arith.constant 0 : index
    %16 = vector.load %arg6[%c0_11, %c0_12] : memref<1x2048xf32, #tpu.memory_space<vmem>>, vector<1x2048xf32>
    %17 = vector.broadcast %16 : vector<1x2048xf32> to vector<2x2048xf32>
    %18 = arith.addf %15, %17 : vector<2x2048xf32>
    %cst_13 = arith.constant 0.000000e+00 : f32
    %19 = vector.broadcast %cst_13 : f32 to vector<2x2048xf32>
    %20 = arith.maximumf %18, %19 : vector<2x2048xf32>
    %21 = arith.truncf %20 : vector<2x2048xf32> to vector<2x2048xbf16>
    %c0_14 = arith.constant 0 : index
    %c0_15 = arith.constant 0 : index
    %22 = vector.load %arg7[%c0_14, %c0_15] : memref<2048x128xbf16, #tpu.memory_space<vmem>>, vector<2048x128xbf16>
    %cst_16 = arith.constant dense<0.000000e+00> : vector<2x128xf32>
    %23 = tpu.matmul %21, %22, %cst_16 {dimension_numbers = #tpu.dot_dimension_numbers<[1], [0], [0], [1], [0, 0, 1, 1], [], []>} : vector<2x2048xbf16>, vector<2048x128xbf16>, vector<2x128xf32> -> vector<2x128xf32>
    %c0_17 = arith.constant 0 : index
    %c0_18 = arith.constant 0 : index
    %24 = vector.load %arg8[%c0_17, %c0_18] : memref<1x128xf32, #tpu.memory_space<vmem>>, vector<1x128xf32>
    %25 = vector.broadcast %24 : vector<1x128xf32> to vector<2x128xf32>
    %26 = arith.addf %23, %25 : vector<2x128xf32>
    %27 = vector.extract_strided_slice %26 {offsets = [0, 0], sizes = [2, 126], strides = [1, 1]} : vector<2x128xf32> to vector<2x126xf32>
    %cst_19 = arith.constant 1.000000e+00 : f32
    %28 = vector.broadcast %cst_19 : f32 to vector<2x126xf32>
    %29 = arith.mulf %27, %28 : vector<2x126xf32>
    %c0_20 = arith.constant 0 : index
    %c0_21 = arith.constant 0 : index
    %30 = vector.load %arg9[%c0_20, %c0_21] : memref<3x2048xf32, #tpu.memory_space<vmem>>, vector<3x2048xf32>
    %31 = vector.extract_strided_slice %30 {offsets = [0, 0], sizes = [1, 2048], strides = [1, 1]} : vector<3x2048xf32> to vector<1x2048xf32>
    %32 = vector.broadcast %31 : vector<1x2048xf32> to vector<2x2048xf32>
    %33 = arith.mulf %20, %32 : vector<2x2048xf32>
    %cst_22 = arith.constant dense<0.000000e+00> : vector<2xf32>
    %34 = vector.multi_reduction <add>, %33, %cst_22 [1] : vector<2x2048xf32> to vector<2xf32>
    %35 = vector.shape_cast %34 : vector<2xf32> to vector<2x1xf32>
    %c0_23 = arith.constant 0 : index
    %c0_24 = arith.constant 0 : index
    %36 = vector.load %arg10[%c0_23, %c0_24] : memref<1x128xf32, #tpu.memory_space<vmem>>, vector<1x1xf32>
    %37 = vector.broadcast %36 : vector<1x1xf32> to vector<2x1xf32>
    %38 = arith.addf %35, %37 : vector<2x1xf32>
    %cst_25 = arith.constant 1.000000e-01 : f32
    %39 = vector.broadcast %cst_25 : f32 to vector<2x1xf32>
    %40 = arith.mulf %38, %39 : vector<2x1xf32>
    %41 = math.tanh %40 : vector<2x1xf32>
    %42 = vector.extract_strided_slice %30 {offsets = [1, 0], sizes = [1, 2048], strides = [1, 1]} : vector<3x2048xf32> to vector<1x2048xf32>
    %43 = vector.broadcast %42 : vector<1x2048xf32> to vector<2x2048xf32>
    %44 = arith.mulf %20, %43 : vector<2x2048xf32>
    %cst_26 = arith.constant dense<0.000000e+00> : vector<2xf32>
    %45 = vector.multi_reduction <add>, %44, %cst_26 [1] : vector<2x2048xf32> to vector<2xf32>
    %46 = vector.shape_cast %45 : vector<2xf32> to vector<2x1xf32>
    %c0_27 = arith.constant 0 : index
    %c1 = arith.constant 1 : index
    %47 = vector.load %arg10[%c0_27, %c1] : memref<1x128xf32, #tpu.memory_space<vmem>>, vector<1x1xf32>
    %48 = vector.broadcast %47 : vector<1x1xf32> to vector<2x1xf32>
    %49 = arith.addf %46, %48 : vector<2x1xf32>
    %cst_28 = arith.constant 1.000000e-01 : f32
    %50 = vector.broadcast %cst_28 : f32 to vector<2x1xf32>
    %51 = arith.mulf %49, %50 : vector<2x1xf32>
    %52 = math.tanh %51 : vector<2x1xf32>
    %53 = vector.extract_strided_slice %30 {offsets = [2, 0], sizes = [1, 2048], strides = [1, 1]} : vector<3x2048xf32> to vector<1x2048xf32>
    %54 = vector.broadcast %53 : vector<1x2048xf32> to vector<2x2048xf32>
    %55 = arith.mulf %20, %54 : vector<2x2048xf32>
    %cst_29 = arith.constant dense<0.000000e+00> : vector<2xf32>
    %56 = vector.multi_reduction <add>, %55, %cst_29 [1] : vector<2x2048xf32> to vector<2xf32>
    %57 = vector.shape_cast %56 : vector<2xf32> to vector<2x1xf32>
    %c0_30 = arith.constant 0 : index
    %c2 = arith.constant 2 : index
    %58 = vector.load %arg10[%c0_30, %c2] : memref<1x128xf32, #tpu.memory_space<vmem>>, vector<1x1xf32>
    %59 = vector.broadcast %58 : vector<1x1xf32> to vector<2x1xf32>
    %60 = arith.addf %57, %59 : vector<2x1xf32>
    %cst_31 = arith.constant 1.000000e-01 : f32
    %61 = vector.broadcast %cst_31 : f32 to vector<2x1xf32>
    %62 = arith.mulf %60, %61 : vector<2x1xf32>
    %63 = math.tanh %62 : vector<2x1xf32>
    %c0_32 = arith.constant 0 : index
    %c0_33 = arith.constant 0 : index
    %64 = vector.load %arg11[%c0_32, %c0_33] : memref<5x126xf32, #tpu.memory_space<vmem>>, vector<1x126xf32>
    %c1_34 = arith.constant 1 : index
    %c0_35 = arith.constant 0 : index
    %65 = vector.load %arg11[%c1_34, %c0_35] : memref<5x126xf32, #tpu.memory_space<vmem>>, vector<1x126xf32>
    %c2_36 = arith.constant 2 : index
    %c0_37 = arith.constant 0 : index
    %66 = vector.load %arg11[%c2_36, %c0_37] : memref<5x126xf32, #tpu.memory_space<vmem>>, vector<1x126xf32>
    %67 = vector.broadcast %41 : vector<2x1xf32> to vector<2x126xf32>
    %68 = vector.broadcast %66 : vector<1x126xf32> to vector<2x126xf32>
    %69 = arith.mulf %67, %68 : vector<2x126xf32>
    %c3 = arith.constant 3 : index
    %c0_38 = arith.constant 0 : index
    %70 = vector.load %arg11[%c3, %c0_38] : memref<5x126xf32, #tpu.memory_space<vmem>>, vector<1x126xf32>
    %71 = vector.broadcast %52 : vector<2x1xf32> to vector<2x126xf32>
    %72 = vector.broadcast %70 : vector<1x126xf32> to vector<2x126xf32>
    %73 = arith.mulf %71, %72 : vector<2x126xf32>
    %74 = arith.addf %69, %73 : vector<2x126xf32>
    %c4 = arith.constant 4 : index
    %c0_39 = arith.constant 0 : index
    %75 = vector.load %arg11[%c4, %c0_39] : memref<5x126xf32, #tpu.memory_space<vmem>>, vector<1x126xf32>
    %76 = vector.broadcast %63 : vector<2x1xf32> to vector<2x126xf32>
    %77 = vector.broadcast %75 : vector<1x126xf32> to vector<2x126xf32>
    %78 = arith.mulf %76, %77 : vector<2x126xf32>
    %79 = arith.addf %74, %78 : vector<2x126xf32>
    %80 = vector.broadcast %64 : vector<1x126xf32> to vector<2x126xf32>
    %81 = arith.addf %80, %29 : vector<2x126xf32>
    %82 = arith.negf %81 : vector<2x126xf32>
    %83 = math.exp %82 : vector<2x126xf32>
    %cst_40 = arith.constant 1.000000e+00 : f32
    %84 = vector.broadcast %cst_40 : f32 to vector<2x126xf32>
    %85 = arith.addf %84, %83 : vector<2x126xf32>
    %86 = arith.divf %84, %85 : vector<2x126xf32>
    %87 = vector.broadcast %65 : vector<1x126xf32> to vector<2x126xf32>
    %88 = arith.mulf %86, %87 : vector<2x126xf32>
    %89 = math.absf %88 : vector<2x126xf32>
    %cst_41 = arith.constant 1.000000e+00 : f32
    %90 = vector.broadcast %cst_41 : f32 to vector<2x126xf32>
    %91 = arith.subf %90, %89 : vector<2x126xf32>
    %92 = arith.mulf %91, %79 : vector<2x126xf32>
    %93 = arith.addf %88, %92 : vector<2x126xf32>
    %cst_42 = arith.constant 5.000000e-01 : f32
    %94 = vector.broadcast %cst_42 : f32 to vector<2x126xf32>
    %95 = arith.mulf %94, %93 : vector<2x126xf32>
    %c0_43 = arith.constant 0 : index
    %c0_44 = arith.constant 0 : index
    %96 = vector.load %arg12[%c0_43, %c0_44] : memref<2x126xf32, #tpu.memory_space<vmem>>, vector<2x126xf32>
    tpu.vector_store %arg12[%c0_43, %c0_44], %95 {strides = array<i32>} : memref<2x126xf32, #tpu.memory_space<vmem>>, vector<2x126xf32>,
    return
  }
  func.func @transform_0(%arg0: i32) -> (i32, i32) {
    %c0_i32 = arith.constant 0 : i32
    %c0_i32_0 = arith.constant 0 : i32
    %c0_i32_1 = arith.constant 0 : i32
    return %c0_i32, %c0_i32_0 : i32, i32
  }
  func.func @transform_1(%arg0: i32) -> (i32, i32) {
    %c0_i32 = arith.constant 0 : i32
    %c0_i32_0 = arith.constant 0 : i32
    %c0_i32_1 = arith.constant 0 : i32
    return %c0_i32, %c0_i32_0 : i32, i32
  }
  func.func @transform_2(%arg0: i32) -> (i32, i32) {
    %c0_i32 = arith.constant 0 : i32
    %c0_i32_0 = arith.constant 0 : i32
    %c0_i32_1 = arith.constant 0 : i32
    return %c0_i32, %c0_i32_0 : i32, i32
  }
  func.func @transform_3(%arg0: i32) -> (i32, i32) {
    %c0_i32 = arith.constant 0 : i32
    %c0_i32_0 = arith.constant 0 : i32
    %c0_i32_1 = arith.constant 0 : i32
    return %c0_i32, %c0_i32_0 : i32, i32
  }
  func.func @transform_4(%arg0: i32) -> (i32, i32) {
    %c0_i32 = arith.constant 0 : i32
    %c0_i32_0 = arith.constant 0 : i32
    %c0_i32_1 = arith.constant 0 : i32
    return %c0_i32, %c0_i32_0 : i32, i32
  }
  func.func @transform_5(%arg0: i32) -> (i32, i32) {
    %c0_i32 = arith.constant 0 : i32
    %c0_i32_0 = arith.constant 0 : i32
    %c0_i32_1 = arith.constant 0 : i32
    return %c0_i32, %c0_i32_0 : i32, i32
  }
  func.func @transform_6(%arg0: i32) -> (i32, i32) {
    %c0_i32 = arith.constant 0 : i32
    %c0_i32_0 = arith.constant 0 : i32
    %c0_i32_1 = arith.constant 0 : i32
    return %c0_i32, %c0_i32_0 : i32, i32
  }
  func.func @transform_7(%arg0: i32) -> (i32, i32) {
    %c0_i32 = arith.constant 0 : i32
    %c0_i32_0 = arith.constant 0 : i32
    %c0_i32_1 = arith.constant 0 : i32
    return %c0_i32, %c0_i32_0 : i32, i32
  }
  func.func @transform_8(%arg0: i32) -> (i32, i32) {
    %c0_i32 = arith.constant 0 : i32
    %c0_i32_0 = arith.constant 0 : i32
    %c0_i32_1 = arith.constant 0 : i32
    return %c0_i32, %c0_i32_0 : i32, i32
  }
  func.func @transform_9(%arg0: i32) -> (i32, i32) {
    %c0_i32 = arith.constant 0 : i32
    %c0_i32_0 = arith.constant 0 : i32
    %c0_i32_1 = arith.constant 0 : i32
    return %c0_i32, %c0_i32_0 : i32, i32
  }
  func.func @transform_10(%arg0: i32) -> (i32, i32) {
    %c0_i32 = arith.constant 0 : i32
    %c0_i32_0 = arith.constant 0 : i32
    %c0_i32_1 = arith.constant 0 : i32
    return %c0_i32, %c0_i32_0 : i32, i32
  }
  func.func @transform_11(%arg0: i32) -> (i32, i32) {
    %c0_i32 = arith.constant 0 : i32
    %c0_i32_0 = arith.constant 0 : i32
    %c0_i32_1 = arith.constant 0 : i32
    return %c0_i32, %c0_i32_0 : i32, i32
  }
}

</mosaic_0001>

<bundles_post_ra>
// kernel: _lambda_.1
= control target key start
LH: loop header
LB: loop body
LE: loop exit
PB: predicated region body
PF: predicated region fallthrough
CT: control target
= control target key end

     0   :  { %16 = vsyncpa [#allocation3], 0  ;;  %s11293_s0 = inlined_call_operand.hbm [shape: f32[2,512], index: 0, kind: input, shape index: {}]   ;;  %s11294_s1 = inlined_call_operand.vmem [shape: bf16[512,1024], index: 1, kind: input, shape index: {}]   ;;  %s11295_s2 = inlined_call_operand.hbm [shape: f32[1,1024], index: 2, kind: input, shape index: {}]   ;;  %s11296_s3 = inlined_call_operand.vmem [shape: s8[1024,2048], index: 3, kind: input, shape index: {}]   ;;  %s11297_s4 = inlined_call_operand.vmem [shape: f32[1,2048], index: 4, kind: input, shape index: {}]   ;;  %s11298_s5 = inlined_call_operand.vmem [shape: f32[1,2048], index: 5, kind: input, shape index: {}]   ;;  %s11299_s6 = inlined_call_operand.hbm [shape: bf16[2048,128], index: 6, kind: input, shape index: {}]   ;;  %s11300_s7 = inlined_call_operand.vmem [shape: f32[1,128], index: 7, kind: input, shape index: {}]   ;;  %s11301_s8 = inlined_call_operand.hbm [shape: f32[3,2048], index: 8, kind: input, shape index: {}]   ;;  %s11302_s9 = inlined_call_operand.vmem [shape: f32[1,128], index: 9, kind: input, shape index: {}]   ;;  %s11303_s10 = inlined_call_operand.hbm [shape: f32[5,126], index: 10, kind: input, shape index: {}]   ;;  %s11304_s11 = inlined_call_operand.vmem [shape: f32[2,126], index: 11, kind: output, shape index: {}]  }
   0x1   :  { %17 = vsyncpa [#allocation5], 0 }
   0x2   :  { %18 = vsyncpa [#allocation8], 0  ;;  %s8119_s17 = smov [#allocation4]   ;;  %s8120_s19 = smov [#allocation7]  }
   0x3   :  { %s37_s18 = sshll.u32 %s8119_s17, 4  ;;  %s67_s20 = sshll.u32 %s8120_s19, 4  ;;  %s38_s18 = int_to_ptr.vmem [resolvable:$true] %s37_s18  ;;  %s68_s20 = int_to_ptr.vmem [resolvable:$true] %s67_s20 }
   0x4   :  { %s8003_s23 = scalar_lea.hbm %s11295_s2, 128 }
   0x5   :  { %p8004_p0 = scmp.ne.s32.totalorder %s11295_s2, %s8003_s23  ;;  %p8007_p1 = scmp.lt.u32.totalorder %s8003_s23, %s11295_s2 }
   0x7   :  { %p8009_p2 = pnand %p8007_p1, %p8004_p0 }
   0x9   :  { %8012 = shalt.err (!%p8009_p2)
}
   0xa   :  { %s8013_s28 = scalar_lea.vmem %s38_s18, 128  ;;  %p8018_p4 = scmp.lt.s32.totalorder %s38_s18, %s38_s18 }
   0xb   :  { %p8014_p3 = scmp.ne.s32.totalorder %s38_s18, %s8013_s28  ;;  %p8019_p5 = scmp.lt.s32.totalorder %s8013_s28, %s8013_s28 }
   0xd   :  { %p8020_p6 = por %p8019_p5, %p8018_p4 }
   0xf   :  { %p8021_p7 = pnand %p8020_p6, %p8014_p3 }
  0x11   :  { %8024 = shalt.err (!%p8021_p7)
}
  0x12   :  { %40 = dma.hbm_to_vmem [thread:$0]  %s11295_s2, 128, %s38_s18, [#allocation5]  }
  0x13   :  { %s8025_s14 = scalar_lea.hbm %s11301_s8, 1024 }
  0x14   :  { %p8026_p8 = scmp.ne.s32.totalorder %s11301_s8, %s8025_s14  ;;  %p8029_p9 = scmp.lt.u32.totalorder %s8025_s14, %s11301_s8 }
  0x16   :  { %p8031_p10 = pnand %p8029_p9, %p8026_p8 }
  0x18   :  { %8034 = shalt.err (!%p8031_p10)
}
  0x19   :  { %s8035_s21 = scalar_lea.vmem %s68_s20, 1024  ;;  %p8040_p12 = scmp.lt.s32.totalorder %s68_s20, %s68_s20 }
  0x1a   :  { %p8036_p11 = scmp.ne.s32.totalorder %s68_s20, %s8035_s21  ;;  %p8041_p13 = scmp.lt.s32.totalorder %s8035_s21, %s8035_s21 }
  0x1c   :  { %p8042_p0 = por %p8041_p13, %p8040_p12 }
  0x1e   :  { %p8043_p1 = pnand %p8042_p0, %p8036_p11 }
  0x20   :  { %8046 = shalt.err (!%p8043_p1)
}
  0x21   :  { %70 = dma.hbm_to_vmem [thread:$0]  %s11301_s8, 1024, %s68_s20, [#allocation8]  }
  0x22   :  { %s8121_s22 = smov [#allocation2]   ;;  %s8122_s24 = smov [#allocation6]  }
  0x23   :  { %s25_s23 = sshll.u32 %s8121_s22, 4  ;;  %s52_s25 = sshll.u32 %s8122_s24, 4  ;;  %s26_s23 = int_to_ptr.vmem [resolvable:$true] %s25_s23  ;;  %s8214_s25 = int_to_ptr.vmem [resolvable:$true] %s52_s25 }
  0x24   :  { %s8047_s28 = scalar_lea.hbm %s11293_s0, 128 }
  0x25   :  { %p8048_p2 = scmp.ne.s32.totalorder %s11293_s0, %s8047_s28  ;;  %p8051_p3 = scmp.lt.u32.totalorder %s8047_s28, %s11293_s0 }
  0x27   :  { %p8053_p4 = pnand %p8051_p3, %p8048_p2 }
  0x29   :  { %8056 = shalt.err (!%p8053_p4)
}
  0x2a   :  { %s8057_s8 = scalar_lea.vmem %s26_s23, 128  ;;  %p8062_p6 = scmp.lt.s32.totalorder %s26_s23, %s26_s23 }
  0x2b   :  { %p8058_p5 = scmp.ne.s32.totalorder %s26_s23, %s8057_s8  ;;  %p8063_p7 = scmp.lt.s32.totalorder %s8057_s8, %s8057_s8 }
  0x2d   :  { %p8064_p8 = por %p8063_p7, %p8062_p6 }
  0x2f   :  { %p8065_p9 = pnand %p8064_p8, %p8058_p5 }
  0x31   :  { %8068 = shalt.err (!%p8065_p9)
}
  0x32   :  { %28 = dma.hbm_to_vmem [thread:$0]  %s11293_s0, 128, %s26_s23, [#allocation3]  }
  0x33   :  { %s8069_s17 = scalar_lea.hbm %s11299_s6, 16384 }
  0x34   :  { %p8070_p10 = scmp.ne.s32.totalorder %s11299_s6, %s8069_s17  ;;  %p8073_p11 = scmp.lt.u32.totalorder %s8069_s17, %s11299_s6 }
  0x36   :  { %p8075_p12 = pnand %p8073_p11, %p8070_p10 }
  0x38   :  { %8078 = shalt.err (!%p8075_p12)
}
  0x39   :  { %s8079_s22 = scalar_lea.vmem %s8214_s25, 16384  ;;  %p8084_p0 = scmp.lt.s32.totalorder %s8214_s25, %s8214_s25 }
  0x3a   :  { %p8080_p13 = scmp.ne.s32.totalorder %s8214_s25, %s8079_s22  ;;  %p8085_p1 = scmp.lt.s32.totalorder %s8079_s22, %s8079_s22 }
  0x3c   :  { %p8086_p2 = por %p8085_p1, %p8084_p0 }
  0x3e   :  { %p8087_p3 = pnand %p8086_p2, %p8080_p13 }
  0x40   :  { %8090 = shalt.err (!%p8087_p3)
}
  0x41   :  { %s8123_s0 = smov 64   ;;  %s8124_s23 = smov 4  }
  0x42   :  { %58 = dma.hbm_to_vmem [thread:$0]  %s11299_s6, 16384, %s8214_s25, [#allocation5], %s8123_s0, %s8123_s0, %s8124_s23  }
  0x43   :  { %s8125_s27 = smov [#allocation9]   ;;  %s8091_s12 = scalar_lea.hbm %s11303_s10, 128 }
  0x44   :  { %s79_s28 = sshll.u32 %s8125_s27, 4  ;;  %p8092_p4 = scmp.ne.s32.totalorder %s11303_s10, %s8091_s12  ;;  %s80_s28 = int_to_ptr.vmem [resolvable:$true] %s79_s28 }
  0x45   :  { %p8095_p5 = scmp.lt.u32.totalorder %s8091_s12, %s11303_s10 }
  0x47   :  { %p8097_p6 = pnand %p8095_p5, %p8092_p4 }
  0x49   :  { %8100 = shalt.err (!%p8097_p6)
}
  0x4a   :  { %s8101_s15 = scalar_lea.vmem %s80_s28, 128  ;;  %p8106_p8 = scmp.lt.s32.totalorder %s80_s28, %s80_s28 }
  0x4b   :  { %p8102_p7 = scmp.ne.s32.totalorder %s80_s28, %s8101_s15  ;;  %p8107_p9 = scmp.lt.s32.totalorder %s8101_s15, %s8101_s15 }
  0x4d   :  { %p8108_p10 = por %p8107_p9, %p8106_p8 }
  0x4f   :  { %p8109_p11 = pnand %p8108_p10, %p8102_p7 }
  0x51   :  { %8112 = shalt.err (!%p8109_p11)
}
  0x52   :  { %82 = dma.hbm_to_vmem [thread:$0]  %s11303_s10, 128, %s80_s28, [#allocation8]  }
  0x53   :  { %8113 = dma.done.wait [#allocation3], 128  }
  0x54   :  { %8114 = vsyncadd [#allocation3], 4294967168 }
  0x55   :  { %8115 = dma.done.wait [#allocation5], 16512  }
  0x56   :  { %8116 = vsyncadd [#allocation5], 4294950784 }
  0x57   :  { %8117 = dma.done.wait [#allocation8], 1152  }
  0x58   :  { %8118 = vsyncadd [#allocation8], 4294966144  ;;  %v126_v0 = vld [vmem:[%s11294_s1] sm:$0xff]  ;;  %v127_v2 = vld [vmem:[%s11294_s1 + $0x8] sm:$0xff]  ;;  %v8126_v32 = vmov 1983009808   ;;  %v105_v34 = vlaneseq }
  0x59   :  { %v130_v1 = vld [vmem:[%s11294_s1 + $0x20] sm:$0xff]  ;;  %v131_v4 = vld [vmem:[%s11294_s1 + $0x28] sm:$0xff]  ;;  %v103_v33 = vunpack.c.l.s4 %v8126_v32  ;;  %vm6655_vm0 = vcmask 1041408   ;;  %vm7149_vm1 = vcmask 1025024  }
  0x5a   :  { %v7159_v3 = vcombine.high %v126_v0, %v130_v1  ;;  %v7158_v5 = vcombine.low %v126_v0, %v130_v1  ;;  %v134_v6 = vld [vmem:[%s11294_s1 + $0x40] sm:$0xff]  ;;  %v7161_v8 = vcombine.high %v127_v2, %v131_v4  ;;  %v7160_v9 = vcombine.low %v127_v2, %v131_v4  ;;  %v135_v11 = vld [vmem:[%s11294_s1 + $0x48] sm:$0xff] }
  0x5b   :  { %v138_v7 = vld [vmem:[%s11294_s1 + $0x60] sm:$0xff]  ;;  %v139_v12 = vld [vmem:[%s11294_s1 + $0x68] sm:$0xff]  ;;  %v104_v43 = vunpack.c.0.s8 %v103_v33  ;;  %v8323_v44 = vshrl.u32 %v105_v34, 7 }
  0x5c   :  { %v7167_v10 = vcombine.high %v134_v6, %v138_v7  ;;  %v142_v13 = vld [vmem:[%s11294_s1 + $0x80] sm:$0xff]  ;;  %1704 = vmatprep.subr.bf16.mxu0 %v7159_v3  ;;  %v7169_v14 = vcombine.high %v135_v11, %v139_v12  ;;  %v143_v16 = vld [vmem:[%s11294_s1 + $0x88] sm:$0xff]  ;;  %1786 = vmatprep.subr.bf16.mxu1 %v7161_v8  ;;  %v7166_v18 = vcombine.low %v134_v6, %v138_v7 }
  0x5d   :  { %v146_v15 = vld [vmem:[%s11294_s1 + $0xa0] sm:$0xff]  ;;  %v147_v17 = vld [vmem:[%s11294_s1 + $0xa8] sm:$0xff]  ;;  %1705 = vmatpush1.bf16.msra.mxu0 %v7158_v5  ;;  %1787 = vmatpush1.bf16.msra.mxu1 %v7160_v9  ;;  %v7168_v19 = vcombine.low %v135_v11, %v139_v12  ;;  %v8338_v53 = vsub.s32 %v104_v43, %v8323_v44 }
  0x5e   :  { %1706 = vmatprep.subr.bf16.mxu0 %v7167_v10  ;;  %v7175_v20 = vcombine.high %v142_v13, %v146_v15  ;;  %1788 = vmatprep.subr.bf16.mxu1 %v7169_v14  ;;  %v7177_v21 = vcombine.high %v143_v16, %v147_v17  ;;  %v150_v22 = vld [vmem:[%s11294_s1 + $0xc0] sm:$0xff]  ;;  %v151_v24 = vld [vmem:[%s11294_s1 + $0xc8] sm:$0xff]  ;;  %v7174_v26 = vcombine.low %v142_v13, %v146_v15 }
  0x5f   :  { %v154_v23 = vld [vmem:[%s11294_s1 + $0xe0] sm:$0xff]  ;;  %v155_v25 = vld [vmem:[%s11294_s1 + $0xe8] sm:$0xff]  ;;  %v7176_v27 = vcombine.low %v143_v16, %v147_v17 }
  0x60   :  { %v7183_v28 = vcombine.high %v150_v22, %v154_v23  ;;  %v7185_v29 = vcombine.high %v151_v24, %v155_v25  ;;  %v158_v30 = vld [vmem:[%s11294_s1 + $0x100] sm:$0xff]  ;;  %v159_v35 = vld [vmem:[%s11294_s1 + $0x108] sm:$0xff]  ;;  %v7182_v37 = vcombine.low %v150_v22, %v154_v23  ;;  %v7184_v38 = vcombine.low %v151_v24, %v155_v25 }
  0x61   :  { %1707 = vmatpush1.bf16.msra.mxu0 %v7166_v18  ;;  %1789 = vmatpush1.bf16.msra.mxu1 %v7168_v19  ;;  %v162_v31 = vld [vmem:[%s11294_s1 + $0x120] sm:$0xff]  ;;  %v163_v36 = vld [vmem:[%s11294_s1 + $0x128] sm:$0xff] }
  0x62   :  { %1708 = vmatprep.subr.bf16.mxu0 %v7175_v20  ;;  %1790 = vmatprep.subr.bf16.mxu1 %v7177_v21  ;;  %v7191_v39 = vcombine.high %v158_v30, %v162_v31  ;;  %v7193_v40 = vcombine.high %v159_v35, %v163_v36  ;;  %v166_v41 = vld [vmem:[%s11294_s1 + $0x140] sm:$0xff]  ;;  %v167_v45 = vld [vmem:[%s11294_s1 + $0x148] sm:$0xff]  ;;  %v7190_v47 = vcombine.low %v158_v30, %v162_v31 }
  0x63   :  { %v170_v42 = vld [vmem:[%s11294_s1 + $0x160] sm:$0xff]  ;;  %v171_v46 = vld [vmem:[%s11294_s1 + $0x168] sm:$0xff]  ;;  %v7192_v48 = vcombine.low %v159_v35, %v163_v36 }
  0x64   :  { %v7199_v49 = vcombine.high %v166_v41, %v170_v42  ;;  %v7201_v50 = vcombine.high %v167_v45, %v171_v46  ;;  %v174_v51 = vld [vmem:[%s11294_s1 + $0x180] sm:$0xff]  ;;  %v175_v54 = vld [vmem:[%s11294_s1 + $0x188] sm:$0xff]  ;;  %v7198_v56 = vcombine.low %v166_v41, %v170_v42  ;;  %v7200_v57 = vcombine.low %v167_v45, %v171_v46 }
  0x65   :  { %1709 = vmatpush1.bf16.msra.mxu0 %v7174_v26  ;;  %1791 = vmatpush1.bf16.msra.mxu1 %v7176_v27  ;;  %v178_v52 = vld [vmem:[%s11294_s1 + $0x1a0] sm:$0xff]  ;;  %v179_v55 = vld [vmem:[%s11294_s1 + $0x1a8] sm:$0xff] }
  0x66   :  { %1710 = vmatprep.subr.bf16.mxu0 %v7183_v28  ;;  %1792 = vmatprep.subr.bf16.mxu1 %v7185_v29  ;;  %v7207_v58 = vcombine.high %v174_v51, %v178_v52  ;;  %v8346_v59 = vld [vmem:[#allocation2] sm:$0xff]  ;;  %v7209_v60 = vcombine.high %v175_v54, %v179_v55  ;;  %v183_v0 = vld [vmem:[%s11294_s1 + $0x1c8] sm:$0xff]  ;;  %v7206_v2 = vcombine.low %v174_v51, %v178_v52 }
  0x67   :  { %v182_v61 = vld [vmem:[%s11294_s1 + $0x1c0] sm:$0xff]  ;;  %v8356_v63 = vrot.slane %v8346_v59, %v8338_v53  ;;  %v187_v1 = vld [vmem:[%s11294_s1 + $0x1e8] sm:$0xff]  ;;  %v7208_v4 = vcombine.low %v175_v54, %v179_v55 }
  0x68   :  { %v186_v62 = vld [vmem:[%s11294_s1 + $0x1e0] sm:$0xff]  ;;  %v7217_v6 = vcombine.high %v183_v0, %v187_v1  ;;  %v191_v10 = vld [vmem:[%s11294_s1 + $0x208] sm:$0xff]  ;;  %v7216_v13 = vcombine.low %v183_v0, %v187_v1 }
  0x69   :  { %1711 = vmatpush1.bf16.msra.mxu0 %v7182_v37  ;;  %1793 = vmatpush1.bf16.msra.mxu1 %v7184_v38  ;;  %v116_v3 = vcombine.high %v8356_v63, %v8356_v63  ;;  %v7215_v5 = vcombine.high %v182_v61, %v186_v62  ;;  %v190_v7 = vld [vmem:[%s11294_s1 + $0x200] sm:$0xff]  ;;  %v195_v11 = vld [vmem:[%s11294_s1 + $0x228] sm:$0xff]  ;;  %v7214_v12 = vcombine.low %v182_v61, %v186_v62 }
  0x6a   :  { %1712 = vmatprep.subr.bf16.mxu0 %v7191_v39  ;;  %1794 = vmatprep.subr.bf16.mxu1 %v7193_v40  ;;  %v194_v8 = vld [vmem:[%s11294_s1 + $0x220] sm:$0xff]  ;;  %v7225_v15 = vcombine.high %v191_v10, %v195_v11  ;;  %v199_v18 = vld [vmem:[%s11294_s1 + $0x248] sm:$0xff]  ;;  %v7224_v21 = vcombine.low %v191_v10, %v195_v11 }
  0x6b   :  { %v8372_v9 = vpack.c.bf16 %v116_v3, %v116_v3  ;;  %v7223_v14 = vcombine.high %v190_v7, %v194_v8  ;;  %v198_v16 = vld [vmem:[%s11294_s1 + $0x240] sm:$0xff]  ;;  %v203_v19 = vld [vmem:[%s11294_s1 + $0x268] sm:$0xff]  ;;  %v7222_v20 = vcombine.low %v190_v7, %v194_v8 }
  0x6c   :  { %v202_v17 = vld [vmem:[%s11294_s1 + $0x260] sm:$0xff]  ;;  %v7233_v23 = vcombine.high %v199_v18, %v203_v19  ;;  %v207_v26 = vld [vmem:[%s11294_s1 + $0x288] sm:$0xff]  ;;  %v7232_v29 = vcombine.low %v199_v18, %v203_v19 }
  0x6d   :  { %1713 = vmatpush1.bf16.msra.mxu0 %v7190_v47  ;;  %1795 = vmatpush1.bf16.msra.mxu1 %v7192_v48  ;;  %v7231_v22 = vcombine.high %v198_v16, %v202_v17  ;;  %v206_v24 = vld [vmem:[%s11294_s1 + $0x280] sm:$0xff]  ;;  %v211_v27 = vld [vmem:[%s11294_s1 + $0x2a8] sm:$0xff]  ;;  %v7230_v28 = vcombine.low %v198_v16, %v202_v17 }
  0x6e   :  { %1714 = vmatprep.subr.bf16.mxu0 %v7199_v49  ;;  %1796 = vmatprep.subr.bf16.mxu1 %v7201_v50  ;;  %v210_v25 = vld [vmem:[%s11294_s1 + $0x2a0] sm:$0xff]  ;;  %v7241_v31 = vcombine.high %v207_v26, %v211_v27  ;;  %v215_v34 = vld [vmem:[%s11294_s1 + $0x2c8] sm:$0xff]  ;;  %v7240_v37 = vcombine.low %v207_v26, %v211_v27 }
  0x6f   :  { %1736 = vmatprep.mubr.bf16.mxu0 %v8372_v9  ;;  %1818 = vmatprep.mubr.bf16.mxu1 %v8372_v9  ;;  %v7239_v30 = vcombine.high %v206_v24, %v210_v25  ;;  %v214_v32 = vld [vmem:[%s11294_s1 + $0x2c0] sm:$0xff]  ;;  %v219_v35 = vld [vmem:[%s11294_s1 + $0x2e8] sm:$0xff]  ;;  %v7238_v36 = vcombine.low %v206_v24, %v210_v25  ;;  %v8493_v24 = vpack.c.bf16 %v8356_v63, %v8356_v63 }
  0x70   :  { %v218_v33 = vld [vmem:[%s11294_s1 + $0x2e0] sm:$0xff]  ;;  %v7249_v39 = vcombine.high %v215_v34, %v219_v35  ;;  %v223_v42 = vld [vmem:[%s11294_s1 + $0x308] sm:$0xff]  ;;  %v7248_v46 = vcombine.low %v215_v34, %v219_v35 }
  0x71   :  { %1715 = vmatpush1.bf16.msra.mxu0 %v7198_v56  ;;  %1797 = vmatpush1.bf16.msra.mxu1 %v7200_v57  ;;  %v7247_v38 = vcombine.high %v214_v32, %v218_v33  ;;  %v222_v40 = vld [vmem:[%s11294_s1 + $0x300] sm:$0xff]  ;;  %v227_v43 = vld [vmem:[%s11294_s1 + $0x328] sm:$0xff]  ;;  %v7246_v45 = vcombine.low %v214_v32, %v218_v33 }
  0x72   :  { %1716 = vmatprep.subr.bf16.mxu0 %v7207_v58  ;;  %1798 = vmatprep.subr.bf16.mxu1 %v7209_v60  ;;  %v226_v41 = vld [vmem:[%s11294_s1 + $0x320] sm:$0xff]  ;;  %v7257_v48 = vcombine.high %v223_v42, %v227_v43  ;;  %v231_v51 = vld [vmem:[%s11294_s1 + $0x348] sm:$0xff]  ;;  %v7256_v55 = vcombine.low %v223_v42, %v227_v43 }
  0x73   :  { %v7255_v47 = vcombine.high %v222_v40, %v226_v41  ;;  %v230_v49 = vld [vmem:[%s11294_s1 + $0x340] sm:$0xff]  ;;  %v235_v52 = vld [vmem:[%s11294_s1 + $0x368] sm:$0xff]  ;;  %v7254_v54 = vcombine.low %v222_v40, %v226_v41 }
  0x74   :  { %v234_v50 = vld [vmem:[%s11294_s1 + $0x360] sm:$0xff]  ;;  %v7265_v57 = vcombine.high %v231_v51, %v235_v52  ;;  %v239_v61 = vld [vmem:[%s11294_s1 + $0x388] sm:$0xff]  ;;  %v7264_v1 = vcombine.low %v231_v51, %v235_v52 }
  0x75   :  { %1717 = vmatpush1.bf16.msra.mxu0 %v7206_v2  ;;  %1799 = vmatpush1.bf16.msra.mxu1 %v7208_v4  ;;  %v7263_v56 = vcombine.high %v230_v49, %v234_v50  ;;  %v238_v58 = vld [vmem:[%s11294_s1 + $0x380] sm:$0xff]  ;;  %v243_v62 = vld [vmem:[%s11294_s1 + $0x3a8] sm:$0xff]  ;;  %v7262_v0 = vcombine.low %v230_v49, %v234_v50 }
  0x76   :  { %1718 = vmatprep.subr.bf16.mxu0 %v7215_v5  ;;  %1800 = vmatprep.subr.bf16.mxu1 %v7217_v6  ;;  %v242_v60 = vld [vmem:[%s11294_s1 + $0x3a0] sm:$0xff]  ;;  %v7273_v3 = vcombine.high %v239_v61, %v243_v62  ;;  %v101_v6 = vcombine.high %v8346_v59, %v8346_v59  ;;  %v247_v7 = vld [vmem:[%s11294_s1 + $0x3c8] sm:$0xff]  ;;  %v7272_v11 = vcombine.low %v239_v61, %v243_v62 }
  0x77   :  { %v7271_v2 = vcombine.high %v238_v58, %v242_v60  ;;  %v246_v4 = vld [vmem:[%s11294_s1 + $0x3c0] sm:$0xff]  ;;  %v251_v8 = vld [vmem:[%s11294_s1 + $0x3e8] sm:$0xff]  ;;  %v7270_v10 = vcombine.low %v238_v58, %v242_v60 }
  0x78   :  { %v250_v5 = vld [vmem:[%s11294_s1 + $0x3e0] sm:$0xff]  ;;  %v255_v16 = vld [vmem:[%s11294_s1 + $0x408] sm:$0xff]  ;;  %v7280_v19 = vcombine.low %v247_v7, %v251_v8 }
  0x79   :  { %1719 = vmatpush1.bf16.msra.mxu0 %v7214_v12  ;;  %1801 = vmatpush1.bf16.msra.mxu1 %v7216_v13  ;;  %v7279_v12 = vcombine.high %v246_v4, %v250_v5  ;;  %v7281_v13 = vcombine.high %v247_v7, %v251_v8  ;;  %v254_v59 = vld [vmem:[%s11294_s1 + $0x400] sm:$0xff]  ;;  %v259_v17 = vld [vmem:[%s11294_s1 + $0x428] sm:$0xff]  ;;  %v7278_v18 = vcombine.low %v246_v4, %v250_v5 }
  0x7a   :  { %1720 = vmatprep.subr.bf16.mxu0 %v7223_v14  ;;  %1802 = vmatprep.subr.bf16.mxu1 %v7225_v15  ;;  %v258_v14 = vld [vmem:[%s11294_s1 + $0x420] sm:$0xff]  ;;  %v8475_v15 = vrot.slane %v101_v6, %v8338_v53  ;;  %v263_v25 = vld [vmem:[%s11294_s1 + $0x448] sm:$0xff] }
  0x7b   :  { %v262_v53 = vld [vmem:[%s11294_s1 + $0x440] sm:$0xff]  ;;  %v267_v26 = vld [vmem:[%s11294_s1 + $0x468] sm:$0xff]  ;;  %v7286_v27 = vcombine.low %v254_v59, %v258_v14 }
  0x7c   :  { %v274_v63 = vld [vmem:[%s11294_s1 + $0x4a0] sm:$0xff]  ;;  %v7297_v32 = vcombine.high %v263_v25, %v267_v26  ;;  %v275_v33 = vld [vmem:[%s11294_s1 + $0x4a8] sm:$0xff] }
  0x7d   :  { %1721 = vmatpush1.bf16.msra.mxu0 %v7222_v20  ;;  %1803 = vmatpush1.bf16.msra.mxu1 %v7224_v21  ;;  %v7287_v20 = vcombine.high %v254_v59, %v258_v14  ;;  %v7289_v21 = vcombine.high %v255_v16, %v259_v17  ;;  %v279_v40 = vld [vmem:[%s11294_s1 + $0x4c8] sm:$0xff] }
  0x7e   :  { %1722 = vmatprep.subr.bf16.mxu0 %v7231_v22  ;;  %1804 = vmatprep.subr.bf16.mxu1 %v7233_v23  ;;  %v266_v22 = vld [vmem:[%s11294_s1 + $0x460] sm:$0xff]  ;;  %v117_v23 = vcombine.high %v8475_v15, %v8475_v15  ;;  %v283_v42 = vld [vmem:[%s11294_s1 + $0x4e8] sm:$0xff] }
  0x7f   :  { %v7294_v35 = vcombine.low %v262_v53, %v266_v22  ;;  %v287_v49 = vld [vmem:[%s11294_s1 + $0x508] sm:$0xff]  ;;  %v7313_v50 = vcombine.high %v279_v40, %v283_v42 }
  0x80   :  { %v8513_v34 = vpack.c.bf16 %v117_v23, %v117_v23  ;;  %v291_v51 = vld [vmem:[%s11294_s1 + $0x528] sm:$0xff] }
  0x81   :  { %1723 = vmatpush1.bf16.msra.mxu0 %v7230_v28  ;;  %1805 = vmatpush1.bf16.msra.mxu1 %v7232_v29  ;;  %v7288_v28 = vcombine.low %v255_v16, %v259_v17  ;;  %v7295_v29 = vcombine.high %v262_v53, %v266_v22  ;;  %v295_v58 = vld [vmem:[%s11294_s1 + $0x548] sm:$0xff]  ;;  %v7321_v60 = vcombine.high %v287_v49, %v291_v51 }
  0x82   :  { %1724 = vmatprep.subr.bf16.mxu0 %v7239_v30  ;;  %1806 = vmatprep.subr.bf16.mxu1 %v7241_v31  ;;  %v270_v30 = vld [vmem:[%s11294_s1 + $0x480] sm:$0xff]  ;;  %v271_v31 = vld [vmem:[%s11294_s1 + $0x488] sm:$0xff] }
  0x83   :  { %v7305_v41 = vcombine.high %v271_v31, %v275_v33  ;;  %v7302_v43 = vcombine.low %v270_v30, %v274_v63  ;;  %v299_v61 = vld [vmem:[%s11294_s1 + $0x568] sm:$0xff] }
  0x84   :  { %v303_v4 = vld [vmem:[%s11294_s1 + $0x588] sm:$0xff]  ;;  %v7329_v5 = vcombine.high %v295_v58, %v299_v61  ;;  %v7328_v8 = vcombine.low %v295_v58, %v299_v61 }
  0x85   :  { %1725 = vmatpush1.bf16.msra.mxu0 %v7238_v36  ;;  %1807 = vmatpush1.bf16.msra.mxu1 %v7240_v37  ;;  %v7296_v36 = vcombine.low %v263_v25, %v267_v26  ;;  %v7303_v37 = vcombine.high %v270_v30, %v274_v63  ;;  %v307_v6 = vld [vmem:[%s11294_s1 + $0x5a8] sm:$0xff] }
  0x86   :  { %1726 = vmatprep.subr.bf16.mxu0 %v7247_v38  ;;  %1808 = vmatprep.subr.bf16.mxu1 %v7249_v39  ;;  %v278_v38 = vld [vmem:[%s11294_s1 + $0x4c0] sm:$0xff]  ;;  %v7337_v59 = vcombine.high %v303_v4, %v307_v6  ;;  %v315_v14 = vld [vmem:[%s11294_s1 + $0x5e8] sm:$0xff]  ;;  %v7336_v17 = vcombine.low %v303_v4, %v307_v6 }
  0x87   :  { %v282_v39 = vld [vmem:[%s11294_s1 + $0x4e0] sm:$0xff]  ;;  %v323_v22 = vld [vmem:[%s11294_s1 + $0x628] sm:$0xff] }
  0x88   :  { %v7310_v52 = vcombine.low %v278_v38, %v282_v39  ;;  %v331_v63 = vld [vmem:[%s11294_s1 + $0x668] sm:$0xff] }
  0x89   :  { %1727 = vmatpush1.bf16.msra.mxu0 %v7246_v45  ;;  %1809 = vmatpush1.bf16.msra.mxu1 %v7248_v46  ;;  %v7304_v45 = vcombine.low %v271_v31, %v275_v33  ;;  %v7311_v46 = vcombine.high %v278_v38, %v282_v39  ;;  %v339_v39 = vld [vmem:[%s11294_s1 + $0x6a8] sm:$0xff] }
  0x8a   :  { %1728 = vmatprep.subr.bf16.mxu0 %v7255_v47  ;;  %1810 = vmatprep.subr.bf16.mxu1 %v7257_v48  ;;  %v286_v47 = vld [vmem:[%s11294_s1 + $0x500] sm:$0xff] }
  0x8b   :  { %v290_v48 = vld [vmem:[%s11294_s1 + $0x520] sm:$0xff] }
  0x8c   :  { %v7318_v62 = vcombine.low %v286_v47, %v290_v48 }
  0x8d   :  { %1729 = vmatpush1.bf16.msra.mxu0 %v7254_v54  ;;  %1811 = vmatpush1.bf16.msra.mxu1 %v7256_v55  ;;  %v7312_v54 = vcombine.low %v279_v40, %v283_v42  ;;  %v7319_v55 = vcombine.high %v286_v47, %v290_v48  ;;  %v347_v48 = vld [vmem:[%s11294_s1 + $0x6e8] sm:$0xff] }
  0x8e   :  { %1730 = vmatprep.subr.bf16.mxu0 %v7263_v56  ;;  %1812 = vmatprep.subr.bf16.mxu1 %v7265_v57  ;;  %v294_v56 = vld [vmem:[%s11294_s1 + $0x540] sm:$0xff] }
  0x8f   :  { %v298_v57 = vld [vmem:[%s11294_s1 + $0x560] sm:$0xff] }
  0x90   :  { %v7326_v7 = vcombine.low %v294_v56, %v298_v57 }
  0x91   :  { %1731 = vmatpush1.bf16.msra.mxu0 %v7262_v0  ;;  %1813 = vmatpush1.bf16.msra.mxu1 %v7264_v1  ;;  %v7320_v0 = vcombine.low %v287_v49, %v291_v51  ;;  %v7327_v1 = vcombine.high %v294_v56, %v298_v57  ;;  %v355_v57 = vld [vmem:[%s11294_s1 + $0x728] sm:$0xff] }
  0x92   :  { %1732 = vmatprep.subr.bf16.mxu0 %v7271_v2  ;;  %1814 = vmatprep.subr.bf16.mxu1 %v7273_v3  ;;  %v302_v2 = vld [vmem:[%s11294_s1 + $0x580] sm:$0xff] }
  0x93   :  { %v306_v3 = vld [vmem:[%s11294_s1 + $0x5a0] sm:$0xff] }
  0x94   :  { %v7334_v16 = vcombine.low %v302_v2, %v306_v3 }
  0x95   :  { %1733 = vmatpush1.bf16.msra.mxu0 %v7270_v10  ;;  %1815 = vmatpush1.bf16.msra.mxu1 %v7272_v11  ;;  %v7335_v10 = vcombine.high %v302_v2, %v306_v3  ;;  %v310_v11 = vld [vmem:[%s11294_s1 + $0x5c0] sm:$0xff]  ;;  %v363_v3 = vld [vmem:[%s11294_s1 + $0x768] sm:$0xff] }
  0x96   :  { %1734 = vmatprep.subr.bf16.mxu0 %v7279_v12  ;;  %1816 = vmatprep.subr.bf16.mxu1 %v7281_v13  ;;  %v314_v12 = vld [vmem:[%s11294_s1 + $0x5e0] sm:$0xff]  ;;  %v311_v13 = vld [vmem:[%s11294_s1 + $0x5c8] sm:$0xff] }
  0x97   :  { %v7345_v53 = vcombine.high %v311_v13, %v315_v14  ;;  %v7342_v23 = vcombine.low %v310_v11, %v314_v12  ;;  %v7344_v25 = vcombine.low %v311_v13, %v315_v14 }
  0x99   :  { %1735 = vmatpush1.bf16.msra.mxu0 %v7278_v18  ;;  %1817 = vmatpush1.bf16.msra.mxu1 %v7280_v19  ;;  %v7343_v18 = vcombine.high %v310_v11, %v314_v12  ;;  %v318_v19 = vld [vmem:[%s11294_s1 + $0x600] sm:$0xff]  ;;  %v371_v12 = vld [vmem:[%s11294_s1 + $0x7a8] sm:$0xff] }
  0x9a   :  { %1745 = vmatprep.subr.bf16.mxu0 %v7287_v20  ;;  %1827 = vmatprep.subr.bf16.mxu1 %v7289_v21  ;;  %v322_v20 = vld [vmem:[%s11294_s1 + $0x620] sm:$0xff]  ;;  %v319_v21 = vld [vmem:[%s11294_s1 + $0x608] sm:$0xff] }
  0x9b   :  { %v7351_v26 = vcombine.high %v318_v19, %v322_v20  ;;  %v7353_v30 = vcombine.high %v319_v21, %v323_v22  ;;  %v7350_v31 = vcombine.low %v318_v19, %v322_v20  ;;  %v379_v20 = vld [vmem:[%s11294_s1 + $0x7e8] sm:$0xff] }
  0x9c   :  { %1737 = vmatmul.mubr.bf16.vlgmr.msra.gmra.mrb[0].mxu0 %v8493_v24  ;;  %1819 = vmatmul.mubr.bf16.vlgmr.msra.gmra.mrb[0].mxu1 %v8493_v24 }
  0x9d   :  { %1746 = vmatpush1.bf16.msra.mxu0 %v7286_v27  ;;  %1828 = vmatpush1.bf16.msra.mxu1 %v7288_v28  ;;  %v326_v27 = vld [vmem:[%s11294_s1 + $0x640] sm:$0xff] }
  0x9e   :  { %1747 = vmatprep.subr.bf16.mxu0 %v7295_v29  ;;  %1829 = vmatprep.subr.bf16.mxu1 %v7297_v32  ;;  %v330_v28 = vld [vmem:[%s11294_s1 + $0x660] sm:$0xff]  ;;  %v327_v29 = vld [vmem:[%s11294_s1 + $0x648] sm:$0xff]  ;;  %v7352_v32 = vcombine.low %v319_v21, %v323_v22 }
  0x9f   :  { %1777 = vmatprep.mubr.bf16.mxu0 %v8513_v34  ;;  %1859 = vmatprep.mubr.bf16.mxu1 %v8513_v34  ;;  %v7359_v33 = vcombine.high %v326_v27, %v330_v28  ;;  %v7361_v38 = vcombine.high %v327_v29, %v331_v63  ;;  %v7358_v40 = vcombine.low %v326_v27, %v330_v28  ;;  %v133_v28 = vld [vmem:[%s11294_s1 + $0x38] sm:$0xff] }
  0xa1   :  { %1748 = vmatpush1.bf16.msra.mxu0 %v7294_v35  ;;  %1830 = vmatpush1.bf16.msra.mxu1 %v7296_v36  ;;  %v334_v35 = vld [vmem:[%s11294_s1 + $0x680] sm:$0xff] }
  0xa2   :  { %1749 = vmatprep.subr.bf16.mxu0 %v7303_v37  ;;  %1831 = vmatprep.subr.bf16.mxu1 %v7305_v41  ;;  %v338_v36 = vld [vmem:[%s11294_s1 + $0x6a0] sm:$0xff]  ;;  %v335_v37 = vld [vmem:[%s11294_s1 + $0x688] sm:$0xff]  ;;  %v7360_v41 = vcombine.low %v327_v29, %v331_v63 }
  0xa3   :  { %v7367_v42 = vcombine.high %v334_v35, %v338_v36  ;;  %v7369_v47 = vcombine.high %v335_v37, %v339_v39  ;;  %v7366_v49 = vcombine.low %v334_v35, %v338_v36  ;;  %v141_v36 = vld [vmem:[%s11294_s1 + $0x78] sm:$0xff] }
  0xa5   :  { %1750 = vmatpush1.bf16.msra.mxu0 %v7302_v43  ;;  %1832 = vmatpush1.bf16.msra.mxu1 %v7304_v45  ;;  %v342_v43 = vld [vmem:[%s11294_s1 + $0x6c0] sm:$0xff] }
  0xa6   :  { %1751 = vmatprep.subr.bf16.mxu0 %v7311_v46  ;;  %1833 = vmatprep.subr.bf16.mxu1 %v7313_v50  ;;  %v346_v45 = vld [vmem:[%s11294_s1 + $0x6e0] sm:$0xff]  ;;  %v343_v46 = vld [vmem:[%s11294_s1 + $0x6c8] sm:$0xff]  ;;  %v7368_v50 = vcombine.low %v335_v37, %v339_v39  ;;  %v8701_v37 = vpack.c.bf16 %v8475_v15, %v8475_v15  ;;  %v144_v39 = vld [vmem:[%s11294_s1 + $0x90] sm:$0xff] }
  0xa7   :  { %v7375_v51 = vcombine.high %v342_v43, %v346_v45  ;;  %v7377_v56 = vcombine.high %v343_v46, %v347_v48  ;;  %v7374_v58 = vcombine.low %v342_v43, %v346_v45  ;;  %v145_v43 = vld [vmem:[%s11294_s1 + $0x98] sm:$0xff] }
  0xa8   :  { %v149_v15 = vld [vmem:[%s11294_s1 + $0xb8] sm:$0xff] }
  0xa9   :  { %1752 = vmatpush1.bf16.msra.mxu0 %v7310_v52  ;;  %1834 = vmatpush1.bf16.msra.mxu1 %v7312_v54  ;;  %v350_v52 = vld [vmem:[%s11294_s1 + $0x700] sm:$0xff] }
  0xaa   :  { %1753 = vmatprep.subr.bf16.mxu0 %v7319_v55  ;;  %1835 = vmatprep.subr.bf16.mxu1 %v7321_v60  ;;  %v354_v54 = vld [vmem:[%s11294_s1 + $0x720] sm:$0xff]  ;;  %v351_v55 = vld [vmem:[%s11294_s1 + $0x708] sm:$0xff]  ;;  %v7376_v60 = vcombine.low %v343_v46, %v347_v48  ;;  %v156_v48 = vld [vmem:[%s11294_s1 + $0xf0] sm:$0xff] }
  0xab   :  { %v7383_v61 = vcombine.high %v350_v52, %v354_v54  ;;  %v7385_v2 = vcombine.high %v351_v55, %v355_v57  ;;  %v7382_v4 = vcombine.low %v350_v52, %v354_v54  ;;  %v157_v52 = vld [vmem:[%s11294_s1 + $0xf8] sm:$0xff]  ;;  %v7181_v54 = vcombine.high %v145_v43, %v149_v15 }
  0xad   :  { %1754 = vmatpush1.bf16.msra.mxu0 %v7318_v62  ;;  %1836 = vmatpush1.bf16.msra.mxu1 %v7320_v0  ;;  %v358_v62 = vld [vmem:[%s11294_s1 + $0x740] sm:$0xff] }
  0xae   :  { %1755 = vmatprep.subr.bf16.mxu0 %v7327_v1  ;;  %1837 = vmatprep.subr.bf16.mxu1 %v7329_v5  ;;  %v362_v0 = vld [vmem:[%s11294_s1 + $0x760] sm:$0xff]  ;;  %v359_v1 = vld [vmem:[%s11294_s1 + $0x748] sm:$0xff]  ;;  %v7384_v5 = vcombine.low %v351_v55, %v355_v57  ;;  %v7180_v57 = vcombine.low %v145_v43, %v149_v15  ;;  %v208_v43 = vld [vmem:[%s11294_s1 + $0x290] sm:$0xff] }
  0xaf   :  { %v7391_v6 = vcombine.high %v358_v62, %v362_v0  ;;  %v7393_v11 = vcombine.high %v359_v1, %v363_v3  ;;  %v7390_v13 = vcombine.low %v358_v62, %v362_v0  ;;  %v165_v62 = vld [vmem:[%s11294_s1 + $0x138] sm:$0xff] }
  0xb1   :  { %1756 = vmatpush1.bf16.msra.mxu0 %v7326_v7  ;;  %1838 = vmatpush1.bf16.msra.mxu1 %v7328_v8  ;;  %v366_v7 = vld [vmem:[%s11294_s1 + $0x780] sm:$0xff] }
  0xb2   :  { %1757 = vmatprep.subr.bf16.mxu0 %v7335_v10  ;;  %1839 = vmatprep.subr.bf16.mxu1 %v7337_v59  ;;  %v370_v8 = vld [vmem:[%s11294_s1 + $0x7a0] sm:$0xff]  ;;  %v367_v10 = vld [vmem:[%s11294_s1 + $0x788] sm:$0xff]  ;;  %v7392_v59 = vcombine.low %v359_v1, %v363_v3  ;;  %v168_v1 = vld [vmem:[%s11294_s1 + $0x150] sm:$0xff] }
  0xb3   :  { %v7399_v14 = vcombine.high %v366_v7, %v370_v8  ;;  %v7401_v19 = vcombine.high %v367_v10, %v371_v12  ;;  %v7398_v21 = vcombine.low %v366_v7, %v370_v8 }
  0xb5   :  { %1758 = vmatpush1.bf16.msra.mxu0 %v7334_v16  ;;  %1840 = vmatpush1.bf16.msra.mxu1 %v7336_v17  ;;  %v374_v16 = vld [vmem:[%s11294_s1 + $0x7c0] sm:$0xff] }
  0xb6   :  { %1759 = vmatprep.subr.bf16.mxu0 %v7343_v18  ;;  %1841 = vmatprep.subr.bf16.mxu1 %v7345_v53  ;;  %v378_v17 = vld [vmem:[%s11294_s1 + $0x7e0] sm:$0xff]  ;;  %v375_v18 = vld [vmem:[%s11294_s1 + $0x7c8] sm:$0xff]  ;;  %v7400_v53 = vcombine.low %v367_v10, %v371_v12  ;;  %v176_v10 = vld [vmem:[%s11294_s1 + $0x190] sm:$0xff] }
  0xb7   :  { %v7407_v22 = vcombine.high %v374_v16, %v378_v17  ;;  %v7409_v27 = vcombine.high %v375_v18, %v379_v20  ;;  %v7406_v29 = vcombine.low %v374_v16, %v378_v17  ;;  %v181_v16 = vld [vmem:[%s11294_s1 + $0x1b8] sm:$0xff] }
  0xb9   :  { %1760 = vmatpush1.bf16.msra.mxu0 %v7342_v23  ;;  %1842 = vmatpush1.bf16.msra.mxu1 %v7344_v25  ;;  %v128_v23 = vld [vmem:[%s11294_s1 + $0x10] sm:$0xff] }
  0xba   :  { %1761 = vmatprep.subr.bf16.mxu0 %v7351_v26  ;;  %1843 = vmatprep.subr.bf16.mxu1 %v7353_v30  ;;  %v132_v25 = vld [vmem:[%s11294_s1 + $0x30] sm:$0xff]  ;;  %v129_v26 = vld [vmem:[%s11294_s1 + $0x18] sm:$0xff]  ;;  %v7408_v30 = vcombine.low %v375_v18, %v379_v20 }
  0xbb   :  { %v7163_v63 = vcombine.high %v128_v23, %v132_v25  ;;  %v7165_v35 = vcombine.high %v129_v26, %v133_v28  ;;  %v184_v18 = vld [vmem:[%s11294_s1 + $0x1d0] sm:$0xff] }
  0xbd   :  { %1762 = vmatpush1.bf16.msra.mxu0 %v7350_v31  ;;  %1844 = vmatpush1.bf16.msra.mxu1 %v7352_v32  ;;  %v136_v31 = vld [vmem:[%s11294_s1 + $0x50] sm:$0xff] }
  0xbe   :  { %1763 = vmatprep.subr.bf16.mxu0 %v7359_v33  ;;  %1845 = vmatprep.subr.bf16.mxu1 %v7361_v38  ;;  %v140_v32 = vld [vmem:[%s11294_s1 + $0x70] sm:$0xff]  ;;  %v137_v33 = vld [vmem:[%s11294_s1 + $0x58] sm:$0xff]  ;;  %v7162_v38 = vcombine.low %v128_v23, %v132_v25 }
  0xbf   :  { %v7173_v45 = vcombine.high %v137_v33, %v141_v36  ;;  %v7170_v46 = vcombine.low %v136_v31, %v140_v32 }
  0xc1   :  { %1764 = vmatpush1.bf16.msra.mxu0 %v7358_v40  ;;  %1846 = vmatpush1.bf16.msra.mxu1 %v7360_v41  ;;  %v148_v40 = vld [vmem:[%s11294_s1 + $0xb0] sm:$0xff]  ;;  %v7164_v41 = vcombine.low %v129_v26, %v133_v28 }
  0xc2   :  { %1765 = vmatprep.subr.bf16.mxu0 %v7367_v42  ;;  %1847 = vmatprep.subr.bf16.mxu1 %v7369_v47  ;;  %v7171_v42 = vcombine.high %v136_v31, %v140_v32  ;;  %v152_v47 = vld [vmem:[%s11294_s1 + $0xd0] sm:$0xff]  ;;  %v7178_v55 = vcombine.low %v144_v39, %v148_v40  ;;  %v197_v31 = vld [vmem:[%s11294_s1 + $0x238] sm:$0xff] }
  0xc3   :  { %v7186_v0 = vcombine.low %v152_v47, %v156_v48  ;;  %v192_v26 = vld [vmem:[%s11294_s1 + $0x210] sm:$0xff] }
  0xc5   :  { %1766 = vmatpush1.bf16.msra.mxu0 %v7366_v49  ;;  %1848 = vmatpush1.bf16.msra.mxu1 %v7368_v50  ;;  %v7172_v49 = vcombine.low %v137_v33, %v141_v36  ;;  %v7179_v50 = vcombine.high %v144_v39, %v148_v40  ;;  %v200_v33 = vld [vmem:[%s11294_s1 + $0x250] sm:$0xff]  ;;  %v201_v39 = vld [vmem:[%s11294_s1 + $0x258] sm:$0xff] }
  0xc6   :  { %1767 = vmatprep.subr.bf16.mxu0 %v7375_v51  ;;  %1849 = vmatprep.subr.bf16.mxu1 %v7377_v56  ;;  %v153_v51 = vld [vmem:[%s11294_s1 + $0xd8] sm:$0xff]  ;;  %v160_v56 = vld [vmem:[%s11294_s1 + $0x110] sm:$0xff] }
  0xc7   :  { %v7188_v3 = vcombine.low %v153_v51, %v157_v52  ;;  %v205_v40 = vld [vmem:[%s11294_s1 + $0x278] sm:$0xff] }
  0xc9   :  { %1768 = vmatpush1.bf16.msra.mxu0 %v7374_v58  ;;  %1850 = vmatpush1.bf16.msra.mxu1 %v7376_v60  ;;  %v7187_v58 = vcombine.high %v152_v47, %v156_v48  ;;  %v164_v60 = vld [vmem:[%s11294_s1 + $0x130] sm:$0xff]  ;;  %v209_v47 = vld [vmem:[%s11294_s1 + $0x298] sm:$0xff]  ;;  %v7237_v48 = vcombine.high %v201_v39, %v205_v40 }
  0xca   :  { %1769 = vmatprep.subr.bf16.mxu0 %v7383_v61  ;;  %1851 = vmatprep.subr.bf16.mxu1 %v7385_v2  ;;  %v161_v61 = vld [vmem:[%s11294_s1 + $0x118] sm:$0xff]  ;;  %v172_v2 = vld [vmem:[%s11294_s1 + $0x170] sm:$0xff]  ;;  %v7194_v8 = vcombine.low %v160_v56, %v164_v60 }
  0xcb   :  { %v7197_v7 = vcombine.high %v161_v61, %v165_v62  ;;  %v7203_v12 = vcombine.high %v168_v1, %v172_v2  ;;  %v7202_v17 = vcombine.low %v168_v1, %v172_v2  ;;  %v225_v1 = vld [vmem:[%s11294_s1 + $0x318] sm:$0xff] }
  0xcd   :  { %1770 = vmatpush1.bf16.msra.mxu0 %v7382_v4  ;;  %1852 = vmatpush1.bf16.msra.mxu1 %v7384_v5  ;;  %v7195_v4 = vcombine.high %v160_v56, %v164_v60  ;;  %v169_v5 = vld [vmem:[%s11294_s1 + $0x158] sm:$0xff] }
  0xce   :  { %1771 = vmatprep.subr.bf16.mxu0 %v7391_v6  ;;  %1853 = vmatprep.subr.bf16.mxu1 %v7393_v11  ;;  %v173_v6 = vld [vmem:[%s11294_s1 + $0x178] sm:$0xff]  ;;  %v7196_v11 = vcombine.low %v161_v61, %v165_v62  ;;  %v224_v61 = vld [vmem:[%s11294_s1 + $0x310] sm:$0xff] }
  0xcf   :  { %v7204_v20 = vcombine.low %v169_v5, %v173_v6  ;;  %v217_v56 = vld [vmem:[%s11294_s1 + $0x2d8] sm:$0xff] }
  0xd1   :  { %1772 = vmatpush1.bf16.msra.mxu0 %v7390_v13  ;;  %1854 = vmatpush1.bf16.msra.mxu1 %v7392_v59  ;;  %v180_v13 = vld [vmem:[%s11294_s1 + $0x1b0] sm:$0xff]  ;;  %v177_v59 = vld [vmem:[%s11294_s1 + $0x198] sm:$0xff] }
  0xd2   :  { %1773 = vmatprep.subr.bf16.mxu0 %v7399_v14  ;;  %1855 = vmatprep.subr.bf16.mxu1 %v7401_v19  ;;  %v7205_v14 = vcombine.high %v169_v5, %v173_v6  ;;  %v188_v19 = vld [vmem:[%s11294_s1 + $0x1f0] sm:$0xff]  ;;  %v7213_v23 = vcombine.high %v177_v59, %v181_v16  ;;  %v7210_v25 = vcombine.low %v176_v10, %v180_v13 }
  0xd3   :  { %v7219_v28 = vcombine.high %v184_v18, %v188_v19  ;;  %v7218_v32 = vcombine.low %v184_v18, %v188_v19  ;;  %v232_v5 = vld [vmem:[%s11294_s1 + $0x350] sm:$0xff]  ;;  %v241_v18 = vld [vmem:[%s11294_s1 + $0x398] sm:$0xff] }
  0xd4   :  { %v236_v6 = vld [vmem:[%s11294_s1 + $0x370] sm:$0xff] }
  0xd5   :  { %1774 = vmatpush1.bf16.msra.mxu0 %v7398_v21  ;;  %1856 = vmatpush1.bf16.msra.mxu1 %v7400_v53  ;;  %v7211_v21 = vcombine.high %v176_v10, %v180_v13  ;;  %v185_v53 = vld [vmem:[%s11294_s1 + $0x1d8] sm:$0xff] }
  0xd6   :  { %1775 = vmatprep.subr.bf16.mxu0 %v7407_v22  ;;  %1857 = vmatprep.subr.bf16.mxu1 %v7409_v27  ;;  %v189_v22 = vld [vmem:[%s11294_s1 + $0x1f8] sm:$0xff]  ;;  %v7212_v27 = vcombine.low %v177_v59, %v181_v16  ;;  %v240_v59 = vld [vmem:[%s11294_s1 + $0x390] sm:$0xff]  ;;  %v7267_v16 = vcombine.high %v232_v5, %v236_v6 }
  0xd7   :  { %v7220_v36 = vcombine.low %v185_v53, %v189_v22  ;;  %v233_v10 = vld [vmem:[%s11294_s1 + $0x358] sm:$0xff] }
  0xd9   :  { %1776 = vmatpush1.bf16.msra.mxu0 %v7406_v29  ;;  %1858 = vmatpush1.bf16.msra.mxu1 %v7408_v30  ;;  %v196_v29 = vld [vmem:[%s11294_s1 + $0x230] sm:$0xff]  ;;  %v193_v30 = vld [vmem:[%s11294_s1 + $0x218] sm:$0xff] }
  0xda   :  { %1868 = vmatprep.subr.bf16.mxu0 %v7163_v63  ;;  %1950 = vmatprep.subr.bf16.mxu1 %v7165_v35  ;;  %v7221_v63 = vcombine.high %v185_v53, %v189_v22  ;;  %v204_v35 = vld [vmem:[%s11294_s1 + $0x270] sm:$0xff]  ;;  %v7228_v15 = vcombine.low %v193_v30, %v197_v31 }
  0xdc   :  { %1778 = vmatmul.mubr.bf16.vlgmr.msra.gmra.mrb[0].mxu0 %v8701_v37  ;;  %1860 = vmatmul.mubr.bf16.vlgmr.msra.gmra.mrb[0].mxu1 %v8701_v37 }
  0xdd   :  { %1869 = vmatpush1.bf16.msra.mxu0 %v7162_v38  ;;  %1951 = vmatpush1.bf16.msra.mxu1 %v7164_v41  ;;  %v7227_v38 = vcombine.high %v192_v26, %v196_v29  ;;  %v7229_v41 = vcombine.high %v193_v30, %v197_v31 }
  0xde   :  { %1870 = vmatprep.subr.bf16.mxu0 %v7171_v42  ;;  %1952 = vmatprep.subr.bf16.mxu1 %v7173_v45  ;;  %v7226_v42 = vcombine.low %v192_v26, %v196_v29  ;;  %v7235_v45 = vcombine.high %v200_v33, %v204_v35  ;;  %v252_v26 = vld [vmem:[%s11294_s1 + $0x3f0] sm:$0xff] }
  0xdf   :  { %1900 = vmatprep.mubr.bf16.mxu0 %v8372_v9  ;;  %1982 = vmatprep.mubr.bf16.mxu1 %v8372_v9  ;;  %v7189_v9 = vcombine.high %v153_v51, %v157_v52  ;;  %v216_v51 = vld [vmem:[%s11294_s1 + $0x2d0] sm:$0xff] }
  0xe0   :  { %v220_v52 = vld [vmem:[%s11294_s1 + $0x2f0] sm:$0xff] }
  0xe1   :  { %1871 = vmatpush1.bf16.msra.mxu0 %v7170_v46  ;;  %1953 = vmatpush1.bf16.msra.mxu1 %v7172_v49  ;;  %v212_v46 = vld [vmem:[%s11294_s1 + $0x2b0] sm:$0xff]  ;;  %v213_v49 = vld [vmem:[%s11294_s1 + $0x2b8] sm:$0xff]  ;;  %v7251_v62 = vcombine.high %v216_v51, %v220_v52 }
  0xe2   :  { %1872 = vmatprep.subr.bf16.mxu0 %v7179_v50  ;;  %1954 = vmatprep.subr.bf16.mxu1 %v7181_v54  ;;  %v7234_v50 = vcombine.low %v200_v33, %v204_v35  ;;  %v7236_v54 = vcombine.low %v201_v39, %v205_v40  ;;  %v7242_v60 = vcombine.low %v208_v43, %v212_v46  ;;  %v260_v33 = vld [vmem:[%s11294_s1 + $0x430] sm:$0xff]  ;;  %v257_v35 = vld [vmem:[%s11294_s1 + $0x418] sm:$0xff] }
  0xe5   :  { %1873 = vmatpush1.bf16.msra.mxu0 %v7178_v55  ;;  %1955 = vmatpush1.bf16.msra.mxu1 %v7180_v57  ;;  %v7243_v55 = vcombine.high %v208_v43, %v212_v46  ;;  %v221_v57 = vld [vmem:[%s11294_s1 + $0x2f8] sm:$0xff]  ;;  %v268_v43 = vld [vmem:[%s11294_s1 + $0x470] sm:$0xff] }
  0xe6   :  { %1874 = vmatprep.subr.bf16.mxu0 %v7187_v58  ;;  %1956 = vmatprep.subr.bf16.mxu1 %v7189_v9  ;;  %v7245_v58 = vcombine.high %v209_v47, %v213_v49  ;;  %v7244_v9 = vcombine.low %v209_v47, %v213_v49  ;;  %v7253_v2 = vcombine.high %v217_v56, %v221_v57 }
  0xe9   :  { %1875 = vmatpush1.bf16.msra.mxu0 %v7186_v0  ;;  %1957 = vmatpush1.bf16.msra.mxu1 %v7188_v3  ;;  %v228_v0 = vld [vmem:[%s11294_s1 + $0x330] sm:$0xff]  ;;  %v229_v3 = vld [vmem:[%s11294_s1 + $0x338] sm:$0xff] }
  0xea   :  { %1876 = vmatprep.subr.bf16.mxu0 %v7195_v4  ;;  %1958 = vmatprep.subr.bf16.mxu1 %v7197_v7  ;;  %v7250_v4 = vcombine.low %v216_v51, %v220_v52  ;;  %v7252_v7 = vcombine.low %v217_v56, %v221_v57  ;;  %v7258_v13 = vcombine.low %v224_v61, %v228_v0  ;;  %v276_v51 = vld [vmem:[%s11294_s1 + $0x4b0] sm:$0xff]  ;;  %v273_v52 = vld [vmem:[%s11294_s1 + $0x498] sm:$0xff] }
  0xed   :  { %1877 = vmatpush1.bf16.msra.mxu0 %v7194_v8  ;;  %1959 = vmatpush1.bf16.msra.mxu1 %v7196_v11  ;;  %v7259_v8 = vcombine.high %v224_v61, %v228_v0  ;;  %v237_v11 = vld [vmem:[%s11294_s1 + $0x378] sm:$0xff]  ;;  %v284_v61 = vld [vmem:[%s11294_s1 + $0x4f0] sm:$0xff] }
  0xee   :  { %1878 = vmatprep.subr.bf16.mxu0 %v7203_v12  ;;  %1960 = vmatprep.subr.bf16.mxu1 %v7205_v14  ;;  %v7261_v12 = vcombine.high %v225_v1, %v229_v3  ;;  %v7260_v14 = vcombine.low %v225_v1, %v229_v3  ;;  %v7269_v19 = vcombine.high %v233_v10, %v237_v11  ;;  %v288_v3 = vld [vmem:[%s11294_s1 + $0x510] sm:$0xff] }
  0xef   :  { %v7268_v53 = vcombine.low %v233_v10, %v237_v11  ;;  %v296_v11 = vld [vmem:[%s11294_s1 + $0x550] sm:$0xff] }
  0xf1   :  { %1879 = vmatpush1.bf16.msra.mxu0 %v7202_v17  ;;  %1961 = vmatpush1.bf16.msra.mxu1 %v7204_v20  ;;  %v244_v17 = vld [vmem:[%s11294_s1 + $0x3b0] sm:$0xff]  ;;  %v245_v20 = vld [vmem:[%s11294_s1 + $0x3b8] sm:$0xff] }
  0xf2   :  { %1880 = vmatprep.subr.bf16.mxu0 %v7211_v21  ;;  %1962 = vmatprep.subr.bf16.mxu1 %v7213_v23  ;;  %v7266_v21 = vcombine.low %v232_v5, %v236_v6  ;;  %v7275_v22 = vcombine.high %v240_v59, %v244_v17  ;;  %v7277_v23 = vcombine.high %v241_v18, %v245_v20  ;;  %v293_v5 = vld [vmem:[%s11294_s1 + $0x538] sm:$0xff] }
  0xf3   :  { %v7274_v29 = vcombine.low %v240_v59, %v244_v17  ;;  %v7276_v30 = vcombine.low %v241_v18, %v245_v20  ;;  %v301_v59 = vld [vmem:[%s11294_s1 + $0x578] sm:$0xff]  ;;  %v308_v20 = vld [vmem:[%s11294_s1 + $0x5b0] sm:$0xff] }
  0xf5   :  { %1881 = vmatpush1.bf16.msra.mxu0 %v7210_v25  ;;  %1963 = vmatpush1.bf16.msra.mxu1 %v7212_v27  ;;  %v248_v25 = vld [vmem:[%s11294_s1 + $0x3d0] sm:$0xff]  ;;  %v249_v27 = vld [vmem:[%s11294_s1 + $0x3d8] sm:$0xff] }
  0xf6   :  { %1882 = vmatprep.subr.bf16.mxu0 %v7219_v28  ;;  %1964 = vmatprep.subr.bf16.mxu1 %v7221_v63  ;;  %v253_v28 = vld [vmem:[%s11294_s1 + $0x3f8] sm:$0xff]  ;;  %v7283_v63 = vcombine.high %v248_v25, %v252_v26 }
  0xf7   :  { %v7285_v31 = vcombine.high %v249_v27, %v253_v28  ;;  %v7284_v39 = vcombine.low %v249_v27, %v253_v28  ;;  %v312_v27 = vld [vmem:[%s11294_s1 + $0x5d0] sm:$0xff] }
  0xf8   :  { %v316_v28 = vld [vmem:[%s11294_s1 + $0x5f0] sm:$0xff] }
  0xf9   :  { %1883 = vmatpush1.bf16.msra.mxu0 %v7218_v32  ;;  %1965 = vmatpush1.bf16.msra.mxu1 %v7220_v36  ;;  %v256_v32 = vld [vmem:[%s11294_s1 + $0x410] sm:$0xff]  ;;  %v261_v36 = vld [vmem:[%s11294_s1 + $0x438] sm:$0xff] }
  0xfa   :  { %1884 = vmatprep.subr.bf16.mxu0 %v7227_v38  ;;  %1966 = vmatprep.subr.bf16.mxu1 %v7229_v41  ;;  %v7282_v38 = vcombine.low %v248_v25, %v252_v26  ;;  %v7291_v40 = vcombine.high %v256_v32, %v260_v33  ;;  %v7293_v41 = vcombine.high %v257_v35, %v261_v36 }
  0xfb   :  { %v7290_v46 = vcombine.low %v256_v32, %v260_v33  ;;  %v7292_v47 = vcombine.low %v257_v35, %v261_v36  ;;  %v7347_v32 = vcombine.high %v312_v27, %v316_v28  ;;  %v320_v35 = vld [vmem:[%s11294_s1 + $0x610] sm:$0xff] }
  0xfc   :  { %v324_v36 = vld [vmem:[%s11294_s1 + $0x630] sm:$0xff] }
  0xfd   :  { %1885 = vmatpush1.bf16.msra.mxu0 %v7226_v42  ;;  %1967 = vmatpush1.bf16.msra.mxu1 %v7228_v15  ;;  %v264_v42 = vld [vmem:[%s11294_s1 + $0x450] sm:$0xff]  ;;  %v265_v15 = vld [vmem:[%s11294_s1 + $0x458] sm:$0xff] }
  0xfe   :  { %1886 = vmatprep.subr.bf16.mxu0 %v7235_v45  ;;  %1968 = vmatprep.subr.bf16.mxu1 %v7237_v48  ;;  %v269_v45 = vld [vmem:[%s11294_s1 + $0x478] sm:$0xff]  ;;  %v7299_v48 = vcombine.high %v264_v42, %v268_v43 }
  0xff   :  { %v7301_v49 = vcombine.high %v265_v15, %v269_v45  ;;  %v7300_v56 = vcombine.low %v265_v15, %v269_v45  ;;  %v328_v15 = vld [vmem:[%s11294_s1 + $0x650] sm:$0xff] }
 0x100   :  { %v332_v45 = vld [vmem:[%s11294_s1 + $0x670] sm:$0xff] }
 0x101   :  { %1887 = vmatpush1.bf16.msra.mxu0 %v7234_v50  ;;  %1969 = vmatpush1.bf16.msra.mxu1 %v7236_v54  ;;  %v272_v50 = vld [vmem:[%s11294_s1 + $0x490] sm:$0xff]  ;;  %v277_v54 = vld [vmem:[%s11294_s1 + $0x4b8] sm:$0xff] }
 0x102   :  { %1888 = vmatprep.subr.bf16.mxu0 %v7243_v55  ;;  %1970 = vmatprep.subr.bf16.mxu1 %v7245_v58  ;;  %v7298_v55 = vcombine.low %v264_v42, %v268_v43  ;;  %v7307_v57 = vcombine.high %v272_v50, %v276_v51  ;;  %v7309_v58 = vcombine.high %v273_v52, %v277_v54 }
 0x103   :  { %v7308_v0 = vcombine.low %v273_v52, %v277_v54  ;;  %v7355_v42 = vcombine.high %v320_v35, %v324_v36  ;;  %v336_v52 = vld [vmem:[%s11294_s1 + $0x690] sm:$0xff] }
 0x104   :  { %v340_v54 = vld [vmem:[%s11294_s1 + $0x6b0] sm:$0xff] }
 0x105   :  { %1889 = vmatpush1.bf16.msra.mxu0 %v7242_v60  ;;  %1971 = vmatpush1.bf16.msra.mxu1 %v7244_v9  ;;  %v280_v60 = vld [vmem:[%s11294_s1 + $0x4d0] sm:$0xff]  ;;  %v285_v9 = vld [vmem:[%s11294_s1 + $0x4f8] sm:$0xff] }
 0x106   :  { %1890 = vmatprep.subr.bf16.mxu0 %v7251_v62  ;;  %1972 = vmatprep.subr.bf16.mxu1 %v7253_v2  ;;  %v7306_v62 = vcombine.low %v272_v50, %v276_v51  ;;  %v7315_v1 = vcombine.high %v280_v60, %v284_v61  ;;  %v7314_v6 = vcombine.low %v280_v60, %v284_v61 }
 0x107   :  { %v7363_v50 = vcombine.high %v328_v15, %v332_v45  ;;  %v7371_v60 = vcombine.high %v336_v52, %v340_v54 }
 0x109   :  { %1891 = vmatpush1.bf16.msra.mxu0 %v7250_v4  ;;  %1973 = vmatpush1.bf16.msra.mxu1 %v7252_v7  ;;  %v292_v4 = vld [vmem:[%s11294_s1 + $0x530] sm:$0xff] }
 0x10a   :  { %1892 = vmatprep.subr.bf16.mxu0 %v7259_v8  ;;  %1974 = vmatprep.subr.bf16.mxu1 %v7261_v12  ;;  %v7323_v8 = vcombine.high %v288_v3, %v292_v4  ;;  %v300_v12 = vld [vmem:[%s11294_s1 + $0x570] sm:$0xff] }
 0x10b   :  { %v7331_v17 = vcombine.high %v296_v11, %v300_v12 }
 0x10d   :  { %1893 = vmatpush1.bf16.msra.mxu0 %v7258_v13  ;;  %1975 = vmatpush1.bf16.msra.mxu1 %v7260_v14  ;;  %v297_v13 = vld [vmem:[%s11294_s1 + $0x558] sm:$0xff]  ;;  %v7322_v14 = vcombine.low %v288_v3, %v292_v4 }
 0x10e   :  { %1894 = vmatprep.subr.bf16.mxu0 %v7267_v16  ;;  %1976 = vmatprep.subr.bf16.mxu1 %v7269_v19  ;;  %v7333_v18 = vcombine.high %v297_v13, %v301_v59  ;;  %v304_v19 = vld [vmem:[%s11294_s1 + $0x590] sm:$0xff] }
 0x10f   :  { %v7339_v25 = vcombine.high %v304_v19, %v308_v20 }
 0x111   :  { %1895 = vmatpush1.bf16.msra.mxu0 %v7266_v21  ;;  %1977 = vmatpush1.bf16.msra.mxu1 %v7268_v53  ;;  %v305_v21 = vld [vmem:[%s11294_s1 + $0x598] sm:$0xff] }
 0x112   :  { %1896 = vmatprep.subr.bf16.mxu0 %v7275_v22  ;;  %1978 = vmatprep.subr.bf16.mxu1 %v7277_v23  ;;  %v309_v53 = vld [vmem:[%s11294_s1 + $0x5b8] sm:$0xff]  ;;  %v7330_v22 = vcombine.low %v296_v11, %v300_v12  ;;  %v7332_v23 = vcombine.low %v297_v13, %v301_v59  ;;  %v360_v13 = vld [vmem:[%s11294_s1 + $0x750] sm:$0xff] }
 0x113   :  { %v7341_v26 = vcombine.high %v305_v21, %v309_v53  ;;  %v364_v59 = vld [vmem:[%s11294_s1 + $0x770] sm:$0xff] }
 0x115   :  { %1897 = vmatpush1.bf16.msra.mxu0 %v7274_v29  ;;  %1979 = vmatpush1.bf16.msra.mxu1 %v7276_v30  ;;  %v313_v29 = vld [vmem:[%s11294_s1 + $0x5d8] sm:$0xff] }
 0x116   :  { %1898 = vmatprep.subr.bf16.mxu0 %v7283_v63  ;;  %1980 = vmatprep.subr.bf16.mxu1 %v7285_v31  ;;  %v317_v30 = vld [vmem:[%s11294_s1 + $0x5f8] sm:$0xff]  ;;  %v7338_v63 = vcombine.low %v304_v19, %v308_v20  ;;  %v7340_v31 = vcombine.low %v305_v21, %v309_v53  ;;  %v7395_v19 = vcombine.high %v360_v13, %v364_v59  ;;  %v368_v21 = vld [vmem:[%s11294_s1 + $0x790] sm:$0xff] }
 0x117   :  { %v7349_v33 = vcombine.high %v313_v29, %v317_v30  ;;  %v372_v53 = vld [vmem:[%s11294_s1 + $0x7b0] sm:$0xff] }
 0x119   :  { %1899 = vmatpush1.bf16.msra.mxu0 %v7282_v38  ;;  %1981 = vmatpush1.bf16.msra.mxu1 %v7284_v39  ;;  %v321_v38 = vld [vmem:[%s11294_s1 + $0x618] sm:$0xff] }
 0x11a   :  { %1909 = vmatprep.subr.bf16.mxu0 %v7291_v40  ;;  %1991 = vmatprep.subr.bf16.mxu1 %v7293_v41  ;;  %v325_v39 = vld [vmem:[%s11294_s1 + $0x638] sm:$0xff]  ;;  %v7346_v40 = vcombine.low %v312_v27, %v316_v28  ;;  %v7348_v41 = vcombine.low %v313_v29, %v317_v30  ;;  %v7403_v27 = vcombine.high %v368_v21, %v372_v53  ;;  %v376_v29 = vld [vmem:[%s11294_s1 + $0x7d0] sm:$0xff] }
 0x11b   :  { %v7357_v43 = vcombine.high %v321_v38, %v325_v39  ;;  %v380_v30 = vld [vmem:[%s11294_s1 + $0x7f0] sm:$0xff] }
 0x11c   :  { %1901 = vmatmul.mubr.bf16.vlgmr.msra.gmra.mrb[4].mxu0 %v8493_v24  ;;  %1983 = vmatmul.mubr.bf16.vlgmr.msra.gmra.mrb[4].mxu1 %v8493_v24  ;;  %v281_v24 = vld [vmem:[%s11294_s1 + $0x4d8] sm:$0xff] }
 0x11d   :  { %1910 = vmatpush1.bf16.msra.mxu0 %v7290_v46  ;;  %1992 = vmatpush1.bf16.msra.mxu1 %v7292_v47  ;;  %v7317_v2 = vcombine.high %v281_v24, %v285_v9  ;;  %v7316_v7 = vcombine.low %v281_v24, %v285_v9  ;;  %v329_v46 = vld [vmem:[%s11294_s1 + $0x658] sm:$0xff]  ;;  %v344_v24 = vld [vmem:[%s11294_s1 + $0x6d0] sm:$0xff] }
 0x11e   :  { %1911 = vmatprep.subr.bf16.mxu0 %v7299_v48  ;;  %1993 = vmatprep.subr.bf16.mxu1 %v7301_v49  ;;  %v333_v47 = vld [vmem:[%s11294_s1 + $0x678] sm:$0xff]  ;;  %v7354_v48 = vcombine.low %v320_v35, %v324_v36  ;;  %v7356_v49 = vcombine.low %v321_v38, %v325_v39  ;;  %v348_v9 = vld [vmem:[%s11294_s1 + $0x6f0] sm:$0xff]  ;;  %v7411_v35 = vcombine.high %v376_v29, %v380_v30  ;;  %v2041_v38 = vld [vmem:[%s11296_s3 + $0x8] sm:$0xff] }
 0x11f   :  { %1941 = vmatprep.mubr.bf16.mxu0 %v8513_v34  ;;  %2023 = vmatprep.mubr.bf16.mxu1 %v8513_v34  ;;  %v289_v34 = vld [vmem:[%s11294_s1 + $0x518] sm:$0xff]  ;;  %v7365_v51 = vcombine.high %v329_v46, %v333_v47  ;;  %v7379_v3 = vcombine.high %v344_v24, %v348_v9 }
 0x120   :  { %v7325_v10 = vcombine.high %v289_v34, %v293_v5  ;;  %v7324_v16 = vcombine.low %v289_v34, %v293_v5  ;;  %v352_v34 = vld [vmem:[%s11294_s1 + $0x710] sm:$0xff]  ;;  %v2043_v39 = vld [vmem:[%s11296_s3 + $0x18] sm:$0xff] }
 0x121   :  { %1912 = vmatpush1.bf16.msra.mxu0 %v7298_v55  ;;  %1994 = vmatpush1.bf16.msra.mxu1 %v7300_v56  ;;  %v337_v55 = vld [vmem:[%s11294_s1 + $0x698] sm:$0xff]  ;;  %v356_v5 = vld [vmem:[%s11294_s1 + $0x730] sm:$0xff] }
 0x122   :  { %1913 = vmatprep.subr.bf16.mxu0 %v7307_v57  ;;  %1995 = vmatprep.subr.bf16.mxu1 %v7309_v58  ;;  %v341_v56 = vld [vmem:[%s11294_s1 + $0x6b8] sm:$0xff]  ;;  %v7362_v57 = vcombine.low %v328_v15, %v332_v45  ;;  %v7364_v58 = vcombine.low %v329_v46, %v333_v47  ;;  %v7387_v11 = vcombine.high %v352_v34, %v356_v5  ;;  %v2555_v15 = vunpack.c.l.s8.bf16 %v2043_v39  ;;  %v2042_v45 = vld [vmem:[%s11296_s3 + $0x10] sm:$0xff] }
 0x123   :  { %v7373_v61 = vcombine.high %v337_v55, %v341_v56  ;;  %v2554_v47 = vunpack.c.l.s8.bf16 %v2042_v45 }
 0x125   :  { %1914 = vmatpush1.bf16.msra.mxu0 %v7306_v62  ;;  %1996 = vmatpush1.bf16.msra.mxu1 %v7308_v0  ;;  %v345_v62 = vld [vmem:[%s11294_s1 + $0x6d8] sm:$0xff] }
 0x126   :  { %1915 = vmatprep.subr.bf16.mxu0 %v7315_v1  ;;  %1997 = vmatprep.subr.bf16.mxu1 %v7317_v2  ;;  %v349_v0 = vld [vmem:[%s11294_s1 + $0x6f8] sm:$0xff]  ;;  %v7370_v1 = vcombine.low %v336_v52, %v340_v54  ;;  %v7372_v2 = vcombine.low %v337_v55, %v341_v56  ;;  %v2570_v54 = vunpack.c.h.s8.bf16 %v2042_v45  ;;  %v2056_v56 = vld [vmem:[%s11296_s3 + $0x80] sm:$0xff] }
 0x127   :  { %v7381_v4 = vcombine.high %v345_v62, %v349_v0 }
 0x129   :  { %1916 = vmatpush1.bf16.msra.mxu0 %v7314_v6  ;;  %1998 = vmatpush1.bf16.msra.mxu1 %v7316_v7  ;;  %v353_v6 = vld [vmem:[%s11294_s1 + $0x718] sm:$0xff] }
 0x12a   :  { %1917 = vmatprep.subr.bf16.mxu0 %v7323_v8  ;;  %1999 = vmatprep.subr.bf16.mxu1 %v7325_v10  ;;  %v357_v7 = vld [vmem:[%s11294_s1 + $0x738] sm:$0xff]  ;;  %v7378_v8 = vcombine.low %v344_v24, %v348_v9  ;;  %v7380_v10 = vcombine.low %v345_v62, %v349_v0  ;;  %v2073_v9 = vld [vmem:[%s11296_s3 + $0x108] sm:$0xff]  ;;  %v2600_v0 = vunpack.c.h.s8.bf16 %v2056_v56 }
 0x12b   :  { %v7389_v12 = vcombine.high %v353_v6, %v357_v7  ;;  %v2075_v62 = vld [vmem:[%s11296_s3 + $0x118] sm:$0xff] }
 0x12d   :  { %1918 = vmatpush1.bf16.msra.mxu0 %v7322_v14  ;;  %2000 = vmatpush1.bf16.msra.mxu1 %v7324_v16  ;;  %v361_v14 = vld [vmem:[%s11294_s1 + $0x758] sm:$0xff] }
 0x12e   :  { %1919 = vmatprep.subr.bf16.mxu0 %v7331_v17  ;;  %2001 = vmatprep.subr.bf16.mxu1 %v7333_v18  ;;  %v365_v16 = vld [vmem:[%s11294_s1 + $0x778] sm:$0xff]  ;;  %v7386_v17 = vcombine.low %v352_v34, %v356_v5  ;;  %v7388_v18 = vcombine.low %v353_v6, %v357_v7  ;;  %v2074_v34 = vld [vmem:[%s11296_s3 + $0x110] sm:$0xff]  ;;  %v2633_v7 = vunpack.c.h.s8.bf16 %v2073_v9 }
 0x12f   :  { %v7397_v20 = vcombine.high %v361_v14, %v365_v16  ;;  %v2618_v6 = vunpack.c.l.s8.bf16 %v2074_v34 }
 0x131   :  { %1920 = vmatpush1.bf16.msra.mxu0 %v7330_v22  ;;  %2002 = vmatpush1.bf16.msra.mxu1 %v7332_v23  ;;  %v369_v22 = vld [vmem:[%s11294_s1 + $0x798] sm:$0xff] }
 0x132   :  { %1921 = vmatprep.subr.bf16.mxu0 %v7339_v25  ;;  %2003 = vmatprep.subr.bf16.mxu1 %v7341_v26  ;;  %v373_v23 = vld [vmem:[%s11294_s1 + $0x7b8] sm:$0xff]  ;;  %v7394_v25 = vcombine.low %v360_v13, %v364_v59  ;;  %v7396_v26 = vcombine.low %v361_v14, %v365_v16  ;;  %v2634_v13 = vunpack.c.h.s8.bf16 %v2074_v34  ;;  %v2088_v14 = vld [vmem:[%s11296_s3 + $0x180] sm:$0xff] }
 0x133   :  { %v7405_v28 = vcombine.high %v369_v22, %v373_v23 }
 0x135   :  { %1922 = vmatpush1.bf16.msra.mxu0 %v7338_v63  ;;  %2004 = vmatpush1.bf16.msra.mxu1 %v7340_v31  ;;  %v377_v63 = vld [vmem:[%s11294_s1 + $0x7d8] sm:$0xff] }
 0x136   :  { %1923 = vmatprep.subr.bf16.mxu0 %v7347_v32  ;;  %2005 = vmatprep.subr.bf16.mxu1 %v7349_v33  ;;  %v381_v31 = vld [vmem:[%s11294_s1 + $0x7f8] sm:$0xff]  ;;  %v7402_v32 = vcombine.low %v368_v21, %v372_v53  ;;  %v7404_v33 = vcombine.low %v369_v22, %v373_v23  ;;  %v2105_v53 = vld [vmem:[%s11296_s3 + $0x208] sm:$0xff]  ;;  %v2664_v23 = vunpack.c.h.s8.bf16 %v2088_v14 }
 0x137   :  { %v7413_v36 = vcombine.high %v377_v63, %v381_v31  ;;  %v2107_v22 = vld [vmem:[%s11296_s3 + $0x218] sm:$0xff] }
 0x139   :  { %1924 = vmatpush1.bf16.msra.mxu0 %v7346_v40  ;;  %2006 = vmatpush1.bf16.msra.mxu1 %v7348_v41  ;;  %v7410_v40 = vcombine.low %v376_v29, %v380_v30  ;;  %v7412_v41 = vcombine.low %v377_v63, %v381_v31  ;;  %v2106_v29 = vld [vmem:[%s11296_s3 + $0x210] sm:$0xff]  ;;  %v2697_v31 = vunpack.c.h.s8.bf16 %v2105_v53 }
 0x13a   :  { %1925 = vmatprep.subr.bf16.mxu0 %v7355_v42  ;;  %2007 = vmatprep.subr.bf16.mxu1 %v7357_v43  ;;  %v2553_v42 = vunpack.c.l.s8.bf16 %v2041_v38  ;;  %v2040_v43 = vld [vmem:[%s11296_s3] sm:$0xff]  ;;  %v2682_v63 = vunpack.c.l.s8.bf16 %v2106_v29 }
 0x13b   :  { %v2552_v46 = vunpack.c.l.s8.bf16 %v2040_v43  ;;  %v2568_v52 = vunpack.c.h.s8.bf16 %v2040_v43 }
 0x13d   :  { %1926 = vmatpush1.bf16.msra.mxu0 %v7354_v48  ;;  %2008 = vmatpush1.bf16.msra.mxu1 %v7356_v49  ;;  %v2569_v48 = vunpack.c.h.s8.bf16 %v2041_v38  ;;  %v2571_v49 = vunpack.c.h.s8.bf16 %v2043_v39  ;;  %v2698_v38 = vunpack.c.h.s8.bf16 %v2106_v29 }
 0x13e   :  { %1927 = vmatprep.subr.bf16.mxu0 %v7363_v50  ;;  %2009 = vmatprep.subr.bf16.mxu1 %v7365_v51  ;;  %v2057_v50 = vld [vmem:[%s11296_s3 + $0x88] sm:$0xff]  ;;  %v2059_v51 = vld [vmem:[%s11296_s3 + $0x98] sm:$0xff] }
 0x13f   :  { %v2585_v55 = vunpack.c.l.s8.bf16 %v2057_v50  ;;  %v2603_v24 = vunpack.c.h.s8.bf16 %v2059_v51 }
 0x141   :  { %1928 = vmatpush1.bf16.msra.mxu0 %v7362_v57  ;;  %2010 = vmatpush1.bf16.msra.mxu1 %v7364_v58  ;;  %v2587_v57 = vunpack.c.l.s8.bf16 %v2059_v51  ;;  %v2058_v58 = vld [vmem:[%s11296_s3 + $0x90] sm:$0xff] }
 0x142   :  { %1929 = vmatprep.subr.bf16.mxu0 %v7371_v60  ;;  %2011 = vmatprep.subr.bf16.mxu1 %v7373_v61  ;;  %v2584_v60 = vunpack.c.l.s8.bf16 %v2056_v56  ;;  %v2601_v61 = vunpack.c.h.s8.bf16 %v2057_v50 }
 0x145   :  { %1930 = vmatpush1.bf16.msra.mxu0 %v7370_v1  ;;  %2012 = vmatpush1.bf16.msra.mxu1 %v7372_v2  ;;  %v2602_v1 = vunpack.c.h.s8.bf16 %v2058_v58  ;;  %v2617_v2 = vunpack.c.l.s8.bf16 %v2073_v9 }
 0x146   :  { %1931 = vmatprep.subr.bf16.mxu0 %v7379_v3  ;;  %2013 = vmatprep.subr.bf16.mxu1 %v7381_v4  ;;  %v2072_v3 = vld [vmem:[%s11296_s3 + $0x100] sm:$0xff]  ;;  %v2619_v4 = vunpack.c.l.s8.bf16 %v2075_v62 }
 0x147   :  { %v2616_v5 = vunpack.c.l.s8.bf16 %v2072_v3 }
 0x149   :  { %1932 = vmatpush1.bf16.msra.mxu0 %v7378_v8  ;;  %2014 = vmatpush1.bf16.msra.mxu1 %v7380_v10  ;;  %v2635_v8 = vunpack.c.h.s8.bf16 %v2075_v62  ;;  %v2089_v10 = vld [vmem:[%s11296_s3 + $0x188] sm:$0xff] }
 0x14a   :  { %1933 = vmatprep.subr.bf16.mxu0 %v7387_v11  ;;  %2015 = vmatprep.subr.bf16.mxu1 %v7389_v12  ;;  %v2091_v11 = vld [vmem:[%s11296_s3 + $0x198] sm:$0xff]  ;;  %v2632_v12 = vunpack.c.h.s8.bf16 %v2072_v3  ;;  %v2649_v59 = vunpack.c.l.s8.bf16 %v2089_v10 }
 0x14b   :  { %v2651_v16 = vunpack.c.l.s8.bf16 %v2091_v11  ;;  %v2667_v21 = vunpack.c.h.s8.bf16 %v2091_v11 }
 0x14d   :  { %1934 = vmatpush1.bf16.msra.mxu0 %v7386_v17  ;;  %2016 = vmatpush1.bf16.msra.mxu1 %v7388_v18  ;;  %v2090_v17 = vld [vmem:[%s11296_s3 + $0x190] sm:$0xff]  ;;  %v2648_v18 = vunpack.c.l.s8.bf16 %v2088_v14  ;;  %v9181_v14 = vld [vmem:[#allocation4] sm:$0xff] }
 0x14e   :  { %1935 = vmatprep.subr.bf16.mxu0 %v7395_v19  ;;  %2017 = vmatprep.subr.bf16.mxu1 %v7397_v20  ;;  %v2650_v19 = vunpack.c.l.s8.bf16 %v2090_v17  ;;  %v2665_v20 = vunpack.c.h.s8.bf16 %v2089_v10 }
 0x151   :  { %1936 = vmatpush1.bf16.msra.mxu0 %v7394_v25  ;;  %2018 = vmatpush1.bf16.msra.mxu1 %v7396_v26  ;;  %v2666_v25 = vunpack.c.h.s8.bf16 %v2090_v17  ;;  %v2681_v26 = vunpack.c.l.s8.bf16 %v2105_v53 }
 0x152   :  { %1937 = vmatprep.subr.bf16.mxu0 %v7403_v27  ;;  %2019 = vmatprep.subr.bf16.mxu1 %v7405_v28  ;;  %v2104_v27 = vld [vmem:[%s11296_s3 + $0x200] sm:$0xff]  ;;  %v2683_v28 = vunpack.c.l.s8.bf16 %v2107_v22 }
 0x153   :  { %v2680_v30 = vunpack.c.l.s8.bf16 %v2104_v27 }
 0x155   :  { %1938 = vmatpush1.bf16.msra.mxu0 %v7402_v32  ;;  %2020 = vmatpush1.bf16.msra.mxu1 %v7404_v33  ;;  %v2699_v32 = vunpack.c.h.s8.bf16 %v2107_v22  ;;  %v2121_v33 = vld [vmem:[%s11296_s3 + $0x288] sm:$0xff] }
 0x156   :  { %1939 = vmatprep.subr.bf16.mxu0 %v7411_v35  ;;  %2021 = vmatprep.subr.bf16.mxu1 %v7413_v36  ;;  %v2123_v35 = vld [vmem:[%s11296_s3 + $0x298] sm:$0xff]  ;;  %v2696_v36 = vunpack.c.h.s8.bf16 %v2104_v27  ;;  %v2713_v39 = vunpack.c.l.s8.bf16 %v2121_v33  ;;  %v2729_v45 = vunpack.c.h.s8.bf16 %v2121_v33 }
 0x159   :  { %1940 = vmatpush1.bf16.msra.mxu0 %v7410_v40  ;;  %2022 = vmatpush1.bf16.msra.mxu1 %v7412_v41  ;;  %v2120_v40 = vld [vmem:[%s11296_s3 + $0x280] sm:$0xff]  ;;  %v2715_v41 = vunpack.c.l.s8.bf16 %v2123_v35 }
 0x15a   :  { %3584 = vmatprep.subr.bf16.mxu0 %v2553_v42  ;;  %3748 = vmatprep.subr.bf16.mxu1 %v2555_v15  ;;  %v2122_v42 = vld [vmem:[%s11296_s3 + $0x290] sm:$0xff]  ;;  %v2712_v43 = vunpack.c.l.s8.bf16 %v2120_v40 }
 0x15b   :  { %v2714_v15 = vunpack.c.l.s8.bf16 %v2122_v42  ;;  %v2730_v50 = vunpack.c.h.s8.bf16 %v2122_v42 }
 0x15c   :  { %1942 = vmatmul.mubr.bf16.vlgmr.msra.gmra.mrb[4].mxu0 %v8701_v37  ;;  %2024 = vmatmul.mubr.bf16.vlgmr.msra.gmra.mrb[4].mxu1 %v8701_v37  ;;  %v2586_v37 = vunpack.c.l.s8.bf16 %v2058_v58 }
 0x15d   :  { %3585 = vmatpush1.bf16.msra.mxu0 %v2552_v46  ;;  %3749 = vmatpush1.bf16.msra.mxu1 %v2554_v47  ;;  %v2731_v46 = vunpack.c.h.s8.bf16 %v2123_v35  ;;  %v2137_v47 = vld [vmem:[%s11296_s3 + $0x308] sm:$0xff] }
 0x15e   :  { %3586 = vmatprep.subr.bf16.mxu0 %v2569_v48  ;;  %3750 = vmatprep.subr.bf16.mxu1 %v2571_v49  ;;  %v2139_v48 = vld [vmem:[%s11296_s3 + $0x318] sm:$0xff]  ;;  %v2728_v49 = vunpack.c.h.s8.bf16 %v2120_v40  ;;  %v2745_v51 = vunpack.c.l.s8.bf16 %v2137_v47  ;;  %v2761_v58 = vunpack.c.h.s8.bf16 %v2137_v47 }
 0x161   :  { %3587 = vmatpush1.bf16.msra.mxu0 %v2568_v52  ;;  %3751 = vmatpush1.bf16.msra.mxu1 %v2570_v54  ;;  %v2136_v52 = vld [vmem:[%s11296_s3 + $0x300] sm:$0xff]  ;;  %v2747_v54 = vunpack.c.l.s8.bf16 %v2139_v48 }
 0x162   :  { %3588 = vmatprep.subr.bf16.mxu0 %v2585_v55  ;;  %3752 = vmatprep.subr.bf16.mxu1 %v2587_v57  ;;  %v2138_v55 = vld [vmem:[%s11296_s3 + $0x310] sm:$0xff]  ;;  %v2744_v56 = vunpack.c.l.s8.bf16 %v2136_v52 }
 0x163   :  { %v2746_v57 = vunpack.c.l.s8.bf16 %v2138_v55  ;;  %v2762_v9 = vunpack.c.h.s8.bf16 %v2138_v55 }
 0x165   :  { %3589 = vmatpush1.bf16.msra.mxu0 %v2584_v60  ;;  %3753 = vmatpush1.bf16.msra.mxu1 %v2586_v37  ;;  %v2763_v60 = vunpack.c.h.s8.bf16 %v2139_v48  ;;  %v2153_v37 = vld [vmem:[%s11296_s3 + $0x388] sm:$0xff] }
 0x166   :  { %3590 = vmatprep.subr.bf16.mxu0 %v2601_v61  ;;  %3754 = vmatprep.subr.bf16.mxu1 %v2603_v24  ;;  %v2155_v61 = vld [vmem:[%s11296_s3 + $0x398] sm:$0xff]  ;;  %v2760_v24 = vunpack.c.h.s8.bf16 %v2136_v52  ;;  %v2777_v62 = vunpack.c.l.s8.bf16 %v2153_v37  ;;  %v2793_v34 = vunpack.c.h.s8.bf16 %v2153_v37 }
 0x169   :  { %3591 = vmatpush1.bf16.msra.mxu0 %v2600_v0  ;;  %3755 = vmatpush1.bf16.msra.mxu1 %v2602_v1  ;;  %v2152_v0 = vld [vmem:[%s11296_s3 + $0x380] sm:$0xff]  ;;  %v2779_v1 = vunpack.c.l.s8.bf16 %v2155_v61 }
 0x16a   :  { %3592 = vmatprep.subr.bf16.mxu0 %v2617_v2  ;;  %3756 = vmatprep.subr.bf16.mxu1 %v2619_v4  ;;  %v2154_v2 = vld [vmem:[%s11296_s3 + $0x390] sm:$0xff]  ;;  %v2776_v3 = vunpack.c.l.s8.bf16 %v2152_v0 }
 0x16b   :  { %v2778_v4 = vunpack.c.l.s8.bf16 %v2154_v2  ;;  %v2794_v10 = vunpack.c.h.s8.bf16 %v2154_v2 }
 0x16d   :  { %3593 = vmatpush1.bf16.msra.mxu0 %v2616_v5  ;;  %3757 = vmatpush1.bf16.msra.mxu1 %v2618_v6  ;;  %v2795_v5 = vunpack.c.h.s8.bf16 %v2155_v61  ;;  %v2169_v6 = vld [vmem:[%s11296_s3 + $0x408] sm:$0xff] }
 0x16e   :  { %3594 = vmatprep.subr.bf16.mxu0 %v2633_v7  ;;  %3758 = vmatprep.subr.bf16.mxu1 %v2635_v8  ;;  %v2171_v7 = vld [vmem:[%s11296_s3 + $0x418] sm:$0xff]  ;;  %v2792_v8 = vunpack.c.h.s8.bf16 %v2152_v0  ;;  %v2809_v11 = vunpack.c.l.s8.bf16 %v2169_v6 }
 0x16f   :  { %v2827_v42 = vunpack.c.h.s8.bf16 %v2171_v7 }
 0x171   :  { %3595 = vmatpush1.bf16.msra.mxu0 %v2632_v12  ;;  %3759 = vmatpush1.bf16.msra.mxu1 %v2634_v13  ;;  %v2811_v12 = vunpack.c.l.s8.bf16 %v2171_v7  ;;  %v9176_v13 = vsub.s32 0, %v8323_v44 }
 0x172   :  { %3596 = vmatprep.subr.bf16.mxu0 %v2649_v59  ;;  %3760 = vmatprep.subr.bf16.mxu1 %v2651_v16  ;;  %v9179_v59 = vsub.s32 1, %v8323_v44  ;;  %v9184_v16 = vsub.s32 3, %v8323_v44 }
 0x173   :  { %v387_v17 = vrot.slane %v9181_v14, %v9176_v13 }
 0x175   :  { %3597 = vmatpush1.bf16.msra.mxu0 %v2648_v18  ;;  %3761 = vmatpush1.bf16.msra.mxu1 %v2650_v19  ;;  %v391_v18 = vrot.slane %v9181_v14, %v9179_v59  ;;  %v399_v19 = vrot.slane %v9181_v14, %v9184_v16 }
 0x176   :  { %3598 = vmatprep.subr.bf16.mxu0 %v2665_v20  ;;  %3762 = vmatprep.subr.bf16.mxu1 %v2667_v21 }
 0x179   :  { %3599 = vmatpush1.bf16.msra.mxu0 %v2664_v23  ;;  %3763 = vmatpush1.bf16.msra.mxu1 %v2666_v25 }
 0x17a   :  { %3600 = vmatprep.subr.bf16.mxu0 %v2681_v26  ;;  %3764 = vmatprep.subr.bf16.mxu1 %v2683_v28 }
 0x17d   :  { %3601 = vmatpush1.bf16.msra.mxu0 %v2680_v30  ;;  %3765 = vmatpush1.bf16.msra.mxu1 %v2682_v63  ;;  %v2168_v63 = vld [vmem:[%s11296_s3 + $0x400] sm:$0xff] }
 0x17e   :  { %3602 = vmatprep.subr.bf16.mxu0 %v2697_v31  ;;  %3766 = vmatprep.subr.bf16.mxu1 %v2699_v32  ;;  %v2170_v31 = vld [vmem:[%s11296_s3 + $0x410] sm:$0xff] }
 0x17f   :  { %v2826_v47 = vunpack.c.h.s8.bf16 %v2170_v31 }
 0x181   :  { %3603 = vmatpush1.bf16.msra.mxu0 %v2696_v36  ;;  %3767 = vmatpush1.bf16.msra.mxu1 %v2698_v38  ;;  %v2808_v38 = vunpack.c.l.s8.bf16 %v2168_v63 }
 0x182   :  { %3604 = vmatprep.subr.bf16.mxu0 %v2713_v39  ;;  %3768 = vmatprep.subr.bf16.mxu1 %v2715_v41  ;;  %v2810_v39 = vunpack.c.l.s8.bf16 %v2170_v31  ;;  %v2825_v41 = vunpack.c.h.s8.bf16 %v2169_v6 }
 0x185   :  { %3605 = vmatpush1.bf16.msra.mxu0 %v2712_v43  ;;  %3769 = vmatpush1.bf16.msra.mxu1 %v2714_v15  ;;  %v2185_v43 = vld [vmem:[%s11296_s3 + $0x488] sm:$0xff]  ;;  %v2187_v15 = vld [vmem:[%s11296_s3 + $0x498] sm:$0xff] }
 0x186   :  { %3606 = vmatprep.subr.bf16.mxu0 %v2729_v45  ;;  %3770 = vmatprep.subr.bf16.mxu1 %v2731_v46  ;;  %v2824_v46 = vunpack.c.h.s8.bf16 %v2168_v63  ;;  %v2841_v48 = vunpack.c.l.s8.bf16 %v2185_v43  ;;  %v2857_v55 = vunpack.c.h.s8.bf16 %v2185_v43  ;;  %v2250_v43 = vld [vmem:[%s11296_s3 + $0x690] sm:$0xff] }
 0x189   :  { %3607 = vmatpush1.bf16.msra.mxu0 %v2728_v49  ;;  %3771 = vmatpush1.bf16.msra.mxu1 %v2730_v50  ;;  %v2843_v49 = vunpack.c.l.s8.bf16 %v2187_v15  ;;  %v2184_v50 = vld [vmem:[%s11296_s3 + $0x480] sm:$0xff] }
 0x18a   :  { %3608 = vmatprep.subr.bf16.mxu0 %v2745_v51  ;;  %3772 = vmatprep.subr.bf16.mxu1 %v2747_v54  ;;  %v2186_v51 = vld [vmem:[%s11296_s3 + $0x490] sm:$0xff]  ;;  %v2840_v52 = vunpack.c.l.s8.bf16 %v2184_v50 }
 0x18b   :  { %v2842_v54 = vunpack.c.l.s8.bf16 %v2186_v51  ;;  %v2858_v37 = vunpack.c.h.s8.bf16 %v2186_v51 }
 0x18d   :  { %3609 = vmatpush1.bf16.msra.mxu0 %v2744_v56  ;;  %3773 = vmatpush1.bf16.msra.mxu1 %v2746_v57  ;;  %v2859_v56 = vunpack.c.h.s8.bf16 %v2187_v15  ;;  %v2201_v57 = vld [vmem:[%s11296_s3 + $0x508] sm:$0xff] }
 0x18e   :  { %3610 = vmatprep.subr.bf16.mxu0 %v2761_v58  ;;  %3774 = vmatprep.subr.bf16.mxu1 %v2763_v60  ;;  %v2203_v58 = vld [vmem:[%s11296_s3 + $0x518] sm:$0xff]  ;;  %v2856_v60 = vunpack.c.h.s8.bf16 %v2184_v50  ;;  %v2873_v61 = vunpack.c.l.s8.bf16 %v2201_v57  ;;  %v2889_v2 = vunpack.c.h.s8.bf16 %v2201_v57  ;;  %v2266_v57 = vld [vmem:[%s11296_s3 + $0x710] sm:$0xff] }
 0x18f   :  { %v2267_v50 = vld [vmem:[%s11296_s3 + $0x718] sm:$0xff] }
 0x191   :  { %3611 = vmatpush1.bf16.msra.mxu0 %v2760_v24  ;;  %3775 = vmatpush1.bf16.msra.mxu1 %v2762_v9  ;;  %v2875_v24 = vunpack.c.l.s8.bf16 %v2203_v58  ;;  %v2200_v9 = vld [vmem:[%s11296_s3 + $0x500] sm:$0xff] }
 0x192   :  { %3612 = vmatprep.subr.bf16.mxu0 %v2777_v62  ;;  %3776 = vmatprep.subr.bf16.mxu1 %v2779_v1  ;;  %v2202_v62 = vld [vmem:[%s11296_s3 + $0x510] sm:$0xff]  ;;  %v2872_v0 = vunpack.c.l.s8.bf16 %v2200_v9 }
 0x193   :  { %v2874_v1 = vunpack.c.l.s8.bf16 %v2202_v62  ;;  %v2890_v6 = vunpack.c.h.s8.bf16 %v2202_v62  ;;  %v2283_v62 = vld [vmem:[%s11296_s3 + $0x798] sm:$0xff] }
 0x195   :  { %3613 = vmatpush1.bf16.msra.mxu0 %v2776_v3  ;;  %3777 = vmatpush1.bf16.msra.mxu1 %v2778_v4  ;;  %v2891_v3 = vunpack.c.h.s8.bf16 %v2203_v58  ;;  %v2217_v4 = vld [vmem:[%s11296_s3 + $0x588] sm:$0xff] }
 0x196   :  { %3614 = vmatprep.subr.bf16.mxu0 %v2793_v34  ;;  %3778 = vmatprep.subr.bf16.mxu1 %v2795_v5  ;;  %v2219_v34 = vld [vmem:[%s11296_s3 + $0x598] sm:$0xff]  ;;  %v2888_v5 = vunpack.c.h.s8.bf16 %v2200_v9  ;;  %v2905_v7 = vunpack.c.l.s8.bf16 %v2217_v4  ;;  %v2281_v9 = vld [vmem:[%s11296_s3 + $0x788] sm:$0xff] }
 0x199   :  { %3615 = vmatpush1.bf16.msra.mxu0 %v2792_v8  ;;  %3779 = vmatpush1.bf16.msra.mxu1 %v2794_v10  ;;  %v2907_v8 = vunpack.c.l.s8.bf16 %v2219_v34  ;;  %v2216_v10 = vld [vmem:[%s11296_s3 + $0x580] sm:$0xff] }
 0x19a   :  { %3625 = vmatprep.subr.bf16.mxu0 %v2809_v11  ;;  %3789 = vmatprep.subr.bf16.mxu1 %v2811_v12  ;;  %v2218_v11 = vld [vmem:[%s11296_s3 + $0x590] sm:$0xff]  ;;  %v2904_v12 = vunpack.c.l.s8.bf16 %v2216_v10 }
 0x1af   :  { %v1779_v20 = vpop.f32.mrb[0].mxu0  ;;  %v9192_v53 = vpop.f32.mrb[0].mxu1 }
 0x1b0   :  { %v7726_v21 = vadd.f32 %v1779_v20, %v387_v17  ;;  %v1781_v22 = vpop.f32.mrb[1].mxu0  ;;  %v1863_v25 = vpop.f32.mrb[1].mxu1  ;;  %v2906_v17 = vunpack.c.l.s8.bf16 %v2218_v11  ;;  %v2233_v20 = vld [vmem:[%s11296_s3 + $0x608] sm:$0xff] }
 0x1b1   :  { %v7727_v23 = vadd.f32 %v1781_v22, %v391_v18  ;;  %v1783_v26 = vpop.f32.mrb[2].mxu0  ;;  %v7729_v28 = vadd.f32 %v1863_v25, %v399_v19  ;;  %v1865_v29 = vpop.f32.mrb[2].mxu1  ;;  %v2921_v18 = vunpack.c.h.s8.bf16 %v2217_v4  ;;  %v2923_v19 = vunpack.c.h.s8.bf16 %v2219_v34  ;;  %v2280_v34 = vld [vmem:[%s11296_s3 + $0x780] sm:$0xff] }
 0x1b2   :  { %v2032_v27 = vmax.f32 %v7726_v21, 0.0  ;;  %v1784_v30 = vpop.f32.mrb[3].mxu0  ;;  %v1866_v33 = vpop.f32.mrb[3].mxu1  ;;  %v2235_v21 = vld [vmem:[%s11296_s3 + $0x618] sm:$0xff]  ;;  %v2920_v22 = vunpack.c.h.s8.bf16 %v2216_v10  ;;  %v2937_v25 = vunpack.c.l.s8.bf16 %v2233_v20  ;;  %v2953_v63 = vunpack.c.h.s8.bf16 %v2233_v20 }
 0x1b3   :  { %v2033_v32 = vmax.f32 %v7727_v23, 0.0  ;;  %v2035_v35 = vmax.f32 %v7729_v28, 0.0  ;;  %v2922_v23 = vunpack.c.h.s8.bf16 %v2218_v11  ;;  %v2939_v26 = vunpack.c.l.s8.bf16 %v2235_v21  ;;  %v2234_v28 = vld [vmem:[%s11296_s3 + $0x610] sm:$0xff]  ;;  %v2251_v33 = vld [vmem:[%s11296_s3 + $0x698] sm:$0xff] }
 0x1b4   :  { %v9202_v40 = vpack.c.bf16 %v2032_v27, %v2032_v27  ;;  %v2232_v27 = vld [vmem:[%s11296_s3 + $0x600] sm:$0xff]  ;;  %v2938_v30 = vunpack.c.l.s8.bf16 %v2234_v28  ;;  %v2955_v31 = vunpack.c.h.s8.bf16 %v2235_v21  ;;  %v3035_v4 = vunpack.c.l.s8.bf16 %v2283_v62 }
 0x1b5   :  { %v9200_v36 = vpack.c.bf16 %v2033_v32, %v2033_v32  ;;  %v9212_v45 = vpack.c.bf16 %v2035_v35, %v2035_v35  ;;  %v2936_v29 = vunpack.c.l.s8.bf16 %v2232_v27  ;;  %v2249_v32 = vld [vmem:[%s11296_s3 + $0x688] sm:$0xff]  ;;  %v2952_v35 = vunpack.c.h.s8.bf16 %v2232_v27 }
 0x1b6   :  { %v3049_v10 = vunpack.c.h.s8.bf16 %v2281_v9  ;;  %v3051_v11 = vunpack.c.h.s8.bf16 %v2283_v62 }
 0x1b7   :  { %3616 = vmatprep.mubr.bf16.mxu0 %v9200_v36  ;;  %3780 = vmatprep.mubr.bf16.mxu1 %v9200_v36 }
 0x1b8   :  { %3617 = vmatmul.mubr.bf16.vlgmr.msra.gmra.mrb[8].mxu0 %v9202_v40  ;;  %3781 = vmatmul.mubr.bf16.vlgmr.msra.gmra.mrb[8].mxu1 %v9202_v40 }
 0x1b9   :  { %3626 = vmatpush1.bf16.msra.mxu0 %v2808_v38  ;;  %3790 = vmatpush1.bf16.msra.mxu1 %v2810_v39  ;;  %v2954_v38 = vunpack.c.h.s8.bf16 %v2234_v28  ;;  %v2969_v39 = vunpack.c.l.s8.bf16 %v2249_v32 }
 0x1ba   :  { %3657 = vmatprep.mubr.bf16.mxu0 %v9212_v45  ;;  %3821 = vmatprep.mubr.bf16.mxu1 %v9212_v45 }
 0x1bb   :  { %3627 = vmatprep.subr.bf16.mxu0 %v2825_v41  ;;  %3791 = vmatprep.subr.bf16.mxu1 %v2827_v42  ;;  %v2971_v41 = vunpack.c.l.s8.bf16 %v2251_v33  ;;  %v2248_v42 = vld [vmem:[%s11296_s3 + $0x680] sm:$0xff] }
 0x1bc   :  { %v2968_v15 = vunpack.c.l.s8.bf16 %v2248_v42  ;;  %v2984_v51 = vunpack.c.h.s8.bf16 %v2248_v42 }
 0x1bd   :  { %3628 = vmatpush1.bf16.msra.mxu0 %v2824_v46  ;;  %3792 = vmatpush1.bf16.msra.mxu1 %v2826_v47  ;;  %v2970_v46 = vunpack.c.l.s8.bf16 %v2250_v43  ;;  %v2985_v47 = vunpack.c.h.s8.bf16 %v2249_v32 }
 0x1be   :  { %3629 = vmatprep.subr.bf16.mxu0 %v2841_v48  ;;  %3793 = vmatprep.subr.bf16.mxu1 %v2843_v49  ;;  %v2987_v48 = vunpack.c.h.s8.bf16 %v2251_v33  ;;  %v2265_v49 = vld [vmem:[%s11296_s3 + $0x708] sm:$0xff] }
 0x1c1   :  { %3630 = vmatpush1.bf16.msra.mxu0 %v2840_v52  ;;  %3794 = vmatpush1.bf16.msra.mxu1 %v2842_v54  ;;  %v2986_v52 = vunpack.c.h.s8.bf16 %v2250_v43  ;;  %v3001_v54 = vunpack.c.l.s8.bf16 %v2265_v49 }
 0x1c2   :  { %3631 = vmatprep.subr.bf16.mxu0 %v2857_v55  ;;  %3795 = vmatprep.subr.bf16.mxu1 %v2859_v56  ;;  %v3003_v55 = vunpack.c.l.s8.bf16 %v2267_v50  ;;  %v2264_v56 = vld [vmem:[%s11296_s3 + $0x700] sm:$0xff] }
 0x1c3   :  { %v3000_v58 = vunpack.c.l.s8.bf16 %v2264_v56 }
 0x1c5   :  { %3632 = vmatpush1.bf16.msra.mxu0 %v2856_v60  ;;  %3796 = vmatpush1.bf16.msra.mxu1 %v2858_v37  ;;  %v3002_v60 = vunpack.c.l.s8.bf16 %v2266_v57  ;;  %v9285_v37 = vsub.s32 2, %v8323_v44 }
 0x1c6   :  { %3633 = vmatprep.subr.bf16.mxu0 %v2873_v61  ;;  %3797 = vmatprep.subr.bf16.mxu1 %v2875_v24  ;;  %v3017_v61 = vunpack.c.h.s8.bf16 %v2265_v49  ;;  %v3019_v24 = vunpack.c.h.s8.bf16 %v2267_v50 }
 0x1c9   :  { %3634 = vmatpush1.bf16.msra.mxu0 %v2872_v0  ;;  %3798 = vmatpush1.bf16.msra.mxu1 %v2874_v1  ;;  %v3016_v0 = vunpack.c.h.s8.bf16 %v2264_v56  ;;  %v3018_v1 = vunpack.c.h.s8.bf16 %v2266_v57 }
 0x1ca   :  { %3635 = vmatprep.subr.bf16.mxu0 %v2889_v2  ;;  %3799 = vmatprep.subr.bf16.mxu1 %v2891_v3  ;;  %v395_v2 = vrot.slane %v9181_v14, %v9285_v37  ;;  %v3033_v3 = vunpack.c.l.s8.bf16 %v2281_v9 }
 0x1cd   :  { %3636 = vmatpush1.bf16.msra.mxu0 %v2888_v5  ;;  %3800 = vmatpush1.bf16.msra.mxu1 %v2890_v6  ;;  %v2282_v5 = vld [vmem:[%s11296_s3 + $0x790] sm:$0xff]  ;;  %v3032_v6 = vunpack.c.l.s8.bf16 %v2280_v34 }
 0x1ce   :  { %3637 = vmatprep.subr.bf16.mxu0 %v2905_v7  ;;  %3801 = vmatprep.subr.bf16.mxu1 %v2907_v8  ;;  %v3034_v7 = vunpack.c.l.s8.bf16 %v2282_v5  ;;  %v7728_v8 = vadd.f32 %v9192_v53, %v395_v2  ;;  %v2346_v2 = vld [vmem:[%s11296_s3 + $0x990] sm:$0xff] }
 0x1d0   :  { %v2034_v20 = vmax.f32 %v7728_v8, 0.0 }
 0x1d1   :  { %3638 = vmatpush1.bf16.msra.mxu0 %v2904_v12  ;;  %3802 = vmatpush1.bf16.msra.mxu1 %v2906_v17  ;;  %v2297_v12 = vld [vmem:[%s11296_s3 + $0x808] sm:$0xff]  ;;  %v2299_v17 = vld [vmem:[%s11296_s3 + $0x818] sm:$0xff] }
 0x1d2   :  { %3639 = vmatprep.subr.bf16.mxu0 %v2921_v18  ;;  %3803 = vmatprep.subr.bf16.mxu1 %v2923_v19  ;;  %v3048_v18 = vunpack.c.h.s8.bf16 %v2280_v34  ;;  %v3050_v19 = vunpack.c.h.s8.bf16 %v2282_v5  ;;  %v3065_v53 = vunpack.c.l.s8.bf16 %v2297_v12  ;;  %v3067_v21 = vunpack.c.l.s8.bf16 %v2299_v17 }
 0x1d3   :  { %v9314_v27 = vpack.c.bf16 %v2034_v20, %v2034_v20  ;;  %v3081_v28 = vunpack.c.h.s8.bf16 %v2297_v12 }
 0x1d5   :  { %3640 = vmatpush1.bf16.msra.mxu0 %v2920_v22  ;;  %3804 = vmatpush1.bf16.msra.mxu1 %v2922_v23  ;;  %v2296_v22 = vld [vmem:[%s11296_s3 + $0x800] sm:$0xff]  ;;  %v2298_v23 = vld [vmem:[%s11296_s3 + $0x810] sm:$0xff] }
 0x1d6   :  { %3641 = vmatprep.subr.bf16.mxu0 %v2937_v25  ;;  %3805 = vmatprep.subr.bf16.mxu1 %v2939_v26  ;;  %v3064_v25 = vunpack.c.l.s8.bf16 %v2296_v22  ;;  %v3066_v26 = vunpack.c.l.s8.bf16 %v2298_v23  ;;  %v3082_v32 = vunpack.c.h.s8.bf16 %v2298_v23  ;;  %v2379_v23 = vld [vmem:[%s11296_s3 + $0xa98] sm:$0xff] }
 0x1d9   :  { %3642 = vmatpush1.bf16.msra.mxu0 %v2936_v29  ;;  %3806 = vmatpush1.bf16.msra.mxu1 %v2938_v30  ;;  %v3083_v29 = vunpack.c.h.s8.bf16 %v2299_v17  ;;  %v2313_v30 = vld [vmem:[%s11296_s3 + $0x888] sm:$0xff]  ;;  %v2360_v17 = vld [vmem:[%s11296_s3 + $0xa00] sm:$0xff] }
 0x1da   :  { %3643 = vmatprep.subr.bf16.mxu0 %v2953_v63  ;;  %3807 = vmatprep.subr.bf16.mxu1 %v2955_v31  ;;  %v2315_v63 = vld [vmem:[%s11296_s3 + $0x898] sm:$0xff]  ;;  %v3080_v31 = vunpack.c.h.s8.bf16 %v2296_v22  ;;  %v3097_v33 = vunpack.c.l.s8.bf16 %v2313_v30  ;;  %v3113_v43 = vunpack.c.h.s8.bf16 %v2313_v30  ;;  %v2377_v22 = vld [vmem:[%s11296_s3 + $0xa88] sm:$0xff]  ;;  %v2376_v30 = vld [vmem:[%s11296_s3 + $0xa80] sm:$0xff] }
 0x1dd   :  { %3644 = vmatpush1.bf16.msra.mxu0 %v2952_v35  ;;  %3808 = vmatpush1.bf16.msra.mxu1 %v2954_v38  ;;  %v3099_v35 = vunpack.c.l.s8.bf16 %v2315_v63  ;;  %v2312_v38 = vld [vmem:[%s11296_s3 + $0x880] sm:$0xff] }
 0x1de   :  { %3645 = vmatprep.subr.bf16.mxu0 %v2969_v39  ;;  %3809 = vmatprep.subr.bf16.mxu1 %v2971_v41  ;;  %v2314_v39 = vld [vmem:[%s11296_s3 + $0x890] sm:$0xff]  ;;  %v3096_v41 = vunpack.c.l.s8.bf16 %v2312_v38 }
 0x1df   :  { %v3098_v42 = vunpack.c.l.s8.bf16 %v2314_v39  ;;  %v3114_v49 = vunpack.c.h.s8.bf16 %v2314_v39  ;;  %v2395_v39 = vld [vmem:[%s11296_s3 + $0xb18] sm:$0xff] }
 0x1e1   :  { %3646 = vmatpush1.bf16.msra.mxu0 %v2968_v15  ;;  %3810 = vmatpush1.bf16.msra.mxu1 %v2970_v46  ;;  %v3115_v15 = vunpack.c.h.s8.bf16 %v2315_v63  ;;  %v2329_v46 = vld [vmem:[%s11296_s3 + $0x908] sm:$0xff]  ;;  %v2378_v63 = vld [vmem:[%s11296_s3 + $0xa90] sm:$0xff] }
 0x1e2   :  { %3647 = vmatprep.subr.bf16.mxu0 %v2985_v47  ;;  %3811 = vmatprep.subr.bf16.mxu1 %v2987_v48  ;;  %v2331_v47 = vld [vmem:[%s11296_s3 + $0x918] sm:$0xff]  ;;  %v3112_v48 = vunpack.c.h.s8.bf16 %v2312_v38  ;;  %v3129_v50 = vunpack.c.l.s8.bf16 %v2329_v46  ;;  %v3145_v57 = vunpack.c.h.s8.bf16 %v2329_v46  ;;  %v2393_v38 = vld [vmem:[%s11296_s3 + $0xb08] sm:$0xff]  ;;  %v2392_v46 = vld [vmem:[%s11296_s3 + $0xb00] sm:$0xff] }
 0x1e5   :  { %3648 = vmatpush1.bf16.msra.mxu0 %v2984_v51  ;;  %3812 = vmatpush1.bf16.msra.mxu1 %v2986_v52  ;;  %v3131_v51 = vunpack.c.l.s8.bf16 %v2331_v47  ;;  %v2328_v52 = vld [vmem:[%s11296_s3 + $0x900] sm:$0xff] }
 0x1e6   :  { %3649 = vmatprep.subr.bf16.mxu0 %v3001_v54  ;;  %3813 = vmatprep.subr.bf16.mxu1 %v3003_v55  ;;  %v2330_v54 = vld [vmem:[%s11296_s3 + $0x910] sm:$0xff]  ;;  %v3128_v55 = vunpack.c.l.s8.bf16 %v2328_v52 }
 0x1e7   :  { %v3130_v56 = vunpack.c.l.s8.bf16 %v2330_v54  ;;  %v3146_v9 = vunpack.c.h.s8.bf16 %v2330_v54  ;;  %v2411_v54 = vld [vmem:[%s11296_s3 + $0xb98] sm:$0xff] }
 0x1e9   :  { %3650 = vmatpush1.bf16.msra.mxu0 %v3000_v58  ;;  %3814 = vmatpush1.bf16.msra.mxu1 %v3002_v60  ;;  %v3147_v58 = vunpack.c.h.s8.bf16 %v2331_v47  ;;  %v2345_v60 = vld [vmem:[%s11296_s3 + $0x988] sm:$0xff]  ;;  %v2394_v47 = vld [vmem:[%s11296_s3 + $0xb10] sm:$0xff] }
 0x1ea   :  { %3651 = vmatprep.subr.bf16.mxu0 %v3017_v61  ;;  %3815 = vmatprep.subr.bf16.mxu1 %v3019_v24  ;;  %v2347_v61 = vld [vmem:[%s11296_s3 + $0x998] sm:$0xff]  ;;  %v3144_v24 = vunpack.c.h.s8.bf16 %v2328_v52  ;;  %v3161_v62 = vunpack.c.l.s8.bf16 %v2345_v60  ;;  %v3177_v34 = vunpack.c.h.s8.bf16 %v2345_v60  ;;  %v2409_v52 = vld [vmem:[%s11296_s3 + $0xb88] sm:$0xff] }
 0x1eb   :  { %v3179_v5 = vunpack.c.h.s8.bf16 %v2347_v61  ;;  %v3289_v60 = vunpack.c.l.s8.bf16 %v2409_v52 }
 0x1ed   :  { %3652 = vmatpush1.bf16.msra.mxu0 %v3016_v0  ;;  %3816 = vmatpush1.bf16.msra.mxu1 %v3018_v1  ;;  %v3163_v0 = vunpack.c.l.s8.bf16 %v2347_v61  ;;  %v2344_v1 = vld [vmem:[%s11296_s3 + $0x980] sm:$0xff]  ;;  %v3291_v61 = vunpack.c.l.s8.bf16 %v2411_v54 }
 0x1ee   :  { %3653 = vmatprep.subr.bf16.mxu0 %v3033_v3  ;;  %3817 = vmatprep.subr.bf16.mxu1 %v3035_v4  ;;  %v3160_v3 = vunpack.c.l.s8.bf16 %v2344_v1  ;;  %v3162_v4 = vunpack.c.l.s8.bf16 %v2346_v2  ;;  %v3176_v8 = vunpack.c.h.s8.bf16 %v2344_v1 }
 0x1f1   :  { %3654 = vmatpush1.bf16.msra.mxu0 %v3032_v6  ;;  %3818 = vmatpush1.bf16.msra.mxu1 %v3034_v7  ;;  %v2361_v6 = vld [vmem:[%s11296_s3 + $0xa08] sm:$0xff]  ;;  %v2363_v7 = vld [vmem:[%s11296_s3 + $0xa18] sm:$0xff] }
 0x1f2   :  { %3655 = vmatprep.subr.bf16.mxu0 %v3049_v10  ;;  %3819 = vmatprep.subr.bf16.mxu1 %v3051_v11  ;;  %v3178_v10 = vunpack.c.h.s8.bf16 %v2346_v2  ;;  %v3193_v11 = vunpack.c.l.s8.bf16 %v2361_v6  ;;  %v3195_v12 = vunpack.c.l.s8.bf16 %v2363_v7 }
 0x1f5   :  { %3656 = vmatpush1.bf16.msra.mxu0 %v3048_v18  ;;  %3820 = vmatpush1.bf16.msra.mxu1 %v3050_v19  ;;  %v2362_v18 = vld [vmem:[%s11296_s3 + $0xa10] sm:$0xff]  ;;  %v3192_v19 = vunpack.c.l.s8.bf16 %v2360_v17 }
 0x1f6   :  { %3666 = vmatprep.subr.bf16.mxu0 %v3065_v53  ;;  %3830 = vmatprep.subr.bf16.mxu1 %v3067_v21  ;;  %v3194_v20 = vunpack.c.l.s8.bf16 %v2362_v18  ;;  %v3209_v53 = vunpack.c.h.s8.bf16 %v2361_v6  ;;  %v3211_v21 = vunpack.c.h.s8.bf16 %v2363_v7  ;;  %v2425_v7 = vld [vmem:[%s11296_s3 + $0xc08] sm:$0xff] }
 0x1f8   :  { %3658 = vmatmul.mubr.bf16.vlgmr.msra.gmra.mrb[8].mxu0 %v9314_v27  ;;  %3822 = vmatmul.mubr.bf16.vlgmr.msra.gmra.mrb[8].mxu1 %v9314_v27 }
 0x1f9   :  { %3667 = vmatpush1.bf16.msra.mxu0 %v3064_v25  ;;  %3831 = vmatpush1.bf16.msra.mxu1 %v3066_v26  ;;  %v3208_v25 = vunpack.c.h.s8.bf16 %v2360_v17  ;;  %v3210_v26 = vunpack.c.h.s8.bf16 %v2362_v18 }
 0x1fa   :  { %3668 = vmatprep.subr.bf16.mxu0 %v3081_v28  ;;  %3832 = vmatprep.subr.bf16.mxu1 %v3083_v29  ;;  %v3225_v28 = vunpack.c.l.s8.bf16 %v2377_v22  ;;  %v3227_v29 = vunpack.c.l.s8.bf16 %v2379_v23 }
 0x1fd   :  { %3669 = vmatpush1.bf16.msra.mxu0 %v3080_v31  ;;  %3833 = vmatpush1.bf16.msra.mxu1 %v3082_v32  ;;  %v3224_v31 = vunpack.c.l.s8.bf16 %v2376_v30  ;;  %v3226_v32 = vunpack.c.l.s8.bf16 %v2378_v63 }
 0x1fe   :  { %3670 = vmatprep.subr.bf16.mxu0 %v3097_v33  ;;  %3834 = vmatprep.subr.bf16.mxu1 %v3099_v35  ;;  %v3241_v33 = vunpack.c.h.s8.bf16 %v2377_v22  ;;  %v3243_v35 = vunpack.c.h.s8.bf16 %v2379_v23 }
 0x201   :  { %3671 = vmatpush1.bf16.msra.mxu0 %v3096_v41  ;;  %3835 = vmatpush1.bf16.msra.mxu1 %v3098_v42  ;;  %v3240_v41 = vunpack.c.h.s8.bf16 %v2376_v30  ;;  %v3242_v42 = vunpack.c.h.s8.bf16 %v2378_v63 }
 0x202   :  { %3672 = vmatprep.subr.bf16.mxu0 %v3113_v43  ;;  %3836 = vmatprep.subr.bf16.mxu1 %v3115_v15  ;;  %v3257_v43 = vunpack.c.l.s8.bf16 %v2393_v38  ;;  %v3259_v15 = vunpack.c.l.s8.bf16 %v2395_v39 }
 0x205   :  { %3673 = vmatpush1.bf16.msra.mxu0 %v3112_v48  ;;  %3837 = vmatpush1.bf16.msra.mxu1 %v3114_v49  ;;  %v3256_v48 = vunpack.c.l.s8.bf16 %v2392_v46  ;;  %v3258_v49 = vunpack.c.l.s8.bf16 %v2394_v47 }
 0x206   :  { %3674 = vmatprep.subr.bf16.mxu0 %v3129_v50  ;;  %3838 = vmatprep.subr.bf16.mxu1 %v3131_v51  ;;  %v3273_v50 = vunpack.c.h.s8.bf16 %v2393_v38  ;;  %v3275_v51 = vunpack.c.h.s8.bf16 %v2395_v39  ;;  %v3337_v39 = vunpack.c.h.s8.bf16 %v2425_v7 }
 0x209   :  { %3675 = vmatpush1.bf16.msra.mxu0 %v3128_v55  ;;  %3839 = vmatpush1.bf16.msra.mxu1 %v3130_v56  ;;  %v9397_v55 = vsub.s32 4, %v8323_v44  ;;  %v3272_v56 = vunpack.c.h.s8.bf16 %v2392_v46 }
 0x20a   :  { %3676 = vmatprep.subr.bf16.mxu0 %v3145_v57  ;;  %3840 = vmatprep.subr.bf16.mxu1 %v3147_v58  ;;  %v3274_v57 = vunpack.c.h.s8.bf16 %v2394_v47  ;;  %v9400_v58 = vsub.s32 5, %v8323_v44 }
 0x20c   :  { %v407_v1 = vrot.slane %v9181_v14, %v9400_v58 }
 0x20d   :  { %3677 = vmatpush1.bf16.msra.mxu0 %v3144_v24  ;;  %3841 = vmatpush1.bf16.msra.mxu1 %v3146_v9  ;;  %v9403_v24 = vsub.s32 7, %v8323_v44  ;;  %v2408_v9 = vld [vmem:[%s11296_s3 + $0xb80] sm:$0xff] }
 0x20e   :  { %3678 = vmatprep.subr.bf16.mxu0 %v3161_v62  ;;  %3842 = vmatprep.subr.bf16.mxu1 %v3163_v0  ;;  %v2410_v62 = vld [vmem:[%s11296_s3 + $0xb90] sm:$0xff]  ;;  %v403_v0 = vrot.slane %v9181_v14, %v9397_v55  ;;  %v3288_v2 = vunpack.c.l.s8.bf16 %v2408_v9 }
 0x211   :  { %3679 = vmatpush1.bf16.msra.mxu0 %v3160_v3  ;;  %3843 = vmatpush1.bf16.msra.mxu1 %v3162_v4  ;;  %v3290_v3 = vunpack.c.l.s8.bf16 %v2410_v62  ;;  %v415_v4 = vrot.slane %v9181_v14, %v9403_v24 }
 0x212   :  { %3680 = vmatprep.subr.bf16.mxu0 %v3177_v34  ;;  %3844 = vmatprep.subr.bf16.mxu1 %v3179_v5  ;;  %v3305_v34 = vunpack.c.h.s8.bf16 %v2409_v52  ;;  %v3307_v5 = vunpack.c.h.s8.bf16 %v2411_v54 }
 0x215   :  { %3681 = vmatpush1.bf16.msra.mxu0 %v3176_v8  ;;  %3845 = vmatpush1.bf16.msra.mxu1 %v3178_v10  ;;  %v2427_v8 = vld [vmem:[%s11296_s3 + $0xc18] sm:$0xff] }
 0x216   :  { %3682 = vmatprep.subr.bf16.mxu0 %v3193_v11  ;;  %3846 = vmatprep.subr.bf16.mxu1 %v3195_v12 }
 0x219   :  { %3683 = vmatpush1.bf16.msra.mxu0 %v3192_v19  ;;  %3847 = vmatpush1.bf16.msra.mxu1 %v3194_v20  ;;  %v3304_v19 = vunpack.c.h.s8.bf16 %v2408_v9  ;;  %v3306_v20 = vunpack.c.h.s8.bf16 %v2410_v62 }
 0x21a   :  { %3684 = vmatprep.subr.bf16.mxu0 %v3209_v53  ;;  %3848 = vmatprep.subr.bf16.mxu1 %v3211_v21 }
 0x21d   :  { %3685 = vmatpush1.bf16.msra.mxu0 %v3208_v25  ;;  %3849 = vmatpush1.bf16.msra.mxu1 %v3210_v26  ;;  %v3321_v25 = vunpack.c.l.s8.bf16 %v2425_v7  ;;  %v3323_v26 = vunpack.c.l.s8.bf16 %v2427_v8  ;;  %v2473_v7 = vld [vmem:[%s11296_s3 + $0xd88] sm:$0xff] }
 0x21e   :  { %3686 = vmatprep.subr.bf16.mxu0 %v3225_v28  ;;  %3850 = vmatprep.subr.bf16.mxu1 %v3227_v29  ;;  %v2424_v28 = vld [vmem:[%s11296_s3 + $0xc00] sm:$0xff]  ;;  %v2426_v29 = vld [vmem:[%s11296_s3 + $0xc10] sm:$0xff] }
 0x21f   :  { %v3336_v46 = vunpack.c.h.s8.bf16 %v2424_v28  ;;  %v3338_v47 = vunpack.c.h.s8.bf16 %v2426_v29 }
 0x221   :  { %3687 = vmatpush1.bf16.msra.mxu0 %v3224_v31  ;;  %3851 = vmatpush1.bf16.msra.mxu1 %v3226_v32 }
 0x222   :  { %3688 = vmatprep.subr.bf16.mxu0 %v3241_v33  ;;  %3852 = vmatprep.subr.bf16.mxu1 %v3243_v35  ;;  %v3320_v33 = vunpack.c.l.s8.bf16 %v2424_v28  ;;  %v3322_v35 = vunpack.c.l.s8.bf16 %v2426_v29 }
 0x225   :  { %3689 = vmatpush1.bf16.msra.mxu0 %v3240_v41  ;;  %3853 = vmatpush1.bf16.msra.mxu1 %v3242_v42  ;;  %v3339_v41 = vunpack.c.h.s8.bf16 %v2427_v8  ;;  %v2441_v42 = vld [vmem:[%s11296_s3 + $0xc88] sm:$0xff]  ;;  %v2475_v8 = vld [vmem:[%s11296_s3 + $0xd98] sm:$0xff] }
 0x226   :  { %3690 = vmatprep.subr.bf16.mxu0 %v3257_v43  ;;  %3854 = vmatprep.subr.bf16.mxu1 %v3259_v15  ;;  %v2443_v43 = vld [vmem:[%s11296_s3 + $0xc98] sm:$0xff] }
 0x229   :  { %3691 = vmatpush1.bf16.msra.mxu0 %v3256_v48  ;;  %3855 = vmatpush1.bf16.msra.mxu1 %v3258_v49  ;;  %v3353_v48 = vunpack.c.l.s8.bf16 %v2441_v42  ;;  %v3355_v49 = vunpack.c.l.s8.bf16 %v2443_v43 }
 0x22a   :  { %3692 = vmatprep.subr.bf16.mxu0 %v3273_v50  ;;  %3856 = vmatprep.subr.bf16.mxu1 %v3275_v51  ;;  %v2440_v50 = vld [vmem:[%s11296_s3 + $0xc80] sm:$0xff]  ;;  %v2442_v51 = vld [vmem:[%s11296_s3 + $0xc90] sm:$0xff] }
 0x22b   :  { %v3352_v52 = vunpack.c.l.s8.bf16 %v2440_v50  ;;  %v3354_v54 = vunpack.c.l.s8.bf16 %v2442_v51  ;;  %v3368_v9 = vunpack.c.h.s8.bf16 %v2440_v50  ;;  %v3370_v62 = vunpack.c.h.s8.bf16 %v2442_v51  ;;  %v2504_v50 = vld [vmem:[%s11296_s3 + $0xe80] sm:$0xff]  ;;  %v2506_v51 = vld [vmem:[%s11296_s3 + $0xe90] sm:$0xff] }
 0x22d   :  { %3693 = vmatpush1.bf16.msra.mxu0 %v3272_v56  ;;  %3857 = vmatpush1.bf16.msra.mxu1 %v3274_v57  ;;  %v3369_v56 = vunpack.c.h.s8.bf16 %v2441_v42  ;;  %v3371_v57 = vunpack.c.h.s8.bf16 %v2443_v43  ;;  %v2505_v42 = vld [vmem:[%s11296_s3 + $0xe88] sm:$0xff]  ;;  %v2507_v43 = vld [vmem:[%s11296_s3 + $0xe98] sm:$0xff] }
 0x22e   :  { %3694 = vmatprep.subr.bf16.mxu0 %v3289_v60  ;;  %3858 = vmatprep.subr.bf16.mxu1 %v3291_v61  ;;  %v2457_v60 = vld [vmem:[%s11296_s3 + $0xd08] sm:$0xff]  ;;  %v2459_v61 = vld [vmem:[%s11296_s3 + $0xd18] sm:$0xff] }
 0x22f   :  { %v1943_v6 = vpop.f32.mrb[4].mxu0  ;;  %v9423_v11 = vpop.f32.mrb[4].mxu1 }
 0x230   :  { %v7730_v10 = vadd.f32 %v1943_v6, %v403_v0  ;;  %v1945_v12 = vpop.f32.mrb[5].mxu0  ;;  %v2027_v18 = vpop.f32.mrb[5].mxu1  ;;  %v3385_v0 = vunpack.c.l.s8.bf16 %v2457_v60  ;;  %v3403_v6 = vunpack.c.h.s8.bf16 %v2459_v61 }
 0x231   :  { %v7731_v17 = vadd.f32 %v1945_v12, %v407_v1  ;;  %3695 = vmatpush1.bf16.msra.mxu0 %v3288_v2  ;;  %3859 = vmatpush1.bf16.msra.mxu1 %v3290_v3  ;;  %v1947_v14 = vpop.f32.mrb[6].mxu0  ;;  %v7733_v21 = vadd.f32 %v2027_v18, %v415_v4  ;;  %v2029_v22 = vpop.f32.mrb[6].mxu1  ;;  %v3387_v1 = vunpack.c.l.s8.bf16 %v2459_v61  ;;  %v2456_v2 = vld [vmem:[%s11296_s3 + $0xd00] sm:$0xff]  ;;  %v2458_v3 = vld [vmem:[%s11296_s3 + $0xd10] sm:$0xff]  ;;  %v3419_v18 = vunpack.c.l.s8.bf16 %v2475_v8  ;;  %v2523_v61 = vld [vmem:[%s11296_s3 + $0xf18] sm:$0xff] }
 0x232   :  { %v2036_v53 = vmax.f32 %v7730_v10, 0.0  ;;  %v1948_v23 = vpop.f32.mrb[7].mxu0  ;;  %3696 = vmatprep.subr.bf16.mxu0 %v3305_v34  ;;  %3860 = vmatprep.subr.bf16.mxu1 %v3307_v5  ;;  %v2030_v63 = vpop.f32.mrb[7].mxu1  ;;  %v3384_v4 = vunpack.c.l.s8.bf16 %v2456_v2  ;;  %v3386_v34 = vunpack.c.l.s8.bf16 %v2458_v3  ;;  %v3401_v5 = vunpack.c.h.s8.bf16 %v2457_v60  ;;  %v2472_v14 = vld [vmem:[%s11296_s3 + $0xd80] sm:$0xff]  ;;  %v2521_v60 = vld [vmem:[%s11296_s3 + $0xf08] sm:$0xff] }
 0x233   :  { %v2037_v30 = vmax.f32 %v7731_v17, 0.0  ;;  %v2039_v31 = vmax.f32 %v7733_v21, 0.0  ;;  %v3400_v10 = vunpack.c.h.s8.bf16 %v2456_v2  ;;  %v3402_v12 = vunpack.c.h.s8.bf16 %v2458_v3  ;;  %v2489_v23 = vld [vmem:[%s11296_s3 + $0xe08] sm:$0xff]  ;;  %v2488_v63 = vld [vmem:[%s11296_s3 + $0xe00] sm:$0xff]  ;;  %v2522_v3 = vld [vmem:[%s11296_s3 + $0xf10] sm:$0xff] }
 0x234   :  { %v9433_v38 = vpack.c.bf16 %v2036_v53, %v2036_v53  ;;  %v3417_v17 = vunpack.c.l.s8.bf16 %v2473_v7  ;;  %v3433_v21 = vunpack.c.h.s8.bf16 %v2473_v7  ;;  %v3435_v22 = vunpack.c.h.s8.bf16 %v2475_v8  ;;  %v2520_v2 = vld [vmem:[%s11296_s3 + $0xf00] sm:$0xff]  ;;  %v2537_v8 = vld [vmem:[%s11296_s3 + $0xf88] sm:$0xff] }
 0x235   :  { %v9431_v32 = vpack.c.bf16 %v2037_v30, %v2037_v30  ;;  %3697 = vmatpush1.bf16.msra.mxu0 %v3304_v19  ;;  %3861 = vmatpush1.bf16.msra.mxu1 %v3306_v20  ;;  %v9443_v15 = vpack.c.bf16 %v2039_v31, %v2039_v31  ;;  %v2474_v19 = vld [vmem:[%s11296_s3 + $0xd90] sm:$0xff]  ;;  %v3416_v20 = vunpack.c.l.s8.bf16 %v2472_v14  ;;  %v3449_v29 = vunpack.c.l.s8.bf16 %v2489_v23 }
 0x236   :  { %3707 = vmatprep.subr.bf16.mxu0 %v3321_v25  ;;  %3871 = vmatprep.subr.bf16.mxu1 %v3323_v26  ;;  %v3418_v53 = vunpack.c.l.s8.bf16 %v2474_v19  ;;  %v2491_v25 = vld [vmem:[%s11296_s3 + $0xe18] sm:$0xff]  ;;  %v3432_v26 = vunpack.c.h.s8.bf16 %v2472_v14  ;;  %v3434_v28 = vunpack.c.h.s8.bf16 %v2474_v19  ;;  %v2490_v31 = vld [vmem:[%s11296_s3 + $0xe10] sm:$0xff]  ;;  %v3531_v7 = vunpack.c.h.s8.bf16 %v2523_v61 }
 0x237   :  { %3698 = vmatprep.mubr.bf16.mxu0 %v9431_v32  ;;  %3862 = vmatprep.mubr.bf16.mxu1 %v9431_v32  ;;  %v3451_v30 = vunpack.c.l.s8.bf16 %v2491_v25  ;;  %v3545_v14 = vunpack.c.l.s8.bf16 %v2537_v8 }
 0x238   :  { %3699 = vmatmul.mubr.bf16.vlgmr.msra.gmra.mrb[8].mxu0 %v9433_v38  ;;  %3863 = vmatmul.mubr.bf16.vlgmr.msra.gmra.mrb[8].mxu1 %v9433_v38 }
 0x239   :  { %3708 = vmatpush1.bf16.msra.mxu0 %v3320_v33  ;;  %3872 = vmatpush1.bf16.msra.mxu1 %v3322_v35  ;;  %v3448_v33 = vunpack.c.l.s8.bf16 %v2488_v63  ;;  %v3450_v35 = vunpack.c.l.s8.bf16 %v2490_v31 }
 0x23a   :  { %3739 = vmatprep.mubr.bf16.mxu0 %v9443_v15  ;;  %3903 = vmatprep.mubr.bf16.mxu1 %v9443_v15 }
 0x23b   :  { %3709 = vmatprep.subr.bf16.mxu0 %v3337_v39  ;;  %3873 = vmatprep.subr.bf16.mxu1 %v3339_v41  ;;  %v3465_v39 = vunpack.c.h.s8.bf16 %v2489_v23  ;;  %v3467_v41 = vunpack.c.h.s8.bf16 %v2491_v25  ;;  %v3561_v25 = vunpack.c.h.s8.bf16 %v2537_v8 }
 0x23d   :  { %3710 = vmatpush1.bf16.msra.mxu0 %v3336_v46  ;;  %3874 = vmatpush1.bf16.msra.mxu1 %v3338_v47  ;;  %v3464_v46 = vunpack.c.h.s8.bf16 %v2488_v63  ;;  %v3466_v47 = vunpack.c.h.s8.bf16 %v2490_v31 }
 0x23e   :  { %3711 = vmatprep.subr.bf16.mxu0 %v3353_v48  ;;  %3875 = vmatprep.subr.bf16.mxu1 %v3355_v49  ;;  %v3481_v48 = vunpack.c.l.s8.bf16 %v2505_v42  ;;  %v3483_v49 = vunpack.c.l.s8.bf16 %v2507_v43 }
 0x241   :  { %3712 = vmatpush1.bf16.msra.mxu0 %v3352_v52  ;;  %3876 = vmatpush1.bf16.msra.mxu1 %v3354_v54  ;;  %v3480_v52 = vunpack.c.l.s8.bf16 %v2504_v50  ;;  %v3482_v54 = vunpack.c.l.s8.bf16 %v2506_v51 }
 0x242   :  { %3713 = vmatprep.subr.bf16.mxu0 %v3369_v56  ;;  %3877 = vmatprep.subr.bf16.mxu1 %v3371_v57  ;;  %v3497_v56 = vunpack.c.h.s8.bf16 %v2505_v42  ;;  %v3499_v57 = vunpack.c.h.s8.bf16 %v2507_v43 }
 0x245   :  { %3714 = vmatpush1.bf16.msra.mxu0 %v3368_v9  ;;  %3878 = vmatpush1.bf16.msra.mxu1 %v3370_v62  ;;  %v3496_v9 = vunpack.c.h.s8.bf16 %v2504_v50  ;;  %v3498_v62 = vunpack.c.h.s8.bf16 %v2506_v51 }
 0x246   :  { %3715 = vmatprep.subr.bf16.mxu0 %v3385_v0  ;;  %3879 = vmatprep.subr.bf16.mxu1 %v3387_v1  ;;  %v3513_v0 = vunpack.c.l.s8.bf16 %v2521_v60  ;;  %v3515_v1 = vunpack.c.l.s8.bf16 %v2523_v61 }
 0x249   :  { %3716 = vmatpush1.bf16.msra.mxu0 %v3384_v4  ;;  %3880 = vmatpush1.bf16.msra.mxu1 %v3386_v34  ;;  %v3512_v4 = vunpack.c.l.s8.bf16 %v2520_v2  ;;  %v3514_v34 = vunpack.c.l.s8.bf16 %v2522_v3 }
 0x24a   :  { %3717 = vmatprep.subr.bf16.mxu0 %v3401_v5  ;;  %3881 = vmatprep.subr.bf16.mxu1 %v3403_v6  ;;  %v9516_v5 = vsub.s32 6, %v8323_v44  ;;  %v3529_v6 = vunpack.c.h.s8.bf16 %v2521_v60 }
 0x24d   :  { %3718 = vmatpush1.bf16.msra.mxu0 %v3400_v10  ;;  %3882 = vmatpush1.bf16.msra.mxu1 %v3402_v12  ;;  %v2539_v10 = vld [vmem:[%s11296_s3 + $0xf98] sm:$0xff]  ;;  %v3528_v12 = vunpack.c.h.s8.bf16 %v2520_v2 }
 0x24e   :  { %3719 = vmatprep.subr.bf16.mxu0 %v3417_v17  ;;  %3883 = vmatprep.subr.bf16.mxu1 %v3419_v18  ;;  %v3530_v17 = vunpack.c.h.s8.bf16 %v2522_v3  ;;  %v8000_v18 = vld [vmem:[#allocation4] sm:$0xff]  ;;  %v3547_v19 = vunpack.c.l.s8.bf16 %v2539_v10 }
 0x24f   :  { %v411_v44 = vrot.slane %v8000_v18, %v9516_v5  ;;  %v2093_v18 = vld [vmem:[%s11296_s3 + $0x1a8] sm:$0xff] }
 0x251   :  { %3720 = vmatpush1.bf16.msra.mxu0 %v3416_v20  ;;  %3884 = vmatpush1.bf16.msra.mxu1 %v3418_v53  ;;  %v2536_v20 = vld [vmem:[%s11296_s3 + $0xf80] sm:$0xff]  ;;  %v2538_v53 = vld [vmem:[%s11296_s3 + $0xf90] sm:$0xff]  ;;  %v7732_v23 = vadd.f32 %v9423_v11, %v411_v44  ;;  %v2095_v44 = vld [vmem:[%s11296_s3 + $0x1b8] sm:$0xff] }
 0x252   :  { %3721 = vmatprep.subr.bf16.mxu0 %v3433_v21  ;;  %3885 = vmatprep.subr.bf16.mxu1 %v3435_v22  ;;  %v3544_v21 = vunpack.c.l.s8.bf16 %v2536_v20  ;;  %v3546_v22 = vunpack.c.l.s8.bf16 %v2538_v53  ;;  %v3562_v63 = vunpack.c.h.s8.bf16 %v2538_v53  ;;  %v2092_v53 = vld [vmem:[%s11296_s3 + $0x1a0] sm:$0xff] }
 0x253   :  { %v2038_v31 = vmax.f32 %v7732_v23, 0.0  ;;  %v2652_v23 = vunpack.c.l.s8.bf16 %v2092_v53 }
 0x255   :  { %3722 = vmatpush1.bf16.msra.mxu0 %v3432_v26  ;;  %3886 = vmatpush1.bf16.msra.mxu1 %v3434_v28  ;;  %v3563_v26 = vunpack.c.h.s8.bf16 %v2539_v10  ;;  %v2045_v28 = vld [vmem:[%s11296_s3 + $0x28] sm:$0xff]  ;;  %v9544_v42 = vpack.c.bf16 %v2038_v31, %v2038_v31 }
 0x256   :  { %3723 = vmatprep.subr.bf16.mxu0 %v3449_v29  ;;  %3887 = vmatprep.subr.bf16.mxu1 %v3451_v30  ;;  %v2047_v29 = vld [vmem:[%s11296_s3 + $0x38] sm:$0xff]  ;;  %v3560_v30 = vunpack.c.h.s8.bf16 %v2536_v20  ;;  %v2557_v11 = vunpack.c.l.s8.bf16 %v2045_v28  ;;  %v2653_v20 = vunpack.c.l.s8.bf16 %v2093_v18 }
 0x259   :  { %3724 = vmatpush1.bf16.msra.mxu0 %v3448_v33  ;;  %3888 = vmatpush1.bf16.msra.mxu1 %v3450_v35  ;;  %v2559_v33 = vunpack.c.l.s8.bf16 %v2047_v29  ;;  %v2044_v35 = vld [vmem:[%s11296_s3 + $0x20] sm:$0xff] }
 0x25a   :  { %3725 = vmatprep.subr.bf16.mxu0 %v3465_v39  ;;  %3889 = vmatprep.subr.bf16.mxu1 %v3467_v41  ;;  %v2046_v39 = vld [vmem:[%s11296_s3 + $0x30] sm:$0xff]  ;;  %v2556_v41 = vunpack.c.l.s8.bf16 %v2044_v35  ;;  %v2572_v50 = vunpack.c.h.s8.bf16 %v2044_v35 }
 0x25b   :  { %v2558_v43 = vunpack.c.l.s8.bf16 %v2046_v39  ;;  %v2574_v51 = vunpack.c.h.s8.bf16 %v2046_v39  ;;  %v2110_v39 = vld [vmem:[%s11296_s3 + $0x230] sm:$0xff] }
 0x25d   :  { %3726 = vmatpush1.bf16.msra.mxu0 %v3464_v46  ;;  %3890 = vmatpush1.bf16.msra.mxu1 %v3466_v47  ;;  %v2573_v46 = vunpack.c.h.s8.bf16 %v2045_v28  ;;  %v2575_v47 = vunpack.c.h.s8.bf16 %v2047_v29  ;;  %v2671_v28 = vunpack.c.h.s8.bf16 %v2095_v44  ;;  %v2109_v29 = vld [vmem:[%s11296_s3 + $0x228] sm:$0xff] }
 0x25e   :  { %3727 = vmatprep.subr.bf16.mxu0 %v3481_v48  ;;  %3891 = vmatprep.subr.bf16.mxu1 %v3483_v49  ;;  %v2061_v48 = vld [vmem:[%s11296_s3 + $0xa8] sm:$0xff]  ;;  %v2063_v49 = vld [vmem:[%s11296_s3 + $0xb8] sm:$0xff] }
 0x261   :  { %3728 = vmatpush1.bf16.msra.mxu0 %v3480_v52  ;;  %3892 = vmatpush1.bf16.msra.mxu1 %v3482_v54  ;;  %v2589_v52 = vunpack.c.l.s8.bf16 %v2061_v48  ;;  %v2060_v54 = vld [vmem:[%s11296_s3 + $0xa0] sm:$0xff] }
 0x262   :  { %3729 = vmatprep.subr.bf16.mxu0 %v3497_v56  ;;  %3893 = vmatprep.subr.bf16.mxu1 %v3499_v57  ;;  %v2591_v56 = vunpack.c.l.s8.bf16 %v2063_v49  ;;  %v2062_v57 = vld [vmem:[%s11296_s3 + $0xb0] sm:$0xff]  ;;  %v2588_v60 = vunpack.c.l.s8.bf16 %v2060_v54  ;;  %v2604_v2 = vunpack.c.h.s8.bf16 %v2060_v54  ;;  %v2124_v54 = vld [vmem:[%s11296_s3 + $0x2a0] sm:$0xff] }
 0x263   :  { %v2590_v61 = vunpack.c.l.s8.bf16 %v2062_v57  ;;  %v2606_v3 = vunpack.c.h.s8.bf16 %v2062_v57  ;;  %v2126_v57 = vld [vmem:[%s11296_s3 + $0x2b0] sm:$0xff] }
 0x265   :  { %3730 = vmatpush1.bf16.msra.mxu0 %v3496_v9  ;;  %3894 = vmatpush1.bf16.msra.mxu1 %v3498_v62  ;;  %v2605_v9 = vunpack.c.h.s8.bf16 %v2061_v48  ;;  %v2607_v62 = vunpack.c.h.s8.bf16 %v2063_v49  ;;  %v2125_v48 = vld [vmem:[%s11296_s3 + $0x2a8] sm:$0xff]  ;;  %v2127_v49 = vld [vmem:[%s11296_s3 + $0x2b8] sm:$0xff] }
 0x266   :  { %3731 = vmatprep.subr.bf16.mxu0 %v3513_v0  ;;  %3895 = vmatprep.subr.bf16.mxu1 %v3515_v1  ;;  %v2077_v0 = vld [vmem:[%s11296_s3 + $0x128] sm:$0xff]  ;;  %v2079_v1 = vld [vmem:[%s11296_s3 + $0x138] sm:$0xff] }
 0x269   :  { %3732 = vmatpush1.bf16.msra.mxu0 %v3512_v4  ;;  %3896 = vmatpush1.bf16.msra.mxu1 %v3514_v34  ;;  %v2621_v4 = vunpack.c.l.s8.bf16 %v2077_v0  ;;  %v2076_v34 = vld [vmem:[%s11296_s3 + $0x120] sm:$0xff] }
 0x26a   :  { %3733 = vmatprep.subr.bf16.mxu0 %v3529_v6  ;;  %3897 = vmatprep.subr.bf16.mxu1 %v3531_v7  ;;  %v2623_v6 = vunpack.c.l.s8.bf16 %v2079_v1  ;;  %v2078_v7 = vld [vmem:[%s11296_s3 + $0x130] sm:$0xff]  ;;  %v2620_v8 = vunpack.c.l.s8.bf16 %v2076_v34 }
 0x26b   :  { %v2622_v10 = vunpack.c.l.s8.bf16 %v2078_v7 }
 0x26d   :  { %3734 = vmatpush1.bf16.msra.mxu0 %v3528_v12  ;;  %3898 = vmatpush1.bf16.msra.mxu1 %v3530_v17  ;;  %v2637_v12 = vunpack.c.h.s8.bf16 %v2077_v0  ;;  %v2639_v17 = vunpack.c.h.s8.bf16 %v2079_v1  ;;  %v2141_v0 = vld [vmem:[%s11296_s3 + $0x328] sm:$0xff]  ;;  %v2143_v1 = vld [vmem:[%s11296_s3 + $0x338] sm:$0xff] }
 0x26e   :  { %3735 = vmatprep.subr.bf16.mxu0 %v3545_v14  ;;  %3899 = vmatprep.subr.bf16.mxu1 %v3547_v19  ;;  %v2636_v14 = vunpack.c.h.s8.bf16 %v2076_v34  ;;  %v2638_v19 = vunpack.c.h.s8.bf16 %v2078_v7  ;;  %v2140_v34 = vld [vmem:[%s11296_s3 + $0x320] sm:$0xff]  ;;  %v2142_v7 = vld [vmem:[%s11296_s3 + $0x330] sm:$0xff] }
 0x271   :  { %3736 = vmatpush1.bf16.msra.mxu0 %v3544_v21  ;;  %3900 = vmatpush1.bf16.msra.mxu1 %v3546_v22  ;;  %v2655_v21 = vunpack.c.l.s8.bf16 %v2095_v44  ;;  %v2094_v22 = vld [vmem:[%s11296_s3 + $0x1b0] sm:$0xff]  ;;  %v2159_v44 = vld [vmem:[%s11296_s3 + $0x3b8] sm:$0xff] }
 0x272   :  { %3737 = vmatprep.subr.bf16.mxu0 %v3561_v25  ;;  %3901 = vmatprep.subr.bf16.mxu1 %v3563_v26  ;;  %v2654_v25 = vunpack.c.l.s8.bf16 %v2094_v22  ;;  %v2669_v26 = vunpack.c.h.s8.bf16 %v2093_v18  ;;  %v2670_v31 = vunpack.c.h.s8.bf16 %v2094_v22  ;;  %v2157_v18 = vld [vmem:[%s11296_s3 + $0x3a8] sm:$0xff]  ;;  %v2158_v22 = vld [vmem:[%s11296_s3 + $0x3b0] sm:$0xff] }
 0x275   :  { %3738 = vmatpush1.bf16.msra.mxu0 %v3560_v30  ;;  %3902 = vmatpush1.bf16.msra.mxu1 %v3562_v63  ;;  %v2111_v30 = vld [vmem:[%s11296_s3 + $0x238] sm:$0xff]  ;;  %v2668_v63 = vunpack.c.h.s8.bf16 %v2092_v53  ;;  %v2156_v53 = vld [vmem:[%s11296_s3 + $0x3a0] sm:$0xff] }
 0x276   :  { %3912 = vmatprep.subr.bf16.mxu0 %v2557_v11  ;;  %4076 = vmatprep.subr.bf16.mxu1 %v2559_v33  ;;  %v2685_v11 = vunpack.c.l.s8.bf16 %v2109_v29  ;;  %v2108_v33 = vld [vmem:[%s11296_s3 + $0x220] sm:$0xff]  ;;  %v2687_v35 = vunpack.c.l.s8.bf16 %v2111_v30 }
 0x278   :  { %3740 = vmatmul.mubr.bf16.vlgmr.msra.gmra.mrb[8].mxu0 %v9544_v42  ;;  %3904 = vmatmul.mubr.bf16.vlgmr.msra.gmra.mrb[8].mxu1 %v9544_v42 }
 0x279   :  { %3913 = vmatpush1.bf16.msra.mxu0 %v2556_v41  ;;  %3944 = vmatprep.mubr.bf16.mxu0 %v9200_v36  ;;  %v2684_v41 = vunpack.c.l.s8.bf16 %v2108_v33 }
 0x27a   :  { %4077 = vmatpush1.bf16.msra.mxu1 %v2558_v43  ;;  %4108 = vmatprep.mubr.bf16.mxu1 %v9200_v36  ;;  %v2686_v43 = vunpack.c.l.s8.bf16 %v2110_v39 }
 0x27b   :  { %3914 = vmatprep.subr.bf16.mxu0 %v2573_v46  ;;  %4078 = vmatprep.subr.bf16.mxu1 %v2575_v47  ;;  %v2701_v46 = vunpack.c.h.s8.bf16 %v2109_v29  ;;  %v2703_v47 = vunpack.c.h.s8.bf16 %v2111_v30  ;;  %v2173_v29 = vld [vmem:[%s11296_s3 + $0x428] sm:$0xff]  ;;  %v2175_v30 = vld [vmem:[%s11296_s3 + $0x438] sm:$0xff] }
 0x27d   :  { %3915 = vmatpush1.bf16.msra.mxu0 %v2572_v50  ;;  %v2700_v50 = vunpack.c.h.s8.bf16 %v2108_v33  ;;  %v2172_v33 = vld [vmem:[%s11296_s3 + $0x420] sm:$0xff] }
 0x27e   :  { %4079 = vmatpush1.bf16.msra.mxu1 %v2574_v51  ;;  %3916 = vmatprep.subr.bf16.mxu0 %v2589_v52  ;;  %v2702_v51 = vunpack.c.h.s8.bf16 %v2110_v39  ;;  %v2717_v52 = vunpack.c.l.s8.bf16 %v2125_v48  ;;  %v2174_v39 = vld [vmem:[%s11296_s3 + $0x430] sm:$0xff] }
 0x27f   :  { %4080 = vmatprep.subr.bf16.mxu1 %v2591_v56  ;;  %v2719_v56 = vunpack.c.l.s8.bf16 %v2127_v49 }
 0x281   :  { %3917 = vmatpush1.bf16.msra.mxu0 %v2588_v60  ;;  %v2716_v60 = vunpack.c.l.s8.bf16 %v2124_v54 }
 0x282   :  { %4081 = vmatpush1.bf16.msra.mxu1 %v2590_v61  ;;  %3918 = vmatprep.subr.bf16.mxu0 %v2605_v9  ;;  %v2718_v61 = vunpack.c.l.s8.bf16 %v2126_v57  ;;  %v2733_v9 = vunpack.c.h.s8.bf16 %v2125_v48  ;;  %v2831_v48 = vunpack.c.h.s8.bf16 %v2175_v30 }
 0x283   :  { %4082 = vmatprep.subr.bf16.mxu1 %v2607_v62  ;;  %v2735_v62 = vunpack.c.h.s8.bf16 %v2127_v49  ;;  %v2191_v49 = vld [vmem:[%s11296_s3 + $0x4b8] sm:$0xff] }
 0x285   :  { %3919 = vmatpush1.bf16.msra.mxu0 %v2604_v2  ;;  %v2732_v2 = vunpack.c.h.s8.bf16 %v2124_v54  ;;  %v2188_v54 = vld [vmem:[%s11296_s3 + $0x4a0] sm:$0xff] }
 0x286   :  { %4083 = vmatpush1.bf16.msra.mxu1 %v2606_v3  ;;  %3920 = vmatprep.subr.bf16.mxu0 %v2621_v4  ;;  %v2734_v3 = vunpack.c.h.s8.bf16 %v2126_v57  ;;  %v2749_v4 = vunpack.c.l.s8.bf16 %v2141_v0  ;;  %v2190_v57 = vld [vmem:[%s11296_s3 + $0x4b0] sm:$0xff] }
 0x287   :  { %4084 = vmatprep.subr.bf16.mxu1 %v2623_v6  ;;  %v2751_v6 = vunpack.c.l.s8.bf16 %v2143_v1 }
 0x289   :  { %3921 = vmatpush1.bf16.msra.mxu0 %v2620_v8  ;;  %v2748_v8 = vunpack.c.l.s8.bf16 %v2140_v34 }
 0x28a   :  { %4085 = vmatpush1.bf16.msra.mxu1 %v2622_v10  ;;  %3922 = vmatprep.subr.bf16.mxu0 %v2637_v12  ;;  %v2750_v10 = vunpack.c.l.s8.bf16 %v2142_v7  ;;  %v2765_v12 = vunpack.c.h.s8.bf16 %v2141_v0  ;;  %v2205_v0 = vld [vmem:[%s11296_s3 + $0x528] sm:$0xff] }
 0x28b   :  { %4086 = vmatprep.subr.bf16.mxu1 %v2639_v17  ;;  %v2767_v17 = vunpack.c.h.s8.bf16 %v2143_v1  ;;  %v2207_v1 = vld [vmem:[%s11296_s3 + $0x538] sm:$0xff] }
 0x28d   :  { %3923 = vmatpush1.bf16.msra.mxu0 %v2636_v14  ;;  %v2764_v14 = vunpack.c.h.s8.bf16 %v2140_v34  ;;  %v2204_v34 = vld [vmem:[%s11296_s3 + $0x520] sm:$0xff] }
 0x28e   :  { %4087 = vmatpush1.bf16.msra.mxu1 %v2638_v19  ;;  %3924 = vmatprep.subr.bf16.mxu0 %v2653_v20  ;;  %v2766_v19 = vunpack.c.h.s8.bf16 %v2142_v7  ;;  %v2781_v20 = vunpack.c.l.s8.bf16 %v2157_v18  ;;  %v2206_v7 = vld [vmem:[%s11296_s3 + $0x530] sm:$0xff] }
 0x28f   :  { %4088 = vmatprep.subr.bf16.mxu1 %v2655_v21  ;;  %v2783_v21 = vunpack.c.l.s8.bf16 %v2159_v44 }
 0x291   :  { %3925 = vmatpush1.bf16.msra.mxu0 %v2652_v23  ;;  %v2780_v23 = vunpack.c.l.s8.bf16 %v2156_v53 }
 0x292   :  { %4089 = vmatpush1.bf16.msra.mxu1 %v2654_v25  ;;  %3926 = vmatprep.subr.bf16.mxu0 %v2669_v26  ;;  %v2782_v25 = vunpack.c.l.s8.bf16 %v2158_v22  ;;  %v2797_v26 = vunpack.c.h.s8.bf16 %v2157_v18  ;;  %v2221_v18 = vld [vmem:[%s11296_s3 + $0x5a8] sm:$0xff] }
 0x293   :  { %4090 = vmatprep.subr.bf16.mxu1 %v2671_v28  ;;  %v2799_v28 = vunpack.c.h.s8.bf16 %v2159_v44  ;;  %v2223_v44 = vld [vmem:[%s11296_s3 + $0x5b8] sm:$0xff] }
 0x295   :  { %3927 = vmatpush1.bf16.msra.mxu0 %v2668_v63  ;;  %v2796_v63 = vunpack.c.h.s8.bf16 %v2156_v53  ;;  %v2220_v53 = vld [vmem:[%s11296_s3 + $0x5a0] sm:$0xff] }
 0x296   :  { %4091 = vmatpush1.bf16.msra.mxu1 %v2670_v31  ;;  %3928 = vmatprep.subr.bf16.mxu0 %v2685_v11  ;;  %v2798_v31 = vunpack.c.h.s8.bf16 %v2158_v22  ;;  %v2813_v11 = vunpack.c.l.s8.bf16 %v2173_v29  ;;  %v2222_v22 = vld [vmem:[%s11296_s3 + $0x5b0] sm:$0xff] }
 0x297   :  { %4092 = vmatprep.subr.bf16.mxu1 %v2687_v35  ;;  %v2815_v35 = vunpack.c.l.s8.bf16 %v2175_v30  ;;  %v2239_v30 = vld [vmem:[%s11296_s3 + $0x638] sm:$0xff] }
 0x299   :  { %3929 = vmatpush1.bf16.msra.mxu0 %v2684_v41  ;;  %v2812_v41 = vunpack.c.l.s8.bf16 %v2172_v33 }
 0x29a   :  { %4093 = vmatpush1.bf16.msra.mxu1 %v2686_v43  ;;  %3930 = vmatprep.subr.bf16.mxu0 %v2701_v46  ;;  %v2814_v43 = vunpack.c.l.s8.bf16 %v2174_v39  ;;  %v2829_v46 = vunpack.c.h.s8.bf16 %v2173_v29  ;;  %v2237_v29 = vld [vmem:[%s11296_s3 + $0x628] sm:$0xff] }
 0x29b   :  { %4094 = vmatprep.subr.bf16.mxu1 %v2703_v47  ;;  %v2189_v47 = vld [vmem:[%s11296_s3 + $0x4a8] sm:$0xff] }
 0x29d   :  { %3931 = vmatpush1.bf16.msra.mxu0 %v2700_v50  ;;  %v2828_v50 = vunpack.c.h.s8.bf16 %v2172_v33  ;;  %v2236_v33 = vld [vmem:[%s11296_s3 + $0x620] sm:$0xff] }
 0x29e   :  { %4095 = vmatpush1.bf16.msra.mxu1 %v2702_v51  ;;  %3932 = vmatprep.subr.bf16.mxu0 %v2717_v52  ;;  %v2830_v51 = vunpack.c.h.s8.bf16 %v2174_v39  ;;  %v2845_v52 = vunpack.c.l.s8.bf16 %v2189_v47  ;;  %v2238_v39 = vld [vmem:[%s11296_s3 + $0x630] sm:$0xff] }
 0x29f   :  { %4096 = vmatprep.subr.bf16.mxu1 %v2719_v56  ;;  %v2847_v56 = vunpack.c.l.s8.bf16 %v2191_v49 }
 0x2a1   :  { %3933 = vmatpush1.bf16.msra.mxu0 %v2716_v60  ;;  %v2844_v60 = vunpack.c.l.s8.bf16 %v2188_v54 }
 0x2a2   :  { %4097 = vmatpush1.bf16.msra.mxu1 %v2718_v61  ;;  %3934 = vmatprep.subr.bf16.mxu0 %v2733_v9  ;;  %v2846_v61 = vunpack.c.l.s8.bf16 %v2190_v57  ;;  %v2861_v9 = vunpack.c.h.s8.bf16 %v2189_v47  ;;  %v2959_v47 = vunpack.c.h.s8.bf16 %v2239_v30 }
 0x2a3   :  { %4098 = vmatprep.subr.bf16.mxu1 %v2735_v62  ;;  %v2863_v62 = vunpack.c.h.s8.bf16 %v2191_v49  ;;  %v2255_v49 = vld [vmem:[%s11296_s3 + $0x6b8] sm:$0xff] }
 0x2a5   :  { %3935 = vmatpush1.bf16.msra.mxu0 %v2732_v2  ;;  %v2860_v2 = vunpack.c.h.s8.bf16 %v2188_v54  ;;  %v2252_v54 = vld [vmem:[%s11296_s3 + $0x6a0] sm:$0xff] }
 0x2a6   :  { %4099 = vmatpush1.bf16.msra.mxu1 %v2734_v3  ;;  %3936 = vmatprep.subr.bf16.mxu0 %v2749_v4  ;;  %v2862_v3 = vunpack.c.h.s8.bf16 %v2190_v57  ;;  %v2877_v4 = vunpack.c.l.s8.bf16 %v2205_v0  ;;  %v2254_v57 = vld [vmem:[%s11296_s3 + $0x6b0] sm:$0xff] }
 0x2a7   :  { %4100 = vmatprep.subr.bf16.mxu1 %v2751_v6  ;;  %v2879_v6 = vunpack.c.l.s8.bf16 %v2207_v1 }
 0x2a9   :  { %3937 = vmatpush1.bf16.msra.mxu0 %v2748_v8  ;;  %v2876_v8 = vunpack.c.l.s8.bf16 %v2204_v34 }
 0x2aa   :  { %4101 = vmatpush1.bf16.msra.mxu1 %v2750_v10  ;;  %3938 = vmatprep.subr.bf16.mxu0 %v2765_v12  ;;  %v2878_v10 = vunpack.c.l.s8.bf16 %v2206_v7  ;;  %v2893_v12 = vunpack.c.h.s8.bf16 %v2205_v0  ;;  %v2269_v0 = vld [vmem:[%s11296_s3 + $0x728] sm:$0xff] }
 0x2ab   :  { %4102 = vmatprep.subr.bf16.mxu1 %v2767_v17  ;;  %v2895_v17 = vunpack.c.h.s8.bf16 %v2207_v1  ;;  %v2271_v1 = vld [vmem:[%s11296_s3 + $0x738] sm:$0xff] }
 0x2ad   :  { %3939 = vmatpush1.bf16.msra.mxu0 %v2764_v14  ;;  %v2892_v14 = vunpack.c.h.s8.bf16 %v2204_v34  ;;  %v2268_v34 = vld [vmem:[%s11296_s3 + $0x720] sm:$0xff] }
 0x2ae   :  { %4103 = vmatpush1.bf16.msra.mxu1 %v2766_v19  ;;  %3940 = vmatprep.subr.bf16.mxu0 %v2781_v20  ;;  %v2894_v19 = vunpack.c.h.s8.bf16 %v2206_v7  ;;  %v2909_v20 = vunpack.c.l.s8.bf16 %v2221_v18  ;;  %v2270_v7 = vld [vmem:[%s11296_s3 + $0x730] sm:$0xff] }
 0x2af   :  { %4104 = vmatprep.subr.bf16.mxu1 %v2783_v21  ;;  %v2911_v21 = vunpack.c.l.s8.bf16 %v2223_v44 }
 0x2b1   :  { %3941 = vmatpush1.bf16.msra.mxu0 %v2780_v23  ;;  %v2908_v23 = vunpack.c.l.s8.bf16 %v2220_v53 }
 0x2b2   :  { %4105 = vmatpush1.bf16.msra.mxu1 %v2782_v25  ;;  %3942 = vmatprep.subr.bf16.mxu0 %v2797_v26  ;;  %v2910_v25 = vunpack.c.l.s8.bf16 %v2222_v22  ;;  %v2925_v26 = vunpack.c.h.s8.bf16 %v2221_v18  ;;  %v2285_v18 = vld [vmem:[%s11296_s3 + $0x7a8] sm:$0xff] }
 0x2b3   :  { %4106 = vmatprep.subr.bf16.mxu1 %v2799_v28  ;;  %v2927_v28 = vunpack.c.h.s8.bf16 %v2223_v44  ;;  %v2287_v44 = vld [vmem:[%s11296_s3 + $0x7b8] sm:$0xff] }
 0x2b5   :  { %3943 = vmatpush1.bf16.msra.mxu0 %v2796_v63  ;;  %v2924_v63 = vunpack.c.h.s8.bf16 %v2220_v53  ;;  %v2284_v53 = vld [vmem:[%s11296_s3 + $0x7a0] sm:$0xff] }
 0x2b6   :  { %4107 = vmatpush1.bf16.msra.mxu1 %v2798_v31  ;;  %3953 = vmatprep.subr.bf16.mxu0 %v2813_v11  ;;  %v2926_v31 = vunpack.c.h.s8.bf16 %v2222_v22  ;;  %v2941_v11 = vunpack.c.l.s8.bf16 %v2237_v29  ;;  %v2286_v22 = vld [vmem:[%s11296_s3 + $0x7b0] sm:$0xff] }
 0x2b7   :  { %4117 = vmatprep.subr.bf16.mxu1 %v2815_v35  ;;  %v2943_v35 = vunpack.c.l.s8.bf16 %v2239_v30  ;;  %v2303_v30 = vld [vmem:[%s11296_s3 + $0x838] sm:$0xff] }
 0x2b8   :  { %3945 = vmatmul.mubr.bf16.vlgmr.msra.gmra.mrb[12].mxu0 %v9202_v40 }
 0x2b9   :  { %4109 = vmatmul.mubr.bf16.vlgmr.msra.gmra.mrb[12].mxu1 %v9202_v40  ;;  %3954 = vmatpush1.bf16.msra.mxu0 %v2812_v41  ;;  %v2940_v41 = vunpack.c.l.s8.bf16 %v2236_v33 }
 0x2ba   :  { %3985 = vmatprep.mubr.bf16.mxu0 %v9212_v45  ;;  %4118 = vmatpush1.bf16.msra.mxu1 %v2814_v43  ;;  %v2942_v43 = vunpack.c.l.s8.bf16 %v2238_v39 }
 0x2bb   :  { %4149 = vmatprep.mubr.bf16.mxu1 %v9212_v45  ;;  %3955 = vmatprep.subr.bf16.mxu0 %v2829_v46  ;;  %v2957_v46 = vunpack.c.h.s8.bf16 %v2237_v29  ;;  %v2301_v29 = vld [vmem:[%s11296_s3 + $0x828] sm:$0xff] }
 0x2bc   :  { %4119 = vmatprep.subr.bf16.mxu1 %v2831_v48  ;;  %v2253_v48 = vld [vmem:[%s11296_s3 + $0x6a8] sm:$0xff] }
 0x2bd   :  { %3956 = vmatpush1.bf16.msra.mxu0 %v2828_v50  ;;  %v2956_v50 = vunpack.c.h.s8.bf16 %v2236_v33  ;;  %v2300_v33 = vld [vmem:[%s11296_s3 + $0x820] sm:$0xff] }
 0x2be   :  { %4120 = vmatpush1.bf16.msra.mxu1 %v2830_v51  ;;  %3957 = vmatprep.subr.bf16.mxu0 %v2845_v52  ;;  %v2958_v51 = vunpack.c.h.s8.bf16 %v2238_v39  ;;  %v2973_v52 = vunpack.c.l.s8.bf16 %v2253_v48  ;;  %v2302_v39 = vld [vmem:[%s11296_s3 + $0x830] sm:$0xff] }
 0x2bf   :  { %4121 = vmatprep.subr.bf16.mxu1 %v2847_v56  ;;  %v2975_v56 = vunpack.c.l.s8.bf16 %v2255_v49 }
 0x2c1   :  { %3958 = vmatpush1.bf16.msra.mxu0 %v2844_v60  ;;  %v2972_v60 = vunpack.c.l.s8.bf16 %v2252_v54 }
 0x2c2   :  { %4122 = vmatpush1.bf16.msra.mxu1 %v2846_v61  ;;  %3959 = vmatprep.subr.bf16.mxu0 %v2861_v9  ;;  %v2974_v61 = vunpack.c.l.s8.bf16 %v2254_v57  ;;  %v2989_v9 = vunpack.c.h.s8.bf16 %v2253_v48  ;;  %v3087_v48 = vunpack.c.h.s8.bf16 %v2303_v30 }
 0x2c3   :  { %4123 = vmatprep.subr.bf16.mxu1 %v2863_v62  ;;  %v2991_v62 = vunpack.c.h.s8.bf16 %v2255_v49  ;;  %v2319_v49 = vld [vmem:[%s11296_s3 + $0x8b8] sm:$0xff] }
 0x2c5   :  { %3960 = vmatpush1.bf16.msra.mxu0 %v2860_v2  ;;  %v2988_v2 = vunpack.c.h.s8.bf16 %v2252_v54  ;;  %v2316_v54 = vld [vmem:[%s11296_s3 + $0x8a0] sm:$0xff] }
 0x2c6   :  { %4124 = vmatpush1.bf16.msra.mxu1 %v2862_v3  ;;  %3961 = vmatprep.subr.bf16.mxu0 %v2877_v4  ;;  %v2990_v3 = vunpack.c.h.s8.bf16 %v2254_v57  ;;  %v3005_v4 = vunpack.c.l.s8.bf16 %v2269_v0  ;;  %v2318_v57 = vld [vmem:[%s11296_s3 + $0x8b0] sm:$0xff] }
 0x2c7   :  { %4125 = vmatprep.subr.bf16.mxu1 %v2879_v6  ;;  %v3007_v6 = vunpack.c.l.s8.bf16 %v2271_v1 }
 0x2c9   :  { %3962 = vmatpush1.bf16.msra.mxu0 %v2876_v8  ;;  %v3004_v8 = vunpack.c.l.s8.bf16 %v2268_v34 }
 0x2ca   :  { %4126 = vmatpush1.bf16.msra.mxu1 %v2878_v10  ;;  %3963 = vmatprep.subr.bf16.mxu0 %v2893_v12  ;;  %v3006_v10 = vunpack.c.l.s8.bf16 %v2270_v7  ;;  %v3021_v12 = vunpack.c.h.s8.bf16 %v2269_v0  ;;  %v2333_v0 = vld [vmem:[%s11296_s3 + $0x928] sm:$0xff] }
 0x2cb   :  { %4127 = vmatprep.subr.bf16.mxu1 %v2895_v17  ;;  %v3023_v17 = vunpack.c.h.s8.bf16 %v2271_v1  ;;  %v2335_v1 = vld [vmem:[%s11296_s3 + $0x938] sm:$0xff] }
 0x2cd   :  { %3964 = vmatpush1.bf16.msra.mxu0 %v2892_v14  ;;  %v3020_v14 = vunpack.c.h.s8.bf16 %v2268_v34  ;;  %v2332_v34 = vld [vmem:[%s11296_s3 + $0x920] sm:$0xff] }
 0x2ce   :  { %4128 = vmatpush1.bf16.msra.mxu1 %v2894_v19  ;;  %3965 = vmatprep.subr.bf16.mxu0 %v2909_v20  ;;  %v3022_v19 = vunpack.c.h.s8.bf16 %v2270_v7  ;;  %v3037_v20 = vunpack.c.l.s8.bf16 %v2285_v18  ;;  %v2334_v7 = vld [vmem:[%s11296_s3 + $0x930] sm:$0xff] }
 0x2cf   :  { %4129 = vmatprep.subr.bf16.mxu1 %v2911_v21  ;;  %v3039_v21 = vunpack.c.l.s8.bf16 %v2287_v44 }
 0x2d1   :  { %3966 = vmatpush1.bf16.msra.mxu0 %v2908_v23  ;;  %v3036_v23 = vunpack.c.l.s8.bf16 %v2284_v53 }
 0x2d2   :  { %4130 = vmatpush1.bf16.msra.mxu1 %v2910_v25  ;;  %3967 = vmatprep.subr.bf16.mxu0 %v2925_v26  ;;  %v3038_v25 = vunpack.c.l.s8.bf16 %v2286_v22  ;;  %v3053_v26 = vunpack.c.h.s8.bf16 %v2285_v18  ;;  %v2349_v18 = vld [vmem:[%s11296_s3 + $0x9a8] sm:$0xff] }
 0x2d3   :  { %4131 = vmatprep.subr.bf16.mxu1 %v2927_v28  ;;  %v3055_v28 = vunpack.c.h.s8.bf16 %v2287_v44  ;;  %v2351_v44 = vld [vmem:[%s11296_s3 + $0x9b8] sm:$0xff] }
 0x2d5   :  { %3968 = vmatpush1.bf16.msra.mxu0 %v2924_v63  ;;  %v3052_v63 = vunpack.c.h.s8.bf16 %v2284_v53  ;;  %v2348_v53 = vld [vmem:[%s11296_s3 + $0x9a0] sm:$0xff] }
 0x2d6   :  { %4132 = vmatpush1.bf16.msra.mxu1 %v2926_v31  ;;  %3969 = vmatprep.subr.bf16.mxu0 %v2941_v11  ;;  %v3054_v31 = vunpack.c.h.s8.bf16 %v2286_v22  ;;  %v3069_v11 = vunpack.c.l.s8.bf16 %v2301_v29  ;;  %v2350_v22 = vld [vmem:[%s11296_s3 + $0x9b0] sm:$0xff] }
 0x2d7   :  { %4133 = vmatprep.subr.bf16.mxu1 %v2943_v35  ;;  %v3071_v35 = vunpack.c.l.s8.bf16 %v2303_v30  ;;  %v2367_v30 = vld [vmem:[%s11296_s3 + $0xa38] sm:$0xff] }
 0x2d9   :  { %3970 = vmatpush1.bf16.msra.mxu0 %v2940_v41  ;;  %v3068_v41 = vunpack.c.l.s8.bf16 %v2300_v33 }
 0x2da   :  { %4134 = vmatpush1.bf16.msra.mxu1 %v2942_v43  ;;  %3971 = vmatprep.subr.bf16.mxu0 %v2957_v46  ;;  %v3070_v43 = vunpack.c.l.s8.bf16 %v2302_v39  ;;  %v3085_v46 = vunpack.c.h.s8.bf16 %v2301_v29  ;;  %v2365_v29 = vld [vmem:[%s11296_s3 + $0xa28] sm:$0xff] }
 0x2db   :  { %4135 = vmatprep.subr.bf16.mxu1 %v2959_v47  ;;  %v2317_v47 = vld [vmem:[%s11296_s3 + $0x8a8] sm:$0xff] }
 0x2dd   :  { %3972 = vmatpush1.bf16.msra.mxu0 %v2956_v50  ;;  %v3084_v50 = vunpack.c.h.s8.bf16 %v2300_v33  ;;  %v2364_v33 = vld [vmem:[%s11296_s3 + $0xa20] sm:$0xff] }
 0x2de   :  { %4136 = vmatpush1.bf16.msra.mxu1 %v2958_v51  ;;  %3973 = vmatprep.subr.bf16.mxu0 %v2973_v52  ;;  %v3086_v51 = vunpack.c.h.s8.bf16 %v2302_v39  ;;  %v3101_v52 = vunpack.c.l.s8.bf16 %v2317_v47  ;;  %v2366_v39 = vld [vmem:[%s11296_s3 + $0xa30] sm:$0xff] }
 0x2df   :  { %4137 = vmatprep.subr.bf16.mxu1 %v2975_v56  ;;  %v3103_v56 = vunpack.c.l.s8.bf16 %v2319_v49 }
 0x2e1   :  { %3974 = vmatpush1.bf16.msra.mxu0 %v2972_v60  ;;  %v3100_v60 = vunpack.c.l.s8.bf16 %v2316_v54 }
 0x2e2   :  { %4138 = vmatpush1.bf16.msra.mxu1 %v2974_v61  ;;  %3975 = vmatprep.subr.bf16.mxu0 %v2989_v9  ;;  %v3102_v61 = vunpack.c.l.s8.bf16 %v2318_v57  ;;  %v3117_v9 = vunpack.c.h.s8.bf16 %v2317_v47  ;;  %v3215_v47 = vunpack.c.h.s8.bf16 %v2367_v30 }
 0x2e3   :  { %4139 = vmatprep.subr.bf16.mxu1 %v2991_v62  ;;  %v3119_v62 = vunpack.c.h.s8.bf16 %v2319_v49  ;;  %v2383_v49 = vld [vmem:[%s11296_s3 + $0xab8] sm:$0xff] }
 0x2e5   :  { %3976 = vmatpush1.bf16.msra.mxu0 %v2988_v2  ;;  %v3116_v2 = vunpack.c.h.s8.bf16 %v2316_v54  ;;  %v2380_v54 = vld [vmem:[%s11296_s3 + $0xaa0] sm:$0xff] }
 0x2e6   :  { %4140 = vmatpush1.bf16.msra.mxu1 %v2990_v3  ;;  %3977 = vmatprep.subr.bf16.mxu0 %v3005_v4  ;;  %v3118_v3 = vunpack.c.h.s8.bf16 %v2318_v57  ;;  %v3133_v4 = vunpack.c.l.s8.bf16 %v2333_v0  ;;  %v2382_v57 = vld [vmem:[%s11296_s3 + $0xab0] sm:$0xff] }
 0x2e7   :  { %4141 = vmatprep.subr.bf16.mxu1 %v3007_v6  ;;  %v3135_v6 = vunpack.c.l.s8.bf16 %v2335_v1 }
 0x2e9   :  { %3978 = vmatpush1.bf16.msra.mxu0 %v3004_v8  ;;  %v3132_v8 = vunpack.c.l.s8.bf16 %v2332_v34 }
 0x2ea   :  { %4142 = vmatpush1.bf16.msra.mxu1 %v3006_v10  ;;  %3979 = vmatprep.subr.bf16.mxu0 %v3021_v12  ;;  %v3134_v10 = vunpack.c.l.s8.bf16 %v2334_v7  ;;  %v3149_v12 = vunpack.c.h.s8.bf16 %v2333_v0  ;;  %v2397_v0 = vld [vmem:[%s11296_s3 + $0xb28] sm:$0xff] }
 0x2eb   :  { %4143 = vmatprep.subr.bf16.mxu1 %v3023_v17  ;;  %v3151_v17 = vunpack.c.h.s8.bf16 %v2335_v1  ;;  %v2399_v1 = vld [vmem:[%s11296_s3 + $0xb38] sm:$0xff] }
 0x2ed   :  { %3980 = vmatpush1.bf16.msra.mxu0 %v3020_v14  ;;  %v3148_v14 = vunpack.c.h.s8.bf16 %v2332_v34  ;;  %v2396_v34 = vld [vmem:[%s11296_s3 + $0xb20] sm:$0xff] }
 0x2ee   :  { %4144 = vmatpush1.bf16.msra.mxu1 %v3022_v19  ;;  %3981 = vmatprep.subr.bf16.mxu0 %v3037_v20  ;;  %v3150_v19 = vunpack.c.h.s8.bf16 %v2334_v7  ;;  %v3165_v20 = vunpack.c.l.s8.bf16 %v2349_v18  ;;  %v2398_v7 = vld [vmem:[%s11296_s3 + $0xb30] sm:$0xff] }
 0x2ef   :  { %4145 = vmatprep.subr.bf16.mxu1 %v3039_v21  ;;  %v3167_v21 = vunpack.c.l.s8.bf16 %v2351_v44 }
 0x2f1   :  { %3982 = vmatpush1.bf16.msra.mxu0 %v3036_v23  ;;  %v3164_v23 = vunpack.c.l.s8.bf16 %v2348_v53 }
 0x2f2   :  { %4146 = vmatpush1.bf16.msra.mxu1 %v3038_v25  ;;  %3983 = vmatprep.subr.bf16.mxu0 %v3053_v26  ;;  %v3166_v25 = vunpack.c.l.s8.bf16 %v2350_v22  ;;  %v3181_v26 = vunpack.c.h.s8.bf16 %v2349_v18  ;;  %v2413_v18 = vld [vmem:[%s11296_s3 + $0xba8] sm:$0xff] }
 0x2f3   :  { %4147 = vmatprep.subr.bf16.mxu1 %v3055_v28  ;;  %v3183_v28 = vunpack.c.h.s8.bf16 %v2351_v44  ;;  %v2415_v44 = vld [vmem:[%s11296_s3 + $0xbb8] sm:$0xff] }
 0x2f5   :  { %3984 = vmatpush1.bf16.msra.mxu0 %v3052_v63  ;;  %v3180_v63 = vunpack.c.h.s8.bf16 %v2348_v53  ;;  %v2412_v53 = vld [vmem:[%s11296_s3 + $0xba0] sm:$0xff] }
 0x2f6   :  { %4148 = vmatpush1.bf16.msra.mxu1 %v3054_v31  ;;  %3994 = vmatprep.subr.bf16.mxu0 %v3069_v11  ;;  %v3182_v31 = vunpack.c.h.s8.bf16 %v2350_v22  ;;  %v3197_v11 = vunpack.c.l.s8.bf16 %v2365_v29  ;;  %v2414_v22 = vld [vmem:[%s11296_s3 + $0xbb0] sm:$0xff] }
 0x2f7   :  { %4158 = vmatprep.subr.bf16.mxu1 %v3071_v35  ;;  %v3199_v35 = vunpack.c.l.s8.bf16 %v2367_v30  ;;  %v2431_v30 = vld [vmem:[%s11296_s3 + $0xc38] sm:$0xff] }
 0x2f8   :  { %3986 = vmatmul.mubr.bf16.vlgmr.msra.gmra.mrb[12].mxu0 %v9314_v27 }
 0x2f9   :  { %4150 = vmatmul.mubr.bf16.vlgmr.msra.gmra.mrb[12].mxu1 %v9314_v27  ;;  %3995 = vmatpush1.bf16.msra.mxu0 %v3068_v41  ;;  %v3196_v41 = vunpack.c.l.s8.bf16 %v2364_v33 }
 0x2fa   :  { %4026 = vmatprep.mubr.bf16.mxu0 %v9431_v32  ;;  %4159 = vmatpush1.bf16.msra.mxu1 %v3070_v43  ;;  %v3198_v43 = vunpack.c.l.s8.bf16 %v2366_v39 }
 0x2fb   :  { %4190 = vmatprep.mubr.bf16.mxu1 %v9431_v32  ;;  %3996 = vmatprep.subr.bf16.mxu0 %v3085_v46  ;;  %v3213_v46 = vunpack.c.h.s8.bf16 %v2365_v29  ;;  %v2429_v29 = vld [vmem:[%s11296_s3 + $0xc28] sm:$0xff] }
 0x2fc   :  { %4160 = vmatprep.subr.bf16.mxu1 %v3087_v48  ;;  %v2381_v48 = vld [vmem:[%s11296_s3 + $0xaa8] sm:$0xff] }
 0x2fd   :  { %3997 = vmatpush1.bf16.msra.mxu0 %v3084_v50  ;;  %v3212_v50 = vunpack.c.h.s8.bf16 %v2364_v33  ;;  %v2428_v33 = vld [vmem:[%s11296_s3 + $0xc20] sm:$0xff] }
 0x2fe   :  { %4161 = vmatpush1.bf16.msra.mxu1 %v3086_v51  ;;  %3998 = vmatprep.subr.bf16.mxu0 %v3101_v52  ;;  %v3214_v51 = vunpack.c.h.s8.bf16 %v2366_v39  ;;  %v3229_v52 = vunpack.c.l.s8.bf16 %v2381_v48  ;;  %v2430_v39 = vld [vmem:[%s11296_s3 + $0xc30] sm:$0xff] }
 0x2ff   :  { %4162 = vmatprep.subr.bf16.mxu1 %v3103_v56  ;;  %v3231_v56 = vunpack.c.l.s8.bf16 %v2383_v49 }
 0x301   :  { %3999 = vmatpush1.bf16.msra.mxu0 %v3100_v60  ;;  %v3228_v60 = vunpack.c.l.s8.bf16 %v2380_v54 }
 0x302   :  { %4163 = vmatpush1.bf16.msra.mxu1 %v3102_v61  ;;  %4000 = vmatprep.subr.bf16.mxu0 %v3117_v9  ;;  %v3230_v61 = vunpack.c.l.s8.bf16 %v2382_v57  ;;  %v3245_v9 = vunpack.c.h.s8.bf16 %v2381_v48  ;;  %v3343_v48 = vunpack.c.h.s8.bf16 %v2431_v30 }
 0x303   :  { %4164 = vmatprep.subr.bf16.mxu1 %v3119_v62  ;;  %v3247_v62 = vunpack.c.h.s8.bf16 %v2383_v49  ;;  %v2447_v49 = vld [vmem:[%s11296_s3 + $0xcb8] sm:$0xff] }
 0x305   :  { %4001 = vmatpush1.bf16.msra.mxu0 %v3116_v2  ;;  %v3244_v2 = vunpack.c.h.s8.bf16 %v2380_v54  ;;  %v2444_v54 = vld [vmem:[%s11296_s3 + $0xca0] sm:$0xff] }
 0x306   :  { %4165 = vmatpush1.bf16.msra.mxu1 %v3118_v3  ;;  %4002 = vmatprep.subr.bf16.mxu0 %v3133_v4  ;;  %v3246_v3 = vunpack.c.h.s8.bf16 %v2382_v57  ;;  %v3261_v4 = vunpack.c.l.s8.bf16 %v2397_v0  ;;  %v2446_v57 = vld [vmem:[%s11296_s3 + $0xcb0] sm:$0xff] }
 0x307   :  { %4166 = vmatprep.subr.bf16.mxu1 %v3135_v6  ;;  %v3263_v6 = vunpack.c.l.s8.bf16 %v2399_v1 }
 0x309   :  { %4003 = vmatpush1.bf16.msra.mxu0 %v3132_v8  ;;  %v3260_v8 = vunpack.c.l.s8.bf16 %v2396_v34 }
 0x30a   :  { %4167 = vmatpush1.bf16.msra.mxu1 %v3134_v10  ;;  %4004 = vmatprep.subr.bf16.mxu0 %v3149_v12  ;;  %v3262_v10 = vunpack.c.l.s8.bf16 %v2398_v7  ;;  %v3277_v12 = vunpack.c.h.s8.bf16 %v2397_v0  ;;  %v2461_v0 = vld [vmem:[%s11296_s3 + $0xd28] sm:$0xff] }
 0x30b   :  { %4168 = vmatprep.subr.bf16.mxu1 %v3151_v17  ;;  %v3279_v17 = vunpack.c.h.s8.bf16 %v2399_v1  ;;  %v9868_v1 = vld [vmem:[%s11296_s3 + $0xd38] sm:$0xff] }
 0x30d   :  { %4005 = vmatpush1.bf16.msra.mxu0 %v3148_v14  ;;  %v3276_v14 = vunpack.c.h.s8.bf16 %v2396_v34  ;;  %v9888_v34 = vld [vmem:[%s11298_s5] sm:$0xff] }
 0x30e   :  { %4169 = vmatpush1.bf16.msra.mxu1 %v3150_v19  ;;  %4006 = vmatprep.subr.bf16.mxu0 %v3165_v20  ;;  %v3278_v19 = vunpack.c.h.s8.bf16 %v2398_v7  ;;  %v3293_v20 = vunpack.c.l.s8.bf16 %v2413_v18  ;;  %v6479_v7 = vld [vmem:[#allocation7] sm:$0x77] }
 0x30f   :  { %4170 = vmatprep.subr.bf16.mxu1 %v3167_v21  ;;  %v3295_v21 = vunpack.c.l.s8.bf16 %v2415_v44 }
 0x311   :  { %4007 = vmatpush1.bf16.msra.mxu0 %v3164_v23  ;;  %v3292_v23 = vunpack.c.l.s8.bf16 %v2412_v53 }
 0x312   :  { %4171 = vmatpush1.bf16.msra.mxu1 %v3166_v25  ;;  %4008 = vmatprep.subr.bf16.mxu0 %v3181_v26  ;;  %v3294_v25 = vunpack.c.l.s8.bf16 %v2414_v22  ;;  %v3309_v26 = vunpack.c.h.s8.bf16 %v2413_v18  ;;  %v9892_v18 = vld [vmem:[#allocation7 + $0x8] sm:$0x77] }
 0x313   :  { %4172 = vmatprep.subr.bf16.mxu1 %v3183_v28  ;;  %v3311_v28 = vunpack.c.h.s8.bf16 %v2415_v44 }
 0x315   :  { %4009 = vmatpush1.bf16.msra.mxu0 %v3180_v63  ;;  %v3308_v63 = vunpack.c.h.s8.bf16 %v2412_v53  ;;  %v6498_v53 = vrot.slane %v6479_v7, %v9176_v13 }
 0x316   :  { %4173 = vmatpush1.bf16.msra.mxu1 %v3182_v31  ;;  %4010 = vmatprep.subr.bf16.mxu0 %v3197_v11  ;;  %v3310_v31 = vunpack.c.h.s8.bf16 %v2414_v22  ;;  %v3325_v11 = vunpack.c.l.s8.bf16 %v2429_v29  ;;  %v5011_v22 = vrot.slane %v9888_v34, %v9285_v37 }
 0x317   :  { %4174 = vmatprep.subr.bf16.mxu1 %v3199_v35  ;;  %v3327_v35 = vunpack.c.l.s8.bf16 %v2431_v30  ;;  %v6906_v30 = vrot.slane %v9892_v18, %v9285_v37 }
 0x319   :  { %4011 = vmatpush1.bf16.msra.mxu0 %v3196_v41  ;;  %v3324_v41 = vunpack.c.l.s8.bf16 %v2428_v33 }
 0x31a   :  { %4175 = vmatpush1.bf16.msra.mxu1 %v3198_v43  ;;  %4012 = vmatprep.subr.bf16.mxu0 %v3213_v46  ;;  %v3326_v43 = vunpack.c.l.s8.bf16 %v2430_v39  ;;  %v3341_v46 = vunpack.c.h.s8.bf16 %v2429_v29 }
 0x31b   :  { %4176 = vmatprep.subr.bf16.mxu1 %v3215_v47  ;;  %v2445_v47 = vld [vmem:[%s11296_s3 + $0xca8] sm:$0xff] }
 0x31d   :  { %4013 = vmatpush1.bf16.msra.mxu0 %v3212_v50  ;;  %v3340_v50 = vunpack.c.h.s8.bf16 %v2428_v33  ;;  %v5007_v33 = vrot.slane %v9888_v34, %v9179_v59 }
 0x31e   :  { %4177 = vmatpush1.bf16.msra.mxu1 %v3214_v51  ;;  %4014 = vmatprep.subr.bf16.mxu0 %v3229_v52  ;;  %v3342_v51 = vunpack.c.h.s8.bf16 %v2430_v39  ;;  %v3357_v52 = vunpack.c.l.s8.bf16 %v2445_v47  ;;  %v6902_v39 = vrot.slane %v6479_v7, %v9516_v5 }
 0x31f   :  { %4178 = vmatprep.subr.bf16.mxu1 %v3231_v56  ;;  %v3359_v56 = vunpack.c.l.s8.bf16 %v2447_v49 }
 0x321   :  { %4015 = vmatpush1.bf16.msra.mxu0 %v3228_v60  ;;  %v3356_v60 = vunpack.c.l.s8.bf16 %v2444_v54 }
 0x322   :  { %4179 = vmatpush1.bf16.msra.mxu1 %v3230_v61  ;;  %4016 = vmatprep.subr.bf16.mxu0 %v3245_v9  ;;  %v3358_v61 = vunpack.c.l.s8.bf16 %v2446_v57  ;;  %v3373_v9 = vunpack.c.h.s8.bf16 %v2445_v47 }
 0x323   :  { %4180 = vmatprep.subr.bf16.mxu1 %v3247_v62  ;;  %v3375_v62 = vunpack.c.h.s8.bf16 %v2447_v49 }
 0x325   :  { %4017 = vmatpush1.bf16.msra.mxu0 %v3244_v2  ;;  %v9873_v2 = vld [vmem:[%s11296_s3 + $0xd20] sm:$0xff] }
 0x326   :  { %4181 = vmatpush1.bf16.msra.mxu1 %v3246_v3  ;;  %4018 = vmatprep.subr.bf16.mxu0 %v3261_v4  ;;  %v9878_v3 = vld [vmem:[%s11296_s3 + $0xd30] sm:$0xff]  ;;  %v9883_v4 = vld [vmem:[%s11297_s4] sm:$0xff] }
 0x327   :  { %4182 = vmatprep.subr.bf16.mxu1 %v3263_v6  ;;  %v3372_v6 = vunpack.c.h.s8.bf16 %v2444_v54  ;;  %v3390_v44 = vunpack.c.l.s8.bf16 %v9878_v3  ;;  %v4915_v29 = vrot.slane %v9883_v4, %v9184_v16  ;;  %v3406_v49 = vunpack.c.h.s8.bf16 %v9878_v3 }
 0x329   :  { %4019 = vmatpush1.bf16.msra.mxu0 %v3260_v8  ;;  %v3374_v8 = vunpack.c.h.s8.bf16 %v2446_v57  ;;  %v9950_v57 = vld [vmem:[%s11296_s3 + $0xda0] sm:$0xff] }
 0x32a   :  { %4183 = vmatpush1.bf16.msra.mxu1 %v3262_v10  ;;  %4020 = vmatprep.subr.bf16.mxu0 %v3277_v12  ;;  %v3389_v10 = vunpack.c.l.s8.bf16 %v2461_v0  ;;  %v3391_v12 = vunpack.c.l.s8.bf16 %v9868_v1 }
 0x32b   :  { %4184 = vmatprep.subr.bf16.mxu1 %v3279_v17  ;;  %v3388_v17 = vunpack.c.l.s8.bf16 %v9873_v2 }
 0x32d   :  { %4021 = vmatpush1.bf16.msra.mxu0 %v3276_v14  ;;  %v4903_v14 = vrot.slane %v9883_v4, %v9176_v13 }
 0x32e   :  { %4185 = vmatpush1.bf16.msra.mxu1 %v3278_v19  ;;  %4022 = vmatprep.subr.bf16.mxu0 %v3293_v20  ;;  %v5003_v19 = vrot.slane %v9888_v34, %v9176_v13  ;;  %v4911_v20 = vrot.slane %v9883_v4, %v9285_v37 }
 0x32f   :  { %4186 = vmatprep.subr.bf16.mxu1 %v3295_v21  ;;  %v6702_v21 = vrot.slane %v6479_v7, %v9179_v59 }
 0x331   :  { %4023 = vmatpush1.bf16.msra.mxu0 %v3292_v23  ;;  %v4907_v23 = vrot.slane %v9883_v4, %v9179_v59  ;;  %v9932_v47 = vrot.slane %v6702_v21, %v9179_v59  ;;  %v9966_v4 = vrot.slane %v6902_v39, %v9285_v37  ;;  %v9993_v39 = vld [vmem:[%s11296_s3 + $0xe20] sm:$0xff] }
 0x332   :  { %4187 = vmatpush1.bf16.msra.mxu1 %v3294_v25  ;;  %4024 = vmatprep.subr.bf16.mxu0 %v3309_v26  ;;  %v6898_v25 = vrot.slane %v6479_v7, %v9285_v37  ;;  %v6506_v26 = vrot.slane %v9892_v18, %v9176_v13 }
 0x333   :  { %4188 = vmatprep.subr.bf16.mxu1 %v3311_v28  ;;  %v6710_v28 = vrot.slane %v9892_v18, %v9179_v59 }
 0x335   :  { %4025 = vmatpush1.bf16.msra.mxu0 %v3308_v63  ;;  %v6502_v63 = vrot.slane %v6479_v7, %v9397_v55  ;;  %v6790_v54 = vrot.slane %v6710_v28, %v9179_v59 }
 0x336   :  { %4189 = vmatpush1.bf16.msra.mxu1 %v3310_v31  ;;  %4035 = vmatprep.subr.bf16.mxu0 %v3325_v11  ;;  %v3405_v31 = vunpack.c.h.s8.bf16 %v2461_v0  ;;  %v3407_v11 = vunpack.c.h.s8.bf16 %v9868_v1  ;;  %v9962_v0 = vld [vmem:[%s11296_s3 + $0xdb0] sm:$0xff] }
 0x337   :  { %4199 = vmatprep.subr.bf16.mxu1 %v3327_v35  ;;  %v6706_v35 = vrot.slane %v6479_v7, %v9400_v58 }
 0x338   :  { %4027 = vmatmul.mubr.bf16.vlgmr.msra.gmra.mrb[12].mxu0 %v9433_v38 }
 0x339   :  { %4191 = vmatmul.mubr.bf16.vlgmr.msra.gmra.mrb[12].mxu1 %v9433_v38  ;;  %4036 = vmatpush1.bf16.msra.mxu0 %v3324_v41  ;;  %v3404_v41 = vunpack.c.h.s8.bf16 %v9873_v2  ;;  %v6786_v3 = vrot.slane %v6706_v35, %v9179_v59  ;;  %v9988_v35 = vld [vmem:[%s11296_s3 + $0xe38] sm:$0xff] }
 0x33a   :  { %4067 = vmatprep.mubr.bf16.mxu0 %v9443_v15  ;;  %4200 = vmatpush1.bf16.msra.mxu1 %v3326_v43  ;;  %v9926_v43 = vld [vmem:[%s11296_s3 + $0xda8] sm:$0xff] }
 0x33b   :  { %4231 = vmatprep.mubr.bf16.mxu1 %v9443_v15  ;;  %4037 = vmatprep.subr.bf16.mxu0 %v3341_v46  ;;  %v9929_v46 = vrot.slane %v6498_v53, %v9176_v13 }
 0x33c   :  { %4201 = vmatprep.subr.bf16.mxu1 %v3343_v48  ;;  %v6510_v48 = vrot.slane %v9892_v18, %v9397_v55 }
 0x33d   :  { %4038 = vmatpush1.bf16.msra.mxu0 %v3340_v50  ;;  %v9940_v50 = vld [vmem:[%s11296_s3 + $0xdb8] sm:$0xff] }
 0x33e   :  { %4202 = vmatpush1.bf16.msra.mxu1 %v3342_v51  ;;  %4039 = vmatprep.subr.bf16.mxu0 %v3357_v52  ;;  %v6978_v51 = vrot.slane %v6898_v25, %v9285_v37  ;;  %v6586_v52 = vrot.slane %v6506_v26, %v9176_v13  ;;  %v3423_v7 = vunpack.c.l.s8.bf16 %v9940_v50 }
 0x33f   :  { %4203 = vmatprep.subr.bf16.mxu1 %v3359_v56  ;;  %v6714_v56 = vrot.slane %v9892_v18, %v9400_v58 }
 0x341   :  { %4040 = vmatpush1.bf16.msra.mxu0 %v3356_v60  ;;  %v9953_v60 = vrot.slane %v6906_v30, %v9285_v37  ;;  %v6794_v25 = vrot.slane %v6714_v56, %v9179_v59  ;;  %v3422_v30 = vunpack.c.l.s8.bf16 %v9962_v0  ;;  %v3438_v56 = vunpack.c.h.s8.bf16 %v9962_v0 }
 0x342   :  { %4204 = vmatpush1.bf16.msra.mxu1 %v3358_v61  ;;  %4041 = vmatprep.subr.bf16.mxu0 %v3373_v9  ;;  %v6582_v61 = vrot.slane %v6502_v63, %v9176_v13  ;;  %v6910_v9 = vrot.slane %v9892_v18, %v9516_v5  ;;  %v6590_v18 = vrot.slane %v6510_v48, %v9176_v13 }
 0x343   :  { %4205 = vmatprep.subr.bf16.mxu1 %v3375_v62  ;;  %v3421_v62 = vunpack.c.l.s8.bf16 %v9926_v43 }
 0x345   :  { %4042 = vmatpush1.bf16.msra.mxu0 %v3372_v6  ;;  %v5015_v6 = vrot.slane %v9888_v34, %v9184_v16  ;;  %v9998_v34 = vld [vmem:[%s11296_s3 + $0xe30] sm:$0xff] }
 0x346   :  { %4206 = vmatpush1.bf16.msra.mxu1 %v3374_v8  ;;  %4043 = vmatprep.subr.bf16.mxu0 %v3389_v10 }
 0x347   :  { %4207 = vmatprep.subr.bf16.mxu1 %v3391_v12 }
 0x349   :  { %4044 = vmatpush1.bf16.msra.mxu0 %v3388_v17 }
 0x34a   :  { %4208 = vmatpush1.bf16.msra.mxu1 %v3390_v44  ;;  %4045 = vmatprep.subr.bf16.mxu0 %v3405_v31  ;;  %v3420_v44 = vunpack.c.l.s8.bf16 %v9950_v57 }
 0x34b   :  { %v3741_v1 = vpop.f32.mrb[8].mxu0  ;;  %v3905_v2 = vpop.f32.mrb[8].mxu1  ;;  %4209 = vmatprep.subr.bf16.mxu1 %v3407_v11  ;;  %v3437_v11 = vunpack.c.h.s8.bf16 %v9926_v43  ;;  %v3436_v43 = vunpack.c.h.s8.bf16 %v9950_v57 }
 0x34c   :  { %v4980_v8 = vmul.f32 %v4903_v14, %v3741_v1  ;;  %v4982_v10 = vmul.f32 %v4911_v20, %v3905_v2  ;;  %v3743_v12 = vpop.f32.mrb[9].mxu0  ;;  %v3907_v17 = vpop.f32.mrb[9].mxu1  ;;  %v9978_v14 = vld [vmem:[%s11296_s3 + $0xe28] sm:$0xff]  ;;  %v3455_v1 = vunpack.c.l.s8.bf16 %v9988_v35  ;;  %v3454_v2 = vunpack.c.l.s8.bf16 %v9998_v34 }
 0x34d   :  { %v4981_v53 = vmul.f32 %v4907_v23, %v3743_v12  ;;  %v4983_v21 = vmul.f32 %v4915_v29, %v3907_v17  ;;  %v3745_v26 = vpop.f32.mrb[10].mxu0  ;;  %v3909_v28 = vpop.f32.mrb[10].mxu1  ;;  %4046 = vmatpush1.bf16.msra.mxu0 %v3404_v41  ;;  %v6990_v23 = vrot.slane %v6910_v9, %v9285_v37  ;;  %v3439_v41 = vunpack.c.h.s8.bf16 %v9940_v50 }
 0x34e   :  { %v5080_v20 = vadd.f32 %v5003_v19, %v4980_v8  ;;  %v5082_v63 = vadd.f32 %v5011_v22, %v4982_v10  ;;  %4210 = vmatpush1.bf16.msra.mxu1 %v3406_v49  ;;  %v3746_v29 = vpop.f32.mrb[11].mxu0  ;;  %v3910_v31 = vpop.f32.mrb[11].mxu1  ;;  %4047 = vmatprep.subr.bf16.mxu0 %v3421_v62  ;;  %v3453_v9 = vunpack.c.l.s8.bf16 %v9978_v14 }
 0x34f   :  { %v5081_v19 = vadd.f32 %v5007_v33, %v4981_v53  ;;  %v5083_v22 = vadd.f32 %v5015_v6, %v4983_v21  ;;  %4211 = vmatprep.subr.bf16.mxu1 %v3423_v7  ;;  %v3452_v33 = vunpack.c.l.s8.bf16 %v9993_v39  ;;  %v2511_v31 = vld [vmem:[%s11296_s3 + $0xeb8] sm:$0xff] }
 0x350   :  { %v10002_v48 = vmax.f32 %v5080_v20, 0.0  ;;  %v10004_v49 = vmax.f32 %v5082_v63, 0.0  ;;  %v2509_v20 = vld [vmem:[%s11296_s3 + $0xea8] sm:$0xff] }
 0x351   :  { %v10008_v62 = vmax.f32 %v5081_v19, 0.0  ;;  %4048 = vmatpush1.bf16.msra.mxu0 %v3420_v44  ;;  %v10018_v0 = vmax.f32 %v5083_v22, 0.0 }
 0x352   :  { %v6639_v50 = vmul.f32 %v9929_v46, %v10002_v48  ;;  %v6843_v57 = vmul.f32 %v9932_v47, %v10002_v48  ;;  %v7039_v6 = vmul.f32 %v6978_v51, %v10002_v48  ;;  %4212 = vmatpush1.bf16.msra.mxu1 %v3422_v30  ;;  %v6641_v7 = vmul.f32 %v6586_v52, %v10004_v49 }
 0x353   :  { %v6845_v8 = vmul.f32 %v6790_v54, %v10004_v49  ;;  %v6640_v10 = vmul.f32 %v6582_v61, %v10008_v62  ;;  %v6844_v12 = vmul.f32 %v6786_v3, %v10008_v62  ;;  %4049 = vmatprep.subr.bf16.mxu0 %v3437_v11  ;;  %4213 = vmatprep.subr.bf16.mxu1 %v3439_v41  ;;  %v3469_v47 = vunpack.c.h.s8.bf16 %v9978_v14 }
 0x354   :  { %v6656_v17 = vsel %vm6655_vm0, %v6639_v50, 0.0  ;;  %v6859_v46 = vsel %vm6655_vm0, %v6843_v57, 0.0  ;;  %v3471_v51 = vunpack.c.h.s8.bf16 %v9988_v35  ;;  %v7055_v44 = vsel %vm6655_vm0, %v7039_v6, 0.0 }
 0x355   :  { %v7041_v52 = vmul.f32 %v9953_v60, %v10004_v49  ;;  %v6657_v54 = vsel %vm6655_vm0, %v6640_v10, 0.0  ;;  %v6860_v61 = vsel %vm6655_vm0, %v6844_v12, 0.0  ;;  %4050 = vmatpush1.bf16.msra.mxu0 %v3436_v43  ;;  %v7040_v21 = vmul.f32 %v9966_v4, %v10008_v62  ;;  %v2508_v43 = vld [vmem:[%s11296_s3 + $0xea0] sm:$0xff] }
 0x356   :  { %v6658_v3 = vadd.f32 %v6657_v54, %v6656_v17  ;;  %v6861_v53 = vadd.f32 %v6860_v61, %v6859_v46  ;;  %v6642_v26 = vmul.f32 %v6590_v18, %v10018_v0  ;;  %4214 = vmatpush1.bf16.msra.mxu1 %v3438_v56  ;;  %v6659_v28 = vsel %vm6655_vm0, %v6641_v7, 0.0  ;;  %4051 = vmatprep.subr.bf16.mxu0 %v3453_v9  ;;  %v2525_v7 = vld [vmem:[%s11296_s3 + $0xf28] sm:$0xff]  ;;  %v2524_v46 = vld [vmem:[%s11296_s3 + $0xf20] sm:$0xff] }
 0x357   :  { %v6862_v30 = vsel %vm6655_vm0, %v6845_v8, 0.0  ;;  %v6846_v14 = vmul.f32 %v6794_v25, %v10018_v0  ;;  %4215 = vmatprep.subr.bf16.mxu1 %v3455_v1  ;;  %v3468_v60 = vunpack.c.h.s8.bf16 %v9993_v39  ;;  %v7056_v63 = vsel %vm6655_vm0, %v7040_v21, 0.0  ;;  %v2527_v8 = vld [vmem:[%s11296_s3 + $0xf38] sm:$0xff] }
 0x358   :  { %v6660_v4 = vadd.f32 %v6659_v28, %v6658_v3  ;;  %v6863_v29 = vadd.f32 %v6862_v30, %v6861_v53  ;;  %v7042_v18 = vmul.f32 %v6990_v23, %v10018_v0  ;;  %v7057_v11 = vadd.f32 %v7056_v63, %v7055_v44  ;;  %v2541_v3 = vld [vmem:[%s11296_s3 + $0xfa8] sm:$0xff]  ;;  %v2543_v53 = vld [vmem:[%s11296_s3 + $0xfb8] sm:$0xff]  ;;  %v2540_v30 = vld [vmem:[%s11296_s3 + $0xfa0] sm:$0xff] }
 0x359   :  { %v6661_v25 = vsel %vm6655_vm0, %v6642_v26, 0.0  ;;  %v6864_v35 = vsel %vm6655_vm0, %v6846_v14, 0.0  ;;  %4052 = vmatpush1.bf16.msra.mxu0 %v3452_v33  ;;  %v3470_v39 = vunpack.c.h.s8.bf16 %v9998_v34  ;;  %v7058_v19 = vsel %vm6655_vm0, %v7041_v52, 0.0  ;;  %v2510_v34 = vld [vmem:[%s11296_s3 + $0xeb0] sm:$0xff] }
 0x35a   :  { %v10052_v22 = vadd.f32 %v6661_v25, %v6660_v4  ;;  %v10054_v41 = vadd.f32 %v6864_v35, %v6863_v29  ;;  %4216 = vmatpush1.bf16.msra.mxu1 %v3454_v2  ;;  %4053 = vmatprep.subr.bf16.mxu0 %v3469_v47  ;;  %v3485_v23 = vunpack.c.l.s8.bf16 %v2509_v20  ;;  %v7059_v56 = vadd.f32 %v7058_v19, %v7057_v11 }
 0x35b   :  { %4217 = vmatprep.subr.bf16.mxu1 %v3471_v51  ;;  %v3487_v9 = vunpack.c.l.s8.bf16 %v2511_v31  ;;  %v7060_v1 = vsel %vm6655_vm0, %v7042_v18, 0.0  ;;  %v3484_v50 = vunpack.c.l.s8.bf16 %v2508_v43  ;;  %v3486_v2 = vunpack.c.l.s8.bf16 %v2510_v34  ;;  %v2526_v51 = vld [vmem:[%s11296_s3 + $0xf30] sm:$0xff]  ;;  %v2049_v18 = vld [vmem:[%s11296_s3 + $0x48] sm:$0xff] }
 0x35c   :  { %v10063_v33 = vadd.f32 %v7060_v1, %v7059_v56  ;;  %v3501_v57 = vunpack.c.h.s8.bf16 %v2509_v20  ;;  %v3503_v6 = vunpack.c.h.s8.bf16 %v2511_v31  ;;  %v3500_v10 = vunpack.c.h.s8.bf16 %v2508_v43  ;;  %v2051_v31 = vld [vmem:[%s11296_s3 + $0x58] sm:$0xff] }
 0x35d   :  { %4054 = vmatpush1.bf16.msra.mxu0 %v3468_v60  ;;  %v3502_v12 = vunpack.c.h.s8.bf16 %v2510_v34  ;;  %v3517_v17 = vunpack.c.l.s8.bf16 %v2525_v7  ;;  %v3519_v47 = vunpack.c.l.s8.bf16 %v2527_v8  ;;  %v3516_v44 = vunpack.c.l.s8.bf16 %v2524_v46  ;;  %v2542_v60 = vld [vmem:[%s11296_s3 + $0xfb0] sm:$0xff]  ;;  %v2065_v34 = vld [vmem:[%s11296_s3 + $0xc8] sm:$0xff] }
 0x35e   :  { %4218 = vmatpush1.bf16.msra.mxu1 %v3470_v39  ;;  %4055 = vmatprep.subr.bf16.mxu0 %v3485_v23  ;;  %v3518_v52 = vunpack.c.l.s8.bf16 %v2526_v51  ;;  %v3533_v54 = vunpack.c.h.s8.bf16 %v2525_v7  ;;  %v3535_v61 = vunpack.c.h.s8.bf16 %v2527_v8  ;;  %v3532_v21 = vunpack.c.h.s8.bf16 %v2524_v46  ;;  %v2048_v39 = vld [vmem:[%s11296_s3 + $0x40] sm:$0xff]  ;;  %v2050_v23 = vld [vmem:[%s11296_s3 + $0x50] sm:$0xff] }
 0x35f   :  { %4219 = vmatprep.subr.bf16.mxu1 %v3487_v9  ;;  %v3534_v26 = vunpack.c.h.s8.bf16 %v2526_v51  ;;  %v3549_v28 = vunpack.c.l.s8.bf16 %v2541_v3  ;;  %v3551_v14 = vunpack.c.l.s8.bf16 %v2543_v53  ;;  %v3548_v20 = vunpack.c.l.s8.bf16 %v2540_v30  ;;  %v2064_v7 = vld [vmem:[%s11296_s3 + $0xc0] sm:$0xff]  ;;  %v2081_v51 = vld [vmem:[%s11296_s3 + $0x148] sm:$0xff] }
 0x360   :  { %v3550_v63 = vunpack.c.l.s8.bf16 %v2542_v60  ;;  %v3565_v4 = vunpack.c.h.s8.bf16 %v2541_v3  ;;  %v3567_v29 = vunpack.c.h.s8.bf16 %v2543_v53  ;;  %v3564_v11 = vunpack.c.h.s8.bf16 %v2540_v30  ;;  %v2080_v3 = vld [vmem:[%s11296_s3 + $0x140] sm:$0xff] }
 0x361   :  { %4056 = vmatpush1.bf16.msra.mxu0 %v3484_v50  ;;  %v3566_v25 = vunpack.c.h.s8.bf16 %v2542_v60  ;;  %v2561_v35 = vunpack.c.l.s8.bf16 %v2049_v18  ;;  %v2563_v19 = vunpack.c.l.s8.bf16 %v2051_v31  ;;  %v2560_v43 = vunpack.c.l.s8.bf16 %v2048_v39  ;;  %v2067_v50 = vld [vmem:[%s11296_s3 + $0xd8] sm:$0xff]  ;;  %v2097_v60 = vld [vmem:[%s11296_s3 + $0x1c8] sm:$0xff] }
 0x362   :  { %4220 = vmatpush1.bf16.msra.mxu1 %v3486_v2  ;;  %4057 = vmatprep.subr.bf16.mxu0 %v3501_v57  ;;  %v2562_v56 = vunpack.c.l.s8.bf16 %v2050_v23  ;;  %v2577_v9 = vunpack.c.h.s8.bf16 %v2049_v18  ;;  %v2579_v1 = vunpack.c.h.s8.bf16 %v2051_v31  ;;  %v2576_v2 = vunpack.c.h.s8.bf16 %v2048_v39  ;;  %v2096_v18 = vld [vmem:[%s11296_s3 + $0x1c0] sm:$0xff] }
 0x363   :  { %4221 = vmatprep.subr.bf16.mxu1 %v3503_v6  ;;  %v2578_v57 = vunpack.c.h.s8.bf16 %v2050_v23  ;;  %v2593_v6 = vunpack.c.l.s8.bf16 %v2065_v34  ;;  %v2595_v8 = vunpack.c.l.s8.bf16 %v2067_v50  ;;  %v2609_v46 = vunpack.c.h.s8.bf16 %v2065_v34  ;;  %v2113_v23 = vld [vmem:[%s11296_s3 + $0x248] sm:$0xff] }
 0x364   :  { %v2641_v30 = vunpack.c.h.s8.bf16 %v2081_v51  ;;  %v2673_v39 = vunpack.c.h.s8.bf16 %v2097_v60  ;;  %v2689_v34 = vunpack.c.l.s8.bf16 %v2113_v23 }
 0x365   :  { %4058 = vmatpush1.bf16.msra.mxu0 %v3500_v10  ;;  %v2066_v10 = vld [vmem:[%s11296_s3 + $0xd0] sm:$0xff] }
 0x366   :  { %4222 = vmatpush1.bf16.msra.mxu1 %v3502_v12  ;;  %4059 = vmatprep.subr.bf16.mxu0 %v3517_v17  ;;  %v2592_v12 = vunpack.c.l.s8.bf16 %v2064_v7  ;;  %v2594_v17 = vunpack.c.l.s8.bf16 %v2066_v10 }
 0x367   :  { %4223 = vmatprep.subr.bf16.mxu1 %v3519_v47  ;;  %v2611_v47 = vunpack.c.h.s8.bf16 %v2067_v50 }
 0x369   :  { %4060 = vmatpush1.bf16.msra.mxu0 %v3516_v44  ;;  %v2083_v44 = vld [vmem:[%s11296_s3 + $0x158] sm:$0xff] }
 0x36a   :  { %4224 = vmatpush1.bf16.msra.mxu1 %v3518_v52  ;;  %4061 = vmatprep.subr.bf16.mxu0 %v3533_v54  ;;  %v2608_v52 = vunpack.c.h.s8.bf16 %v2064_v7  ;;  %v2610_v54 = vunpack.c.h.s8.bf16 %v2066_v10  ;;  %v2627_v53 = vunpack.c.l.s8.bf16 %v2083_v44  ;;  %v2705_v7 = vunpack.c.h.s8.bf16 %v2113_v23  ;;  %v2129_v10 = vld [vmem:[%s11296_s3 + $0x2c8] sm:$0xff]  ;;  %v2160_v23 = vld [vmem:[%s11296_s3 + $0x3c0] sm:$0xff] }
 0x36b   :  { %4225 = vmatprep.subr.bf16.mxu1 %v3535_v61  ;;  %v2625_v61 = vunpack.c.l.s8.bf16 %v2081_v51  ;;  %v2128_v51 = vld [vmem:[%s11296_s3 + $0x2c0] sm:$0xff] }
 0x36d   :  { %4062 = vmatpush1.bf16.msra.mxu0 %v3532_v21  ;;  %v2082_v21 = vld [vmem:[%s11296_s3 + $0x150] sm:$0xff] }
 0x36e   :  { %4226 = vmatpush1.bf16.msra.mxu1 %v3534_v26  ;;  %4063 = vmatprep.subr.bf16.mxu0 %v3549_v28  ;;  %v2624_v26 = vunpack.c.l.s8.bf16 %v2080_v3  ;;  %v2626_v28 = vunpack.c.l.s8.bf16 %v2082_v21 }
 0x36f   :  { %4227 = vmatprep.subr.bf16.mxu1 %v3551_v14  ;;  %v2643_v14 = vunpack.c.h.s8.bf16 %v2083_v44 }
 0x371   :  { %4064 = vmatpush1.bf16.msra.mxu0 %v3548_v20  ;;  %v2099_v20 = vld [vmem:[%s11296_s3 + $0x1d8] sm:$0xff] }
 0x372   :  { %4228 = vmatpush1.bf16.msra.mxu1 %v3550_v63  ;;  %4065 = vmatprep.subr.bf16.mxu0 %v3565_v4  ;;  %v2640_v63 = vunpack.c.h.s8.bf16 %v2080_v3  ;;  %v2642_v4 = vunpack.c.h.s8.bf16 %v2082_v21  ;;  %v2659_v31 = vunpack.c.l.s8.bf16 %v2099_v20  ;;  %v2737_v3 = vunpack.c.h.s8.bf16 %v2129_v10  ;;  %v2145_v21 = vld [vmem:[%s11296_s3 + $0x348] sm:$0xff] }
 0x373   :  { %4229 = vmatprep.subr.bf16.mxu1 %v3567_v29  ;;  %v2657_v29 = vunpack.c.l.s8.bf16 %v2097_v60  ;;  %v2144_v60 = vld [vmem:[%s11296_s3 + $0x340] sm:$0xff] }
 0x375   :  { %4066 = vmatpush1.bf16.msra.mxu0 %v3564_v11  ;;  %v2098_v11 = vld [vmem:[%s11296_s3 + $0x1d0] sm:$0xff] }
 0x376   :  { %4230 = vmatpush1.bf16.msra.mxu1 %v3566_v25  ;;  %4240 = vmatprep.subr.bf16.mxu0 %v2561_v35  ;;  %v2656_v25 = vunpack.c.l.s8.bf16 %v2096_v18  ;;  %v2658_v35 = vunpack.c.l.s8.bf16 %v2098_v11 }
 0x377   :  { %4404 = vmatprep.subr.bf16.mxu1 %v2563_v19  ;;  %v2675_v19 = vunpack.c.h.s8.bf16 %v2099_v20 }
 0x378   :  { %4068 = vmatmul.mubr.bf16.vlgmr.msra.gmra.mrb[12].mxu0 %v9544_v42 }
 0x379   :  { %4232 = vmatmul.mubr.bf16.vlgmr.msra.gmra.mrb[12].mxu1 %v9544_v42  ;;  %4241 = vmatpush1.bf16.msra.mxu0 %v2560_v43  ;;  %v2115_v43 = vld [vmem:[%s11296_s3 + $0x258] sm:$0xff] }
 0x37a   :  { %4272 = vmatprep.mubr.bf16.mxu0 %v9200_v36  ;;  %4405 = vmatpush1.bf16.msra.mxu1 %v2562_v56  ;;  %v2672_v56 = vunpack.c.h.s8.bf16 %v2096_v18  ;;  %v2691_v50 = vunpack.c.l.s8.bf16 %v2115_v43  ;;  %v2769_v18 = vunpack.c.h.s8.bf16 %v2145_v21 }
 0x37b   :  { %4436 = vmatprep.mubr.bf16.mxu1 %v9200_v36  ;;  %4242 = vmatprep.subr.bf16.mxu0 %v2577_v9  ;;  %v2674_v9 = vunpack.c.h.s8.bf16 %v2098_v11  ;;  %v2161_v11 = vld [vmem:[%s11296_s3 + $0x3c8] sm:$0xff] }
 0x37c   :  { %4406 = vmatprep.subr.bf16.mxu1 %v2579_v1  ;;  %v2112_v1 = vld [vmem:[%s11296_s3 + $0x240] sm:$0xff] }
 0x37d   :  { %4243 = vmatpush1.bf16.msra.mxu0 %v2576_v2  ;;  %v2114_v2 = vld [vmem:[%s11296_s3 + $0x250] sm:$0xff] }
 0x37e   :  { %4407 = vmatpush1.bf16.msra.mxu1 %v2578_v57  ;;  %4244 = vmatprep.subr.bf16.mxu0 %v2593_v6  ;;  %v2688_v57 = vunpack.c.l.s8.bf16 %v2112_v1  ;;  %v2690_v6 = vunpack.c.l.s8.bf16 %v2114_v2 }
 0x37f   :  { %4408 = vmatprep.subr.bf16.mxu1 %v2595_v8  ;;  %v2707_v8 = vunpack.c.h.s8.bf16 %v2115_v43 }
 0x381   :  { %4245 = vmatpush1.bf16.msra.mxu0 %v2592_v12  ;;  %v2131_v12 = vld [vmem:[%s11296_s3 + $0x2d8] sm:$0xff] }
 0x382   :  { %4409 = vmatpush1.bf16.msra.mxu1 %v2594_v17  ;;  %4246 = vmatprep.subr.bf16.mxu0 %v2609_v46  ;;  %v2704_v17 = vunpack.c.h.s8.bf16 %v2112_v1  ;;  %v2706_v46 = vunpack.c.h.s8.bf16 %v2114_v2  ;;  %v2723_v44 = vunpack.c.l.s8.bf16 %v2131_v12  ;;  %v2801_v1 = vunpack.c.h.s8.bf16 %v2161_v11  ;;  %v2177_v2 = vld [vmem:[%s11296_s3 + $0x448] sm:$0xff] }
 0x383   :  { %4410 = vmatprep.subr.bf16.mxu1 %v2611_v47  ;;  %v2721_v47 = vunpack.c.l.s8.bf16 %v2129_v10  ;;  %v2176_v10 = vld [vmem:[%s11296_s3 + $0x440] sm:$0xff] }
 0x385   :  { %4247 = vmatpush1.bf16.msra.mxu0 %v2608_v52  ;;  %v2130_v52 = vld [vmem:[%s11296_s3 + $0x2d0] sm:$0xff] }
 0x386   :  { %4411 = vmatpush1.bf16.msra.mxu1 %v2610_v54  ;;  %4248 = vmatprep.subr.bf16.mxu0 %v2625_v61  ;;  %v2720_v54 = vunpack.c.l.s8.bf16 %v2128_v51  ;;  %v2722_v61 = vunpack.c.l.s8.bf16 %v2130_v52 }
 0x387   :  { %4412 = vmatprep.subr.bf16.mxu1 %v2627_v53  ;;  %v2739_v53 = vunpack.c.h.s8.bf16 %v2131_v12 }
 0x389   :  { %4249 = vmatpush1.bf16.msra.mxu0 %v2624_v26  ;;  %v2147_v26 = vld [vmem:[%s11296_s3 + $0x358] sm:$0xff] }
 0x38a   :  { %4413 = vmatpush1.bf16.msra.mxu1 %v2626_v28  ;;  %4250 = vmatprep.subr.bf16.mxu0 %v2641_v30  ;;  %v2736_v28 = vunpack.c.h.s8.bf16 %v2128_v51  ;;  %v2738_v30 = vunpack.c.h.s8.bf16 %v2130_v52  ;;  %v2755_v20 = vunpack.c.l.s8.bf16 %v2147_v26  ;;  %v2833_v51 = vunpack.c.h.s8.bf16 %v2177_v2 }
 0x38b   :  { %4414 = vmatprep.subr.bf16.mxu1 %v2643_v14  ;;  %v2753_v14 = vunpack.c.l.s8.bf16 %v2145_v21  ;;  %v2192_v21 = vld [vmem:[%s11296_s3 + $0x4c0] sm:$0xff] }
 0x38d   :  { %4251 = vmatpush1.bf16.msra.mxu0 %v2640_v63  ;;  %v2146_v63 = vld [vmem:[%s11296_s3 + $0x350] sm:$0xff] }
 0x38e   :  { %4415 = vmatpush1.bf16.msra.mxu1 %v2642_v4  ;;  %4252 = vmatprep.subr.bf16.mxu0 %v2657_v29  ;;  %v2752_v4 = vunpack.c.l.s8.bf16 %v2144_v60  ;;  %v2754_v29 = vunpack.c.l.s8.bf16 %v2146_v63 }
 0x38f   :  { %4416 = vmatprep.subr.bf16.mxu1 %v2659_v31  ;;  %v2771_v31 = vunpack.c.h.s8.bf16 %v2147_v26 }
 0x391   :  { %4253 = vmatpush1.bf16.msra.mxu0 %v2656_v25  ;;  %v2163_v25 = vld [vmem:[%s11296_s3 + $0x3d8] sm:$0xff] }
 0x392   :  { %4417 = vmatpush1.bf16.msra.mxu1 %v2658_v35  ;;  %4254 = vmatprep.subr.bf16.mxu0 %v2673_v39  ;;  %v2768_v35 = vunpack.c.h.s8.bf16 %v2144_v60  ;;  %v2770_v39 = vunpack.c.h.s8.bf16 %v2146_v63  ;;  %v2787_v43 = vunpack.c.l.s8.bf16 %v2163_v25  ;;  %v2209_v63 = vld [vmem:[%s11296_s3 + $0x548] sm:$0xff] }
 0x393   :  { %4418 = vmatprep.subr.bf16.mxu1 %v2675_v19  ;;  %v2785_v19 = vunpack.c.l.s8.bf16 %v2161_v11  ;;  %v2208_v11 = vld [vmem:[%s11296_s3 + $0x540] sm:$0xff] }
 0x395   :  { %4255 = vmatpush1.bf16.msra.mxu0 %v2672_v56  ;;  %v2162_v56 = vld [vmem:[%s11296_s3 + $0x3d0] sm:$0xff] }
 0x396   :  { %4419 = vmatpush1.bf16.msra.mxu1 %v2674_v9  ;;  %4256 = vmatprep.subr.bf16.mxu0 %v2689_v34  ;;  %v2784_v9 = vunpack.c.l.s8.bf16 %v2160_v23  ;;  %v2786_v34 = vunpack.c.l.s8.bf16 %v2162_v56 }
 0x397   :  { %4420 = vmatprep.subr.bf16.mxu1 %v2691_v50  ;;  %v2803_v50 = vunpack.c.h.s8.bf16 %v2163_v25 }
 0x399   :  { %4257 = vmatpush1.bf16.msra.mxu0 %v2688_v57  ;;  %v2179_v57 = vld [vmem:[%s11296_s3 + $0x458] sm:$0xff] }
 0x39a   :  { %4421 = vmatpush1.bf16.msra.mxu1 %v2690_v6  ;;  %4258 = vmatprep.subr.bf16.mxu0 %v2705_v7  ;;  %v2800_v6 = vunpack.c.h.s8.bf16 %v2160_v23  ;;  %v2802_v7 = vunpack.c.h.s8.bf16 %v2162_v56  ;;  %v2819_v12 = vunpack.c.l.s8.bf16 %v2179_v57  ;;  %v2835_v52 = vunpack.c.h.s8.bf16 %v2179_v57  ;;  %v2225_v56 = vld [vmem:[%s11296_s3 + $0x5c8] sm:$0xff] }
 0x39b   :  { %4422 = vmatprep.subr.bf16.mxu1 %v2707_v8  ;;  %v2817_v8 = vunpack.c.l.s8.bf16 %v2177_v2  ;;  %v2897_v23 = vunpack.c.h.s8.bf16 %v2209_v63  ;;  %v2224_v2 = vld [vmem:[%s11296_s3 + $0x5c0] sm:$0xff] }
 0x39d   :  { %4259 = vmatpush1.bf16.msra.mxu0 %v2704_v17  ;;  %v2178_v17 = vld [vmem:[%s11296_s3 + $0x450] sm:$0xff] }
 0x39e   :  { %4423 = vmatpush1.bf16.msra.mxu1 %v2706_v46  ;;  %4260 = vmatprep.subr.bf16.mxu0 %v2721_v47  ;;  %v2816_v46 = vunpack.c.l.s8.bf16 %v2176_v10  ;;  %v2818_v47 = vunpack.c.l.s8.bf16 %v2178_v17 }
 0x39f   :  { %4424 = vmatprep.subr.bf16.mxu1 %v2723_v44  ;;  %v2193_v44 = vld [vmem:[%s11296_s3 + $0x4c8] sm:$0xff] }
 0x3a0   :  { %v2865_v60 = vunpack.c.h.s8.bf16 %v2193_v44 }
 0x3a1   :  { %4261 = vmatpush1.bf16.msra.mxu0 %v2720_v54  ;;  %v2195_v54 = vld [vmem:[%s11296_s3 + $0x4d8] sm:$0xff] }
 0x3a2   :  { %4425 = vmatpush1.bf16.msra.mxu1 %v2722_v61  ;;  %4262 = vmatprep.subr.bf16.mxu0 %v2737_v3  ;;  %v2832_v61 = vunpack.c.h.s8.bf16 %v2176_v10  ;;  %v2834_v3 = vunpack.c.h.s8.bf16 %v2178_v17  ;;  %v2851_v26 = vunpack.c.l.s8.bf16 %v2195_v54  ;;  %v2929_v10 = vunpack.c.h.s8.bf16 %v2225_v56  ;;  %v2241_v17 = vld [vmem:[%s11296_s3 + $0x648] sm:$0xff] }
 0x3a3   :  { %4426 = vmatprep.subr.bf16.mxu1 %v2739_v53  ;;  %v2849_v53 = vunpack.c.l.s8.bf16 %v2193_v44  ;;  %v2945_v44 = vunpack.c.l.s8.bf16 %v2241_v17 }
 0x3a5   :  { %4263 = vmatpush1.bf16.msra.mxu0 %v2736_v28  ;;  %v2194_v28 = vld [vmem:[%s11296_s3 + $0x4d0] sm:$0xff] }
 0x3a6   :  { %4427 = vmatpush1.bf16.msra.mxu1 %v2738_v30  ;;  %4264 = vmatprep.subr.bf16.mxu0 %v2753_v14  ;;  %v2848_v30 = vunpack.c.l.s8.bf16 %v2192_v21  ;;  %v2850_v14 = vunpack.c.l.s8.bf16 %v2194_v28 }
 0x3a7   :  { %4428 = vmatprep.subr.bf16.mxu1 %v2755_v20  ;;  %v2867_v20 = vunpack.c.h.s8.bf16 %v2195_v54 }
 0x3a9   :  { %4265 = vmatpush1.bf16.msra.mxu0 %v2752_v4  ;;  %v2211_v4 = vld [vmem:[%s11296_s3 + $0x558] sm:$0xff] }
 0x3aa   :  { %4429 = vmatpush1.bf16.msra.mxu1 %v2754_v29  ;;  %4266 = vmatprep.subr.bf16.mxu0 %v2769_v18  ;;  %v2864_v29 = vunpack.c.h.s8.bf16 %v2192_v21  ;;  %v2866_v18 = vunpack.c.h.s8.bf16 %v2194_v28  ;;  %v2883_v25 = vunpack.c.l.s8.bf16 %v2211_v4  ;;  %v2961_v21 = vunpack.c.h.s8.bf16 %v2241_v17  ;;  %v2257_v28 = vld [vmem:[%s11296_s3 + $0x6c8] sm:$0xff]  ;;  %v2288_v17 = vld [vmem:[%s11296_s3 + $0x7c0] sm:$0xff] }
 0x3ab   :  { %4430 = vmatprep.subr.bf16.mxu1 %v2771_v31  ;;  %v2881_v31 = vunpack.c.l.s8.bf16 %v2209_v63  ;;  %v2256_v63 = vld [vmem:[%s11296_s3 + $0x6c0] sm:$0xff] }
 0x3ad   :  { %4267 = vmatpush1.bf16.msra.mxu0 %v2768_v35  ;;  %v2210_v35 = vld [vmem:[%s11296_s3 + $0x550] sm:$0xff] }
 0x3ae   :  { %4431 = vmatpush1.bf16.msra.mxu1 %v2770_v39  ;;  %4268 = vmatprep.subr.bf16.mxu0 %v2785_v19  ;;  %v2880_v39 = vunpack.c.l.s8.bf16 %v2208_v11  ;;  %v2882_v19 = vunpack.c.l.s8.bf16 %v2210_v35 }
 0x3af   :  { %4432 = vmatprep.subr.bf16.mxu1 %v2787_v43  ;;  %v2899_v43 = vunpack.c.h.s8.bf16 %v2211_v4 }
 0x3b1   :  { %4269 = vmatpush1.bf16.msra.mxu0 %v2784_v9  ;;  %v2227_v9 = vld [vmem:[%s11296_s3 + $0x5d8] sm:$0xff] }
 0x3b2   :  { %4433 = vmatpush1.bf16.msra.mxu1 %v2786_v34  ;;  %4270 = vmatprep.subr.bf16.mxu0 %v2801_v1  ;;  %v2896_v34 = vunpack.c.h.s8.bf16 %v2208_v11  ;;  %v2898_v1 = vunpack.c.h.s8.bf16 %v2210_v35  ;;  %v2915_v57 = vunpack.c.l.s8.bf16 %v2227_v9  ;;  %v2993_v11 = vunpack.c.h.s8.bf16 %v2257_v28  ;;  %v2273_v35 = vld [vmem:[%s11296_s3 + $0x748] sm:$0xff] }
 0x3b3   :  { %4434 = vmatprep.subr.bf16.mxu1 %v2803_v50  ;;  %v2913_v50 = vunpack.c.l.s8.bf16 %v2225_v56  ;;  %v2272_v56 = vld [vmem:[%s11296_s3 + $0x740] sm:$0xff] }
 0x3b5   :  { %4271 = vmatpush1.bf16.msra.mxu0 %v2800_v6  ;;  %v2226_v6 = vld [vmem:[%s11296_s3 + $0x5d0] sm:$0xff] }
 0x3b6   :  { %4435 = vmatpush1.bf16.msra.mxu1 %v2802_v7  ;;  %4281 = vmatprep.subr.bf16.mxu0 %v2817_v8  ;;  %v2912_v7 = vunpack.c.l.s8.bf16 %v2224_v2  ;;  %v2914_v8 = vunpack.c.l.s8.bf16 %v2226_v6 }
 0x3b7   :  { %4445 = vmatprep.subr.bf16.mxu1 %v2819_v12  ;;  %v2931_v12 = vunpack.c.h.s8.bf16 %v2227_v9 }
 0x3b8   :  { %4273 = vmatmul.mubr.bf16.vlgmr.msra.gmra.mrb[16].mxu0 %v9202_v40 }
 0x3b9   :  { %4437 = vmatmul.mubr.bf16.vlgmr.msra.gmra.mrb[16].mxu1 %v9202_v40  ;;  %4282 = vmatpush1.bf16.msra.mxu0 %v2816_v46  ;;  %v2243_v46 = vld [vmem:[%s11296_s3 + $0x658] sm:$0xff] }
 0x3ba   :  { %4313 = vmatprep.mubr.bf16.mxu0 %v9212_v45  ;;  %4446 = vmatpush1.bf16.msra.mxu1 %v2818_v47  ;;  %v2928_v47 = vunpack.c.h.s8.bf16 %v2224_v2  ;;  %v2947_v54 = vunpack.c.l.s8.bf16 %v2243_v46  ;;  %v3025_v2 = vunpack.c.h.s8.bf16 %v2273_v35 }
 0x3bb   :  { %4477 = vmatprep.mubr.bf16.mxu1 %v9212_v45  ;;  %4283 = vmatprep.subr.bf16.mxu0 %v2833_v51  ;;  %v2930_v51 = vunpack.c.h.s8.bf16 %v2226_v6  ;;  %v2289_v6 = vld [vmem:[%s11296_s3 + $0x7c8] sm:$0xff] }
 0x3bc   :  { %4447 = vmatprep.subr.bf16.mxu1 %v2835_v52  ;;  %v2240_v52 = vld [vmem:[%s11296_s3 + $0x640] sm:$0xff] }
 0x3bd   :  { %4284 = vmatpush1.bf16.msra.mxu0 %v2832_v61  ;;  %v2242_v61 = vld [vmem:[%s11296_s3 + $0x650] sm:$0xff] }
 0x3be   :  { %4448 = vmatpush1.bf16.msra.mxu1 %v2834_v3  ;;  %4285 = vmatprep.subr.bf16.mxu0 %v2849_v53  ;;  %v2944_v3 = vunpack.c.l.s8.bf16 %v2240_v52  ;;  %v2946_v53 = vunpack.c.l.s8.bf16 %v2242_v61 }
 0x3bf   :  { %4449 = vmatprep.subr.bf16.mxu1 %v2851_v26  ;;  %v2963_v26 = vunpack.c.h.s8.bf16 %v2243_v46 }
 0x3c1   :  { %4286 = vmatpush1.bf16.msra.mxu0 %v2848_v30  ;;  %v2259_v30 = vld [vmem:[%s11296_s3 + $0x6d8] sm:$0xff] }
 0x3c2   :  { %4450 = vmatpush1.bf16.msra.mxu1 %v2850_v14  ;;  %4287 = vmatprep.subr.bf16.mxu0 %v2865_v60  ;;  %v2960_v14 = vunpack.c.h.s8.bf16 %v2240_v52  ;;  %v2962_v60 = vunpack.c.h.s8.bf16 %v2242_v61  ;;  %v2979_v4 = vunpack.c.l.s8.bf16 %v2259_v30  ;;  %v3057_v52 = vunpack.c.h.s8.bf16 %v2289_v6  ;;  %v2305_v61 = vld [vmem:[%s11296_s3 + $0x848] sm:$0xff] }
 0x3c3   :  { %4451 = vmatprep.subr.bf16.mxu1 %v2867_v20  ;;  %v2977_v20 = vunpack.c.l.s8.bf16 %v2257_v28  ;;  %v2304_v28 = vld [vmem:[%s11296_s3 + $0x840] sm:$0xff] }
 0x3c5   :  { %4288 = vmatpush1.bf16.msra.mxu0 %v2864_v29  ;;  %v2258_v29 = vld [vmem:[%s11296_s3 + $0x6d0] sm:$0xff] }
 0x3c6   :  { %4452 = vmatpush1.bf16.msra.mxu1 %v2866_v18  ;;  %4289 = vmatprep.subr.bf16.mxu0 %v2881_v31  ;;  %v2976_v18 = vunpack.c.l.s8.bf16 %v2256_v63  ;;  %v2978_v31 = vunpack.c.l.s8.bf16 %v2258_v29 }
 0x3c7   :  { %4453 = vmatprep.subr.bf16.mxu1 %v2883_v25  ;;  %v2995_v25 = vunpack.c.h.s8.bf16 %v2259_v30 }
 0x3c9   :  { %4290 = vmatpush1.bf16.msra.mxu0 %v2880_v39  ;;  %v2275_v39 = vld [vmem:[%s11296_s3 + $0x758] sm:$0xff] }
 0x3ca   :  { %4454 = vmatpush1.bf16.msra.mxu1 %v2882_v19  ;;  %4291 = vmatprep.subr.bf16.mxu0 %v2897_v23  ;;  %v2992_v19 = vunpack.c.h.s8.bf16 %v2256_v63  ;;  %v2994_v23 = vunpack.c.h.s8.bf16 %v2258_v29  ;;  %v3011_v9 = vunpack.c.l.s8.bf16 %v2275_v39  ;;  %v3089_v63 = vunpack.c.h.s8.bf16 %v2305_v61 }
 0x3cb   :  { %4455 = vmatprep.subr.bf16.mxu1 %v2899_v43  ;;  %v3009_v43 = vunpack.c.l.s8.bf16 %v2273_v35  ;;  %v2320_v35 = vld [vmem:[%s11296_s3 + $0x8c0] sm:$0xff] }
 0x3cd   :  { %4292 = vmatpush1.bf16.msra.mxu0 %v2896_v34  ;;  %v2274_v34 = vld [vmem:[%s11296_s3 + $0x750] sm:$0xff] }
 0x3ce   :  { %4456 = vmatpush1.bf16.msra.mxu1 %v2898_v1  ;;  %4293 = vmatprep.subr.bf16.mxu0 %v2913_v50  ;;  %v3008_v1 = vunpack.c.l.s8.bf16 %v2272_v56  ;;  %v3010_v50 = vunpack.c.l.s8.bf16 %v2274_v34 }
 0x3cf   :  { %4457 = vmatprep.subr.bf16.mxu1 %v2915_v57  ;;  %v3027_v57 = vunpack.c.h.s8.bf16 %v2275_v39 }
 0x3d1   :  { %4294 = vmatpush1.bf16.msra.mxu0 %v2912_v7  ;;  %v2291_v7 = vld [vmem:[%s11296_s3 + $0x7d8] sm:$0xff] }
 0x3d2   :  { %4458 = vmatpush1.bf16.msra.mxu1 %v2914_v8  ;;  %4295 = vmatprep.subr.bf16.mxu0 %v2929_v10  ;;  %v3024_v8 = vunpack.c.h.s8.bf16 %v2272_v56  ;;  %v3026_v10 = vunpack.c.h.s8.bf16 %v2274_v34  ;;  %v3043_v46 = vunpack.c.l.s8.bf16 %v2291_v7  ;;  %v2337_v34 = vld [vmem:[%s11296_s3 + $0x948] sm:$0xff] }
 0x3d3   :  { %4459 = vmatprep.subr.bf16.mxu1 %v2931_v12  ;;  %v3041_v12 = vunpack.c.l.s8.bf16 %v2289_v6  ;;  %v2336_v6 = vld [vmem:[%s11296_s3 + $0x940] sm:$0xff] }
 0x3d5   :  { %4296 = vmatpush1.bf16.msra.mxu0 %v2928_v47  ;;  %v2290_v47 = vld [vmem:[%s11296_s3 + $0x7d0] sm:$0xff] }
 0x3d6   :  { %4460 = vmatpush1.bf16.msra.mxu1 %v2930_v51  ;;  %4297 = vmatprep.subr.bf16.mxu0 %v2945_v44  ;;  %v3040_v51 = vunpack.c.l.s8.bf16 %v2288_v17  ;;  %v3042_v44 = vunpack.c.l.s8.bf16 %v2290_v47 }
 0x3d7   :  { %4461 = vmatprep.subr.bf16.mxu1 %v2947_v54  ;;  %v3059_v54 = vunpack.c.h.s8.bf16 %v2291_v7 }
 0x3d9   :  { %4298 = vmatpush1.bf16.msra.mxu0 %v2944_v3  ;;  %v2307_v3 = vld [vmem:[%s11296_s3 + $0x858] sm:$0xff] }
 0x3da   :  { %4462 = vmatpush1.bf16.msra.mxu1 %v2946_v53  ;;  %4299 = vmatprep.subr.bf16.mxu0 %v2961_v21  ;;  %v3056_v53 = vunpack.c.h.s8.bf16 %v2288_v17  ;;  %v3058_v21 = vunpack.c.h.s8.bf16 %v2290_v47  ;;  %v3075_v30 = vunpack.c.l.s8.bf16 %v2307_v3  ;;  %v3091_v29 = vunpack.c.h.s8.bf16 %v2307_v3  ;;  %v2353_v47 = vld [vmem:[%s11296_s3 + $0x9c8] sm:$0xff] }
 0x3db   :  { %4463 = vmatprep.subr.bf16.mxu1 %v2963_v26  ;;  %v3073_v26 = vunpack.c.l.s8.bf16 %v2305_v61  ;;  %v3153_v17 = vunpack.c.h.s8.bf16 %v2337_v34  ;;  %v2352_v61 = vld [vmem:[%s11296_s3 + $0x9c0] sm:$0xff] }
 0x3dd   :  { %4300 = vmatpush1.bf16.msra.mxu0 %v2960_v14  ;;  %v2306_v14 = vld [vmem:[%s11296_s3 + $0x850] sm:$0xff] }
 0x3de   :  { %4464 = vmatpush1.bf16.msra.mxu1 %v2962_v60  ;;  %4301 = vmatprep.subr.bf16.mxu0 %v2977_v20  ;;  %v3072_v60 = vunpack.c.l.s8.bf16 %v2304_v28  ;;  %v3074_v20 = vunpack.c.l.s8.bf16 %v2306_v14 }
 0x3df   :  { %4465 = vmatprep.subr.bf16.mxu1 %v2979_v4  ;;  %v2321_v4 = vld [vmem:[%s11296_s3 + $0x8c8] sm:$0xff] }
 0x3e0   :  { %v3121_v56 = vunpack.c.h.s8.bf16 %v2321_v4 }
 0x3e1   :  { %4302 = vmatpush1.bf16.msra.mxu0 %v2976_v18  ;;  %v2323_v18 = vld [vmem:[%s11296_s3 + $0x8d8] sm:$0xff] }
 0x3e2   :  { %4466 = vmatpush1.bf16.msra.mxu1 %v2978_v31  ;;  %4303 = vmatprep.subr.bf16.mxu0 %v2993_v11  ;;  %v3088_v31 = vunpack.c.h.s8.bf16 %v2304_v28  ;;  %v3090_v11 = vunpack.c.h.s8.bf16 %v2306_v14  ;;  %v3107_v39 = vunpack.c.l.s8.bf16 %v2323_v18  ;;  %v3185_v28 = vunpack.c.h.s8.bf16 %v2353_v47  ;;  %v2369_v14 = vld [vmem:[%s11296_s3 + $0xa48] sm:$0xff] }
 0x3e3   :  { %4467 = vmatprep.subr.bf16.mxu1 %v2995_v25  ;;  %v3105_v25 = vunpack.c.l.s8.bf16 %v2321_v4  ;;  %v3201_v4 = vunpack.c.l.s8.bf16 %v2369_v14 }
 0x3e5   :  { %4304 = vmatpush1.bf16.msra.mxu0 %v2992_v19  ;;  %v2322_v19 = vld [vmem:[%s11296_s3 + $0x8d0] sm:$0xff] }
 0x3e6   :  { %4468 = vmatpush1.bf16.msra.mxu1 %v2994_v23  ;;  %4305 = vmatprep.subr.bf16.mxu0 %v3009_v43  ;;  %v3104_v23 = vunpack.c.l.s8.bf16 %v2320_v35  ;;  %v3106_v43 = vunpack.c.l.s8.bf16 %v2322_v19 }
 0x3e7   :  { %4469 = vmatprep.subr.bf16.mxu1 %v3011_v9  ;;  %v3123_v9 = vunpack.c.h.s8.bf16 %v2323_v18 }
 0x3e9   :  { %4306 = vmatpush1.bf16.msra.mxu0 %v3008_v1  ;;  %v2339_v1 = vld [vmem:[%s11296_s3 + $0x958] sm:$0xff] }
 0x3ea   :  { %4470 = vmatpush1.bf16.msra.mxu1 %v3010_v50  ;;  %4307 = vmatprep.subr.bf16.mxu0 %v3025_v2  ;;  %v3120_v50 = vunpack.c.h.s8.bf16 %v2320_v35  ;;  %v3122_v2 = vunpack.c.h.s8.bf16 %v2322_v19  ;;  %v3139_v7 = vunpack.c.l.s8.bf16 %v2339_v1  ;;  %v3217_v35 = vunpack.c.h.s8.bf16 %v2369_v14  ;;  %v2385_v19 = vld [vmem:[%s11296_s3 + $0xac8] sm:$0xff]  ;;  %v2416_v14 = vld [vmem:[%s11296_s3 + $0xbc0] sm:$0xff] }
 0x3eb   :  { %4471 = vmatprep.subr.bf16.mxu1 %v3027_v57  ;;  %v3137_v57 = vunpack.c.l.s8.bf16 %v2337_v34  ;;  %v2384_v34 = vld [vmem:[%s11296_s3 + $0xac0] sm:$0xff] }
 0x3ed   :  { %4308 = vmatpush1.bf16.msra.mxu0 %v3024_v8  ;;  %v2338_v8 = vld [vmem:[%s11296_s3 + $0x950] sm:$0xff] }
 0x3ee   :  { %4472 = vmatpush1.bf16.msra.mxu1 %v3026_v10  ;;  %4309 = vmatprep.subr.bf16.mxu0 %v3041_v12  ;;  %v3136_v10 = vunpack.c.l.s8.bf16 %v2336_v6  ;;  %v3138_v12 = vunpack.c.l.s8.bf16 %v2338_v8 }
 0x3ef   :  { %4473 = vmatprep.subr.bf16.mxu1 %v3043_v46  ;;  %v3155_v46 = vunpack.c.h.s8.bf16 %v2339_v1 }
 0x3f1   :  { %4310 = vmatpush1.bf16.msra.mxu0 %v3040_v51  ;;  %v2355_v51 = vld [vmem:[%s11296_s3 + $0x9d8] sm:$0xff] }
 0x3f2   :  { %4474 = vmatpush1.bf16.msra.mxu1 %v3042_v44  ;;  %4311 = vmatprep.subr.bf16.mxu0 %v3057_v52  ;;  %v3152_v44 = vunpack.c.h.s8.bf16 %v2336_v6  ;;  %v3154_v52 = vunpack.c.h.s8.bf16 %v2338_v8  ;;  %v3171_v3 = vunpack.c.l.s8.bf16 %v2355_v51  ;;  %v3249_v6 = vunpack.c.h.s8.bf16 %v2385_v19  ;;  %v2401_v8 = vld [vmem:[%s11296_s3 + $0xb48] sm:$0xff] }
 0x3f3   :  { %4475 = vmatprep.subr.bf16.mxu1 %v3059_v54  ;;  %v3169_v54 = vunpack.c.l.s8.bf16 %v2353_v47  ;;  %v2400_v47 = vld [vmem:[%s11296_s3 + $0xb40] sm:$0xff] }
 0x3f5   :  { %4312 = vmatpush1.bf16.msra.mxu0 %v3056_v53  ;;  %v2354_v53 = vld [vmem:[%s11296_s3 + $0x9d0] sm:$0xff] }
 0x3f6   :  { %4476 = vmatpush1.bf16.msra.mxu1 %v3058_v21  ;;  %4322 = vmatprep.subr.bf16.mxu0 %v3073_v26  ;;  %v3168_v21 = vunpack.c.l.s8.bf16 %v2352_v61  ;;  %v3170_v26 = vunpack.c.l.s8.bf16 %v2354_v53 }
 0x3f7   :  { %4486 = vmatprep.subr.bf16.mxu1 %v3075_v30  ;;  %v3187_v30 = vunpack.c.h.s8.bf16 %v2355_v51 }
 0x3f8   :  { %4314 = vmatmul.mubr.bf16.vlgmr.msra.gmra.mrb[16].mxu0 %v9314_v27 }
 0x3f9   :  { %4478 = vmatmul.mubr.bf16.vlgmr.msra.gmra.mrb[16].mxu1 %v9314_v27  ;;  %4323 = vmatpush1.bf16.msra.mxu0 %v3072_v60  ;;  %v2371_v60 = vld [vmem:[%s11296_s3 + $0xa58] sm:$0xff] }
 0x3fa   :  { %4354 = vmatprep.mubr.bf16.mxu0 %v9431_v32  ;;  %4487 = vmatpush1.bf16.msra.mxu1 %v3074_v20  ;;  %v3184_v20 = vunpack.c.h.s8.bf16 %v2352_v61  ;;  %v3203_v18 = vunpack.c.l.s8.bf16 %v2371_v60  ;;  %v3281_v61 = vunpack.c.h.s8.bf16 %v2401_v8 }
 0x3fb   :  { %4518 = vmatprep.mubr.bf16.mxu1 %v9431_v32  ;;  %4324 = vmatprep.subr.bf16.mxu0 %v3089_v63  ;;  %v3186_v63 = vunpack.c.h.s8.bf16 %v2354_v53  ;;  %v2417_v53 = vld [vmem:[%s11296_s3 + $0xbc8] sm:$0xff] }
 0x3fc   :  { %4488 = vmatprep.subr.bf16.mxu1 %v3091_v29  ;;  %v2368_v29 = vld [vmem:[%s11296_s3 + $0xa40] sm:$0xff] }
 0x3fd   :  { %4325 = vmatpush1.bf16.msra.mxu0 %v3088_v31  ;;  %v2370_v31 = vld [vmem:[%s11296_s3 + $0xa50] sm:$0xff] }
 0x3fe   :  { %4489 = vmatpush1.bf16.msra.mxu1 %v3090_v11  ;;  %4326 = vmatprep.subr.bf16.mxu0 %v3105_v25  ;;  %v3200_v11 = vunpack.c.l.s8.bf16 %v2368_v29  ;;  %v3202_v25 = vunpack.c.l.s8.bf16 %v2370_v31 }
 0x3ff   :  { %4490 = vmatprep.subr.bf16.mxu1 %v3107_v39  ;;  %v3219_v39 = vunpack.c.h.s8.bf16 %v2371_v60 }
 0x401   :  { %4327 = vmatpush1.bf16.msra.mxu0 %v3104_v23  ;;  %v2387_v23 = vld [vmem:[%s11296_s3 + $0xad8] sm:$0xff] }
 0x402   :  { %4491 = vmatpush1.bf16.msra.mxu1 %v3106_v43  ;;  %4328 = vmatprep.subr.bf16.mxu0 %v3121_v56  ;;  %v3216_v43 = vunpack.c.h.s8.bf16 %v2368_v29  ;;  %v3218_v56 = vunpack.c.h.s8.bf16 %v2370_v31  ;;  %v3235_v1 = vunpack.c.l.s8.bf16 %v2387_v23  ;;  %v3313_v29 = vunpack.c.h.s8.bf16 %v2417_v53  ;;  %v2433_v31 = vld [vmem:[%s11296_s3 + $0xc48] sm:$0xff] }
 0x403   :  { %4492 = vmatprep.subr.bf16.mxu1 %v3123_v9  ;;  %v3233_v9 = vunpack.c.l.s8.bf16 %v2385_v19  ;;  %v2432_v19 = vld [vmem:[%s11296_s3 + $0xc40] sm:$0xff] }
 0x405   :  { %4329 = vmatpush1.bf16.msra.mxu0 %v3120_v50  ;;  %v2386_v50 = vld [vmem:[%s11296_s3 + $0xad0] sm:$0xff] }
 0x406   :  { %4493 = vmatpush1.bf16.msra.mxu1 %v3122_v2  ;;  %4330 = vmatprep.subr.bf16.mxu0 %v3137_v57  ;;  %v3232_v2 = vunpack.c.l.s8.bf16 %v2384_v34  ;;  %v3234_v57 = vunpack.c.l.s8.bf16 %v2386_v50 }
 0x407   :  { %4494 = vmatprep.subr.bf16.mxu1 %v3139_v7  ;;  %v3251_v7 = vunpack.c.h.s8.bf16 %v2387_v23 }
 0x409   :  { %4331 = vmatpush1.bf16.msra.mxu0 %v3136_v10  ;;  %v2403_v10 = vld [vmem:[%s11296_s3 + $0xb58] sm:$0xff] }
 0x40a   :  { %4495 = vmatpush1.bf16.msra.mxu1 %v3138_v12  ;;  %4332 = vmatprep.subr.bf16.mxu0 %v3153_v17  ;;  %v3248_v12 = vunpack.c.h.s8.bf16 %v2384_v34  ;;  %v3250_v17 = vunpack.c.h.s8.bf16 %v2386_v50  ;;  %v3267_v51 = vunpack.c.l.s8.bf16 %v2403_v10  ;;  %v3345_v34 = vunpack.c.h.s8.bf16 %v2433_v31 }
 0x40b   :  { %4496 = vmatprep.subr.bf16.mxu1 %v3155_v46  ;;  %v3265_v46 = vunpack.c.l.s8.bf16 %v2401_v8  ;;  %v2448_v8 = vld [vmem:[%s11296_s3 + $0xcc0] sm:$0xff] }
 0x40d   :  { %4333 = vmatpush1.bf16.msra.mxu0 %v3152_v44  ;;  %v2402_v44 = vld [vmem:[%s11296_s3 + $0xb50] sm:$0xff] }
 0x40e   :  { %4497 = vmatpush1.bf16.msra.mxu1 %v3154_v52  ;;  %4334 = vmatprep.subr.bf16.mxu0 %v3169_v54  ;;  %v3264_v52 = vunpack.c.l.s8.bf16 %v2400_v47  ;;  %v3266_v54 = vunpack.c.l.s8.bf16 %v2402_v44 }
 0x40f   :  { %4498 = vmatprep.subr.bf16.mxu1 %v3171_v3  ;;  %v3283_v3 = vunpack.c.h.s8.bf16 %v2403_v10 }
 0x411   :  { %4335 = vmatpush1.bf16.msra.mxu0 %v3168_v21  ;;  %v2419_v21 = vld [vmem:[%s11296_s3 + $0xbd8] sm:$0xff] }
 0x412   :  { %4499 = vmatpush1.bf16.msra.mxu1 %v3170_v26  ;;  %4336 = vmatprep.subr.bf16.mxu0 %v3185_v28  ;;  %v3280_v26 = vunpack.c.h.s8.bf16 %v2400_v47  ;;  %v3282_v28 = vunpack.c.h.s8.bf16 %v2402_v44  ;;  %v3299_v60 = vunpack.c.l.s8.bf16 %v2419_v21  ;;  %v2465_v44 = vld [vmem:[%s11296_s3 + $0xd48] sm:$0xff] }
 0x413   :  { %4500 = vmatprep.subr.bf16.mxu1 %v3187_v30  ;;  %v3297_v30 = vunpack.c.l.s8.bf16 %v2417_v53 }
 0x415   :  { %4337 = vmatpush1.bf16.msra.mxu0 %v3184_v20  ;;  %v2418_v20 = vld [vmem:[%s11296_s3 + $0xbd0] sm:$0xff] }
 0x416   :  { %4501 = vmatpush1.bf16.msra.mxu1 %v3186_v63  ;;  %4338 = vmatprep.subr.bf16.mxu0 %v3201_v4  ;;  %v3296_v63 = vunpack.c.l.s8.bf16 %v2416_v14  ;;  %v3298_v4 = vunpack.c.l.s8.bf16 %v2418_v20 }
 0x417   :  { %4502 = vmatprep.subr.bf16.mxu1 %v3203_v18  ;;  %v3315_v18 = vunpack.c.h.s8.bf16 %v2419_v21  ;;  %v3393_v21 = vunpack.c.l.s8.bf16 %v2465_v44 }
 0x419   :  { %4339 = vmatpush1.bf16.msra.mxu0 %v3200_v11  ;;  %v2435_v11 = vld [vmem:[%s11296_s3 + $0xc58] sm:$0xff] }
 0x41a   :  { %4503 = vmatpush1.bf16.msra.mxu1 %v3202_v25  ;;  %4340 = vmatprep.subr.bf16.mxu0 %v3217_v35  ;;  %v3312_v25 = vunpack.c.h.s8.bf16 %v2416_v14  ;;  %v3314_v35 = vunpack.c.h.s8.bf16 %v2418_v20  ;;  %v3331_v23 = vunpack.c.l.s8.bf16 %v2435_v11  ;;  %v3347_v50 = vunpack.c.h.s8.bf16 %v2435_v11  ;;  %v10437_v14 = vld [vmem:[#allocation7 + $0x18] sm:$0x77]  ;;  %v10443_v20 = vld [vmem:[%s11297_s4] sm:$0xff] }
 0x41b   :  { %4504 = vmatprep.subr.bf16.mxu1 %v3219_v39  ;;  %v3329_v39 = vunpack.c.l.s8.bf16 %v2433_v31  ;;  %v4923_v31 = vrot.slane %v10443_v20, %v9400_v58  ;;  %v4931_v11 = vrot.slane %v10443_v20, %v9403_v24 }
 0x41d   :  { %4341 = vmatpush1.bf16.msra.mxu0 %v3216_v43  ;;  %v2434_v43 = vld [vmem:[%s11296_s3 + $0xc50] sm:$0xff] }
 0x41e   :  { %4505 = vmatpush1.bf16.msra.mxu1 %v3218_v56  ;;  %4342 = vmatprep.subr.bf16.mxu0 %v3233_v9  ;;  %v3328_v56 = vunpack.c.l.s8.bf16 %v2432_v19  ;;  %v3330_v9 = vunpack.c.l.s8.bf16 %v2434_v43 }
 0x41f   :  { %4506 = vmatprep.subr.bf16.mxu1 %v3235_v1  ;;  %v2449_v1 = vld [vmem:[%s11296_s3 + $0xcc8] sm:$0xff] }
 0x420   :  { %v3377_v47 = vunpack.c.h.s8.bf16 %v2449_v1 }
 0x421   :  { %4343 = vmatpush1.bf16.msra.mxu0 %v3232_v2  ;;  %v2451_v2 = vld [vmem:[%s11296_s3 + $0xcd8] sm:$0xff] }
 0x422   :  { %4507 = vmatpush1.bf16.msra.mxu1 %v3234_v57  ;;  %4344 = vmatprep.subr.bf16.mxu0 %v3249_v6  ;;  %v3344_v57 = vunpack.c.h.s8.bf16 %v2432_v19  ;;  %v3346_v6 = vunpack.c.h.s8.bf16 %v2434_v43  ;;  %v3363_v10 = vunpack.c.l.s8.bf16 %v2451_v2  ;;  %v6522_v43 = vrot.slane %v10437_v14, %v9176_v13 }
 0x423   :  { %4508 = vmatprep.subr.bf16.mxu1 %v3251_v7  ;;  %v3361_v7 = vunpack.c.l.s8.bf16 %v2449_v1 }
 0x425   :  { %4345 = vmatpush1.bf16.msra.mxu0 %v3248_v12  ;;  %v2450_v12 = vld [vmem:[%s11296_s3 + $0xcd0] sm:$0xff] }
 0x426   :  { %4509 = vmatpush1.bf16.msra.mxu1 %v3250_v17  ;;  %4346 = vmatprep.subr.bf16.mxu0 %v3265_v46  ;;  %v3360_v17 = vunpack.c.l.s8.bf16 %v2448_v8  ;;  %v3362_v46 = vunpack.c.l.s8.bf16 %v2450_v12  ;;  %v3378_v53 = vunpack.c.h.s8.bf16 %v2450_v12  ;;  %v6526_v12 = vrot.slane %v10437_v14, %v9397_v55 }
 0x427   :  { %4510 = vmatprep.subr.bf16.mxu1 %v3267_v51  ;;  %v3379_v51 = vunpack.c.h.s8.bf16 %v2451_v2 }
 0x429   :  { %4347 = vmatpush1.bf16.msra.mxu0 %v3264_v52  ;;  %v10423_v52 = vld [vmem:[%s11296_s3 + $0xd58] sm:$0xff] }
 0x42a   :  { %4511 = vmatpush1.bf16.msra.mxu1 %v3266_v54  ;;  %4348 = vmatprep.subr.bf16.mxu0 %v3281_v61  ;;  %v10428_v54 = vld [vmem:[%s11296_s3 + $0xd40] sm:$0xff]  ;;  %v10433_v61 = vld [vmem:[%s11296_s3 + $0xd50] sm:$0xff] }
 0x42b   :  { %4512 = vmatprep.subr.bf16.mxu1 %v3283_v3  ;;  %v3376_v3 = vunpack.c.h.s8.bf16 %v2448_v8  ;;  %v3408_v1 = vunpack.c.h.s8.bf16 %v10428_v54 }
 0x42d   :  { %4349 = vmatpush1.bf16.msra.mxu0 %v3280_v26  ;;  %v3395_v26 = vunpack.c.l.s8.bf16 %v10423_v52 }
 0x42e   :  { %4513 = vmatpush1.bf16.msra.mxu1 %v3282_v28  ;;  %4350 = vmatprep.subr.bf16.mxu0 %v3297_v30  ;;  %v3392_v28 = vunpack.c.l.s8.bf16 %v10428_v54  ;;  %v6481_v30 = vld [vmem:[#allocation7 + $0x10] sm:$0x77] }
 0x42f   :  { %4514 = vmatprep.subr.bf16.mxu1 %v3299_v60  ;;  %v3394_v60 = vunpack.c.l.s8.bf16 %v10433_v61  ;;  %v6718_v19 = vrot.slane %v6481_v30, %v9179_v59  ;;  %v6722_v2 = vrot.slane %v6481_v30, %v9400_v58  ;;  %v10502_v54 = vld [vmem:[%s11296_s3 + $0xdc0] sm:$0xff] }
 0x431   :  { %4351 = vmatpush1.bf16.msra.mxu0 %v3296_v63  ;;  %v4919_v63 = vrot.slane %v10443_v20, %v9397_v55 }
 0x432   :  { %4515 = vmatpush1.bf16.msra.mxu1 %v3298_v4  ;;  %4352 = vmatprep.subr.bf16.mxu0 %v3313_v29  ;;  %v10450_v4 = vld [vmem:[%s11298_s5] sm:$0xff] }
 0x433   :  { %4516 = vmatprep.subr.bf16.mxu1 %v3315_v18  ;;  %v5019_v29 = vrot.slane %v10450_v4, %v9397_v55  ;;  %v4927_v18 = vrot.slane %v10443_v20, %v9516_v5  ;;  %v5023_v8 = vrot.slane %v10450_v4, %v9400_v58 }
 0x435   :  { %4353 = vmatpush1.bf16.msra.mxu0 %v3312_v25  ;;  %v3409_v25 = vunpack.c.h.s8.bf16 %v2465_v44 }
 0x436   :  { %4517 = vmatpush1.bf16.msra.mxu1 %v3314_v35  ;;  %4363 = vmatprep.subr.bf16.mxu0 %v3329_v39  ;;  %v3411_v35 = vunpack.c.h.s8.bf16 %v10423_v52  ;;  %v6514_v39 = vrot.slane %v6481_v30, %v9176_v13  ;;  %v6602_v52 = vrot.slane %v6522_v43, %v9176_v13  ;;  %v3424_v43 = vunpack.c.l.s8.bf16 %v10502_v54 }
 0x437   :  { %4527 = vmatprep.subr.bf16.mxu1 %v3331_v23  ;;  %v6914_v23 = vrot.slane %v6481_v30, %v9285_v37 }
 0x438   :  { %4355 = vmatmul.mubr.bf16.vlgmr.msra.gmra.mrb[16].mxu0 %v9433_v38 }
 0x439   :  { %4519 = vmatmul.mubr.bf16.vlgmr.msra.gmra.mrb[16].mxu1 %v9433_v38  ;;  %4364 = vmatpush1.bf16.msra.mxu0 %v3328_v56  ;;  %v5027_v56 = vrot.slane %v10450_v4, %v9516_v5  ;;  %v6994_v44 = vrot.slane %v6914_v23, %v9285_v37 }
 0x43a   :  { %4395 = vmatprep.mubr.bf16.mxu0 %v9443_v15  ;;  %4528 = vmatpush1.bf16.msra.mxu1 %v3330_v9  ;;  %v6726_v9 = vrot.slane %v10437_v14, %v9179_v59 }
 0x43b   :  { %4559 = vmatprep.mubr.bf16.mxu1 %v9443_v15  ;;  %4365 = vmatprep.subr.bf16.mxu0 %v3345_v34  ;;  %v6922_v34 = vrot.slane %v10437_v14, %v9285_v37 }
 0x43c   :  { %4529 = vmatprep.subr.bf16.mxu1 %v3347_v50  ;;  %v6518_v50 = vrot.slane %v6481_v30, %v9397_v55 }
 0x43d   :  { %4366 = vmatpush1.bf16.msra.mxu0 %v3344_v57  ;;  %v6918_v57 = vrot.slane %v6481_v30, %v9516_v5 }
 0x43e   :  { %4530 = vmatpush1.bf16.msra.mxu1 %v3346_v6  ;;  %4367 = vmatprep.subr.bf16.mxu0 %v3361_v7  ;;  %v3410_v6 = vunpack.c.h.s8.bf16 %v10433_v61  ;;  %v10480_v7 = vld [vmem:[%s11296_s3 + $0xdc8] sm:$0xff]  ;;  %v6806_v61 = vrot.slane %v6726_v9, %v9179_v59  ;;  %v6598_v30 = vrot.slane %v6518_v50, %v9176_v13 }
 0x43f   :  { %4531 = vmatprep.subr.bf16.mxu1 %v3363_v10  ;;  %v5031_v10 = vrot.slane %v10450_v4, %v9403_v24  ;;  %v10519_v20 = vrot.slane %v6918_v57, %v9285_v37  ;;  %v3441_v57 = vunpack.c.h.s8.bf16 %v10480_v7 }
 0x441   :  { %4368 = vmatpush1.bf16.msra.mxu0 %v3360_v17  ;;  %v6730_v17 = vrot.slane %v10437_v14, %v9400_v58 }
 0x442   :  { %4532 = vmatpush1.bf16.msra.mxu1 %v3362_v46  ;;  %4369 = vmatprep.subr.bf16.mxu0 %v3377_v47  ;;  %v10493_v46 = vld [vmem:[%s11296_s3 + $0xdd8] sm:$0xff]  ;;  %v6594_v47 = vrot.slane %v6514_v39, %v9176_v13 }
 0x443   :  { %4533 = vmatprep.subr.bf16.mxu1 %v3379_v51  ;;  %v6798_v51 = vrot.slane %v6718_v19, %v9179_v59  ;;  %v3427_v4 = vunpack.c.l.s8.bf16 %v10493_v46  ;;  %v10523_v19 = vrot.slane %v6526_v12, %v9176_v13  ;;  %v10526_v23 = vrot.slane %v6730_v17, %v9179_v59  ;;  %v10539_v12 = vld [vmem:[%s11296_s3 + $0xe58] sm:$0xff] }
 0x445   :  { %4370 = vmatpush1.bf16.msra.mxu0 %v3376_v3  ;;  %v10506_v3 = vrot.slane %v6922_v34, %v9285_v37 }
 0x446   :  { %4534 = vmatpush1.bf16.msra.mxu1 %v3378_v53  ;;  %4371 = vmatprep.subr.bf16.mxu0 %v3393_v21  ;;  %v6926_v53 = vrot.slane %v10437_v14, %v9516_v5  ;;  %v3425_v21 = vunpack.c.l.s8.bf16 %v10480_v7  ;;  %v3443_v7 = vunpack.c.h.s8.bf16 %v10493_v46 }
 0x447   :  { %4535 = vmatprep.subr.bf16.mxu1 %v3395_v26  ;;  %v10514_v26 = vld [vmem:[%s11296_s3 + $0xdd0] sm:$0xff] }
 0x449   :  { %4372 = vmatpush1.bf16.msra.mxu0 %v3392_v28 }
 0x44a   :  { %4536 = vmatpush1.bf16.msra.mxu1 %v3394_v60  ;;  %4373 = vmatprep.subr.bf16.mxu0 %v3409_v25  ;;  %v6802_v60 = vrot.slane %v6722_v2, %v9179_v59 }
 0x44b   :  { %v4069_v28 = vpop.f32.mrb[12].mxu0  ;;  %4537 = vmatprep.subr.bf16.mxu1 %v3411_v35  ;;  %v3426_v35 = vunpack.c.l.s8.bf16 %v10514_v26 }
 0x44c   :  { %v4984_v14 = vmul.f32 %v4919_v63, %v4069_v28  ;;  %v4233_v25 = vpop.f32.mrb[12].mxu1  ;;  %v4071_v39 = vpop.f32.mrb[13].mxu0  ;;  %v10534_v63 = vld [vmem:[%s11296_s3 + $0xe48] sm:$0xff] }
 0x44d   :  { %v4986_v9 = vmul.f32 %v4927_v18, %v4233_v25  ;;  %v4985_v34 = vmul.f32 %v4923_v31, %v4071_v39  ;;  %v4235_v50 = vpop.f32.mrb[13].mxu1  ;;  %v4073_v2 = vpop.f32.mrb[14].mxu0  ;;  %4374 = vmatpush1.bf16.msra.mxu0 %v3408_v1  ;;  %v10542_v31 = vrot.slane %v6926_v53, %v9285_v37  ;;  %v10548_v25 = vld [vmem:[%s11296_s3 + $0xe40] sm:$0xff]  ;;  %v10553_v39 = vld [vmem:[%s11296_s3 + $0xe50] sm:$0xff] }
 0x44e   :  { %v5084_v17 = vadd.f32 %v5019_v29, %v4984_v14  ;;  %v4987_v18 = vmul.f32 %v4931_v11, %v4235_v50  ;;  %v4237_v1 = vpop.f32.mrb[14].mxu1  ;;  %4538 = vmatpush1.bf16.msra.mxu1 %v3410_v6  ;;  %v4074_v28 = vpop.f32.mrb[15].mxu0  ;;  %4375 = vmatprep.subr.bf16.mxu0 %v3425_v21  ;;  %v3440_v6 = vunpack.c.h.s8.bf16 %v10502_v54  ;;  %v3442_v21 = vunpack.c.h.s8.bf16 %v10514_v26 }
 0x44f   :  { %v5086_v29 = vadd.f32 %v5027_v56, %v4986_v9  ;;  %v5085_v11 = vadd.f32 %v5023_v8, %v4985_v34  ;;  %v4238_v53 = vpop.f32.mrb[15].mxu1  ;;  %4539 = vmatprep.subr.bf16.mxu1 %v3427_v4  ;;  %v3457_v50 = vunpack.c.l.s8.bf16 %v10534_v63  ;;  %v3459_v2 = vunpack.c.l.s8.bf16 %v10539_v12 }
 0x450   :  { %v10557_v14 = vmax.f32 %v5084_v17, 0.0  ;;  %v5087_v46 = vadd.f32 %v5031_v10, %v4987_v18  ;;  %v3456_v56 = vunpack.c.l.s8.bf16 %v10548_v25  ;;  %v3458_v8 = vunpack.c.l.s8.bf16 %v10553_v39 }
 0x451   :  { %v10561_v1 = vmax.f32 %v5086_v29, 0.0  ;;  %v10563_v28 = vmax.f32 %v5085_v11, 0.0  ;;  %4376 = vmatpush1.bf16.msra.mxu0 %v3424_v43  ;;  %v3473_v10 = vunpack.c.h.s8.bf16 %v10534_v63  ;;  %v3474_v53 = vunpack.c.h.s8.bf16 %v10553_v39  ;;  %v2512_v39 = vld [vmem:[%s11296_s3 + $0xec0] sm:$0xff] }
 0x452   :  { %v6643_v54 = vmul.f32 %v6594_v47, %v10557_v14  ;;  %v6847_v26 = vmul.f32 %v6798_v51, %v10557_v14  ;;  %v7043_v4 = vmul.f32 %v6994_v44, %v10557_v14  ;;  %4540 = vmatpush1.bf16.msra.mxu1 %v3426_v35  ;;  %4377 = vmatprep.subr.bf16.mxu0 %v3441_v57  ;;  %v10574_v17 = vmax.f32 %v5087_v46, 0.0 }
 0x453   :  { %v6645_v9 = vmul.f32 %v6602_v52, %v10561_v1  ;;  %v6849_v34 = vmul.f32 %v6806_v61, %v10561_v1  ;;  %v6644_v43 = vmul.f32 %v6598_v30, %v10563_v28  ;;  %4541 = vmatprep.subr.bf16.mxu1 %v3443_v7  ;;  %v6848_v44 = vmul.f32 %v6802_v60, %v10563_v28 }
 0x454   :  { %v6663_v18 = vsel %vm6655_vm0, %v6643_v54, 0.0  ;;  %v6866_v47 = vsel %vm6655_vm0, %v6847_v26, 0.0  ;;  %v7062_v51 = vsel %vm6655_vm0, %v7043_v4, 0.0  ;;  %v3475_v61 = vunpack.c.h.s8.bf16 %v10539_v12 }
 0x455   :  { %v6664_v35 = vadd.f32 %v6663_v18, %v10052_v22  ;;  %v6867_v57 = vadd.f32 %v6866_v47, %v10054_v41  ;;  %v7063_v52 = vadd.f32 %v7062_v51, %v10063_v33  ;;  %4378 = vmatpush1.bf16.msra.mxu0 %v3440_v6  ;;  %v7045_v30 = vmul.f32 %v10506_v3, %v10561_v1  ;;  %v2513_v3 = vld [vmem:[%s11296_s3 + $0xec8] sm:$0xff] }
 0x456   :  { %v6665_v63 = vsel %vm6655_vm0, %v6644_v43, 0.0  ;;  %v6868_v7 = vsel %vm6655_vm0, %v6848_v44, 0.0  ;;  %4542 = vmatpush1.bf16.msra.mxu1 %v3442_v21  ;;  %4379 = vmatprep.subr.bf16.mxu0 %v3457_v50  ;;  %v3472_v60 = vunpack.c.h.s8.bf16 %v10548_v25  ;;  %v7044_v41 = vmul.f32 %v10519_v20, %v10563_v28  ;;  %v2515_v20 = vld [vmem:[%s11296_s3 + $0xed8] sm:$0xff]  ;;  %v2529_v44 = vld [vmem:[%s11296_s3 + $0xf48] sm:$0xff] }
 0x457   :  { %v6666_v29 = vadd.f32 %v6665_v63, %v6664_v35  ;;  %v6869_v22 = vadd.f32 %v6868_v7, %v6867_v57  ;;  %v6646_v33 = vmul.f32 %v10523_v19, %v10574_v17  ;;  %4543 = vmatprep.subr.bf16.mxu1 %v3459_v2  ;;  %v6667_v12 = vsel %vm6655_vm0, %v6645_v9, 0.0  ;;  %v2531_v35 = vld [vmem:[%s11296_s3 + $0xf58] sm:$0xff]  ;;  %v2530_v7 = vld [vmem:[%s11296_s3 + $0xf50] sm:$0xff] }
 0x458   :  { %v6870_v11 = vsel %vm6655_vm0, %v6849_v34, 0.0  ;;  %v6850_v25 = vmul.f32 %v10526_v23, %v10574_v17  ;;  %v7064_v19 = vsel %vm6655_vm0, %v7044_v41, 0.0  ;;  %v7046_v46 = vmul.f32 %v10542_v31, %v10574_v17 }
 0x459   :  { %v6668_v6 = vadd.f32 %v6667_v12, %v6666_v29  ;;  %v6871_v21 = vadd.f32 %v6870_v11, %v6869_v22  ;;  %4380 = vmatpush1.bf16.msra.mxu0 %v3456_v56  ;;  %v7065_v50 = vadd.f32 %v7064_v19, %v7063_v52  ;;  %v6669_v2 = vsel %vm6655_vm0, %v6646_v33, 0.0  ;;  %v2514_v56 = vld [vmem:[%s11296_s3 + $0xed0] sm:$0xff]  ;;  %v2545_v33 = vld [vmem:[%s11296_s3 + $0xfc8] sm:$0xff] }
 0x45a   :  { %v6872_v54 = vsel %vm6655_vm0, %v6850_v25, 0.0  ;;  %4544 = vmatpush1.bf16.msra.mxu1 %v3458_v8  ;;  %4381 = vmatprep.subr.bf16.mxu0 %v3473_v10  ;;  %v3489_v23 = vunpack.c.l.s8.bf16 %v2513_v3  ;;  %v7066_v26 = vsel %vm6655_vm0, %v7045_v30, 0.0  ;;  %v3491_v31 = vunpack.c.l.s8.bf16 %v2515_v20  ;;  %v2528_v30 = vld [vmem:[%s11296_s3 + $0xf40] sm:$0xff]  ;;  %v2546_v19 = vld [vmem:[%s11296_s3 + $0xfd0] sm:$0xff] }
 0x45b   :  { %v10613_v4 = vadd.f32 %v6669_v2, %v6668_v6  ;;  %v10615_v9 = vadd.f32 %v6872_v54, %v6871_v21  ;;  %4545 = vmatprep.subr.bf16.mxu1 %v3475_v61  ;;  %v7067_v34 = vadd.f32 %v7066_v26, %v7065_v50  ;;  %v7068_v8 = vsel %vm6655_vm0, %v7046_v46, 0.0  ;;  %v2053_v2 = vld [vmem:[%s11296_s3 + $0x68] sm:$0xff]  ;;  %v2055_v54 = vld [vmem:[%s11296_s3 + $0x78] sm:$0xff] }
 0x45c   :  { %v3488_v10 = vunpack.c.l.s8.bf16 %v2512_v39  ;;  %v3490_v18 = vunpack.c.l.s8.bf16 %v2514_v56  ;;  %v3505_v47 = vunpack.c.h.s8.bf16 %v2513_v3  ;;  %v3507_v51 = vunpack.c.h.s8.bf16 %v2515_v20  ;;  %v2547_v3 = vld [vmem:[%s11296_s3 + $0xfd8] sm:$0xff] }
 0x45d   :  { %4382 = vmatpush1.bf16.msra.mxu0 %v3472_v60  ;;  %v10621_v43 = vadd.f32 %v7068_v8, %v7067_v34  ;;  %v3504_v57 = vunpack.c.h.s8.bf16 %v2512_v39  ;;  %v3506_v52 = vunpack.c.h.s8.bf16 %v2514_v56  ;;  %v3521_v61 = vunpack.c.l.s8.bf16 %v2529_v44  ;;  %v2054_v34 = vld [vmem:[%s11296_s3 + $0x70] sm:$0xff] }
 0x45e   :  { %4546 = vmatpush1.bf16.msra.mxu1 %v3474_v53  ;;  %4383 = vmatprep.subr.bf16.mxu0 %v3489_v23  ;;  %v3523_v63 = vunpack.c.l.s8.bf16 %v2531_v35  ;;  %v3520_v60 = vunpack.c.l.s8.bf16 %v2528_v30  ;;  %v3522_v29 = vunpack.c.l.s8.bf16 %v2530_v7  ;;  %v3537_v22 = vunpack.c.h.s8.bf16 %v2529_v44  ;;  %v2544_v53 = vld [vmem:[%s11296_s3 + $0xfc0] sm:$0xff]  ;;  %v2071_v44 = vld [vmem:[%s11296_s3 + $0xf8] sm:$0xff] }
 0x45f   :  { %4547 = vmatprep.subr.bf16.mxu1 %v3491_v31  ;;  %v3539_v41 = vunpack.c.h.s8.bf16 %v2531_v35  ;;  %v3536_v12 = vunpack.c.h.s8.bf16 %v2528_v30  ;;  %v3538_v11 = vunpack.c.h.s8.bf16 %v2530_v7  ;;  %v3553_v25 = vunpack.c.l.s8.bf16 %v2545_v33  ;;  %v2052_v31 = vld [vmem:[%s11296_s3 + $0x60] sm:$0xff] }
 0x460   :  { %v3555_v20 = vunpack.c.l.s8.bf16 %v2547_v3  ;;  %v3552_v6 = vunpack.c.l.s8.bf16 %v2544_v53  ;;  %v3554_v21 = vunpack.c.l.s8.bf16 %v2546_v19  ;;  %v3569_v46 = vunpack.c.h.s8.bf16 %v2545_v33 }
 0x461   :  { %4384 = vmatpush1.bf16.msra.mxu0 %v3488_v10  ;;  %v3571_v50 = vunpack.c.h.s8.bf16 %v2547_v3  ;;  %v3568_v23 = vunpack.c.h.s8.bf16 %v2544_v53  ;;  %v3570_v39 = vunpack.c.h.s8.bf16 %v2546_v19  ;;  %v2565_v26 = vunpack.c.l.s8.bf16 %v2053_v2  ;;  %v2086_v53 = vld [vmem:[%s11296_s3 + $0x170] sm:$0xff] }
 0x462   :  { %4548 = vmatpush1.bf16.msra.mxu1 %v3490_v18  ;;  %4385 = vmatprep.subr.bf16.mxu0 %v3505_v47  ;;  %v2567_v56 = vunpack.c.l.s8.bf16 %v2055_v54  ;;  %v2564_v8 = vunpack.c.l.s8.bf16 %v2052_v31  ;;  %v2566_v10 = vunpack.c.l.s8.bf16 %v2054_v34  ;;  %v2581_v18 = vunpack.c.h.s8.bf16 %v2053_v2  ;;  %v2069_v47 = vld [vmem:[%s11296_s3 + $0xe8] sm:$0xff] }
 0x463   :  { %4549 = vmatprep.subr.bf16.mxu1 %v3507_v51  ;;  %v2583_v51 = vunpack.c.h.s8.bf16 %v2055_v54  ;;  %v2580_v35 = vunpack.c.h.s8.bf16 %v2052_v31  ;;  %v2599_v30 = vunpack.c.l.s8.bf16 %v2071_v44  ;;  %v2630_v19 = vunpack.c.l.s8.bf16 %v2086_v53  ;;  %v2102_v31 = vld [vmem:[%s11296_s3 + $0x1f0] sm:$0xff] }
 0x464   :  { %v2646_v54 = vunpack.c.h.s8.bf16 %v2086_v53 }
 0x465   :  { %4386 = vmatpush1.bf16.msra.mxu0 %v3504_v57  ;;  %v2582_v57 = vunpack.c.h.s8.bf16 %v2054_v34  ;;  %v2662_v34 = vunpack.c.l.s8.bf16 %v2102_v31 }
 0x466   :  { %4550 = vmatpush1.bf16.msra.mxu1 %v3506_v52  ;;  %4387 = vmatprep.subr.bf16.mxu0 %v3521_v61  ;;  %v2597_v52 = vunpack.c.l.s8.bf16 %v2069_v47  ;;  %v2068_v61 = vld [vmem:[%s11296_s3 + $0xe0] sm:$0xff] }
 0x467   :  { %4551 = vmatprep.subr.bf16.mxu1 %v3523_v63  ;;  %v2070_v63 = vld [vmem:[%s11296_s3 + $0xf0] sm:$0xff]  ;;  %v2596_v7 = vunpack.c.l.s8.bf16 %v2068_v61  ;;  %v2612_v33 = vunpack.c.h.s8.bf16 %v2068_v61 }
 0x468   :  { %v2614_v3 = vunpack.c.h.s8.bf16 %v2070_v63  ;;  %v2118_v61 = vld [vmem:[%s11296_s3 + $0x270] sm:$0xff] }
 0x469   :  { %4388 = vmatpush1.bf16.msra.mxu0 %v3520_v60  ;;  %v2598_v60 = vunpack.c.l.s8.bf16 %v2070_v63  ;;  %v2694_v63 = vunpack.c.l.s8.bf16 %v2118_v61 }
 0x46a   :  { %4552 = vmatpush1.bf16.msra.mxu1 %v3522_v29  ;;  %4389 = vmatprep.subr.bf16.mxu0 %v3537_v22  ;;  %v2613_v29 = vunpack.c.h.s8.bf16 %v2069_v47  ;;  %v2615_v22 = vunpack.c.h.s8.bf16 %v2071_v44  ;;  %v2119_v47 = vld [vmem:[%s11296_s3 + $0x278] sm:$0xff]  ;;  %v2678_v44 = vunpack.c.h.s8.bf16 %v2102_v31 }
 0x46b   :  { %4553 = vmatprep.subr.bf16.mxu1 %v3539_v41  ;;  %v2085_v41 = vld [vmem:[%s11296_s3 + $0x168] sm:$0xff] }
 0x46d   :  { %4390 = vmatpush1.bf16.msra.mxu0 %v3536_v12  ;;  %v2629_v12 = vunpack.c.l.s8.bf16 %v2085_v41 }
 0x46e   :  { %4554 = vmatpush1.bf16.msra.mxu1 %v3538_v11  ;;  %4391 = vmatprep.subr.bf16.mxu0 %v3553_v25  ;;  %v2084_v11 = vld [vmem:[%s11296_s3 + $0x160] sm:$0xff] }
 0x46f   :  { %4555 = vmatprep.subr.bf16.mxu1 %v3555_v20  ;;  %v2628_v20 = vunpack.c.l.s8.bf16 %v2084_v11  ;;  %v2644_v2 = vunpack.c.h.s8.bf16 %v2084_v11  ;;  %v2134_v11 = vld [vmem:[%s11296_s3 + $0x2f0] sm:$0xff] }
 0x470   :  { %v2726_v53 = vunpack.c.l.s8.bf16 %v2134_v11 }
 0x471   :  { %4392 = vmatpush1.bf16.msra.mxu0 %v3552_v6  ;;  %v2645_v6 = vunpack.c.h.s8.bf16 %v2085_v41 }
 0x472   :  { %4556 = vmatpush1.bf16.msra.mxu1 %v3554_v21  ;;  %4393 = vmatprep.subr.bf16.mxu0 %v3569_v46  ;;  %v2101_v46 = vld [vmem:[%s11296_s3 + $0x1e8] sm:$0xff] }
 0x473   :  { %4557 = vmatprep.subr.bf16.mxu1 %v3571_v50  ;;  %v2103_v50 = vld [vmem:[%s11296_s3 + $0x1f8] sm:$0xff] }
 0x475   :  { %4394 = vmatpush1.bf16.msra.mxu0 %v3568_v23  ;;  %v2661_v23 = vunpack.c.l.s8.bf16 %v2101_v46 }
 0x476   :  { %4558 = vmatpush1.bf16.msra.mxu1 %v3570_v39  ;;  %4568 = vmatprep.subr.bf16.mxu0 %v2565_v26  ;;  %v2100_v39 = vld [vmem:[%s11296_s3 + $0x1e0] sm:$0xff]  ;;  %v2663_v26 = vunpack.c.l.s8.bf16 %v2103_v50 }
 0x477   :  { %4732 = vmatprep.subr.bf16.mxu1 %v2567_v56  ;;  %v2660_v56 = vunpack.c.l.s8.bf16 %v2100_v39 }
 0x478   :  { %4396 = vmatmul.mubr.bf16.vlgmr.msra.gmra.mrb[16].mxu0 %v9544_v42 }
 0x479   :  { %4560 = vmatmul.mubr.bf16.vlgmr.msra.gmra.mrb[16].mxu1 %v9544_v42  ;;  %4569 = vmatpush1.bf16.msra.mxu0 %v2564_v8  ;;  %v2677_v8 = vunpack.c.h.s8.bf16 %v2101_v46 }
 0x47a   :  { %4600 = vmatprep.mubr.bf16.mxu0 %v9200_v36  ;;  %4733 = vmatpush1.bf16.msra.mxu1 %v2566_v10  ;;  %v2679_v10 = vunpack.c.h.s8.bf16 %v2103_v50  ;;  %v2742_v50 = vunpack.c.h.s8.bf16 %v2134_v11 }
 0x47b   :  { %4764 = vmatprep.mubr.bf16.mxu1 %v9200_v36  ;;  %4570 = vmatprep.subr.bf16.mxu0 %v2581_v18  ;;  %v2087_v36 = vld [vmem:[%s11296_s3 + $0x178] sm:$0xff]  ;;  %v2117_v18 = vld [vmem:[%s11296_s3 + $0x268] sm:$0xff] }
 0x47c   :  { %4734 = vmatprep.subr.bf16.mxu1 %v2583_v51  ;;  %v2631_v25 = vunpack.c.l.s8.bf16 %v2087_v36  ;;  %v2647_v21 = vunpack.c.h.s8.bf16 %v2087_v36  ;;  %v2676_v51 = vunpack.c.h.s8.bf16 %v2100_v39  ;;  %v2710_v36 = vunpack.c.h.s8.bf16 %v2118_v61  ;;  %v2150_v39 = vld [vmem:[%s11296_s3 + $0x370] sm:$0xff] }
 0x47d   :  { %4571 = vmatpush1.bf16.msra.mxu0 %v2580_v35  ;;  %v2693_v35 = vunpack.c.l.s8.bf16 %v2117_v18  ;;  %v2758_v31 = vunpack.c.l.s8.bf16 %v2150_v39 }
 0x47e   :  { %4735 = vmatpush1.bf16.msra.mxu1 %v2582_v57  ;;  %4572 = vmatprep.subr.bf16.mxu0 %v2597_v52  ;;  %v2116_v57 = vld [vmem:[%s11296_s3 + $0x260] sm:$0xff]  ;;  %v2695_v52 = vunpack.c.l.s8.bf16 %v2119_v47 }
 0x47f   :  { %4736 = vmatprep.subr.bf16.mxu1 %v2599_v30  ;;  %v2692_v30 = vunpack.c.l.s8.bf16 %v2116_v57  ;;  %v2708_v41 = vunpack.c.h.s8.bf16 %v2116_v57  ;;  %v2166_v57 = vld [vmem:[%s11296_s3 + $0x3f0] sm:$0xff] }
 0x480   :  { %v2790_v61 = vunpack.c.l.s8.bf16 %v2166_v57 }
 0x481   :  { %4573 = vmatpush1.bf16.msra.mxu0 %v2596_v7  ;;  %v2709_v7 = vunpack.c.h.s8.bf16 %v2117_v18 }
 0x482   :  { %4737 = vmatpush1.bf16.msra.mxu1 %v2598_v60  ;;  %4574 = vmatprep.subr.bf16.mxu0 %v2613_v29  ;;  %v2711_v60 = vunpack.c.h.s8.bf16 %v2119_v47  ;;  %v2133_v29 = vld [vmem:[%s11296_s3 + $0x2e8] sm:$0xff]  ;;  %v2774_v47 = vunpack.c.h.s8.bf16 %v2150_v39 }
 0x483   :  { %4738 = vmatprep.subr.bf16.mxu1 %v2615_v22  ;;  %v2135_v22 = vld [vmem:[%s11296_s3 + $0x2f8] sm:$0xff] }
 0x485   :  { %4575 = vmatpush1.bf16.msra.mxu0 %v2612_v33  ;;  %v2725_v33 = vunpack.c.l.s8.bf16 %v2133_v29 }
 0x486   :  { %4739 = vmatpush1.bf16.msra.mxu1 %v2614_v3  ;;  %4576 = vmatprep.subr.bf16.mxu0 %v2629_v12  ;;  %v2132_v3 = vld [vmem:[%s11296_s3 + $0x2e0] sm:$0xff]  ;;  %v2727_v12 = vunpack.c.l.s8.bf16 %v2135_v22 }
 0x487   :  { %4740 = vmatprep.subr.bf16.mxu1 %v2631_v25  ;;  %v2724_v25 = vunpack.c.l.s8.bf16 %v2132_v3  ;;  %v2740_v46 = vunpack.c.h.s8.bf16 %v2132_v3  ;;  %v2182_v3 = vld [vmem:[%s11296_s3 + $0x470] sm:$0xff] }
 0x488   :  { %v2822_v11 = vunpack.c.l.s8.bf16 %v2182_v3 }
 0x489   :  { %4577 = vmatpush1.bf16.msra.mxu0 %v2628_v20  ;;  %v2741_v20 = vunpack.c.h.s8.bf16 %v2133_v29 }
 0x48a   :  { %4741 = vmatpush1.bf16.msra.mxu1 %v2630_v19  ;;  %4578 = vmatprep.subr.bf16.mxu0 %v2645_v6  ;;  %v2743_v19 = vunpack.c.h.s8.bf16 %v2135_v22  ;;  %v2149_v6 = vld [vmem:[%s11296_s3 + $0x368] sm:$0xff]  ;;  %v2806_v22 = vunpack.c.h.s8.bf16 %v2166_v57 }
 0x48b   :  { %4742 = vmatprep.subr.bf16.mxu1 %v2647_v21  ;;  %v2151_v21 = vld [vmem:[%s11296_s3 + $0x378] sm:$0xff] }
 0x48d   :  { %4579 = vmatpush1.bf16.msra.mxu0 %v2644_v2  ;;  %v2757_v2 = vunpack.c.l.s8.bf16 %v2149_v6 }
 0x48e   :  { %4743 = vmatpush1.bf16.msra.mxu1 %v2646_v54  ;;  %4580 = vmatprep.subr.bf16.mxu0 %v2661_v23  ;;  %v2148_v54 = vld [vmem:[%s11296_s3 + $0x360] sm:$0xff]  ;;  %v2759_v23 = vunpack.c.l.s8.bf16 %v2151_v21 }
 0x48f   :  { %4744 = vmatprep.subr.bf16.mxu1 %v2663_v26  ;;  %v2756_v26 = vunpack.c.l.s8.bf16 %v2148_v54  ;;  %v2772_v18 = vunpack.c.h.s8.bf16 %v2148_v54  ;;  %v2198_v54 = vld [vmem:[%s11296_s3 + $0x4f0] sm:$0xff] }
 0x491   :  { %4581 = vmatpush1.bf16.msra.mxu0 %v2660_v56  ;;  %v2773_v56 = vunpack.c.h.s8.bf16 %v2149_v6 }
 0x492   :  { %4745 = vmatpush1.bf16.msra.mxu1 %v2662_v34  ;;  %4582 = vmatprep.subr.bf16.mxu0 %v2677_v8  ;;  %v2775_v34 = vunpack.c.h.s8.bf16 %v2151_v21  ;;  %v2165_v8 = vld [vmem:[%s11296_s3 + $0x3e8] sm:$0xff]  ;;  %v2838_v21 = vunpack.c.h.s8.bf16 %v2182_v3 }
 0x493   :  { %4746 = vmatprep.subr.bf16.mxu1 %v2679_v10  ;;  %v2167_v10 = vld [vmem:[%s11296_s3 + $0x3f8] sm:$0xff] }
 0x495   :  { %4583 = vmatpush1.bf16.msra.mxu0 %v2676_v51  ;;  %v2789_v51 = vunpack.c.l.s8.bf16 %v2165_v8 }
 0x496   :  { %4747 = vmatpush1.bf16.msra.mxu1 %v2678_v44  ;;  %4584 = vmatprep.subr.bf16.mxu0 %v2693_v35  ;;  %v2164_v44 = vld [vmem:[%s11296_s3 + $0x3e0] sm:$0xff]  ;;  %v2791_v35 = vunpack.c.l.s8.bf16 %v2167_v10 }
 0x497   :  { %4748 = vmatprep.subr.bf16.mxu1 %v2695_v52  ;;  %v2788_v52 = vunpack.c.l.s8.bf16 %v2164_v44  ;;  %v2804_v29 = vunpack.c.h.s8.bf16 %v2164_v44 }
 0x499   :  { %4585 = vmatpush1.bf16.msra.mxu0 %v2692_v30  ;;  %v2805_v30 = vunpack.c.h.s8.bf16 %v2165_v8 }
 0x49a   :  { %4749 = vmatpush1.bf16.msra.mxu1 %v2694_v63  ;;  %4586 = vmatprep.subr.bf16.mxu0 %v2709_v7  ;;  %v2807_v63 = vunpack.c.h.s8.bf16 %v2167_v10  ;;  %v2181_v7 = vld [vmem:[%s11296_s3 + $0x468] sm:$0xff]  ;;  %v2212_v10 = vld [vmem:[%s11296_s3 + $0x560] sm:$0xff] }
 0x49b   :  { %4750 = vmatprep.subr.bf16.mxu1 %v2711_v60  ;;  %v2183_v60 = vld [vmem:[%s11296_s3 + $0x478] sm:$0xff] }
 0x49d   :  { %4587 = vmatpush1.bf16.msra.mxu0 %v2708_v41  ;;  %v2821_v41 = vunpack.c.l.s8.bf16 %v2181_v7 }
 0x49e   :  { %4751 = vmatpush1.bf16.msra.mxu1 %v2710_v36  ;;  %4588 = vmatprep.subr.bf16.mxu0 %v2725_v33  ;;  %v2180_v36 = vld [vmem:[%s11296_s3 + $0x460] sm:$0xff]  ;;  %v2823_v33 = vunpack.c.l.s8.bf16 %v2183_v60 }
 0x49f   :  { %4752 = vmatprep.subr.bf16.mxu1 %v2727_v12  ;;  %v2820_v12 = vunpack.c.l.s8.bf16 %v2180_v36  ;;  %v2836_v6 = vunpack.c.h.s8.bf16 %v2180_v36 }
 0x4a1   :  { %4589 = vmatpush1.bf16.msra.mxu0 %v2724_v25  ;;  %v2837_v25 = vunpack.c.h.s8.bf16 %v2181_v7 }
 0x4a2   :  { %4753 = vmatpush1.bf16.msra.mxu1 %v2726_v53  ;;  %4590 = vmatprep.subr.bf16.mxu0 %v2741_v20  ;;  %v2197_v53 = vld [vmem:[%s11296_s3 + $0x4e8] sm:$0xff]  ;;  %v2839_v20 = vunpack.c.h.s8.bf16 %v2183_v60  ;;  %v2228_v60 = vld [vmem:[%s11296_s3 + $0x5e0] sm:$0xff] }
 0x4a3   :  { %4754 = vmatprep.subr.bf16.mxu1 %v2743_v19  ;;  %v2199_v19 = vld [vmem:[%s11296_s3 + $0x4f8] sm:$0xff]  ;;  %v2869_v39 = vunpack.c.h.s8.bf16 %v2197_v53 }
 0x4a5   :  { %4591 = vmatpush1.bf16.msra.mxu0 %v2740_v46  ;;  %v2853_v46 = vunpack.c.l.s8.bf16 %v2197_v53 }
 0x4a6   :  { %4755 = vmatpush1.bf16.msra.mxu1 %v2742_v50  ;;  %4592 = vmatprep.subr.bf16.mxu0 %v2757_v2  ;;  %v2196_v50 = vld [vmem:[%s11296_s3 + $0x4e0] sm:$0xff]  ;;  %v2855_v2 = vunpack.c.l.s8.bf16 %v2199_v19 }
 0x4a7   :  { %4756 = vmatprep.subr.bf16.mxu1 %v2759_v23  ;;  %v2854_v23 = vunpack.c.l.s8.bf16 %v2198_v54 }
 0x4a9   :  { %4593 = vmatpush1.bf16.msra.mxu0 %v2756_v26  ;;  %v2871_v26 = vunpack.c.h.s8.bf16 %v2199_v19  ;;  %v2244_v19 = vld [vmem:[%s11296_s3 + $0x660] sm:$0xff] }
 0x4aa   :  { %4757 = vmatpush1.bf16.msra.mxu1 %v2758_v31  ;;  %4594 = vmatprep.subr.bf16.mxu0 %v2773_v56  ;;  %v2213_v31 = vld [vmem:[%s11296_s3 + $0x568] sm:$0xff]  ;;  %v2868_v56 = vunpack.c.h.s8.bf16 %v2196_v50 }
 0x4ab   :  { %4758 = vmatprep.subr.bf16.mxu1 %v2775_v34  ;;  %v2870_v34 = vunpack.c.h.s8.bf16 %v2198_v54  ;;  %v2885_v8 = vunpack.c.l.s8.bf16 %v2213_v31 }
 0x4ad   :  { %4595 = vmatpush1.bf16.msra.mxu0 %v2772_v18 }
 0x4ae   :  { %4759 = vmatpush1.bf16.msra.mxu1 %v2774_v47  ;;  %4596 = vmatprep.subr.bf16.mxu0 %v2789_v51  ;;  %v2214_v47 = vld [vmem:[%s11296_s3 + $0x570] sm:$0xff]  ;;  %v2884_v51 = vunpack.c.l.s8.bf16 %v2212_v10 }
 0x4af   :  { %4760 = vmatprep.subr.bf16.mxu1 %v2791_v35  ;;  %v2886_v44 = vunpack.c.l.s8.bf16 %v2214_v47  ;;  %v2901_v35 = vunpack.c.h.s8.bf16 %v2213_v31 }
 0x4b1   :  { %4597 = vmatpush1.bf16.msra.mxu0 %v2788_v52  ;;  %v2229_v52 = vld [vmem:[%s11296_s3 + $0x5e8] sm:$0xff] }
 0x4b2   :  { %4761 = vmatpush1.bf16.msra.mxu1 %v2790_v61  ;;  %4598 = vmatprep.subr.bf16.mxu0 %v2805_v30  ;;  %v2231_v61 = vld [vmem:[%s11296_s3 + $0x5f8] sm:$0xff]  ;;  %v2900_v30 = vunpack.c.h.s8.bf16 %v2212_v10  ;;  %v2917_v7 = vunpack.c.l.s8.bf16 %v2229_v52 }
 0x4b3   :  { %4762 = vmatprep.subr.bf16.mxu1 %v2807_v63  ;;  %v2902_v63 = vunpack.c.h.s8.bf16 %v2214_v47  ;;  %v2935_v3 = vunpack.c.h.s8.bf16 %v2231_v61 }
 0x4b5   :  { %4599 = vmatpush1.bf16.msra.mxu0 %v2804_v29  ;;  %v2919_v29 = vunpack.c.l.s8.bf16 %v2231_v61  ;;  %v2276_v61 = vld [vmem:[%s11296_s3 + $0x760] sm:$0xff] }
 0x4b6   :  { %4763 = vmatpush1.bf16.msra.mxu1 %v2806_v22  ;;  %4609 = vmatprep.subr.bf16.mxu0 %v2821_v41  ;;  %v2230_v22 = vld [vmem:[%s11296_s3 + $0x5f0] sm:$0xff]  ;;  %v2916_v41 = vunpack.c.l.s8.bf16 %v2228_v60 }
 0x4b7   :  { %4773 = vmatprep.subr.bf16.mxu1 %v2823_v33  ;;  %v2918_v36 = vunpack.c.l.s8.bf16 %v2230_v22  ;;  %v2933_v33 = vunpack.c.h.s8.bf16 %v2229_v52  ;;  %v2934_v53 = vunpack.c.h.s8.bf16 %v2230_v22 }
 0x4b8   :  { %4601 = vmatmul.mubr.bf16.vlgmr.msra.gmra.mrb[20].mxu0 %v9202_v40 }
 0x4b9   :  { %4765 = vmatmul.mubr.bf16.vlgmr.msra.gmra.mrb[20].mxu1 %v9202_v40  ;;  %4610 = vmatpush1.bf16.msra.mxu0 %v2820_v12  ;;  %v2852_v40 = vunpack.c.l.s8.bf16 %v2196_v50  ;;  %v2245_v12 = vld [vmem:[%s11296_s3 + $0x668] sm:$0xff] }
 0x4ba   :  { %4641 = vmatprep.mubr.bf16.mxu0 %v9212_v45  ;;  %4774 = vmatpush1.bf16.msra.mxu1 %v2822_v11  ;;  %v2247_v11 = vld [vmem:[%s11296_s3 + $0x678] sm:$0xff] }
 0x4bb   :  { %4805 = vmatprep.mubr.bf16.mxu1 %v9212_v45  ;;  %4611 = vmatprep.subr.bf16.mxu0 %v2837_v25  ;;  %v2215_v45 = vld [vmem:[%s11296_s3 + $0x578] sm:$0xff]  ;;  %v2932_v25 = vunpack.c.h.s8.bf16 %v2228_v60  ;;  %v2967_v54 = vunpack.c.h.s8.bf16 %v2247_v11 }
 0x4bc   :  { %4775 = vmatprep.subr.bf16.mxu1 %v2839_v20  ;;  %v2887_v18 = vunpack.c.l.s8.bf16 %v2215_v45  ;;  %v2903_v57 = vunpack.c.h.s8.bf16 %v2215_v45  ;;  %v2949_v20 = vunpack.c.l.s8.bf16 %v2245_v12  ;;  %v2260_v45 = vld [vmem:[%s11296_s3 + $0x6e0] sm:$0xff] }
 0x4bd   :  { %4612 = vmatpush1.bf16.msra.mxu0 %v2836_v6  ;;  %v2951_v6 = vunpack.c.l.s8.bf16 %v2247_v11  ;;  %v2292_v11 = vld [vmem:[%s11296_s3 + $0x7e0] sm:$0xff] }
 0x4be   :  { %4776 = vmatpush1.bf16.msra.mxu1 %v2838_v21  ;;  %4613 = vmatprep.subr.bf16.mxu0 %v2853_v46  ;;  %v2246_v21 = vld [vmem:[%s11296_s3 + $0x670] sm:$0xff]  ;;  %v2948_v46 = vunpack.c.l.s8.bf16 %v2244_v19 }
 0x4bf   :  { %4777 = vmatprep.subr.bf16.mxu1 %v2855_v2  ;;  %v2950_v50 = vunpack.c.l.s8.bf16 %v2246_v21  ;;  %v2965_v2 = vunpack.c.h.s8.bf16 %v2245_v12 }
 0x4c1   :  { %4614 = vmatpush1.bf16.msra.mxu0 %v2852_v40  ;;  %v2261_v40 = vld [vmem:[%s11296_s3 + $0x6e8] sm:$0xff] }
 0x4c2   :  { %4778 = vmatpush1.bf16.msra.mxu1 %v2854_v23  ;;  %4615 = vmatprep.subr.bf16.mxu0 %v2869_v39  ;;  %v2263_v23 = vld [vmem:[%s11296_s3 + $0x6f8] sm:$0xff]  ;;  %v2964_v39 = vunpack.c.h.s8.bf16 %v2244_v19  ;;  %v2981_v31 = vunpack.c.l.s8.bf16 %v2261_v40 }
 0x4c3   :  { %4779 = vmatprep.subr.bf16.mxu1 %v2871_v26  ;;  %v2966_v26 = vunpack.c.h.s8.bf16 %v2246_v21  ;;  %v2999_v47 = vunpack.c.h.s8.bf16 %v2263_v23 }
 0x4c5   :  { %4616 = vmatpush1.bf16.msra.mxu0 %v2868_v56  ;;  %v2983_v56 = vunpack.c.l.s8.bf16 %v2263_v23  ;;  %v2308_v23 = vld [vmem:[%s11296_s3 + $0x860] sm:$0xff] }
 0x4c6   :  { %4780 = vmatpush1.bf16.msra.mxu1 %v2870_v34  ;;  %4617 = vmatprep.subr.bf16.mxu0 %v2885_v8  ;;  %v2262_v34 = vld [vmem:[%s11296_s3 + $0x6f0] sm:$0xff]  ;;  %v2980_v8 = vunpack.c.l.s8.bf16 %v2260_v45 }
 0x4c7   :  { %4781 = vmatprep.subr.bf16.mxu1 %v2887_v18  ;;  %v2982_v10 = vunpack.c.l.s8.bf16 %v2262_v34  ;;  %v2997_v18 = vunpack.c.h.s8.bf16 %v2261_v40 }
 0x4c9   :  { %4618 = vmatpush1.bf16.msra.mxu0 %v2884_v51  ;;  %v2277_v51 = vld [vmem:[%s11296_s3 + $0x768] sm:$0xff] }
 0x4ca   :  { %4782 = vmatpush1.bf16.msra.mxu1 %v2886_v44  ;;  %4619 = vmatprep.subr.bf16.mxu0 %v2901_v35  ;;  %v2279_v44 = vld [vmem:[%s11296_s3 + $0x778] sm:$0xff]  ;;  %v2996_v35 = vunpack.c.h.s8.bf16 %v2260_v45  ;;  %v3013_v52 = vunpack.c.l.s8.bf16 %v2277_v51 }
 0x4cb   :  { %4783 = vmatprep.subr.bf16.mxu1 %v2903_v57  ;;  %v2998_v57 = vunpack.c.h.s8.bf16 %v2262_v34  ;;  %v3031_v22 = vunpack.c.h.s8.bf16 %v2279_v44  ;;  %v2325_v34 = vld [vmem:[%s11296_s3 + $0x8e8] sm:$0xff] }
 0x4cd   :  { %4620 = vmatpush1.bf16.msra.mxu0 %v2900_v30  ;;  %v3015_v30 = vunpack.c.l.s8.bf16 %v2279_v44  ;;  %v2324_v44 = vld [vmem:[%s11296_s3 + $0x8e0] sm:$0xff] }
 0x4ce   :  { %4784 = vmatpush1.bf16.msra.mxu1 %v2902_v63  ;;  %4621 = vmatprep.subr.bf16.mxu0 %v2917_v7  ;;  %v2278_v63 = vld [vmem:[%s11296_s3 + $0x770] sm:$0xff]  ;;  %v3012_v7 = vunpack.c.l.s8.bf16 %v2276_v61 }
 0x4cf   :  { %4785 = vmatprep.subr.bf16.mxu1 %v2919_v29  ;;  %v3014_v60 = vunpack.c.l.s8.bf16 %v2278_v63  ;;  %v3029_v29 = vunpack.c.h.s8.bf16 %v2277_v51  ;;  %v3109_v51 = vunpack.c.l.s8.bf16 %v2325_v34 }
 0x4d1   :  { %4622 = vmatpush1.bf16.msra.mxu0 %v2916_v41  ;;  %v2293_v41 = vld [vmem:[%s11296_s3 + $0x7e8] sm:$0xff] }
 0x4d2   :  { %4786 = vmatpush1.bf16.msra.mxu1 %v2918_v36  ;;  %4623 = vmatprep.subr.bf16.mxu0 %v2933_v33  ;;  %v2295_v36 = vld [vmem:[%s11296_s3 + $0x7f8] sm:$0xff]  ;;  %v3028_v33 = vunpack.c.h.s8.bf16 %v2276_v61  ;;  %v3045_v12 = vunpack.c.l.s8.bf16 %v2293_v41  ;;  %v3125_v61 = vunpack.c.h.s8.bf16 %v2325_v34  ;;  %v2372_v34 = vld [vmem:[%s11296_s3 + $0xa60] sm:$0xff] }
 0x4d3   :  { %4787 = vmatprep.subr.bf16.mxu1 %v2935_v3  ;;  %v3030_v3 = vunpack.c.h.s8.bf16 %v2278_v63  ;;  %v3063_v21 = vunpack.c.h.s8.bf16 %v2295_v36  ;;  %v2341_v63 = vld [vmem:[%s11296_s3 + $0x968] sm:$0xff] }
 0x4d5   :  { %4624 = vmatpush1.bf16.msra.mxu0 %v2932_v25  ;;  %v3047_v25 = vunpack.c.l.s8.bf16 %v2295_v36  ;;  %v2342_v36 = vld [vmem:[%s11296_s3 + $0x970] sm:$0xff] }
 0x4d6   :  { %4788 = vmatpush1.bf16.msra.mxu1 %v2934_v53  ;;  %4625 = vmatprep.subr.bf16.mxu0 %v2949_v20  ;;  %v2294_v53 = vld [vmem:[%s11296_s3 + $0x7f0] sm:$0xff]  ;;  %v3044_v20 = vunpack.c.l.s8.bf16 %v2292_v11 }
 0x4d7   :  { %4789 = vmatprep.subr.bf16.mxu1 %v2951_v6  ;;  %v3046_v19 = vunpack.c.l.s8.bf16 %v2294_v53  ;;  %v3061_v6 = vunpack.c.h.s8.bf16 %v2293_v41 }
 0x4d9   :  { %4626 = vmatpush1.bf16.msra.mxu0 %v2948_v46  ;;  %v2309_v46 = vld [vmem:[%s11296_s3 + $0x868] sm:$0xff] }
 0x4da   :  { %4790 = vmatpush1.bf16.msra.mxu1 %v2950_v50  ;;  %4627 = vmatprep.subr.bf16.mxu0 %v2965_v2  ;;  %v2311_v50 = vld [vmem:[%s11296_s3 + $0x878] sm:$0xff]  ;;  %v3060_v2 = vunpack.c.h.s8.bf16 %v2292_v11  ;;  %v3077_v40 = vunpack.c.l.s8.bf16 %v2309_v46 }
 0x4db   :  { %4791 = vmatprep.subr.bf16.mxu1 %v2967_v54  ;;  %v3062_v54 = vunpack.c.h.s8.bf16 %v2294_v53  ;;  %v2359_v53 = vld [vmem:[%s11296_s3 + $0x9f8] sm:$0xff] }
 0x4dd   :  { %4628 = vmatpush1.bf16.msra.mxu0 %v2964_v39  ;;  %v3079_v39 = vunpack.c.l.s8.bf16 %v2311_v50 }
 0x4de   :  { %4792 = vmatpush1.bf16.msra.mxu1 %v2966_v26  ;;  %4629 = vmatprep.subr.bf16.mxu0 %v2981_v31  ;;  %v2310_v26 = vld [vmem:[%s11296_s3 + $0x870] sm:$0xff]  ;;  %v3076_v31 = vunpack.c.l.s8.bf16 %v2308_v23 }
 0x4df   :  { %4793 = vmatprep.subr.bf16.mxu1 %v2983_v56  ;;  %v3078_v45 = vunpack.c.l.s8.bf16 %v2310_v26  ;;  %v3093_v56 = vunpack.c.h.s8.bf16 %v2309_v46  ;;  %v3175_v46 = vunpack.c.l.s8.bf16 %v2359_v53 }
 0x4e1   :  { %4630 = vmatpush1.bf16.msra.mxu0 %v2980_v8  ;;  %v3095_v8 = vunpack.c.h.s8.bf16 %v2311_v50  ;;  %v2358_v50 = vld [vmem:[%s11296_s3 + $0x9f0] sm:$0xff] }
 0x4e2   :  { %4794 = vmatpush1.bf16.msra.mxu1 %v2982_v10  ;;  %4631 = vmatprep.subr.bf16.mxu0 %v2997_v18  ;;  %v2327_v10 = vld [vmem:[%s11296_s3 + $0x8f8] sm:$0xff]  ;;  %v3092_v18 = vunpack.c.h.s8.bf16 %v2308_v23  ;;  %v3191_v23 = vunpack.c.h.s8.bf16 %v2359_v53  ;;  %v2406_v53 = vld [vmem:[%s11296_s3 + $0xb70] sm:$0xff] }
 0x4e3   :  { %4795 = vmatprep.subr.bf16.mxu1 %v2999_v47  ;;  %v3094_v47 = vunpack.c.h.s8.bf16 %v2310_v26  ;;  %v2375_v26 = vld [vmem:[%s11296_s3 + $0xa78] sm:$0xff] }
 0x4e5   :  { %4632 = vmatpush1.bf16.msra.mxu0 %v2996_v35  ;;  %v3111_v35 = vunpack.c.l.s8.bf16 %v2327_v10 }
 0x4e6   :  { %4796 = vmatpush1.bf16.msra.mxu1 %v2998_v57  ;;  %4633 = vmatprep.subr.bf16.mxu0 %v3013_v52  ;;  %v2326_v57 = vld [vmem:[%s11296_s3 + $0x8f0] sm:$0xff] }
 0x4e7   :  { %4797 = vmatprep.subr.bf16.mxu1 %v3015_v30  ;;  %v3110_v52 = vunpack.c.l.s8.bf16 %v2326_v57  ;;  %v3127_v30 = vunpack.c.h.s8.bf16 %v2327_v10  ;;  %v2374_v10 = vld [vmem:[%s11296_s3 + $0xa70] sm:$0xff] }
 0x4e9   :  { %4634 = vmatpush1.bf16.msra.mxu0 %v3012_v7  ;;  %v3124_v7 = vunpack.c.h.s8.bf16 %v2324_v44 }
 0x4ea   :  { %4798 = vmatpush1.bf16.msra.mxu1 %v3014_v60  ;;  %4635 = vmatprep.subr.bf16.mxu0 %v3029_v29  ;;  %v3126_v60 = vunpack.c.h.s8.bf16 %v2326_v57  ;;  %v3141_v29 = vunpack.c.l.s8.bf16 %v2341_v63  ;;  %v2391_v57 = vld [vmem:[%s11296_s3 + $0xaf8] sm:$0xff] }
 0x4eb   :  { %4799 = vmatprep.subr.bf16.mxu1 %v3031_v22  ;;  %v2340_v22 = vld [vmem:[%s11296_s3 + $0x960] sm:$0xff] }
 0x4ed   :  { %4636 = vmatpush1.bf16.msra.mxu0 %v3028_v33  ;;  %v3140_v33 = vunpack.c.l.s8.bf16 %v2340_v22 }
 0x4ee   :  { %4800 = vmatpush1.bf16.msra.mxu1 %v3030_v3  ;;  %4637 = vmatprep.subr.bf16.mxu0 %v3045_v12  ;;  %v3142_v3 = vunpack.c.l.s8.bf16 %v2342_v36  ;;  %v3157_v12 = vunpack.c.h.s8.bf16 %v2341_v63  ;;  %v3239_v63 = vunpack.c.l.s8.bf16 %v2391_v57 }
 0x4ef   :  { %4801 = vmatprep.subr.bf16.mxu1 %v3047_v25  ;;  %v2357_v25 = vld [vmem:[%s11296_s3 + $0x9e8] sm:$0xff] }
 0x4f1   :  { %4638 = vmatpush1.bf16.msra.mxu0 %v3044_v20  ;;  %v3156_v20 = vunpack.c.h.s8.bf16 %v2340_v22  ;;  %v3255_v22 = vunpack.c.h.s8.bf16 %v2391_v57  ;;  %v2438_v57 = vld [vmem:[%s11296_s3 + $0xc70] sm:$0xff] }
 0x4f2   :  { %4802 = vmatpush1.bf16.msra.mxu1 %v3046_v19  ;;  %4639 = vmatprep.subr.bf16.mxu0 %v3061_v6  ;;  %v3158_v19 = vunpack.c.h.s8.bf16 %v2342_v36  ;;  %v3173_v6 = vunpack.c.l.s8.bf16 %v2357_v25  ;;  %v2407_v36 = vld [vmem:[%s11296_s3 + $0xb78] sm:$0xff] }
 0x4f3   :  { %4803 = vmatprep.subr.bf16.mxu1 %v3063_v21  ;;  %v2356_v21 = vld [vmem:[%s11296_s3 + $0x9e0] sm:$0xff] }
 0x4f5   :  { %4640 = vmatpush1.bf16.msra.mxu0 %v3060_v2  ;;  %v3172_v2 = vunpack.c.l.s8.bf16 %v2356_v21 }
 0x4f6   :  { %4804 = vmatpush1.bf16.msra.mxu1 %v3062_v54  ;;  %4650 = vmatprep.subr.bf16.mxu0 %v3077_v40  ;;  %v3174_v54 = vunpack.c.l.s8.bf16 %v2358_v50  ;;  %v3189_v40 = vunpack.c.h.s8.bf16 %v2357_v25  ;;  %v3271_v25 = vunpack.c.l.s8.bf16 %v2407_v36 }
 0x4f7   :  { %4814 = vmatprep.subr.bf16.mxu1 %v3079_v39  ;;  %v2373_v39 = vld [vmem:[%s11296_s3 + $0xa68] sm:$0xff] }
 0x4f8   :  { %4642 = vmatmul.mubr.bf16.vlgmr.msra.gmra.mrb[20].mxu0 %v9314_v27 }
 0x4f9   :  { %4806 = vmatmul.mubr.bf16.vlgmr.msra.gmra.mrb[20].mxu1 %v9314_v27  ;;  %4651 = vmatpush1.bf16.msra.mxu0 %v3076_v31  ;;  %v3108_v27 = vunpack.c.l.s8.bf16 %v2324_v44  ;;  %v3188_v31 = vunpack.c.h.s8.bf16 %v2356_v21  ;;  %v3223_v44 = vunpack.c.h.s8.bf16 %v2375_v26  ;;  %v3287_v21 = vunpack.c.h.s8.bf16 %v2407_v36  ;;  %v2454_v36 = vld [vmem:[%s11296_s3 + $0xcf0] sm:$0xff] }
 0x4fa   :  { %4682 = vmatprep.mubr.bf16.mxu0 %v9431_v32  ;;  %4815 = vmatpush1.bf16.msra.mxu1 %v3078_v45  ;;  %v3190_v45 = vunpack.c.h.s8.bf16 %v2358_v50  ;;  %v2423_v50 = vld [vmem:[%s11296_s3 + $0xbf8] sm:$0xff] }
 0x4fb   :  { %4846 = vmatprep.mubr.bf16.mxu1 %v9431_v32  ;;  %4652 = vmatprep.subr.bf16.mxu0 %v3093_v56  ;;  %v2343_v32 = vld [vmem:[%s11296_s3 + $0x978] sm:$0xff]  ;;  %v3205_v56 = vunpack.c.l.s8.bf16 %v2373_v39 }
 0x4fc   :  { %4816 = vmatprep.subr.bf16.mxu1 %v3095_v8  ;;  %v3143_v41 = vunpack.c.l.s8.bf16 %v2343_v32  ;;  %v3159_v11 = vunpack.c.h.s8.bf16 %v2343_v32  ;;  %v3207_v8 = vunpack.c.l.s8.bf16 %v2375_v26  ;;  %v2390_v32 = vld [vmem:[%s11296_s3 + $0xaf0] sm:$0xff] }
 0x4fd   :  { %4653 = vmatpush1.bf16.msra.mxu0 %v3092_v18  ;;  %v3204_v18 = vunpack.c.l.s8.bf16 %v2372_v34  ;;  %v2422_v26 = vld [vmem:[%s11296_s3 + $0xbf0] sm:$0xff] }
 0x4fe   :  { %4817 = vmatpush1.bf16.msra.mxu1 %v3094_v47  ;;  %4654 = vmatprep.subr.bf16.mxu0 %v3109_v51  ;;  %v3206_v47 = vunpack.c.l.s8.bf16 %v2374_v10  ;;  %v3221_v51 = vunpack.c.h.s8.bf16 %v2373_v39  ;;  %v3303_v39 = vunpack.c.l.s8.bf16 %v2423_v50 }
 0x4ff   :  { %4818 = vmatprep.subr.bf16.mxu1 %v3111_v35  ;;  %v2389_v35 = vld [vmem:[%s11296_s3 + $0xae8] sm:$0xff] }
 0x501   :  { %4655 = vmatpush1.bf16.msra.mxu0 %v3108_v27  ;;  %v3220_v27 = vunpack.c.h.s8.bf16 %v2372_v34  ;;  %v3319_v34 = vunpack.c.h.s8.bf16 %v2423_v50  ;;  %v6483_v50 = vld [vmem:[#allocation7 + $0x20] sm:$0x77] }
 0x502   :  { %4819 = vmatpush1.bf16.msra.mxu1 %v3110_v52  ;;  %4656 = vmatprep.subr.bf16.mxu0 %v3125_v61  ;;  %v3222_v52 = vunpack.c.h.s8.bf16 %v2374_v10  ;;  %v3237_v61 = vunpack.c.l.s8.bf16 %v2389_v35  ;;  %v2439_v10 = vld [vmem:[%s11296_s3 + $0xc78] sm:$0xff] }
 0x503   :  { %4820 = vmatprep.subr.bf16.mxu1 %v3127_v30  ;;  %v2388_v30 = vld [vmem:[%s11296_s3 + $0xae0] sm:$0xff] }
 0x505   :  { %4657 = vmatpush1.bf16.msra.mxu0 %v3124_v7  ;;  %v3236_v7 = vunpack.c.l.s8.bf16 %v2388_v30 }
 0x506   :  { %4821 = vmatpush1.bf16.msra.mxu1 %v3126_v60  ;;  %4658 = vmatprep.subr.bf16.mxu0 %v3141_v29  ;;  %v3238_v60 = vunpack.c.l.s8.bf16 %v2390_v32  ;;  %v3253_v29 = vunpack.c.h.s8.bf16 %v2389_v35  ;;  %v3335_v35 = vunpack.c.l.s8.bf16 %v2439_v10 }
 0x507   :  { %4822 = vmatprep.subr.bf16.mxu1 %v3143_v41  ;;  %v2405_v41 = vld [vmem:[%s11296_s3 + $0xb68] sm:$0xff] }
 0x509   :  { %4659 = vmatpush1.bf16.msra.mxu0 %v3140_v33  ;;  %v3252_v33 = vunpack.c.h.s8.bf16 %v2388_v30  ;;  %v2453_v30 = vld [vmem:[%s11296_s3 + $0xce8] sm:$0xff] }
 0x50a   :  { %4823 = vmatpush1.bf16.msra.mxu1 %v3142_v3  ;;  %4660 = vmatprep.subr.bf16.mxu0 %v3157_v12  ;;  %v3254_v3 = vunpack.c.h.s8.bf16 %v2390_v32  ;;  %v3269_v12 = vunpack.c.l.s8.bf16 %v2405_v41  ;;  %v2455_v32 = vld [vmem:[%s11296_s3 + $0xcf8] sm:$0xff] }
 0x50b   :  { %4824 = vmatprep.subr.bf16.mxu1 %v3159_v11  ;;  %v2404_v11 = vld [vmem:[%s11296_s3 + $0xb60] sm:$0xff] }
 0x50d   :  { %4661 = vmatpush1.bf16.msra.mxu0 %v3156_v20  ;;  %v3268_v20 = vunpack.c.l.s8.bf16 %v2404_v11 }
 0x50e   :  { %4825 = vmatpush1.bf16.msra.mxu1 %v3158_v19  ;;  %4662 = vmatprep.subr.bf16.mxu0 %v3173_v6  ;;  %v3270_v19 = vunpack.c.l.s8.bf16 %v2406_v53  ;;  %v3285_v6 = vunpack.c.h.s8.bf16 %v2405_v41  ;;  %v3367_v41 = vunpack.c.l.s8.bf16 %v2455_v32 }
 0x50f   :  { %4826 = vmatprep.subr.bf16.mxu1 %v3175_v46  ;;  %v2421_v46 = vld [vmem:[%s11296_s3 + $0xbe8] sm:$0xff] }
 0x511   :  { %4663 = vmatpush1.bf16.msra.mxu0 %v3172_v2  ;;  %v3284_v2 = vunpack.c.h.s8.bf16 %v2404_v11  ;;  %v2469_v11 = vld [vmem:[%s11296_s3 + $0xd68] sm:$0xff] }
 0x512   :  { %4827 = vmatpush1.bf16.msra.mxu1 %v3174_v54  ;;  %4664 = vmatprep.subr.bf16.mxu0 %v3189_v40  ;;  %v3286_v54 = vunpack.c.h.s8.bf16 %v2406_v53  ;;  %v3301_v40 = vunpack.c.l.s8.bf16 %v2421_v46 }
 0x513   :  { %4828 = vmatprep.subr.bf16.mxu1 %v3191_v23  ;;  %v2420_v23 = vld [vmem:[%s11296_s3 + $0xbe0] sm:$0xff] }
 0x515   :  { %4665 = vmatpush1.bf16.msra.mxu0 %v3188_v31  ;;  %v3300_v31 = vunpack.c.l.s8.bf16 %v2420_v23 }
 0x516   :  { %4829 = vmatpush1.bf16.msra.mxu1 %v3190_v45  ;;  %4666 = vmatprep.subr.bf16.mxu0 %v3205_v56  ;;  %v3302_v45 = vunpack.c.l.s8.bf16 %v2422_v26  ;;  %v3317_v56 = vunpack.c.h.s8.bf16 %v2421_v46  ;;  %v3397_v46 = vunpack.c.l.s8.bf16 %v2469_v11 }
 0x517   :  { %4830 = vmatprep.subr.bf16.mxu1 %v3207_v8  ;;  %v2437_v8 = vld [vmem:[%s11296_s3 + $0xc68] sm:$0xff] }
 0x519   :  { %4667 = vmatpush1.bf16.msra.mxu0 %v3204_v18  ;;  %v3316_v18 = vunpack.c.h.s8.bf16 %v2420_v23 }
 0x51a   :  { %4831 = vmatpush1.bf16.msra.mxu1 %v3206_v47  ;;  %4668 = vmatprep.subr.bf16.mxu0 %v3221_v51  ;;  %v3318_v47 = vunpack.c.h.s8.bf16 %v2422_v26  ;;  %v3333_v51 = vunpack.c.l.s8.bf16 %v2437_v8 }
 0x51b   :  { %4832 = vmatprep.subr.bf16.mxu1 %v3223_v44  ;;  %v2436_v44 = vld [vmem:[%s11296_s3 + $0xc60] sm:$0xff] }
 0x51d   :  { %4669 = vmatpush1.bf16.msra.mxu0 %v3220_v27  ;;  %v3332_v27 = vunpack.c.l.s8.bf16 %v2436_v44 }
 0x51e   :  { %4833 = vmatpush1.bf16.msra.mxu1 %v3222_v52  ;;  %4670 = vmatprep.subr.bf16.mxu0 %v3237_v61  ;;  %v3334_v52 = vunpack.c.l.s8.bf16 %v2438_v57  ;;  %v3349_v61 = vunpack.c.h.s8.bf16 %v2437_v8  ;;  %v3413_v8 = vunpack.c.h.s8.bf16 %v2469_v11 }
 0x51f   :  { %4834 = vmatprep.subr.bf16.mxu1 %v3239_v63  ;;  %v3351_v63 = vunpack.c.h.s8.bf16 %v2439_v10  ;;  %v6930_v10 = vrot.slane %v6483_v50, %v9285_v37 }
 0x521   :  { %4671 = vmatpush1.bf16.msra.mxu0 %v3236_v7  ;;  %v3348_v7 = vunpack.c.h.s8.bf16 %v2436_v44 }
 0x522   :  { %4835 = vmatpush1.bf16.msra.mxu1 %v3238_v60  ;;  %4672 = vmatprep.subr.bf16.mxu0 %v3253_v29  ;;  %v3350_v60 = vunpack.c.h.s8.bf16 %v2438_v57  ;;  %v3365_v29 = vunpack.c.l.s8.bf16 %v2453_v30  ;;  %v6534_v57 = vrot.slane %v6483_v50, %v9397_v55 }
 0x523   :  { %4836 = vmatprep.subr.bf16.mxu1 %v3255_v22  ;;  %v2452_v22 = vld [vmem:[%s11296_s3 + $0xce0] sm:$0xff] }
 0x524   :  { %v3380_v53 = vunpack.c.h.s8.bf16 %v2452_v22 }
 0x525   :  { %4673 = vmatpush1.bf16.msra.mxu0 %v3252_v33  ;;  %v3366_v33 = vunpack.c.l.s8.bf16 %v2454_v36 }
 0x526   :  { %4837 = vmatpush1.bf16.msra.mxu1 %v3254_v3  ;;  %4674 = vmatprep.subr.bf16.mxu0 %v3269_v12  ;;  %v3381_v3 = vunpack.c.h.s8.bf16 %v2453_v30  ;;  %v3383_v12 = vunpack.c.h.s8.bf16 %v2455_v32  ;;  %v6738_v30 = vrot.slane %v6483_v50, %v9400_v58 }
 0x527   :  { %4838 = vmatprep.subr.bf16.mxu1 %v3271_v25  ;;  %v10984_v25 = vld [vmem:[%s11296_s3 + $0xd60] sm:$0xff] }
 0x529   :  { %4675 = vmatpush1.bf16.msra.mxu0 %v3268_v20  ;;  %v10989_v20 = vld [vmem:[%s11296_s3 + $0xd70] sm:$0xff] }
 0x52a   :  { %4839 = vmatpush1.bf16.msra.mxu1 %v3270_v19  ;;  %4676 = vmatprep.subr.bf16.mxu0 %v3285_v6  ;;  %v10994_v19 = vld [vmem:[%s11297_s4 + $0x8] sm:$0xff]  ;;  %v3398_v23 = vunpack.c.l.s8.bf16 %v10989_v20  ;;  %v3414_v32 = vunpack.c.h.s8.bf16 %v10989_v20 }
 0x52b   :  { %4840 = vmatprep.subr.bf16.mxu1 %v3287_v21  ;;  %v10999_v6 = vld [vmem:[%s11298_s5 + $0x8] sm:$0xff]  ;;  %v3382_v21 = vunpack.c.h.s8.bf16 %v2454_v36  ;;  %v11050_v36 = vld [vmem:[%s11296_s3 + $0xde0] sm:$0xff] }
 0x52c   :  { %v5035_v26 = vrot.slane %v10999_v6, %v9176_v13 }
 0x52d   :  { %4677 = vmatpush1.bf16.msra.mxu0 %v3284_v2 }
 0x52e   :  { %4841 = vmatpush1.bf16.msra.mxu1 %v3286_v54  ;;  %4678 = vmatprep.subr.bf16.mxu0 %v3301_v40  ;;  %v3396_v54 = vunpack.c.l.s8.bf16 %v10984_v25  ;;  %v11002_v40 = vld [vmem:[#allocation7 + $0x28] sm:$0x77] }
 0x52f   :  { %4842 = vmatprep.subr.bf16.mxu1 %v3303_v39  ;;  %v4935_v39 = vrot.slane %v10994_v19, %v9176_v13  ;;  %v6742_v44 = vrot.slane %v11002_v40, %v9179_v59 }
 0x531   :  { %4679 = vmatpush1.bf16.msra.mxu0 %v3300_v31  ;;  %v4943_v31 = vrot.slane %v10994_v19, %v9285_v37 }
 0x532   :  { %4843 = vmatpush1.bf16.msra.mxu1 %v3302_v45  ;;  %4680 = vmatprep.subr.bf16.mxu0 %v3317_v56  ;;  %v6530_v45 = vrot.slane %v6483_v50, %v9176_v13  ;;  %v6734_v56 = vrot.slane %v6483_v50, %v9179_v59 }
 0x533   :  { %4844 = vmatprep.subr.bf16.mxu1 %v3319_v34  ;;  %v4939_v34 = vrot.slane %v10994_v19, %v9179_v59 }
 0x535   :  { %4681 = vmatpush1.bf16.msra.mxu0 %v3316_v18  ;;  %v6538_v18 = vrot.slane %v11002_v40, %v9176_v13 }
 0x536   :  { %4845 = vmatpush1.bf16.msra.mxu1 %v3318_v47  ;;  %4691 = vmatprep.subr.bf16.mxu0 %v3333_v51  ;;  %v4947_v47 = vrot.slane %v10994_v19, %v9184_v16 }
 0x537   :  { %4855 = vmatprep.subr.bf16.mxu1 %v3335_v35  ;;  %v6938_v35 = vrot.slane %v11002_v40, %v9285_v37 }
 0x538   :  { %4683 = vmatmul.mubr.bf16.vlgmr.msra.gmra.mrb[20].mxu0 %v9433_v38 }
 0x539   :  { %4847 = vmatmul.mubr.bf16.vlgmr.msra.gmra.mrb[20].mxu1 %v9433_v38  ;;  %4692 = vmatpush1.bf16.msra.mxu0 %v3332_v27  ;;  %v3364_v38 = vunpack.c.l.s8.bf16 %v2452_v22  ;;  %v3412_v27 = vunpack.c.h.s8.bf16 %v10984_v25  ;;  %v5039_v22 = vrot.slane %v10999_v6, %v9179_v59  ;;  %v11068_v25 = vrot.slane %v6938_v35, %v9285_v37 }
 0x53a   :  { %4723 = vmatprep.mubr.bf16.mxu0 %v9443_v15  ;;  %4856 = vmatpush1.bf16.msra.mxu1 %v3334_v52  ;;  %v11029_v52 = vld [vmem:[%s11296_s3 + $0xde8] sm:$0xff] }
 0x53b   :  { %4887 = vmatprep.mubr.bf16.mxu1 %v9443_v15  ;;  %4693 = vmatprep.subr.bf16.mxu0 %v3349_v61  ;;  %v2471_v15 = vld [vmem:[%s11296_s3 + $0xd78] sm:$0xff]  ;;  %v5043_v61 = vrot.slane %v10999_v6, %v9285_v37 }
 0x53c   :  { %4857 = vmatprep.subr.bf16.mxu1 %v3351_v63  ;;  %v3399_v2 = vunpack.c.l.s8.bf16 %v2471_v15  ;;  %v3415_v51 = vunpack.c.h.s8.bf16 %v2471_v15  ;;  %v6934_v63 = vrot.slane %v6483_v50, %v9516_v5  ;;  %v11065_v15 = vrot.slane %v6742_v44, %v9179_v59 }
 0x53d   :  { %4694 = vmatpush1.bf16.msra.mxu0 %v3348_v7  ;;  %v11039_v7 = vld [vmem:[%s11296_s3 + $0xdf8] sm:$0xff] }
 0x53e   :  { %4858 = vmatpush1.bf16.msra.mxu1 %v3350_v60  ;;  %4695 = vmatprep.subr.bf16.mxu0 %v3365_v29  ;;  %v6610_v60 = vrot.slane %v6530_v45, %v9176_v13  ;;  %v6814_v29 = vrot.slane %v6734_v56, %v9179_v59  ;;  %v3431_v20 = vunpack.c.l.s8.bf16 %v11039_v7 }
 0x53f   :  { %4859 = vmatprep.subr.bf16.mxu1 %v3367_v41  ;;  %v5047_v41 = vrot.slane %v10999_v6, %v9184_v16  ;;  %v11062_v16 = vld [vmem:[%s11296_s3 + $0xdf0] sm:$0xff] }
 0x541   :  { %4696 = vmatpush1.bf16.msra.mxu0 %v3364_v38  ;;  %v7010_v38 = vrot.slane %v6930_v10, %v9285_v37 }
 0x542   :  { %4860 = vmatpush1.bf16.msra.mxu1 %v3366_v33  ;;  %4697 = vmatprep.subr.bf16.mxu0 %v3381_v3  ;;  %v11054_v33 = vrot.slane %v6538_v18, %v9176_v13  ;;  %v6746_v3 = vrot.slane %v11002_v40, %v9400_v58  ;;  %v3430_v18 = vunpack.c.l.s8.bf16 %v11062_v16 }
 0x543   :  { %4861 = vmatprep.subr.bf16.mxu1 %v3383_v12  ;;  %v3429_v12 = vunpack.c.l.s8.bf16 %v11029_v52 }
 0x545   :  { %4698 = vmatpush1.bf16.msra.mxu0 %v3380_v53  ;;  %v6614_v53 = vrot.slane %v6534_v57, %v9176_v13  ;;  %v6826_v57 = vrot.slane %v6746_v3, %v9179_v59  ;;  %v6942_v3 = vrot.slane %v11002_v40, %v9516_v5 }
 0x546   :  { %4862 = vmatpush1.bf16.msra.mxu1 %v3382_v21  ;;  %4699 = vmatprep.subr.bf16.mxu0 %v3397_v46 }
 0x547   :  { %4863 = vmatprep.subr.bf16.mxu1 %v3399_v2  ;;  %v6818_v2 = vrot.slane %v6738_v30, %v9179_v59 }
 0x549   :  { %4700 = vmatpush1.bf16.msra.mxu0 %v3396_v54  ;;  %v7014_v54 = vrot.slane %v6934_v63, %v9285_v37 }
 0x54a   :  { %4864 = vmatpush1.bf16.msra.mxu1 %v3398_v23  ;;  %4701 = vmatprep.subr.bf16.mxu0 %v3413_v8  ;;  %v3428_v23 = vunpack.c.l.s8.bf16 %v11050_v36 }
 0x54b   :  { %v4397_v11 = vpop.f32.mrb[16].mxu0  ;;  %4865 = vmatprep.subr.bf16.mxu1 %v3415_v51  ;;  %v3445_v51 = vunpack.c.h.s8.bf16 %v11029_v52  ;;  %v11092_v52 = vld [vmem:[%s11296_s3 + $0xe60] sm:$0xff] }
 0x54c   :  { %v4988_v21 = vmul.f32 %v4935_v39, %v4397_v11  ;;  %v4561_v46 = vpop.f32.mrb[16].mxu1  ;;  %v4399_v50 = vpop.f32.mrb[17].mxu0  ;;  %v11080_v39 = vld [vmem:[%s11296_s3 + $0xe68] sm:$0xff]  ;;  %v3446_v11 = vunpack.c.h.s8.bf16 %v11062_v16 }
 0x54d   :  { %v4990_v45 = vmul.f32 %v4943_v31, %v4561_v46  ;;  %v4989_v56 = vmul.f32 %v4939_v34, %v4399_v50  ;;  %v4563_v8 = vpop.f32.mrb[17].mxu1  ;;  %v4401_v10 = vpop.f32.mrb[18].mxu0  ;;  %4702 = vmatpush1.bf16.msra.mxu0 %v3412_v27  ;;  %v3447_v34 = vunpack.c.h.s8.bf16 %v11039_v7  ;;  %v11087_v27 = vld [vmem:[%s11296_s3 + $0xe78] sm:$0xff]  ;;  %v11104_v46 = vld [vmem:[%s11296_s3 + $0xe70] sm:$0xff] }
 0x54e   :  { %v5088_v44 = vadd.f32 %v5035_v26, %v4988_v21  ;;  %v4991_v35 = vmul.f32 %v4947_v47, %v4563_v8  ;;  %v4565_v30 = vpop.f32.mrb[18].mxu1  ;;  %4866 = vmatpush1.bf16.msra.mxu1 %v3414_v32  ;;  %v4402_v31 = vpop.f32.mrb[19].mxu0  ;;  %4703 = vmatprep.subr.bf16.mxu0 %v3429_v12  ;;  %v3444_v32 = vunpack.c.h.s8.bf16 %v11050_v36  ;;  %v3461_v21 = vunpack.c.l.s8.bf16 %v11080_v39 }
 0x54f   :  { %v5090_v26 = vadd.f32 %v5043_v61, %v4990_v45  ;;  %v5089_v47 = vadd.f32 %v5039_v22, %v4989_v56  ;;  %v4566_v63 = vpop.f32.mrb[19].mxu1  ;;  %4867 = vmatprep.subr.bf16.mxu1 %v3431_v20  ;;  %v3463_v22 = vunpack.c.l.s8.bf16 %v11087_v27  ;;  %v3460_v36 = vunpack.c.l.s8.bf16 %v11092_v52 }
 0x550   :  { %v11097_v7 = vmax.f32 %v5088_v44, 0.0  ;;  %v5091_v12 = vadd.f32 %v5047_v41, %v4991_v35  ;;  %v6542_v20 = vrot.slane %v11002_v40, %v9397_v55  ;;  %v3477_v8 = vunpack.c.h.s8.bf16 %v11080_v39 }
 0x551   :  { %v11106_v61 = vmax.f32 %v5089_v47, 0.0  ;;  %4704 = vmatpush1.bf16.msra.mxu0 %v3428_v23  ;;  %v11115_v45 = vmax.f32 %v5090_v26, 0.0  ;;  %v3462_v23 = vunpack.c.l.s8.bf16 %v11104_v46  ;;  %v7022_v10 = vrot.slane %v6942_v3, %v9285_v37  ;;  %v2516_v3 = vld [vmem:[%s11296_s3 + $0xee0] sm:$0xff] }
 0x552   :  { %v6647_v41 = vmul.f32 %v6610_v60, %v11097_v7  ;;  %v6851_v16 = vmul.f32 %v6814_v29, %v11097_v7  ;;  %v7047_v50 = vmul.f32 %v7010_v38, %v11097_v7  ;;  %4868 = vmatpush1.bf16.msra.mxu1 %v3430_v18  ;;  %4705 = vmatprep.subr.bf16.mxu0 %v3445_v51  ;;  %v11117_v56 = vmax.f32 %v5091_v12, 0.0 }
 0x553   :  { %4869 = vmatprep.subr.bf16.mxu1 %v3447_v34  ;;  %v6648_v29 = vmul.f32 %v6614_v53, %v11106_v61  ;;  %v6852_v38 = vmul.f32 %v6818_v2, %v11106_v61  ;;  %v7048_v44 = vmul.f32 %v7014_v54, %v11106_v61  ;;  %v6622_v35 = vrot.slane %v6542_v20, %v9176_v13  ;;  %v2517_v54 = vld [vmem:[%s11296_s3 + $0xee8] sm:$0xff] }
 0x554   :  { %v6874_v40 = vsel %vm6655_vm0, %v6851_v16, 0.0  ;;  %v7070_v60 = vsel %vm6655_vm0, %v7047_v50, 0.0  ;;  %v6671_v18 = vsel %vm6655_vm0, %v6647_v41, 0.0  ;;  %v6853_v39 = vmul.f32 %v11065_v15, %v11115_v45 }
 0x555   :  { %v6875_v51 = vadd.f32 %v6874_v40, %v10615_v9  ;;  %4706 = vmatpush1.bf16.msra.mxu0 %v3444_v32  ;;  %v7049_v30 = vmul.f32 %v11068_v25, %v11115_v45  ;;  %v6876_v31 = vsel %vm6655_vm0, %v6852_v38, 0.0  ;;  %v3479_v53 = vunpack.c.h.s8.bf16 %v11087_v27  ;;  %v2519_v27 = vld [vmem:[%s11296_s3 + $0xef8] sm:$0xff] }
 0x556   :  { %4870 = vmatpush1.bf16.msra.mxu1 %v3446_v11  ;;  %4707 = vmatprep.subr.bf16.mxu0 %v3461_v21  ;;  %v6649_v9 = vmul.f32 %v11054_v33, %v11115_v45  ;;  %v3476_v2 = vunpack.c.h.s8.bf16 %v11092_v52  ;;  %v7071_v15 = vadd.f32 %v7070_v60, %v10621_v43  ;;  %v7072_v25 = vsel %vm6655_vm0, %v7048_v44, 0.0  ;;  %v2535_v44 = vld [vmem:[%s11296_s3 + $0xf78] sm:$0xff] }
 0x557   :  { %4871 = vmatprep.subr.bf16.mxu1 %v3463_v22  ;;  %v6854_v34 = vmul.f32 %v6826_v57, %v11117_v56  ;;  %v7050_v26 = vmul.f32 %v7022_v10, %v11117_v56  ;;  %v6672_v33 = vadd.f32 %v6671_v18, %v10613_v4  ;;  %v6673_v52 = vsel %vm6655_vm0, %v6648_v29, 0.0 }
 0x558   :  { %v3478_v47 = vunpack.c.h.s8.bf16 %v11104_v46  ;;  %v7073_v63 = vadd.f32 %v7072_v25, %v7071_v15  ;;  %v6650_v43 = vmul.f32 %v6622_v35, %v11117_v56  ;;  %v6877_v32 = vadd.f32 %v6876_v31, %v6875_v51  ;;  %v2518_v46 = vld [vmem:[%s11296_s3 + $0xef0] sm:$0xff]  ;;  %v2533_v51 = vld [vmem:[%s11296_s3 + $0xf68] sm:$0xff]  ;;  %v2532_v31 = vld [vmem:[%s11296_s3 + $0xf60] sm:$0xff] }
 0x559   :  { %4708 = vmatpush1.bf16.msra.mxu0 %v3460_v36  ;;  %v3493_v57 = vunpack.c.l.s8.bf16 %v2517_v54  ;;  %v7074_v12 = vsel %vm6655_vm0, %v7049_v30, 0.0  ;;  %v6674_v11 = vadd.f32 %v6673_v52, %v6672_v33  ;;  %v6878_v4 = vsel %vm6655_vm0, %v6853_v39, 0.0 }
 0x55a   :  { %4872 = vmatpush1.bf16.msra.mxu1 %v3462_v23  ;;  %4709 = vmatprep.subr.bf16.mxu0 %v3477_v8  ;;  %v3495_v21 = vunpack.c.l.s8.bf16 %v2519_v27  ;;  %v7075_v22 = vadd.f32 %v7074_v12, %v7073_v63  ;;  %v6675_v36 = vsel %vm6655_vm0, %v6649_v9, 0.0  ;;  %v6879_v20 = vadd.f32 %v6878_v4, %v6877_v32  ;;  %v2534_v9 = vld [vmem:[%s11296_s3 + $0xf70] sm:$0xff] }
 0x55b   :  { %4873 = vmatprep.subr.bf16.mxu1 %v3479_v53  ;;  %v7076_v41 = vsel %vm6655_vm0, %v7050_v26, 0.0  ;;  %v6676_v16 = vadd.f32 %v6675_v36, %v6674_v11  ;;  %v6880_v50 = vsel %vm6655_vm0, %v6854_v34, 0.0  ;;  %v3492_v23 = vunpack.c.l.s8.bf16 %v2516_v3  ;;  %v2549_v34 = vld [vmem:[%s11296_s3 + $0xfe8] sm:$0xff]  ;;  %v7865_v36 = vld [vmem:[#allocation6 + $0x80] sm:$0xff]  }
 0x55c   :  { %v11164_v8 = vadd.f32 %v7076_v41, %v7075_v22  ;;  %v6677_v10 = vsel %vm6655_vm0, %v6650_v43, 0.0  ;;  %v11167_v40 = vadd.f32 %v6880_v50, %v6879_v20  ;;  %v3494_v60 = vunpack.c.l.s8.bf16 %v2518_v46  ;;  %v2550_v43 = vld [vmem:[%s11296_s3 + $0xff0] sm:$0xff]  ;;  %v7866_v20 = vld [vmem:[#allocation6 + $0x48] sm:$0xff]  }
 0x55d   :  { %4710 = vmatpush1.bf16.msra.mxu0 %v3476_v2  ;;  %v3509_v29 = vunpack.c.h.s8.bf16 %v2517_v54  ;;  %v11169_v38 = vadd.f32 %v6677_v10, %v6676_v16  ;;  %v3511_v18 = vunpack.c.h.s8.bf16 %v2519_v27  ;;  %v3508_v35 = vunpack.c.h.s8.bf16 %v2516_v3  ;;  %v2551_v27 = vld [vmem:[%s11296_s3 + $0xff8] sm:$0xff]  ;;  %v7864_v22 = vld [vmem:[#allocation6] sm:$0xff]  }
 0x55e   :  { %4874 = vmatpush1.bf16.msra.mxu1 %v3478_v47  ;;  %4711 = vmatprep.subr.bf16.mxu0 %v3493_v57  ;;  %v3510_v39 = vunpack.c.h.s8.bf16 %v2518_v46  ;;  %v3525_v30 = vunpack.c.l.s8.bf16 %v2533_v51  ;;  %v3527_v53 = vunpack.c.l.s8.bf16 %v2535_v44  ;;  %v3524_v2 = vunpack.c.l.s8.bf16 %v2532_v31  ;;  %v2548_v47 = vld [vmem:[%s11296_s3 + $0xfe0] sm:$0xff]  ;;  %v7863_v46 = vld [vmem:[#allocation6 + $0xc0] sm:$0xff]   ;;  %v7867_v16 = vld [vmem:[#allocation6 + $0xc8] sm:$0xff]  }
 0x55f   :  { %4875 = vmatprep.subr.bf16.mxu1 %v3495_v21  ;;  %v3526_v54 = vunpack.c.l.s8.bf16 %v2534_v9  ;;  %v3541_v15 = vunpack.c.h.s8.bf16 %v2533_v51  ;;  %v3543_v25 = vunpack.c.h.s8.bf16 %v2535_v44  ;;  %v3540_v26 = vunpack.c.h.s8.bf16 %v2532_v31  ;;  %v7862_v21 = vld [vmem:[#allocation6 + $0x40] sm:$0xff]   ;;  %v7869_v10 = vld [vmem:[#allocation6 + $0x88] sm:$0xff]   ;;  %v7874_v51 = vld [vmem:[#allocation6 + $0x58] sm:$0xff]  }
 0x560   :  { %v3542_v33 = vunpack.c.h.s8.bf16 %v2534_v9  ;;  %v3557_v52 = vunpack.c.l.s8.bf16 %v2549_v34  ;;  %v3559_v63 = vunpack.c.l.s8.bf16 %v2551_v27  ;;  %v3556_v32 = vunpack.c.l.s8.bf16 %v2548_v47  ;;  %v7876_v44 = vld [vmem:[#allocation6 + $0x18] sm:$0xff]   ;;  %v7881_v31 = vld [vmem:[#allocation6 + $0xa0] sm:$0xff]   ;;  %v7883_v9 = vld [vmem:[#allocation6 + $0xe8] sm:$0xff]  }
 0x561   :  { %4712 = vmatpush1.bf16.msra.mxu0 %v3492_v23  ;;  %v3558_v57 = vunpack.c.l.s8.bf16 %v2550_v43  ;;  %v3573_v3 = vunpack.c.h.s8.bf16 %v2549_v34  ;;  %v3575_v12 = vunpack.c.h.s8.bf16 %v2551_v27  ;;  %v3572_v11 = vunpack.c.h.s8.bf16 %v2548_v47  ;;  %v7868_v23 = vld [vmem:[#allocation6 + $0x8] sm:$0xff]   ;;  %v7888_v34 = vld [vmem:[#allocation6 + $0x30] sm:$0xff]   ;;  %v7893_v47 = vld [vmem:[#allocation6 + $0xb8] sm:$0xff]  }
 0x562   :  { %4876 = vmatpush1.bf16.msra.mxu1 %v3494_v60  ;;  %4713 = vmatprep.subr.bf16.mxu0 %v3509_v29  ;;  %v3574_v4 = vunpack.c.h.s8.bf16 %v2550_v43  ;;  %v5113_v41 = vpack.c.bf16 %v10008_v62, %v10008_v62  ;;  %v5115_v50 = vpack.c.bf16 %v10018_v0, %v10018_v0  ;;  %v7870_v60 = vld [vmem:[#allocation6 + $0x50] sm:$0xff]   ;;  %v7877_v0 = vld [vmem:[#allocation6 + $0x98] sm:$0xff]   ;;  %v7895_v43 = vld [vmem:[#allocation6 + $0x1c0] sm:$0xff]  }
 0x563   :  { %4877 = vmatprep.subr.bf16.mxu1 %v3511_v18  ;;  %v7871_v29 = vld [vmem:[#allocation6 + $0xd0] sm:$0xff]  }
 0x564   :  { %v7872_v18 = vld [vmem:[#allocation6 + $0x10] sm:$0xff]  }
 0x565   :  { %4714 = vmatpush1.bf16.msra.mxu0 %v3508_v35  ;;  %v7873_v62 = vld [vmem:[#allocation6 + $0x90] sm:$0xff]   ;;  %v7878_v35 = vld [vmem:[#allocation6 + $0x60] sm:$0xff]  }
 0x566   :  { %4878 = vmatpush1.bf16.msra.mxu1 %v3510_v39  ;;  %4715 = vmatprep.subr.bf16.mxu0 %v3525_v30  ;;  %v7879_v39 = vld [vmem:[#allocation6 + $0xe0] sm:$0xff]   ;;  %v7889_v27 = vld [vmem:[#allocation6 + $0xb0] sm:$0xff]  }
 0x567   :  { %4879 = vmatprep.subr.bf16.mxu1 %v3527_v53  ;;  %v7880_v30 = vld [vmem:[#allocation6 + $0x20] sm:$0xff]   ;;  %v7882_v53 = vld [vmem:[#allocation6 + $0x68] sm:$0xff]  }
 0x569   :  { %4716 = vmatpush1.bf16.msra.mxu0 %v3524_v2  ;;  %v7884_v2 = vld [vmem:[#allocation6 + $0x28] sm:$0xff]  }
 0x56a   :  { %4880 = vmatpush1.bf16.msra.mxu1 %v3526_v54  ;;  %4717 = vmatprep.subr.bf16.mxu0 %v3541_v15  ;;  %v7885_v54 = vld [vmem:[#allocation6 + $0xa8] sm:$0xff]   ;;  %v7886_v15 = vld [vmem:[#allocation6 + $0x70] sm:$0xff]  }
 0x56b   :  { %4881 = vmatprep.subr.bf16.mxu1 %v3543_v25  ;;  %v7887_v25 = vld [vmem:[#allocation6 + $0xf0] sm:$0xff]  }
 0x56d   :  { %4718 = vmatpush1.bf16.msra.mxu0 %v3540_v26  ;;  %v7890_v26 = vld [vmem:[#allocation6 + $0x78] sm:$0xff]  }
 0x56e   :  { %4882 = vmatpush1.bf16.msra.mxu1 %v3542_v33  ;;  %4719 = vmatprep.subr.bf16.mxu0 %v3557_v52  ;;  %v7891_v33 = vld [vmem:[#allocation6 + $0xf8] sm:$0xff]  }
 0x56f   :  { %4883 = vmatprep.subr.bf16.mxu1 %v3559_v63  ;;  %v7892_v52 = vld [vmem:[#allocation6 + $0x38] sm:$0xff]   ;;  %v7894_v63 = vld [vmem:[#allocation6 + $0x140] sm:$0xff]  }
 0x571   :  { %4720 = vmatpush1.bf16.msra.mxu0 %v3556_v32  ;;  %v7896_v32 = vld [vmem:[#allocation6 + $0x100] sm:$0xff]  }
 0x572   :  { %4884 = vmatpush1.bf16.msra.mxu1 %v3558_v57  ;;  %4721 = vmatprep.subr.bf16.mxu0 %v3573_v3  ;;  %v5112_v57 = vpack.c.bf16 %v10002_v48, %v10002_v48  ;;  %v7897_v3 = vld [vmem:[#allocation6 + $0x180] sm:$0xff]   ;;  %v7901_v48 = vld [vmem:[#allocation6 + $0x188] sm:$0xff]  }
 0x573   :  { %4885 = vmatprep.subr.bf16.mxu1 %v3575_v12  ;;  %v5114_v12 = vpack.c.bf16 %v10004_v49, %v10004_v49  ;;  %v7903_v49 = vld [vmem:[#allocation6 + $0x1d0] sm:$0xff]  }
 0x575   :  { %4722 = vmatpush1.bf16.msra.mxu0 %v3572_v11  ;;  %v7898_v11 = vld [vmem:[#allocation6 + $0x148] sm:$0xff]  }
 0x576   :  { %4886 = vmatpush1.bf16.msra.mxu1 %v3574_v4  ;;  %7550 = vmatprep.subr.bf16.mxu0 %v7862_v21  ;;  %v5117_v4 = vpack.c.bf16 %v10563_v28, %v10563_v28  ;;  %v7899_v21 = vld [vmem:[#allocation6 + $0x1c8] sm:$0xff]   ;;  %v7905_v28 = vld [vmem:[#allocation6 + $0x190] sm:$0xff]  }
 0x577   :  { %7572 = vmatprep.subr.bf16.mxu1 %v7863_v46  ;;  %v5119_v46 = vpack.c.bf16 %v10574_v17, %v10574_v17  ;;  %v7909_v17 = vld [vmem:[#allocation6 + $0x198] sm:$0xff]  }
 0x578   :  { %4724 = vmatmul.mubr.bf16.vlgmr.msra.gmra.mrb[20].mxu0 %v9544_v42 }
 0x579   :  { %4888 = vmatmul.mubr.bf16.vlgmr.msra.gmra.mrb[20].mxu1 %v9544_v42  ;;  %7551 = vmatpush3.bf16.msra.mxu0 %v7864_v22  ;;  %v7875_v42 = vld [vmem:[#allocation6 + $0xd8] sm:$0xff]   ;;  %v7900_v22 = vld [vmem:[#allocation6 + $0x108] sm:$0xff]  }
 0x57a   :  { %6191 = vmatprep.mubr.bf16.mxu0 %v5113_v41  ;;  %7573 = vmatpush3.bf16.msra.mxu1 %v7865_v36  ;;  %v7902_v36 = vld [vmem:[#allocation6 + $0x150] sm:$0xff]   ;;  %v7906_v41 = vld [vmem:[#allocation6 + $0x158] sm:$0xff]  }
 0x57b   :  { %6231 = vmatprep.mubr.bf16.mxu1 %v5115_v50  ;;  %7552 = vmatprep.subr.bf16.mxu0 %v7866_v20  ;;  %v7904_v20 = vld [vmem:[#allocation6 + $0x110] sm:$0xff]   ;;  %v7908_v50 = vld [vmem:[#allocation6 + $0x118] sm:$0xff]  }
 0x57c   :  { %7574 = vmatprep.subr.bf16.mxu1 %v7867_v16  ;;  %v7907_v16 = vld [vmem:[#allocation6 + $0x1d8] sm:$0xff]  }
 0x57d   :  { %7553 = vmatpush3.bf16.msra.mxu0 %v7868_v23  ;;  %v7910_v23 = vld [vmem:[#allocation6 + $0x160] sm:$0xff]  }
 0x57e   :  { %7575 = vmatpush3.bf16.msra.mxu1 %v7869_v10  ;;  %7554 = vmatprep.subr.bf16.mxu0 %v7870_v60  ;;  %v7911_v10 = vld [vmem:[#allocation6 + $0x1e0] sm:$0xff]  }
 0x57f   :  { %7576 = vmatprep.subr.bf16.mxu1 %v7871_v29  ;;  %v7912_v60 = vld [vmem:[#allocation6 + $0x120] sm:$0xff]  }
 0x580   :  { %v7913_v29 = vld [vmem:[#allocation6 + $0x1a0] sm:$0xff]  }
 0x581   :  { %7555 = vmatpush3.bf16.msra.mxu0 %v7872_v18  ;;  %v7914_v18 = vld [vmem:[#allocation6 + $0x168] sm:$0xff]  }
 0x582   :  { %7577 = vmatpush3.bf16.msra.mxu1 %v7873_v62  ;;  %7556 = vmatprep.subr.bf16.mxu0 %v7874_v51  ;;  %v7915_v62 = vld [vmem:[#allocation6 + $0x1e8] sm:$0xff]  }
 0x583   :  { %7578 = vmatprep.subr.bf16.mxu1 %v7875_v42  ;;  %v7916_v51 = vld [vmem:[#allocation6 + $0x128] sm:$0xff]  }
 0x584   :  { %v7917_v42 = vld [vmem:[#allocation6 + $0x1a8] sm:$0xff]  }
 0x585   :  { %7557 = vmatpush3.bf16.msra.mxu0 %v7876_v44  ;;  %v7918_v44 = vld [vmem:[#allocation6 + $0x170] sm:$0xff]  }
 0x586   :  { %7579 = vmatpush3.bf16.msra.mxu1 %v7877_v0  ;;  %7558 = vmatprep.subr.bf16.mxu0 %v7878_v35  ;;  %v7919_v0 = vld [vmem:[#allocation6 + $0x1f0] sm:$0xff]  }
 0x587   :  { %7580 = vmatprep.subr.bf16.mxu1 %v7879_v39  ;;  %v7920_v35 = vld [vmem:[#allocation6 + $0x130] sm:$0xff]  }
 0x588   :  { %v7921_v39 = vld [vmem:[#allocation6 + $0x1b0] sm:$0xff]  }
 0x589   :  { %7559 = vmatpush3.bf16.msra.mxu0 %v7880_v30  ;;  %v7922_v30 = vld [vmem:[#allocation6 + $0x178] sm:$0xff]  }
 0x58a   :  { %7581 = vmatpush3.bf16.msra.mxu1 %v7881_v31  ;;  %7560 = vmatprep.subr.bf16.mxu0 %v7882_v53  ;;  %v7923_v31 = vld [vmem:[#allocation6 + $0x1f8] sm:$0xff]  }
 0x58b   :  { %7582 = vmatprep.subr.bf16.mxu1 %v7883_v9  ;;  %v7924_v53 = vld [vmem:[#allocation6 + $0x138] sm:$0xff]  }
 0x58c   :  { %v7925_v9 = vld [vmem:[#allocation6 + $0x1b8] sm:$0xff]  }
 0x58d   :  { %7561 = vmatpush3.bf16.msra.mxu0 %v7884_v2  ;;  %v7926_v2 = vld [vmem:[#allocation6 + $0x240] sm:$0xff]  }
 0x58e   :  { %7583 = vmatpush3.bf16.msra.mxu1 %v7885_v54  ;;  %7562 = vmatprep.subr.bf16.mxu0 %v7886_v15  ;;  %v7927_v54 = vld [vmem:[#allocation6 + $0x2c0] sm:$0xff]  }
 0x58f   :  { %7584 = vmatprep.subr.bf16.mxu1 %v7887_v25  ;;  %v7928_v15 = vld [vmem:[#allocation6 + $0x200] sm:$0xff]   ;;  %v5116_v25 = vpack.c.bf16 %v10557_v14, %v10557_v14  ;;  %v7933_v14 = vld [vmem:[#allocation6 + $0x288] sm:$0xff]  }
 0x591   :  { %7563 = vmatpush3.bf16.msra.mxu0 %v7888_v34  ;;  %v7929_v34 = vld [vmem:[#allocation6 + $0x280] sm:$0xff]  }
 0x592   :  { %7585 = vmatpush3.bf16.msra.mxu1 %v7889_v27  ;;  %7564 = vmatprep.subr.bf16.mxu0 %v7890_v26  ;;  %v5118_v27 = vpack.c.bf16 %v10561_v1, %v10561_v1  ;;  %v7930_v26 = vld [vmem:[#allocation6 + $0x248] sm:$0xff]   ;;  %v7935_v1 = vld [vmem:[#allocation6 + $0x2d0] sm:$0xff]  }
 0x593   :  { %7586 = vmatprep.subr.bf16.mxu1 %v7891_v33  ;;  %v5121_v33 = vpack.c.bf16 %v11106_v61, %v11106_v61  ;;  %v7937_v61 = vld [vmem:[#allocation6 + $0x290] sm:$0xff]  }
 0x595   :  { %7565 = vmatpush3.bf16.msra.mxu0 %v7892_v52  ;;  %v7931_v52 = vld [vmem:[#allocation6 + $0x2c8] sm:$0xff]  }
 0x596   :  { %7587 = vmatpush3.bf16.msra.mxu1 %v7893_v47  ;;  %7594 = vmatprep.subr.bf16.mxu0 %v7894_v63  ;;  %v5123_v47 = vpack.c.bf16 %v11117_v56, %v11117_v56  ;;  %v7932_v63 = vld [vmem:[#allocation6 + $0x208] sm:$0xff]   ;;  %v7941_v56 = vld [vmem:[#allocation6 + $0x298] sm:$0xff]  }
 0x597   :  { %7616 = vmatprep.subr.bf16.mxu1 %v7895_v43  ;;  %v7934_v43 = vld [vmem:[#allocation6 + $0x250] sm:$0xff]  }
 0x598   :  { %6192 = vmatmul.mubr.bf16.vlgmr.msra.gmra.mrb[24].mxu0 %v5112_v57  ;;  %v7938_v57 = vld [vmem:[#allocation6 + $0x258] sm:$0xff]  }
 0x599   :  { %6232 = vmatmul.mubr.bf16.vlgmr.msra.gmra.mrb[24].mxu1 %v5114_v12  ;;  %7595 = vmatpush3.bf16.msra.mxu0 %v7896_v32  ;;  %v7936_v32 = vld [vmem:[#allocation6 + $0x210] sm:$0xff]   ;;  %v7940_v12 = vld [vmem:[#allocation6 + $0x218] sm:$0xff]  }
 0x59a   :  { %6271 = vmatprep.mubr.bf16.mxu0 %v5117_v4  ;;  %7617 = vmatpush3.bf16.msra.mxu1 %v7897_v3  ;;  %v7939_v3 = vld [vmem:[#allocation6 + $0x2d8] sm:$0xff]   ;;  %v7943_v4 = vld [vmem:[#allocation6 + $0x2e0] sm:$0xff]  }
 0x59b   :  { %6311 = vmatprep.mubr.bf16.mxu1 %v5119_v46  ;;  %7596 = vmatprep.subr.bf16.mxu0 %v7898_v11  ;;  %v7942_v11 = vld [vmem:[#allocation6 + $0x260] sm:$0xff]  }
 0x59c   :  { %7618 = vmatprep.subr.bf16.mxu1 %v7899_v21  ;;  %v7944_v21 = vld [vmem:[#allocation6 + $0x220] sm:$0xff]  }
 0x59d   :  { %7597 = vmatpush3.bf16.msra.mxu0 %v7900_v22  ;;  %v7945_v46 = vld [vmem:[#allocation6 + $0x2a0] sm:$0xff]   ;;  %v7946_v22 = vld [vmem:[#allocation6 + $0x268] sm:$0xff]  }
 0x59e   :  { %7619 = vmatpush3.bf16.msra.mxu1 %v7901_v48  ;;  %7598 = vmatprep.subr.bf16.mxu0 %v7902_v36  ;;  %v7947_v48 = vld [vmem:[#allocation6 + $0x2e8] sm:$0xff]  }
 0x59f   :  { %7620 = vmatprep.subr.bf16.mxu1 %v7903_v49  ;;  %v7948_v36 = vld [vmem:[#allocation6 + $0x228] sm:$0xff]  }
 0x5a0   :  { %v7949_v49 = vld [vmem:[#allocation6 + $0x2a8] sm:$0xff]  }
 0x5a1   :  { %7599 = vmatpush3.bf16.msra.mxu0 %v7904_v20  ;;  %v7950_v20 = vld [vmem:[#allocation6 + $0x270] sm:$0xff]  }
 0x5a2   :  { %7621 = vmatpush3.bf16.msra.mxu1 %v7905_v28  ;;  %7600 = vmatprep.subr.bf16.mxu0 %v7906_v41  ;;  %v7951_v28 = vld [vmem:[#allocation6 + $0x2f0] sm:$0xff]  }
 0x5a3   :  { %7622 = vmatprep.subr.bf16.mxu1 %v7907_v16  ;;  %v7952_v41 = vld [vmem:[#allocation6 + $0x230] sm:$0xff]  }
 0x5a4   :  { %v7953_v16 = vld [vmem:[#allocation6 + $0x2b0] sm:$0xff]  }
 0x5a5   :  { %7601 = vmatpush3.bf16.msra.mxu0 %v7908_v50  ;;  %v7954_v50 = vld [vmem:[#allocation6 + $0x278] sm:$0xff]  }
 0x5a6   :  { %7623 = vmatpush3.bf16.msra.mxu1 %v7909_v17  ;;  %7602 = vmatprep.subr.bf16.mxu0 %v7910_v23  ;;  %v7955_v17 = vld [vmem:[#allocation6 + $0x2f8] sm:$0xff]  }
 0x5a7   :  { %7624 = vmatprep.subr.bf16.mxu1 %v7911_v10  ;;  %v7956_v23 = vld [vmem:[#allocation6 + $0x238] sm:$0xff]  }
 0x5a8   :  { %v7957_v10 = vld [vmem:[#allocation6 + $0x2b8] sm:$0xff]  }
 0x5a9   :  { %7603 = vmatpush3.bf16.msra.mxu0 %v7912_v60  ;;  %v7958_v60 = vld [vmem:[#allocation6 + $0x340] sm:$0xff]  }
 0x5aa   :  { %7625 = vmatpush3.bf16.msra.mxu1 %v7913_v29  ;;  %7604 = vmatprep.subr.bf16.mxu0 %v7914_v18  ;;  %v7959_v29 = vld [vmem:[#allocation6 + $0x3c0] sm:$0xff]  }
 0x5ab   :  { %7626 = vmatprep.subr.bf16.mxu1 %v7915_v62  ;;  %v7960_v18 = vld [vmem:[#allocation6 + $0x300] sm:$0xff]   ;;  %v5120_v62 = vpack.c.bf16 %v11097_v7, %v11097_v7  ;;  %v7968_v7 = vld [vmem:[#allocation6 + $0x310] sm:$0xff]  }
 0x5ad   :  { %7605 = vmatpush3.bf16.msra.mxu0 %v7916_v51  ;;  %v7961_v51 = vld [vmem:[#allocation6 + $0x380] sm:$0xff]  }
 0x5ae   :  { %7627 = vmatpush3.bf16.msra.mxu1 %v7917_v42  ;;  %7606 = vmatprep.subr.bf16.mxu0 %v7918_v44  ;;  %v7962_v42 = vld [vmem:[#allocation6 + $0x348] sm:$0xff]   ;;  %v5122_v44 = vpack.c.bf16 %v11115_v45, %v11115_v45  ;;  %v7971_v45 = vld [vmem:[#allocation6 + $0x3d8] sm:$0xff]  }
 0x5af   :  { %7628 = vmatprep.subr.bf16.mxu1 %v7919_v0  ;;  %v7963_v0 = vld [vmem:[#allocation6 + $0x3c8] sm:$0xff]  }
 0x5b1   :  { %7607 = vmatpush3.bf16.msra.mxu0 %v7920_v35  ;;  %v7964_v35 = vld [vmem:[#allocation6 + $0x308] sm:$0xff]  }
 0x5b2   :  { %7629 = vmatpush3.bf16.msra.mxu1 %v7921_v39  ;;  %7608 = vmatprep.subr.bf16.mxu0 %v7922_v30  ;;  %v7965_v39 = vld [vmem:[#allocation6 + $0x388] sm:$0xff]   ;;  %v7966_v30 = vld [vmem:[#allocation6 + $0x350] sm:$0xff]  }
 0x5b3   :  { %7630 = vmatprep.subr.bf16.mxu1 %v7923_v31  ;;  %v7967_v31 = vld [vmem:[#allocation6 + $0x3d0] sm:$0xff]  }
 0x5b5   :  { %7609 = vmatpush3.bf16.msra.mxu0 %v7924_v53  ;;  %v7969_v53 = vld [vmem:[#allocation6 + $0x390] sm:$0xff]  }
 0x5b6   :  { %7631 = vmatpush3.bf16.msra.mxu1 %v7925_v9  ;;  %7638 = vmatprep.subr.bf16.mxu0 %v7926_v2  ;;  %v7970_v9 = vld [vmem:[#allocation6 + $0x358] sm:$0xff]  }
 0x5b7   :  { %7660 = vmatprep.subr.bf16.mxu1 %v7927_v54  ;;  %v7972_v2 = vld [vmem:[#allocation6 + $0x318] sm:$0xff]  }
 0x5b8   :  { %6272 = vmatmul.mubr.bf16.vlgmr.msra.gmra.mrb[28].mxu0 %v5116_v25  ;;  %v7973_v54 = vld [vmem:[#allocation6 + $0x398] sm:$0xff]   ;;  %v7975_v25 = vld [vmem:[#allocation6 + $0x3e0] sm:$0xff]  }
 0x5b9   :  { %6312 = vmatmul.mubr.bf16.vlgmr.msra.gmra.mrb[28].mxu1 %v5118_v27  ;;  %7639 = vmatpush3.bf16.msra.mxu0 %v7928_v15  ;;  %v7974_v15 = vld [vmem:[#allocation6 + $0x360] sm:$0xff]  }
 0x5ba   :  { %6351 = vmatprep.mubr.bf16.mxu0 %v5121_v33  ;;  %7661 = vmatpush3.bf16.msra.mxu1 %v7929_v34  ;;  %v7976_v34 = vld [vmem:[#allocation6 + $0x320] sm:$0xff]   ;;  %v7979_v33 = vld [vmem:[#allocation6 + $0x3e8] sm:$0xff]  }
 0x5bb   :  { %6391 = vmatprep.mubr.bf16.mxu1 %v5123_v47  ;;  %7640 = vmatprep.subr.bf16.mxu0 %v7930_v26  ;;  %v7977_v27 = vld [vmem:[#allocation6 + $0x3a0] sm:$0xff]   ;;  %v7978_v26 = vld [vmem:[#allocation6 + $0x368] sm:$0xff]  }
 0x5bc   :  { %7662 = vmatprep.subr.bf16.mxu1 %v7931_v52  ;;  %v7980_v52 = vld [vmem:[#allocation6 + $0x328] sm:$0xff]  }
 0x5bd   :  { %7641 = vmatpush3.bf16.msra.mxu0 %v7932_v63  ;;  %v7981_v47 = vld [vmem:[#allocation6 + $0x3a8] sm:$0xff]   ;;  %v7982_v63 = vld [vmem:[#allocation6 + $0x370] sm:$0xff]  }
 0x5be   :  { %7663 = vmatpush3.bf16.msra.mxu1 %v7933_v14  ;;  %7642 = vmatprep.subr.bf16.mxu0 %v7934_v43  ;;  %v7983_v14 = vld [vmem:[#allocation6 + $0x3f0] sm:$0xff]  }
 0x5bf   :  { %7664 = vmatprep.subr.bf16.mxu1 %v7935_v1  ;;  %v7984_v43 = vld [vmem:[#allocation6 + $0x330] sm:$0xff]  }
 0x5c0   :  { %v7985_v1 = vld [vmem:[#allocation6 + $0x3b0] sm:$0xff]  }
 0x5c1   :  { %7643 = vmatpush3.bf16.msra.mxu0 %v7936_v32  ;;  %v7986_v32 = vld [vmem:[#allocation6 + $0x378] sm:$0xff]  }
 0x5c2   :  { %7665 = vmatpush3.bf16.msra.mxu1 %v7937_v61  ;;  %7644 = vmatprep.subr.bf16.mxu0 %v7938_v57  ;;  %v7987_v61 = vld [vmem:[#allocation6 + $0x3f8] sm:$0xff]  }
 0x5c3   :  { %7666 = vmatprep.subr.bf16.mxu1 %v7939_v3  ;;  %v7988_v57 = vld [vmem:[#allocation6 + $0x338] sm:$0xff]  }
 0x5c4   :  { %v7989_v3 = vld [vmem:[#allocation6 + $0x3b8] sm:$0xff]  }
 0x5c5   :  { %7645 = vmatpush3.bf16.msra.mxu0 %v7940_v12  ;;  %v6485_v12 = vld [vmem:[#allocation7 + $0x30] sm:$0x77] }
 0x5c6   :  { %7667 = vmatpush3.bf16.msra.mxu1 %v7941_v56  ;;  %7646 = vmatprep.subr.bf16.mxu0 %v7942_v11  ;;  %v11221_v56 = vld [vmem:[#allocation7 + $0x38] sm:$0x77]  ;;  %v6946_v11 = vrot.slane %v6485_v12, %v9285_v37 }
 0x5c7   :  { %7668 = vmatprep.subr.bf16.mxu1 %v7943_v4  ;;  %v6950_v4 = vrot.slane %v6485_v12, %v9516_v5 }
 0x5c9   :  { %7647 = vmatpush3.bf16.msra.mxu0 %v7944_v21  ;;  %v4951_v21 = vrot.slane %v10994_v19, %v9397_v55 }
 0x5ca   :  { %7669 = vmatpush3.bf16.msra.mxu1 %v7945_v46  ;;  %7648 = vmatprep.subr.bf16.mxu0 %v7946_v22  ;;  %v6954_v46 = vrot.slane %v11221_v56, %v9285_v37  ;;  %v4959_v22 = vrot.slane %v10994_v19, %v9516_v5 }
 0x5cb   :  { %7670 = vmatprep.subr.bf16.mxu1 %v7947_v48  ;;  %v4955_v48 = vrot.slane %v10994_v19, %v9400_v58 }
 0x5cd   :  { %7649 = vmatpush3.bf16.msra.mxu0 %v7948_v36  ;;  %v6958_v36 = vrot.slane %v11221_v56, %v9516_v5 }
 0x5ce   :  { %7671 = vmatpush3.bf16.msra.mxu1 %v7949_v49  ;;  %7650 = vmatprep.subr.bf16.mxu0 %v7950_v20  ;;  %v5051_v49 = vrot.slane %v10999_v6, %v9397_v55  ;;  %v5059_v20 = vrot.slane %v10999_v6, %v9516_v5  ;;  %v7034_v5 = vrot.slane %v6954_v46, %v9285_v37 }
 0x5cf   :  { %7672 = vmatprep.subr.bf16.mxu1 %v7951_v28  ;;  %v4963_v28 = vrot.slane %v10994_v19, %v9403_v24  ;;  %v6550_v19 = vrot.slane %v6485_v12, %v9397_v55 }
 0x5d1   :  { %7651 = vmatpush3.bf16.msra.mxu0 %v7952_v41  ;;  %v6546_v41 = vrot.slane %v6485_v12, %v9176_v13 }
 0x5d2   :  { %7673 = vmatpush3.bf16.msra.mxu1 %v7953_v16  ;;  %7652 = vmatprep.subr.bf16.mxu0 %v7954_v50  ;;  %v5055_v50 = vrot.slane %v10999_v6, %v9400_v58 }
 0x5d3   :  { %7674 = vmatprep.subr.bf16.mxu1 %v7955_v17  ;;  %v5063_v17 = vrot.slane %v10999_v6, %v9403_v24  ;;  %v7038_v24 = vrot.slane %v6958_v36, %v9285_v37  ;;  %v6750_v6 = vrot.slane %v6485_v12, %v9179_v59 }
 0x5d5   :  { %7653 = vmatpush3.bf16.msra.mxu0 %v7956_v23  ;;  %v7026_v23 = vrot.slane %v6946_v11, %v9285_v37 }
 0x5d6   :  { %7675 = vmatpush3.bf16.msra.mxu1 %v7957_v10  ;;  %7682 = vmatprep.subr.bf16.mxu0 %v7958_v60  ;;  %v7030_v10 = vrot.slane %v6950_v4, %v9285_v37 }
 0x5d7   :  { %7704 = vmatprep.subr.bf16.mxu1 %v7959_v29 }
 0x5d8   :  { %6352 = vmatmul.mubr.bf16.vlgmr.msra.gmra.mrb[32].mxu0 %v5120_v62  ;;  %v6554_v62 = vrot.slane %v11221_v56, %v9176_v13 }
 0x5d9   :  { %6392 = vmatmul.mubr.bf16.vlgmr.msra.gmra.mrb[32].mxu1 %v5122_v44  ;;  %7683 = vmatpush3.bf16.msra.mxu0 %v7960_v18 }
 0x5da   :  { %7705 = vmatpush3.bf16.msra.mxu1 %v7961_v51  ;;  %7684 = vmatprep.subr.bf16.mxu0 %v7962_v42 }
 0x5db   :  { %7706 = vmatprep.subr.bf16.mxu1 %v7963_v0 }
 0x5dd   :  { %7685 = vmatpush3.bf16.msra.mxu0 %v7964_v35 }
 0x5de   :  { %7707 = vmatpush3.bf16.msra.mxu1 %v7965_v39  ;;  %7686 = vmatprep.subr.bf16.mxu0 %v7966_v30 }
 0x5df   :  { %7708 = vmatprep.subr.bf16.mxu1 %v7967_v31 }
 0x5e1   :  { %7687 = vmatpush3.bf16.msra.mxu0 %v7968_v7  ;;  %v6558_v7 = vrot.slane %v11221_v56, %v9397_v55  ;;  %v6762_v55 = vrot.slane %v11221_v56, %v9400_v58 }
 0x5e2   :  { %7709 = vmatpush3.bf16.msra.mxu1 %v7969_v53  ;;  %7688 = vmatprep.subr.bf16.mxu0 %v7970_v9  ;;  %v6626_v53 = vrot.slane %v6546_v41, %v9176_v13 }
 0x5e3   :  { %7710 = vmatprep.subr.bf16.mxu1 %v7971_v45 }
 0x5e5   :  { %7689 = vmatpush3.bf16.msra.mxu0 %v7972_v2 }
 0x5e6   :  { %7711 = vmatpush3.bf16.msra.mxu1 %v7973_v54  ;;  %7690 = vmatprep.subr.bf16.mxu0 %v7974_v15  ;;  %v6754_v54 = vrot.slane %v6485_v12, %v9400_v58  ;;  %v6758_v15 = vrot.slane %v11221_v56, %v9179_v59 }
 0x5e7   :  { %7712 = vmatprep.subr.bf16.mxu1 %v7975_v25 }
 0x5e8   :  { %v6838_v46 = vrot.slane %v6758_v15, %v9179_v59 }
 0x5e9   :  { %7691 = vmatpush3.bf16.msra.mxu0 %v7976_v34  ;;  %v6630_v34 = vrot.slane %v6550_v19, %v9176_v13 }
 0x5ea   :  { %7713 = vmatpush3.bf16.msra.mxu1 %v7977_v27  ;;  %7692 = vmatprep.subr.bf16.mxu0 %v7978_v26  ;;  %v6634_v27 = vrot.slane %v6554_v62, %v9176_v13 }
 0x5eb   :  { %7714 = vmatprep.subr.bf16.mxu1 %v7979_v33 }
 0x5ed   :  { %7693 = vmatpush3.bf16.msra.mxu0 %v7980_v52  ;;  %v6830_v52 = vrot.slane %v6750_v6, %v9179_v59 }
 0x5ee   :  { %7715 = vmatpush3.bf16.msra.mxu1 %v7981_v47  ;;  %7694 = vmatprep.subr.bf16.mxu0 %v7982_v63 }
 0x5ef   :  { %7716 = vmatprep.subr.bf16.mxu1 %v7983_v14  ;;  %v6638_v14 = vrot.slane %v6558_v7, %v9176_v13 }
 0x5f1   :  { %7695 = vmatpush3.bf16.msra.mxu0 %v7984_v43 }
 0x5f2   :  { %7717 = vmatpush3.bf16.msra.mxu1 %v7985_v1  ;;  %7696 = vmatprep.subr.bf16.mxu0 %v7986_v32 }
 0x5f3   :  { %7718 = vmatprep.subr.bf16.mxu1 %v7987_v61 }
 0x5f5   :  { %7697 = vmatpush3.bf16.msra.mxu0 %v7988_v57  ;;  %v6834_v57 = vrot.slane %v6754_v54, %v9179_v59 }
 0x5f6   :  { %7719 = vmatpush3.bf16.msra.mxu1 %v7989_v3 }
 0x64b   :  { %v4725_v16 = vpop.f32.mrb[20].mxu0 }
 0x64c   :  { %v4992_v60 = vmul.f32 %v4951_v21, %v4725_v16  ;;  %v4889_v29 = vpop.f32.mrb[20].mxu1  ;;  %v4727_v18 = vpop.f32.mrb[21].mxu0 }
 0x64d   :  { %v4994_v51 = vmul.f32 %v4959_v22, %v4889_v29  ;;  %v4993_v42 = vmul.f32 %v4955_v48, %v4727_v18  ;;  %v4891_v44 = vpop.f32.mrb[21].mxu1  ;;  %v4729_v0 = vpop.f32.mrb[22].mxu0 }
 0x64e   :  { %v5092_v35 = vadd.f32 %v5051_v49, %v4992_v60  ;;  %v4995_v39 = vmul.f32 %v4963_v28, %v4891_v44  ;;  %v4893_v30 = vpop.f32.mrb[22].mxu1  ;;  %v4730_v31 = vpop.f32.mrb[23].mxu0  ;;  %v6842_v28 = vrot.slane %v6762_v55, %v9179_v59 }
 0x64f   :  { %v5094_v9 = vadd.f32 %v5059_v20, %v4994_v51  ;;  %v5093_v45 = vadd.f32 %v5055_v50, %v4993_v42  ;;  %v4894_v2 = vpop.f32.mrb[23].mxu1  ;;  %v7414_v30 = vld [vmem:[%s11300_s7] ss:$0 sm:$0xff] }
 0x650   :  { %v5108_v37 = vmax.f32 %v5092_v35, 0.0  ;;  %v5095_v25 = vadd.f32 %v5063_v17, %v4995_v39 }
 0x651   :  { %v5110_v26 = vmax.f32 %v5094_v9, 0.0  ;;  %v5109_v33 = vmax.f32 %v5093_v45, 0.0 }
 0x652   :  { %v5111_v47 = vmax.f32 %v5095_v25, 0.0  ;;  %v7051_v63 = vmul.f32 %v7026_v23, %v5108_v37  ;;  %v6651_v43 = vmul.f32 %v6626_v53, %v5108_v37  ;;  %v5124_v32 = vpack.c.bf16 %v5108_v37, %v5108_v37 }
 0x653   :  { %v5125_v1 = vpack.c.bf16 %v5109_v33, %v5109_v33  ;;  %v7052_v61 = vmul.f32 %v7030_v10, %v5109_v33  ;;  %v7053_v12 = vmul.f32 %v7034_v5, %v5110_v26  ;;  %v6652_v4 = vmul.f32 %v6630_v34, %v5109_v33 }
 0x654   :  { %v5127_v3 = vpack.c.bf16 %v5111_v47, %v5111_v47  ;;  %v7078_v11 = vsel %vm6655_vm0, %v7051_v63, 0.0  ;;  %v5126_v21 = vpack.c.bf16 %v5110_v26, %v5110_v26  ;;  %v7054_v13 = vmul.f32 %v7038_v24, %v5111_v47 }
 0x655   :  { %6431 = vmatprep.mubr.bf16.mxu0 %v5125_v1  ;;  %v7079_v58 = vadd.f32 %v7078_v11, %v11164_v8  ;;  %v7080_v56 = vsel %vm6655_vm0, %v7052_v61, 0.0  ;;  %v6653_v22 = vmul.f32 %v6634_v27, %v5110_v26  ;;  %v6679_v48 = vsel %vm6655_vm0, %v6651_v43, 0.0 }
 0x656   :  { %6471 = vmatprep.mubr.bf16.mxu1 %v5127_v3  ;;  %6432 = vmatmul.mubr.bf16.vlgmr.msra.gmra.mrb[36].mxu0 %v5124_v32  ;;  %v6681_v36 = vsel %vm6655_vm0, %v6652_v4, 0.0  ;;  %v6680_v20 = vadd.f32 %v6679_v48, %v11169_v38  ;;  %v6855_v41 = vmul.f32 %v6830_v52, %v5108_v37  ;;  %v7082_v8 = vsel %vm6655_vm0, %v7053_v12, 0.0 }
 0x657   :  { %6472 = vmatmul.mubr.bf16.vlgmr.msra.gmra.mrb[36].mxu1 %v5126_v21  ;;  %v7081_v49 = vadd.f32 %v7080_v56, %v7079_v58  ;;  %v6654_v16 = vmul.f32 %v6638_v14, %v5111_v47  ;;  %v6856_v50 = vmul.f32 %v6834_v57, %v5109_v33  ;;  %v6857_v10 = vmul.f32 %v6838_v46, %v5110_v26 }
 0x658   :  { %v6682_v23 = vadd.f32 %v6681_v36, %v6680_v20  ;;  %v6882_v60 = vsel %vm6655_vm0, %v6855_v41, 0.0  ;;  %v7084_v29 = vsel %vm6655_vm0, %v7054_v13, 0.0  ;;  %v6683_v18 = vsel %vm6655_vm0, %v6653_v22, 0.0 }
 0x659   :  { %v7083_v17 = vadd.f32 %v7082_v8, %v7081_v49  ;;  %v6883_v5 = vadd.f32 %v6882_v60, %v11167_v40  ;;  %v6884_v38 = vsel %vm6655_vm0, %v6856_v50, 0.0  ;;  %v6858_v62 = vmul.f32 %v6842_v28, %v5111_v47  ;;  %v7543_v49 = vld [vmem:[%s11302_s9] ss:$0 sm:$0xff] }
 0x65a   :  { %v6684_v59 = vadd.f32 %v6683_v18, %v6682_v23  ;;  %v6685_v51 = vsel %vm6655_vm0, %v6654_v16, 0.0  ;;  %v6886_v0 = vsel %vm6655_vm0, %v6857_v10, 0.0  ;;  %v8127_v34 = vmov 0  }
 0x65b   :  { %v7085_v19 = vadd.f32 %v7084_v29, %v7083_v17  ;;  %v6885_v42 = vadd.f32 %v6884_v38, %v6883_v5  ;;  %v6888_v6 = vsel %vm6655_vm0, %v6858_v62, 0.0  ;;  %7857 = vset.pattern.permute.xlu1 %v8127_v34  ;;  %v8128_v27 = vmov 1  }
 0x65c   :  { %v6686_v44 = vadd.f32 %v6685_v51, %v6684_v59  ;;  %7858 = vset.pattern.permute.xlu0 %v8128_v27  ;;  %v8129_v5 = vmov 2  }
 0x65d   :  { %7086 = vadd.xlane.f32.xlu1 %v7085_v19  ;;  %v6887_v24 = vadd.f32 %v6886_v0, %v6885_v42 }
 0x65e   :  { %6687 = vadd.xlane.f32.xlu0 %v6686_v44 }
 0x65f   :  { %v6889_v35 = vadd.f32 %v6888_v6, %v6887_v24 }
 0x662   :  { %6890 = vadd.xlane.f32.xlu0 %v6889_v35 }
 0x66b   :  { %v7566_v39 = vpop.f32.mrb[24].mxu0 }
 0x66c   :  { %v7588_v40 = vpop.f32.mrb[24].mxu1  ;;  %v7567_v31 = vpop.f32.mrb[25].mxu0 }
 0x66d   :  { %v7568_v7 = vadd.f32 %v7567_v31, %v7566_v39  ;;  %v7589_v53 = vpop.f32.mrb[25].mxu1  ;;  %v7569_v9 = vpop.f32.mrb[26].mxu0 }
 0x66e   :  { %v7590_v45 = vadd.f32 %v7589_v53, %v7588_v40  ;;  %v7591_v2 = vpop.f32.mrb[26].mxu1  ;;  %v7570_v54 = vpop.f32.mrb[27].mxu0  ;;  %v7547_v40 = vld [vmem:[#allocation9] ss:$0 sm:$0xff] }
 0x66f   :  { %v6194_v15 = vadd.f32 %v7568_v7, %v7414_v30  ;;  %v7592_v37 = vpop.f32.mrb[27].mxu1 }
 0x670   :  { %v7545_v37 = vld [vmem:[#allocation9 + $0x3] ss:$0 sm:$0xff] }
 0x671   :  { %v6234_v25 = vadd.f32 %v7590_v45, %v6194_v15  ;;  %v7549_v45 = vld [vmem:[#allocation9 + $0x1] ss:$0 sm:$0xff]  ;;  %v7544_v15 = vld [vmem:[#allocation9 + $0x2] ss:$0 sm:$0xff] }
 0x68b   :  { %v7610_v26 = vpop.f32.mrb[28].mxu0 }
 0x68c   :  { %v7632_v33 = vpop.f32.mrb[28].mxu1  ;;  %v7611_v55 = vpop.f32.mrb[29].mxu0 }
 0x68d   :  { %v7612_v52 = vadd.f32 %v7611_v55, %v7610_v26  ;;  %v7633_v47 = vpop.f32.mrb[29].mxu1  ;;  %v7613_v63 = vpop.f32.mrb[30].mxu0 }
 0x68e   :  { %v7634_v14 = vadd.f32 %v7633_v47, %v7632_v33  ;;  %v7635_v43 = vpop.f32.mrb[30].mxu1  ;;  %v7614_v1 = vpop.f32.mrb[31].mxu0 }
 0x68f   :  { %v6274_v32 = vadd.f32 %v7612_v52, %v6234_v25  ;;  %v7636_v61 = vpop.f32.mrb[31].mxu1  ;;  %v7546_v25 = vld [vmem:[#allocation9 + $0x4] ss:$0 sm:$0xff] }
 0x691   :  { %v6314_v57 = vadd.f32 %v7634_v14, %v6274_v32 }
 0x6ab   :  { %v7654_v3 = vpop.f32.mrb[32].mxu0 }
 0x6ac   :  { %v7676_v12 = vpop.f32.mrb[32].mxu1  ;;  %v7655_v11 = vpop.f32.mrb[33].mxu0 }
 0x6ad   :  { %v7656_v4 = vadd.f32 %v7655_v11, %v7654_v3  ;;  %v7677_v21 = vpop.f32.mrb[33].mxu1  ;;  %v7657_v58 = vpop.f32.mrb[34].mxu0 }
 0x6ae   :  { %v7678_v56 = vadd.f32 %v7677_v21, %v7676_v12  ;;  %v7679_v46 = vpop.f32.mrb[34].mxu1  ;;  %v7658_v13 = vpop.f32.mrb[35].mxu0 }
 0x6af   :  { %v6354_v22 = vadd.f32 %v7656_v4, %v6314_v57  ;;  %v7680_v48 = vpop.f32.mrb[35].mxu1 }
 0x6b1   :  { %v6394_v36 = vadd.f32 %v7678_v56, %v6354_v22 }
 0x6ea   :  { %v7087_v20 = vpop.xlane.xlu1 %7086 }
 0x6eb   :  { %v6688_v28 = vpop.xlane.xlu0 %6687  ;;  %v7088_v8 = vadd.f32 %v7543_v49, %v7087_v20 }
 0x6ec   :  { %v6696_v41 = vadd.f32 %v7543_v49, %v6688_v28 }
 0x6ed   :  { %v7089_v23 = vmul.f32 0.1, %v7088_v8 }
 0x6ee   :  { %v6697_v16 = vmul.f32 0.1, %v6696_v41 }
 0x6ef   :  { %v6891_v50 = vpop.xlane.xlu0 %6890 }
 0x6f0   :  { %7990 = vtanh.f32 %v6697_v16  ;;  %v6892_v17 = vadd.f32 %v7543_v49, %v6891_v50 }
 0x6f2   :  { %v6893_v10 = vmul.f32 0.1, %v6892_v17 }
 0x6f4   :  { %7992 = vtanh.f32 %v6893_v10 }
 0x6f5   :  { %7994 = vtanh.f32 %v7089_v23 }
 0x6fa   :  { %v7991_v60 = vpop.eup %7990 }
 0x6fb   :  { %7096 = vperm.xlu1 %7857, %v7991_v60  }
 0x6fe   :  { %v7993_v29 = vpop.eup %7992 }
 0x6ff   :  { %v7995_v18 = vpop.eup %7994  ;;  %7859 = vset.pattern.permute.xlu1 %v8129_v5  ;;  %7107 = vperm.xlu0 %7858, %v7993_v29  }
 0x700   :  { %7119 = vperm.xlu1 %7859, %v7995_v18  }
 0x703   :  { %7860 = vset.pattern.permute.xlu0 %v8129_v5 }
 0x729   :  { %v7698_v38 = vpop.f32.mrb[36].mxu0 }
 0x72a   :  { %v7720_v19 = vpop.f32.mrb[36].mxu1  ;;  %v7699_v59 = vpop.f32.mrb[37].mxu0 }
 0x72b   :  { %v7700_v62 = vadd.f32 %v7699_v59, %v7698_v38  ;;  %v7721_v51 = vpop.f32.mrb[37].mxu1  ;;  %v7701_v42 = vpop.f32.mrb[38].mxu0 }
 0x72c   :  { %v7722_v44 = vadd.f32 %v7721_v51, %v7720_v19  ;;  %v7723_v0 = vpop.f32.mrb[38].mxu1  ;;  %v7702_v24 = vpop.f32.mrb[39].mxu0 }
 0x72d   :  { %v6434_v6 = vadd.f32 %v7700_v62, %v6394_v36  ;;  %v7724_v35 = vpop.f32.mrb[39].mxu1 }
 0x72f   :  { %v6474_v39 = vadd.f32 %v7722_v44, %v6434_v6 }
 0x731   :  { %v7132_v30 = vadd.f32 %v7547_v40, %v6474_v39 }
 0x733   :  { %v7548_v31 = vmul.f32 -1.442695, %v7132_v30 }
 0x735   :  { %7996 = vpow2.f32 %v7548_v31 }
 0x73f   :  { %v7997_v7 = vpop.eup %7996 }
 0x740   :  { %v7136_v53 = vadd.f32 1.0, %v7997_v7 }
 0x742   :  { %7998 = vrcp.f32 %v7136_v53 }
 0x74c   :  { %v7999_v9 = vpop.eup %7998 }
 0x74d   :  { %v7143_v54 = vmul.f32 %v7999_v9, %v7549_v45 }
 0x74f   :  { %v7144_v55 = vand.u32 2147483647, %v7143_v54 }
 0x751   :  { %v7145_v14 = vsub.f32 1.0, %v7144_v55 }
 0x77a   :  { %v7097_v2 = vpop.permute.xlu1 %7096 }
 0x77b   :  { %v7103_v27 = vmul.f32 %v7544_v15, %v7097_v2 }
 0x77e   :  { %v7108_v34 = vpop.permute.xlu0 %7107 }
 0x77f   :  { %v7114_v26 = vmul.f32 %v7545_v37, %v7108_v34  ;;  %v7120_v33 = vpop.permute.xlu1 %7119 }
 0x780   :  { %v7126_v52 = vmul.f32 %v7546_v25, %v7120_v33 }
 0x781   :  { %v7115_v47 = vadd.f32 %v7114_v26, %v7103_v27 }
 0x783   :  { %v7127_v63 = vadd.f32 %v7126_v52, %v7115_v47 }
 0x785   :  { %v7146_v43 = vmul.f32 %v7145_v14, %v7127_v63 }
 0x787   :  { %v7147_v1 = vadd.f32 %v7146_v43, %v7143_v54 }
 0x789   :  { %v7148_v32 = vmul.f32 0.5, %v7147_v1 }
 0x78b   :  { %7150 = vst.msk [vmem:[%s11304_s11] sm:$0x3] %vm7149_vm1, %v7148_v32 }
 0x78c   :  { %7155 = vsyncpa [#allocation3], 1 }
 0x78d   :  { %7156 = vsyncpa [#allocation5], 1 }
 0x78e   :  { %7157 = vsyncpa [#allocation8], 1 }

</bundles_post_ra>
